<compile_context>
chip_gen: v6e
topology: v6e:2x2x1
jax: 0.10.0
libtpu: 0.0.40
codegen_flags: <defaults>
</compile_context>

<pallas_src>
import functools

import jax
import jax.numpy as jnp
from jax.experimental import pallas as pl
from jax.experimental.pallas import tpu as pltpu

LEAKY_SLOPE = 0.0  # params['model/leakyrelu']


def _apply_act(y, relu, slope):
    if not relu:
        return y
    if slope == 0.0:
        return jnp.maximum(y, 0.0)          # one VPU op instead of where+mul
    return jnp.where(y >= 0, y, slope * y)


# --------------------------------------------------------------------- kernels

def _matmul_bias_act_kernel(x_ref, w_ref, b_ref, o_ref, *, relu, slope):
    y = jnp.dot(x_ref[...], w_ref[...], preferred_element_type=jnp.float32)
    y = y + b_ref[...]
    y = _apply_act(y, relu, slope)
    o_ref[...] = y.astype(o_ref.dtype)


def matmul_bias_act(x, w, b, *, relu=True, slope=LEAKY_SLOPE,
                    out_dtype=jnp.bfloat16, tm=512):
    """act(x @ w + b). x:(M,K), w:(K,N) bf16, b:(1,N) f32. Tiled over M."""
    M, K = x.shape
    K2, N = w.shape
    assert K == K2 and b.shape == (1, N)
    tm = min(tm, M)                          # tm=M (full dim) for small M
    return pl.pallas_call(
        functools.partial(_matmul_bias_act_kernel, relu=relu, slope=slope),
        out_shape=jax.ShapeDtypeStruct((M, N), out_dtype),
        grid=(pl.cdiv(M, tm),),
        in_specs=[
            pl.BlockSpec((tm, K), lambda i: (i, 0)),
            pl.BlockSpec((K, N), lambda i: (0, 0)),   # weights resident
            pl.BlockSpec((1, N), lambda i: (0, 0)),
        ],
        out_specs=pl.BlockSpec((tm, N), lambda i: (i, 0)),
        compiler_params=pltpu.CompilerParams(
            dimension_semantics=("parallel",)),
    )(x.astype(jnp.bfloat16), w.astype(jnp.bfloat16), b.astype(jnp.float32))


def _rowconv_kernel(x_ref, w_ref, b_ref, o_ref, *, relu, slope):
    # x_ref: (1, W + kw - 1, Cin)  w_ref: (kw, Cin, Cout)  o_ref: (1, W, Cout)
    kw = w_ref.shape[0]
    W, Cout = o_ref.shape[1], o_ref.shape[2]
    acc = jnp.zeros((W, Cout), jnp.float32)
    for t in range(kw):                      # unrolled: kw accumulated matmuls
        xt = x_ref[0, t:t + W, :]            # (W, Cin) shifted window (no im2col)
        acc = acc + jnp.dot(xt, w_ref[t], preferred_element_type=jnp.float32)
    acc = acc + b_ref[...]
    acc = _apply_act(acc, relu, slope)
    o_ref[...] = acc[None].astype(o_ref.dtype)


def rowconv_act(x, w_k, b, *, relu=True, slope=LEAKY_SLOPE,
                out_dtype=jnp.bfloat16):
    """'same' Conv2d with a (1, kw) kernel on channels-last rows.

    x: (R, W, Cin); w_k: (kw, Cin, Cout); b: (1, Cout). One row per grid step;
    kw shifted MXU matmuls accumulated in f32 inside the kernel.
    """
    R, W, Cin = x.shape
    kw, Cin2, Cout = w_k.shape
    assert Cin == Cin2
    lpad = (kw - 1) // 2
    xp = jnp.pad(x.astype(jnp.bfloat16),
                 ((0, 0), (lpad, kw - 1 - lpad), (0, 0)))  # zero pad along W
    Wp = W + kw - 1
    return pl.pallas_call(
        functools.partial(_rowconv_kernel, relu=relu, slope=slope),
        out_shape=jax.ShapeDtypeStruct((R, W, Cout), out_dtype),
        grid=(R,),
        in_specs=[
            pl.BlockSpec((1, Wp, Cin), lambda r: (r, 0, 0)),
            pl.BlockSpec((kw, Cin, Cout), lambda r: (0, 0, 0)),
            pl.BlockSpec((1, Cout), lambda r: (0, 0)),
        ],
        out_specs=pl.BlockSpec((1, W, Cout), lambda r: (r, 0, 0)),
        compiler_params=pltpu.CompilerParams(
            dimension_semantics=("parallel",)),
    )(xp, w_k.astype(jnp.bfloat16), b.astype(jnp.float32))


def _maxpool3_kernel(x_ref, o_ref):
    m = jnp.maximum(jnp.maximum(x_ref[:, 0:1, :], x_ref[:, 1:2, :]),
                    x_ref[:, 2:3, :])
    o_ref[...] = m.reshape(o_ref.shape)


def maxpool_w3(x, *, tm=512):
    """MaxPool2d((1,3), stride (1,3), pad (0,1), -inf pad) on channels-last (R,W,C)."""
    R, W, C = x.shape
    W_out = (W - 1) // 3 + 1                 # floor((W + 2 - 3)/3) + 1
    need = 3 * W_out                         # padded length covered by windows
    rpad = max(0, need - (W + 1))
    xp = jnp.pad(x, ((0, 0), (1, rpad), (0, 0)),
                 constant_values=-jnp.inf)[:, :need, :]
    xw = xp.reshape(R * W_out, 3, C)         # one slab, windows along axis 1
    M = R * W_out
    tm = min(tm, M)
    out = pl.pallas_call(
        _maxpool3_kernel,
        out_shape=jax.ShapeDtypeStruct((M, C), x.dtype),
        grid=(pl.cdiv(M, tm),),
        in_specs=[pl.BlockSpec((tm, 3, C), lambda i: (i, 0, 0))],
        out_specs=pl.BlockSpec((tm, C), lambda i: (i, 0)),
        compiler_params=pltpu.CompilerParams(
            dimension_semantics=("parallel",)),
    )(xw)
    return out.reshape(R, W_out, C)


# ---------------------------------------------------------------------- params

_CONV_CFG = [  # (name, out_channels, kernel) per update_params defaults
    ("conv1", 64, (4, 9)),
    ("conv2", 64, (1, 9)),
    ("conv3", 128, (1, 9)),
    ("conv4", 128, (1, 9)),
    ("conv5", 64, (1, 9)),
    ("conv6", 64, (1, 9)),
]


def _uniform(key, shape, bound):
    return jax.random.uniform(key, shape, jnp.float32, -bound, bound)


def init_params(key, in_channels=1, in_height=4, in_width=54,
                fc1_features=256, fc2_features=128):
    """Deterministic synthetic parameters in PyTorch Conv2d/Linear layout."""
    params = {}
    keys = jax.random.split(key, 2 * len(_CONV_CFG) + 4)
    ki = 0
    cin = in_channels
    for name, cout, (kh, kw) in _CONV_CFG:
        bound = 1.0 / ((cin * kh * kw) ** 0.5)
        params[name + "/w"] = _uniform(keys[ki], (cout, cin, kh, kw), bound); ki += 1
        params[name + "/b"] = _uniform(keys[ki], (cout,), bound); ki += 1
        cin = cout
    h = in_height + 2 * 1 - 4 + 1            # conv1: kernel 4, pad 1
    w = in_width                             # 'same' width through all convs
    for _ in range(3):                       # maxpool1..3
        w = (w - 1) // 3 + 1
    flat = _CONV_CFG[-1][1] * h * w
    bound = 1.0 / (flat ** 0.5)
    params["fc1/w"] = _uniform(keys[ki], (fc1_features, flat), bound); ki += 1
    params["fc1/b"] = _uniform(keys[ki], (fc1_features,), bound); ki += 1
    bound = 1.0 / (fc1_features ** 0.5)
    params["fc2/w"] = _uniform(keys[ki], (fc2_features, fc1_features), bound); ki += 1
    params["fc2/b"] = _uniform(keys[ki], (fc2_features,), bound); ki += 1
    return params


def pack_params(params):
    """One-time conversion to inference layout: bf16 matmul operands,
    pre-transposed weights, biases as (1, N) f32 (hoisted out of forward)."""
    p = {}
    w1 = params["conv1/w"]                                   # (Cout, Cin, 4, 9)
    cout = w1.shape[0]
    p["conv1/w"] = w1.reshape(cout, -1).T.astype(jnp.bfloat16)   # (Cin*36, Cout)
    p["conv1/b"] = params["conv1/b"].reshape(1, -1).astype(jnp.float32)
    for name in ("conv2", "conv3", "conv4", "conv5", "conv6"):
        w = params[name + "/w"]                              # (Cout, Cin, 1, kw)
        p[name + "/w"] = w[:, :, 0, :].transpose(2, 1, 0).astype(jnp.bfloat16)
        p[name + "/b"] = params[name + "/b"].reshape(1, -1).astype(jnp.float32)
    for name in ("fc1", "fc2"):
        p[name + "/w"] = params[name + "/w"].T.astype(jnp.bfloat16)  # (in, out)
        p[name + "/b"] = params[name + "/b"].reshape(1, -1).astype(jnp.float32)
    return p


# --------------------------------------------------------------------- forward

def forward(packed, x):
    """Washburn2019.forward (inference mode). x: (B, Cin, H, W) NCHW float32."""
    B, Cin, H, W = x.shape

    # conv1: (4,9) kernel, padding (1,4) ('same' per update_params), via
    # im2col (K = Cin*36, tiny since Cin=1) + tiled matmul; output channels-last.
    kh, kw, ph, pw = 4, 9, 1, 4
    Ho = H + 2 * ph - kh + 1
    Wo = W + 2 * pw - kw + 1
    xp = jnp.pad(x.astype(jnp.bfloat16), ((0, 0), (0, 0), (ph, ph), (pw, pw)))
    patches = [xp[:, :, i:i + Ho, j:j + Wo] for i in range(kh) for j in range(kw)]
    pcol = jnp.stack(patches, axis=-1)                       # (B, Cin, Ho, Wo, 36)
    pcol = pcol.transpose(0, 2, 3, 1, 4).reshape(B * Ho * Wo, Cin * kh * kw)
    c1 = packed["conv1/w"].shape[1]
    y = matmul_bias_act(pcol, packed["conv1/w"], packed["conv1/b"])
    y = y.reshape(B * Ho, Wo, c1)                            # channels-last rows

    y = rowconv_act(y, packed["conv2/w"], packed["conv2/b"])
    y = maxpool_w3(y)
    # TODO(synk): Dropout(p=0.1) is identity in inference mode (no RNG state kept).
    y = rowconv_act(y, packed["conv3/w"], packed["conv3/b"])
    y = rowconv_act(y, packed["conv4/w"], packed["conv4/b"])
    y = maxpool_w3(y)
    y = rowconv_act(y, packed["conv5/w"], packed["conv5/b"])
    y = rowconv_act(y, packed["conv6/w"], packed["conv6/b"])
    y = maxpool_w3(y)

    # Flatten in PyTorch NCHW order: (B, C, H, W) -> (B, C*H*W).
    Wf, Cf = y.shape[1], y.shape[2]
    y = y.reshape(B, Ho, Wf, Cf).transpose(0, 3, 1, 2).reshape(B, Cf * Ho * Wf)
    # model/features defaults to False -> optional `v` concat is skipped.
    y = matmul_bias_act(y, packed["fc1/w"], packed["fc1/b"])
    y = matmul_bias_act(y, packed["fc2/w"], packed["fc2/b"],
                        out_dtype=jnp.float32)
    return y


# ------------------------------------------------------------------------ main

if __name__ == "__main__":
    B, C, H, W = 2, 1, 4, 54                 # small analogue of (N, 1, 4, 2150)
    key = jax.random.PRNGKey(0)
    kx, kp = jax.random.split(key)
    x = jax.random.normal(kx, (B, C, H, W), jnp.float32)
    params = init_params(kp, in_channels=C, in_height=H, in_width=W)
    packed = pack_params(params)

    fwd = jax.jit(forward)
    out = fwd(packed, x)
    out = jax.block_until_ready(out)
    assert out.shape == (B, 128), out.shape
    assert bool(jnp.all(jnp.isfinite(out)))
    print("KERNEL_OK")
</pallas_src>

<mosaic_0001>
module attributes {stable_mosaic.version = 11 : i64} {
  func.func @_matmul_bias_act_kernel(%arg0: i32, %arg1: memref<324x36xbf16, #tpu.memory_space<vmem>>, %arg2: memref<36x64xbf16, #tpu.memory_space<vmem>>, %arg3: memref<1x64xf32, #tpu.memory_space<vmem>>, %arg4: memref<324x64xbf16, #tpu.memory_space<vmem>>) attributes {dimension_semantics = [#tpu.dimension_semantics<parallel>], iteration_bounds = array<i64: 1>, scalar_prefetch = 0 : i64, scratch_operands = 0 : i64, tpu.core_type = #tpu.core_type<tc>, window_params = [{transform_indices = @transform_0, window_bounds = array<i64: 324, 36>}, {pipeline_mode = #tpu.pipeline_mode<synchronous>, transform_indices = @transform_1, window_bounds = array<i64: 36, 64>}, {pipeline_mode = #tpu.pipeline_mode<synchronous>, transform_indices = @transform_2, window_bounds = array<i64: 1, 64>}, {transform_indices = @transform_3, window_bounds = array<i64: 324, 64>}]} {
    %c0 = arith.constant 0 : index
    %c0_0 = arith.constant 0 : index
    %0 = vector.load %arg1[%c0, %c0_0] : memref<324x36xbf16, #tpu.memory_space<vmem>>, vector<324x36xbf16>
    %c0_1 = arith.constant 0 : index
    %c0_2 = arith.constant 0 : index
    %1 = vector.load %arg2[%c0_1, %c0_2] : memref<36x64xbf16, #tpu.memory_space<vmem>>, vector<36x64xbf16>
    %cst = arith.constant dense<0.000000e+00> : vector<324x64xf32>
    %2 = tpu.matmul %0, %1, %cst {dimension_numbers = #tpu.dot_dimension_numbers<[1], [0], [0], [1], [0, 0, 1, 1], [], []>} : vector<324x36xbf16>, vector<36x64xbf16>, vector<324x64xf32> -> vector<324x64xf32>
    %c0_3 = arith.constant 0 : index
    %c0_4 = arith.constant 0 : index
    %3 = vector.load %arg3[%c0_3, %c0_4] : memref<1x64xf32, #tpu.memory_space<vmem>>, vector<1x64xf32>
    %4 = vector.broadcast %3 : vector<1x64xf32> to vector<324x64xf32>
    %5 = arith.addf %2, %4 : vector<324x64xf32>
    %cst_5 = arith.constant 0.000000e+00 : f32
    %6 = vector.broadcast %cst_5 : f32 to vector<324x64xf32>
    %7 = arith.maximumf %5, %6 : vector<324x64xf32>
    %8 = arith.truncf %7 : vector<324x64xf32> to vector<324x64xbf16>
    %c0_6 = arith.constant 0 : index
    %c0_7 = arith.constant 0 : index
    %9 = vector.load %arg4[%c0_6, %c0_7] : memref<324x64xbf16, #tpu.memory_space<vmem>>, vector<324x64xbf16>
    tpu.vector_store %arg4[%c0_6, %c0_7], %8 {strides = array<i32>} : memref<324x64xbf16, #tpu.memory_space<vmem>>, vector<324x64xbf16>,
    return
  }
  func.func @transform_0(%arg0: i32) -> (i32, i32) {
    %c0_i32 = arith.constant 0 : i32
    %c0_i32_0 = arith.constant 0 : i32
    return %arg0, %c0_i32 : i32, i32
  }
  func.func @transform_1(%arg0: i32) -> (i32, i32) {
    %c0_i32 = arith.constant 0 : i32
    %c0_i32_0 = arith.constant 0 : i32
    %c0_i32_1 = arith.constant 0 : i32
    return %c0_i32, %c0_i32_0 : i32, i32
  }
  func.func @transform_2(%arg0: i32) -> (i32, i32) {
    %c0_i32 = arith.constant 0 : i32
    %c0_i32_0 = arith.constant 0 : i32
    %c0_i32_1 = arith.constant 0 : i32
    return %c0_i32, %c0_i32_0 : i32, i32
  }
  func.func @transform_3(%arg0: i32) -> (i32, i32) {
    %c0_i32 = arith.constant 0 : i32
    %c0_i32_0 = arith.constant 0 : i32
    return %arg0, %c0_i32 : i32, i32
  }
}

module attributes {stable_mosaic.version = 11 : i64} {
  func.func @_rowconv_kernel(%arg0: i32, %arg1: memref<1x62x64xbf16, #tpu.memory_space<vmem>>, %arg2: memref<9x64x64xbf16, #tpu.memory_space<vmem>>, %arg3: memref<1x64xf32, #tpu.memory_space<vmem>>, %arg4: memref<1x54x64xbf16, #tpu.memory_space<vmem>>) attributes {dimension_semantics = [#tpu.dimension_semantics<parallel>], iteration_bounds = array<i64: 6>, scalar_prefetch = 0 : i64, scratch_operands = 0 : i64, tpu.core_type = #tpu.core_type<tc>, window_params = [{transform_indices = @transform_0, window_bounds = array<i64: 1, 62, 64>}, {pipeline_mode = #tpu.pipeline_mode<synchronous>, transform_indices = @transform_1, window_bounds = array<i64: 9, 64, 64>}, {pipeline_mode = #tpu.pipeline_mode<synchronous>, transform_indices = @transform_2, window_bounds = array<i64: 1, 64>}, {transform_indices = @transform_3, window_bounds = array<i64: 1, 54, 64>}]} {
    %cst = arith.constant 0.000000e+00 : f32
    %0 = vector.broadcast %cst : f32 to vector<54x64xf32>
    %c0 = arith.constant 0 : index
    %c0_0 = arith.constant 0 : index
    %c0_1 = arith.constant 0 : index
    %1 = vector.load %arg1[%c0, %c0_0, %c0_1] : memref<1x62x64xbf16, #tpu.memory_space<vmem>>, vector<1x54x64xbf16>
    %2 = vector.shape_cast %1 : vector<1x54x64xbf16> to vector<54x64xbf16>
    %c0_2 = arith.constant 0 : index
    %c0_3 = arith.constant 0 : index
    %c0_4 = arith.constant 0 : index
    %3 = vector.load %arg2[%c0_2, %c0_3, %c0_4] : memref<9x64x64xbf16, #tpu.memory_space<vmem>>, vector<1x64x64xbf16>
    %4 = vector.shape_cast %3 : vector<1x64x64xbf16> to vector<64x64xbf16>
    %cst_5 = arith.constant dense<0.000000e+00> : vector<54x64xf32>
    %5 = tpu.matmul %2, %4, %cst_5 {dimension_numbers = #tpu.dot_dimension_numbers<[1], [0], [0], [1], [0, 0, 1, 1], [], []>} : vector<54x64xbf16>, vector<64x64xbf16>, vector<54x64xf32> -> vector<54x64xf32>
    %6 = arith.addf %0, %5 : vector<54x64xf32>
    %c0_6 = arith.constant 0 : index
    %c1 = arith.constant 1 : index
    %c0_7 = arith.constant 0 : index
    %7 = vector.load %arg1[%c0_6, %c1, %c0_7] : memref<1x62x64xbf16, #tpu.memory_space<vmem>>, vector<1x54x64xbf16>
    %8 = vector.shape_cast %7 : vector<1x54x64xbf16> to vector<54x64xbf16>
    %c1_8 = arith.constant 1 : index
    %c0_9 = arith.constant 0 : index
    %c0_10 = arith.constant 0 : index
    %9 = vector.load %arg2[%c1_8, %c0_9, %c0_10] : memref<9x64x64xbf16, #tpu.memory_space<vmem>>, vector<1x64x64xbf16>
    %10 = vector.shape_cast %9 : vector<1x64x64xbf16> to vector<64x64xbf16>
    %cst_11 = arith.constant dense<0.000000e+00> : vector<54x64xf32>
    %11 = tpu.matmul %8, %10, %cst_11 {dimension_numbers = #tpu.dot_dimension_numbers<[1], [0], [0], [1], [0, 0, 1, 1], [], []>} : vector<54x64xbf16>, vector<64x64xbf16>, vector<54x64xf32> -> vector<54x64xf32>
    %12 = arith.addf %6, %11 : vector<54x64xf32>
    %c0_12 = arith.constant 0 : index
    %c2 = arith.constant 2 : index
    %c0_13 = arith.constant 0 : index
    %13 = vector.load %arg1[%c0_12, %c2, %c0_13] : memref<1x62x64xbf16, #tpu.memory_space<vmem>>, vector<1x54x64xbf16>
    %14 = vector.shape_cast %13 : vector<1x54x64xbf16> to vector<54x64xbf16>
    %c2_14 = arith.constant 2 : index
    %c0_15 = arith.constant 0 : index
    %c0_16 = arith.constant 0 : index
    %15 = vector.load %arg2[%c2_14, %c0_15, %c0_16] : memref<9x64x64xbf16, #tpu.memory_space<vmem>>, vector<1x64x64xbf16>
    %16 = vector.shape_cast %15 : vector<1x64x64xbf16> to vector<64x64xbf16>
    %cst_17 = arith.constant dense<0.000000e+00> : vector<54x64xf32>
    %17 = tpu.matmul %14, %16, %cst_17 {dimension_numbers = #tpu.dot_dimension_numbers<[1], [0], [0], [1], [0, 0, 1, 1], [], []>} : vector<54x64xbf16>, vector<64x64xbf16>, vector<54x64xf32> -> vector<54x64xf32>
    %18 = arith.addf %12, %17 : vector<54x64xf32>
    %c0_18 = arith.constant 0 : index
    %c3 = arith.constant 3 : index
    %c0_19 = arith.constant 0 : index
    %19 = vector.load %arg1[%c0_18, %c3, %c0_19] : memref<1x62x64xbf16, #tpu.memory_space<vmem>>, vector<1x54x64xbf16>
    %20 = vector.shape_cast %19 : vector<1x54x64xbf16> to vector<54x64xbf16>
    %c3_20 = arith.constant 3 : index
    %c0_21 = arith.constant 0 : index
    %c0_22 = arith.constant 0 : index
    %21 = vector.load %arg2[%c3_20, %c0_21, %c0_22] : memref<9x64x64xbf16, #tpu.memory_space<vmem>>, vector<1x64x64xbf16>
    %22 = vector.shape_cast %21 : vector<1x64x64xbf16> to vector<64x64xbf16>
    %cst_23 = arith.constant dense<0.000000e+00> : vector<54x64xf32>
    %23 = tpu.matmul %20, %22, %cst_23 {dimension_numbers = #tpu.dot_dimension_numbers<[1], [0], [0], [1], [0, 0, 1, 1], [], []>} : vector<54x64xbf16>, vector<64x64xbf16>, vector<54x64xf32> -> vector<54x64xf32>
    %24 = arith.addf %18, %23 : vector<54x64xf32>
    %c0_24 = arith.constant 0 : index
    %c4 = arith.constant 4 : index
    %c0_25 = arith.constant 0 : index
    %25 = vector.load %arg1[%c0_24, %c4, %c0_25] : memref<1x62x64xbf16, #tpu.memory_space<vmem>>, vector<1x54x64xbf16>
    %26 = vector.shape_cast %25 : vector<1x54x64xbf16> to vector<54x64xbf16>
    %c4_26 = arith.constant 4 : index
    %c0_27 = arith.constant 0 : index
    %c0_28 = arith.constant 0 : index
    %27 = vector.load %arg2[%c4_26, %c0_27, %c0_28] : memref<9x64x64xbf16, #tpu.memory_space<vmem>>, vector<1x64x64xbf16>
    %28 = vector.shape_cast %27 : vector<1x64x64xbf16> to vector<64x64xbf16>
    %cst_29 = arith.constant dense<0.000000e+00> : vector<54x64xf32>
    %29 = tpu.matmul %26, %28, %cst_29 {dimension_numbers = #tpu.dot_dimension_numbers<[1], [0], [0], [1], [0, 0, 1, 1], [], []>} : vector<54x64xbf16>, vector<64x64xbf16>, vector<54x64xf32> -> vector<54x64xf32>
    %30 = arith.addf %24, %29 : vector<54x64xf32>
    %c0_30 = arith.constant 0 : index
    %c5 = arith.constant 5 : index
    %c0_31 = arith.constant 0 : index
    %31 = vector.load %arg1[%c0_30, %c5, %c0_31] : memref<1x62x64xbf16, #tpu.memory_space<vmem>>, vector<1x54x64xbf16>
    %32 = vector.shape_cast %31 : vector<1x54x64xbf16> to vector<54x64xbf16>
    %c5_32 = arith.constant 5 : index
    %c0_33 = arith.constant 0 : index
    %c0_34 = arith.constant 0 : index
    %33 = vector.load %arg2[%c5_32, %c0_33, %c0_34] : memref<9x64x64xbf16, #tpu.memory_space<vmem>>, vector<1x64x64xbf16>
    %34 = vector.shape_cast %33 : vector<1x64x64xbf16> to vector<64x64xbf16>
    %cst_35 = arith.constant dense<0.000000e+00> : vector<54x64xf32>
    %35 = tpu.matmul %32, %34, %cst_35 {dimension_numbers = #tpu.dot_dimension_numbers<[1], [0], [0], [1], [0, 0, 1, 1], [], []>} : vector<54x64xbf16>, vector<64x64xbf16>, vector<54x64xf32> -> vector<54x64xf32>
    %36 = arith.addf %30, %35 : vector<54x64xf32>
    %c0_36 = arith.constant 0 : index
    %c6 = arith.constant 6 : index
    %c0_37 = arith.constant 0 : index
    %37 = vector.load %arg1[%c0_36, %c6, %c0_37] : memref<1x62x64xbf16, #tpu.memory_space<vmem>>, vector<1x54x64xbf16>
    %38 = vector.shape_cast %37 : vector<1x54x64xbf16> to vector<54x64xbf16>
    %c6_38 = arith.constant 6 : index
    %c0_39 = arith.constant 0 : index
    %c0_40 = arith.constant 0 : index
    %39 = vector.load %arg2[%c6_38, %c0_39, %c0_40] : memref<9x64x64xbf16, #tpu.memory_space<vmem>>, vector<1x64x64xbf16>
    %40 = vector.shape_cast %39 : vector<1x64x64xbf16> to vector<64x64xbf16>
    %cst_41 = arith.constant dense<0.000000e+00> : vector<54x64xf32>
    %41 = tpu.matmul %38, %40, %cst_41 {dimension_numbers = #tpu.dot_dimension_numbers<[1], [0], [0], [1], [0, 0, 1, 1], [], []>} : vector<54x64xbf16>, vector<64x64xbf16>, vector<54x64xf32> -> vector<54x64xf32>
    %42 = arith.addf %36, %41 : vector<54x64xf32>
    %c0_42 = arith.constant 0 : index
    %c7 = arith.constant 7 : index
    %c0_43 = arith.constant 0 : index
    %43 = vector.load %arg1[%c0_42, %c7, %c0_43] : memref<1x62x64xbf16, #tpu.memory_space<vmem>>, vector<1x54x64xbf16>
    %44 = vector.shape_cast %43 : vector<1x54x64xbf16> to vector<54x64xbf16>
    %c7_44 = arith.constant 7 : index
    %c0_45 = arith.constant 0 : index
    %c0_46 = arith.constant 0 : index
    %45 = vector.load %arg2[%c7_44, %c0_45, %c0_46] : memref<9x64x64xbf16, #tpu.memory_space<vmem>>, vector<1x64x64xbf16>
    %46 = vector.shape_cast %45 : vector<1x64x64xbf16> to vector<64x64xbf16>
    %cst_47 = arith.constant dense<0.000000e+00> : vector<54x64xf32>
    %47 = tpu.matmul %44, %46, %cst_47 {dimension_numbers = #tpu.dot_dimension_numbers<[1], [0], [0], [1], [0, 0, 1, 1], [], []>} : vector<54x64xbf16>, vector<64x64xbf16>, vector<54x64xf32> -> vector<54x64xf32>
    %48 = arith.addf %42, %47 : vector<54x64xf32>
    %c0_48 = arith.constant 0 : index
    %c8 = arith.constant 8 : index
    %c0_49 = arith.constant 0 : index
    %49 = vector.load %arg1[%c0_48, %c8, %c0_49] : memref<1x62x64xbf16, #tpu.memory_space<vmem>>, vector<1x54x64xbf16>
    %50 = vector.shape_cast %49 : vector<1x54x64xbf16> to vector<54x64xbf16>
    %c8_50 = arith.constant 8 : index
    %c0_51 = arith.constant 0 : index
    %c0_52 = arith.constant 0 : index
    %51 = vector.load %arg2[%c8_50, %c0_51, %c0_52] : memref<9x64x64xbf16, #tpu.memory_space<vmem>>, vector<1x64x64xbf16>
    %52 = vector.shape_cast %51 : vector<1x64x64xbf16> to vector<64x64xbf16>
    %cst_53 = arith.constant dense<0.000000e+00> : vector<54x64xf32>
    %53 = tpu.matmul %50, %52, %cst_53 {dimension_numbers = #tpu.dot_dimension_numbers<[1], [0], [0], [1], [0, 0, 1, 1], [], []>} : vector<54x64xbf16>, vector<64x64xbf16>, vector<54x64xf32> -> vector<54x64xf32>
    %54 = arith.addf %48, %53 : vector<54x64xf32>
    %c0_54 = arith.constant 0 : index
    %c0_55 = arith.constant 0 : index
    %55 = vector.load %arg3[%c0_54, %c0_55] : memref<1x64xf32, #tpu.memory_space<vmem>>, vector<1x64xf32>
    %56 = vector.broadcast %55 : vector<1x64xf32> to vector<54x64xf32>
    %57 = arith.addf %54, %56 : vector<54x64xf32>
    %cst_56 = arith.constant 0.000000e+00 : f32
    %58 = vector.broadcast %cst_56 : f32 to vector<54x64xf32>
    %59 = arith.maximumf %57, %58 : vector<54x64xf32>
    %60 = vector.shape_cast %59 : vector<54x64xf32> to vector<1x54x64xf32>
    %61 = arith.truncf %60 : vector<1x54x64xf32> to vector<1x54x64xbf16>
    %c0_57 = arith.constant 0 : index
    %c0_58 = arith.constant 0 : index
    %c0_59 = arith.constant 0 : index
    %62 = vector.load %arg4[%c0_57, %c0_58, %c0_59] : memref<1x54x64xbf16, #tpu.memory_space<vmem>>, vector<1x54x64xbf16>
    tpu.vector_store %arg4[%c0_57, %c0_58, %c0_59], %61 {strides = array<i32>} : memref<1x54x64xbf16, #tpu.memory_space<vmem>>, vector<1x54x64xbf16>,
    return
  }
  func.func @transform_0(%arg0: i32) -> (i32, i32, i32) {
    %c0_i32 = arith.constant 0 : i32
    %c0_i32_0 = arith.constant 0 : i32
    %c0_i32_1 = arith.constant 0 : i32
    return %arg0, %c0_i32, %c0_i32_0 : i32, i32, i32
  }
  func.func @transform_1(%arg0: i32) -> (i32, i32, i32) {
    %c0_i32 = arith.constant 0 : i32
    %c0_i32_0 = arith.constant 0 : i32
    %c0_i32_1 = arith.constant 0 : i32
    %c0_i32_2 = arith.constant 0 : i32
    return %c0_i32, %c0_i32_0, %c0_i32_1 : i32, i32, i32
  }
  func.func @transform_2(%arg0: i32) -> (i32, i32) {
    %c0_i32 = arith.constant 0 : i32
    %c0_i32_0 = arith.constant 0 : i32
    %c0_i32_1 = arith.constant 0 : i32
    return %c0_i32, %c0_i32_0 : i32, i32
  }
  func.func @transform_3(%arg0: i32) -> (i32, i32, i32) {
    %c0_i32 = arith.constant 0 : i32
    %c0_i32_0 = arith.constant 0 : i32
    %c0_i32_1 = arith.constant 0 : i32
    return %arg0, %c0_i32, %c0_i32_0 : i32, i32, i32
  }
}

module attributes {stable_mosaic.version = 11 : i64} {
  func.func @_maxpool3_kernel(%arg0: i32, %arg1: memref<108x3x64xbf16, #tpu.memory_space<vmem>>, %arg2: memref<108x64xbf16, #tpu.memory_space<vmem>>) attributes {dimension_semantics = [#tpu.dimension_semantics<parallel>], iteration_bounds = array<i64: 1>, scalar_prefetch = 0 : i64, scratch_operands = 0 : i64, tpu.core_type = #tpu.core_type<tc>, window_params = [{transform_indices = @transform_0, window_bounds = array<i64: 108, 3, 64>}, {transform_indices = @transform_1, window_bounds = array<i64: 108, 64>}]} {
    %c0 = arith.constant 0 : index
    %c0_0 = arith.constant 0 : index
    %c0_1 = arith.constant 0 : index
    %0 = vector.load %arg1[%c0, %c0_0, %c0_1] : memref<108x3x64xbf16, #tpu.memory_space<vmem>>, vector<108x1x64xbf16>
    %c0_2 = arith.constant 0 : index
    %c1 = arith.constant 1 : index
    %c0_3 = arith.constant 0 : index
    %1 = vector.load %arg1[%c0_2, %c1, %c0_3] : memref<108x3x64xbf16, #tpu.memory_space<vmem>>, vector<108x1x64xbf16>
    %2 = arith.maximumf %0, %1 : vector<108x1x64xbf16>
    %c0_4 = arith.constant 0 : index
    %c2 = arith.constant 2 : index
    %c0_5 = arith.constant 0 : index
    %3 = vector.load %arg1[%c0_4, %c2, %c0_5] : memref<108x3x64xbf16, #tpu.memory_space<vmem>>, vector<108x1x64xbf16>
    %4 = arith.maximumf %2, %3 : vector<108x1x64xbf16>
    %5 = vector.shape_cast %4 : vector<108x1x64xbf16> to vector<108x64xbf16>
    %c0_6 = arith.constant 0 : index
    %c0_7 = arith.constant 0 : index
    %6 = vector.load %arg2[%c0_6, %c0_7] : memref<108x64xbf16, #tpu.memory_space<vmem>>, vector<108x64xbf16>
    tpu.vector_store %arg2[%c0_6, %c0_7], %5 {strides = array<i32>} : memref<108x64xbf16, #tpu.memory_space<vmem>>, vector<108x64xbf16>,
    return
  }
  func.func @transform_0(%arg0: i32) -> (i32, i32, i32) {
    %c0_i32 = arith.constant 0 : i32
    %c0_i32_0 = arith.constant 0 : i32
    %c0_i32_1 = arith.constant 0 : i32
    return %arg0, %c0_i32, %c0_i32_0 : i32, i32, i32
  }
  func.func @transform_1(%arg0: i32) -> (i32, i32) {
    %c0_i32 = arith.constant 0 : i32
    %c0_i32_0 = arith.constant 0 : i32
    return %arg0, %c0_i32 : i32, i32
  }
}

module attributes {stable_mosaic.version = 11 : i64} {
  func.func @_rowconv_kernel(%arg0: i32, %arg1: memref<1x26x128xbf16, #tpu.memory_space<vmem>>, %arg2: memref<9x128x128xbf16, #tpu.memory_space<vmem>>, %arg3: memref<1x128xf32, #tpu.memory_space<vmem>>, %arg4: memref<1x18x128xbf16, #tpu.memory_space<vmem>>) attributes {dimension_semantics = [#tpu.dimension_semantics<parallel>], iteration_bounds = array<i64: 6>, scalar_prefetch = 0 : i64, scratch_operands = 0 : i64, tpu.core_type = #tpu.core_type<tc>, window_params = [{transform_indices = @transform_0, window_bounds = array<i64: 1, 26, 128>}, {pipeline_mode = #tpu.pipeline_mode<synchronous>, transform_indices = @transform_1, window_bounds = array<i64: 9, 128, 128>}, {pipeline_mode = #tpu.pipeline_mode<synchronous>, transform_indices = @transform_2, window_bounds = array<i64: 1, 128>}, {transform_indices = @transform_3, window_bounds = array<i64: 1, 18, 128>}]} {
    %cst = arith.constant 0.000000e+00 : f32
    %0 = vector.broadcast %cst : f32 to vector<18x128xf32>
    %c0 = arith.constant 0 : index
    %c0_0 = arith.constant 0 : index
    %c0_1 = arith.constant 0 : index
    %1 = vector.load %arg1[%c0, %c0_0, %c0_1] : memref<1x26x128xbf16, #tpu.memory_space<vmem>>, vector<1x18x128xbf16>
    %2 = vector.shape_cast %1 : vector<1x18x128xbf16> to vector<18x128xbf16>
    %c0_2 = arith.constant 0 : index
    %c0_3 = arith.constant 0 : index
    %c0_4 = arith.constant 0 : index
    %3 = vector.load %arg2[%c0_2, %c0_3, %c0_4] : memref<9x128x128xbf16, #tpu.memory_space<vmem>>, vector<1x128x128xbf16>
    %4 = vector.shape_cast %3 : vector<1x128x128xbf16> to vector<128x128xbf16>
    %cst_5 = arith.constant dense<0.000000e+00> : vector<18x128xf32>
    %5 = tpu.matmul %2, %4, %cst_5 {dimension_numbers = #tpu.dot_dimension_numbers<[1], [0], [0], [1], [0, 0, 1, 1], [], []>} : vector<18x128xbf16>, vector<128x128xbf16>, vector<18x128xf32> -> vector<18x128xf32>
    %6 = arith.addf %0, %5 : vector<18x128xf32>
    %c0_6 = arith.constant 0 : index
    %c1 = arith.constant 1 : index
    %c0_7 = arith.constant 0 : index
    %7 = vector.load %arg1[%c0_6, %c1, %c0_7] : memref<1x26x128xbf16, #tpu.memory_space<vmem>>, vector<1x18x128xbf16>
    %8 = vector.shape_cast %7 : vector<1x18x128xbf16> to vector<18x128xbf16>
    %c1_8 = arith.constant 1 : index
    %c0_9 = arith.constant 0 : index
    %c0_10 = arith.constant 0 : index
    %9 = vector.load %arg2[%c1_8, %c0_9, %c0_10] : memref<9x128x128xbf16, #tpu.memory_space<vmem>>, vector<1x128x128xbf16>
    %10 = vector.shape_cast %9 : vector<1x128x128xbf16> to vector<128x128xbf16>
    %cst_11 = arith.constant dense<0.000000e+00> : vector<18x128xf32>
    %11 = tpu.matmul %8, %10, %cst_11 {dimension_numbers = #tpu.dot_dimension_numbers<[1], [0], [0], [1], [0, 0, 1, 1], [], []>} : vector<18x128xbf16>, vector<128x128xbf16>, vector<18x128xf32> -> vector<18x128xf32>
    %12 = arith.addf %6, %11 : vector<18x128xf32>
    %c0_12 = arith.constant 0 : index
    %c2 = arith.constant 2 : index
    %c0_13 = arith.constant 0 : index
    %13 = vector.load %arg1[%c0_12, %c2, %c0_13] : memref<1x26x128xbf16, #tpu.memory_space<vmem>>, vector<1x18x128xbf16>
    %14 = vector.shape_cast %13 : vector<1x18x128xbf16> to vector<18x128xbf16>
    %c2_14 = arith.constant 2 : index
    %c0_15 = arith.constant 0 : index
    %c0_16 = arith.constant 0 : index
    %15 = vector.load %arg2[%c2_14, %c0_15, %c0_16] : memref<9x128x128xbf16, #tpu.memory_space<vmem>>, vector<1x128x128xbf16>
    %16 = vector.shape_cast %15 : vector<1x128x128xbf16> to vector<128x128xbf16>
    %cst_17 = arith.constant dense<0.000000e+00> : vector<18x128xf32>
    %17 = tpu.matmul %14, %16, %cst_17 {dimension_numbers = #tpu.dot_dimension_numbers<[1], [0], [0], [1], [0, 0, 1, 1], [], []>} : vector<18x128xbf16>, vector<128x128xbf16>, vector<18x128xf32> -> vector<18x128xf32>
    %18 = arith.addf %12, %17 : vector<18x128xf32>
    %c0_18 = arith.constant 0 : index
    %c3 = arith.constant 3 : index
    %c0_19 = arith.constant 0 : index
    %19 = vector.load %arg1[%c0_18, %c3, %c0_19] : memref<1x26x128xbf16, #tpu.memory_space<vmem>>, vector<1x18x128xbf16>
    %20 = vector.shape_cast %19 : vector<1x18x128xbf16> to vector<18x128xbf16>
    %c3_20 = arith.constant 3 : index
    %c0_21 = arith.constant 0 : index
    %c0_22 = arith.constant 0 : index
    %21 = vector.load %arg2[%c3_20, %c0_21, %c0_22] : memref<9x128x128xbf16, #tpu.memory_space<vmem>>, vector<1x128x128xbf16>
    %22 = vector.shape_cast %21 : vector<1x128x128xbf16> to vector<128x128xbf16>
    %cst_23 = arith.constant dense<0.000000e+00> : vector<18x128xf32>
    %23 = tpu.matmul %20, %22, %cst_23 {dimension_numbers = #tpu.dot_dimension_numbers<[1], [0], [0], [1], [0, 0, 1, 1], [], []>} : vector<18x128xbf16>, vector<128x128xbf16>, vector<18x128xf32> -> vector<18x128xf32>
    %24 = arith.addf %18, %23 : vector<18x128xf32>
    %c0_24 = arith.constant 0 : index
    %c4 = arith.constant 4 : index
    %c0_25 = arith.constant 0 : index
    %25 = vector.load %arg1[%c0_24, %c4, %c0_25] : memref<1x26x128xbf16, #tpu.memory_space<vmem>>, vector<1x18x128xbf16>
    %26 = vector.shape_cast %25 : vector<1x18x128xbf16> to vector<18x128xbf16>
    %c4_26 = arith.constant 4 : index
    %c0_27 = arith.constant 0 : index
    %c0_28 = arith.constant 0 : index
    %27 = vector.load %arg2[%c4_26, %c0_27, %c0_28] : memref<9x128x128xbf16, #tpu.memory_space<vmem>>, vector<1x128x128xbf16>
    %28 = vector.shape_cast %27 : vector<1x128x128xbf16> to vector<128x128xbf16>
    %cst_29 = arith.constant dense<0.000000e+00> : vector<18x128xf32>
    %29 = tpu.matmul %26, %28, %cst_29 {dimension_numbers = #tpu.dot_dimension_numbers<[1], [0], [0], [1], [0, 0, 1, 1], [], []>} : vector<18x128xbf16>, vector<128x128xbf16>, vector<18x128xf32> -> vector<18x128xf32>
    %30 = arith.addf %24, %29 : vector<18x128xf32>
    %c0_30 = arith.constant 0 : index
    %c5 = arith.constant 5 : index
    %c0_31 = arith.constant 0 : index
    %31 = vector.load %arg1[%c0_30, %c5, %c0_31] : memref<1x26x128xbf16, #tpu.memory_space<vmem>>, vector<1x18x128xbf16>
    %32 = vector.shape_cast %31 : vector<1x18x128xbf16> to vector<18x128xbf16>
    %c5_32 = arith.constant 5 : index
    %c0_33 = arith.constant 0 : index
    %c0_34 = arith.constant 0 : index
    %33 = vector.load %arg2[%c5_32, %c0_33, %c0_34] : memref<9x128x128xbf16, #tpu.memory_space<vmem>>, vector<1x128x128xbf16>
    %34 = vector.shape_cast %33 : vector<1x128x128xbf16> to vector<128x128xbf16>
    %cst_35 = arith.constant dense<0.000000e+00> : vector<18x128xf32>
    %35 = tpu.matmul %32, %34, %cst_35 {dimension_numbers = #tpu.dot_dimension_numbers<[1], [0], [0], [1], [0, 0, 1, 1], [], []>} : vector<18x128xbf16>, vector<128x128xbf16>, vector<18x128xf32> -> vector<18x128xf32>
    %36 = arith.addf %30, %35 : vector<18x128xf32>
    %c0_36 = arith.constant 0 : index
    %c6 = arith.constant 6 : index
    %c0_37 = arith.constant 0 : index
    %37 = vector.load %arg1[%c0_36, %c6, %c0_37] : memref<1x26x128xbf16, #tpu.memory_space<vmem>>, vector<1x18x128xbf16>
    %38 = vector.shape_cast %37 : vector<1x18x128xbf16> to vector<18x128xbf16>
    %c6_38 = arith.constant 6 : index
    %c0_39 = arith.constant 0 : index
    %c0_40 = arith.constant 0 : index
    %39 = vector.load %arg2[%c6_38, %c0_39, %c0_40] : memref<9x128x128xbf16, #tpu.memory_space<vmem>>, vector<1x128x128xbf16>
    %40 = vector.shape_cast %39 : vector<1x128x128xbf16> to vector<128x128xbf16>
    %cst_41 = arith.constant dense<0.000000e+00> : vector<18x128xf32>
    %41 = tpu.matmul %38, %40, %cst_41 {dimension_numbers = #tpu.dot_dimension_numbers<[1], [0], [0], [1], [0, 0, 1, 1], [], []>} : vector<18x128xbf16>, vector<128x128xbf16>, vector<18x128xf32> -> vector<18x128xf32>
    %42 = arith.addf %36, %41 : vector<18x128xf32>
    %c0_42 = arith.constant 0 : index
    %c7 = arith.constant 7 : index
    %c0_43 = arith.constant 0 : index
    %43 = vector.load %arg1[%c0_42, %c7, %c0_43] : memref<1x26x128xbf16, #tpu.memory_space<vmem>>, vector<1x18x128xbf16>
    %44 = vector.shape_cast %43 : vector<1x18x128xbf16> to vector<18x128xbf16>
    %c7_44 = arith.constant 7 : index
    %c0_45 = arith.constant 0 : index
    %c0_46 = arith.constant 0 : index
    %45 = vector.load %arg2[%c7_44, %c0_45, %c0_46] : memref<9x128x128xbf16, #tpu.memory_space<vmem>>, vector<1x128x128xbf16>
    %46 = vector.shape_cast %45 : vector<1x128x128xbf16> to vector<128x128xbf16>
    %cst_47 = arith.constant dense<0.000000e+00> : vector<18x128xf32>
    %47 = tpu.matmul %44, %46, %cst_47 {dimension_numbers = #tpu.dot_dimension_numbers<[1], [0], [0], [1], [0, 0, 1, 1], [], []>} : vector<18x128xbf16>, vector<128x128xbf16>, vector<18x128xf32> -> vector<18x128xf32>
    %48 = arith.addf %42, %47 : vector<18x128xf32>
    %c0_48 = arith.constant 0 : index
    %c8 = arith.constant 8 : index
    %c0_49 = arith.constant 0 : index
    %49 = vector.load %arg1[%c0_48, %c8, %c0_49] : memref<1x26x128xbf16, #tpu.memory_space<vmem>>, vector<1x18x128xbf16>
    %50 = vector.shape_cast %49 : vector<1x18x128xbf16> to vector<18x128xbf16>
    %c8_50 = arith.constant 8 : index
    %c0_51 = arith.constant 0 : index
    %c0_52 = arith.constant 0 : index
    %51 = vector.load %arg2[%c8_50, %c0_51, %c0_52] : memref<9x128x128xbf16, #tpu.memory_space<vmem>>, vector<1x128x128xbf16>
    %52 = vector.shape_cast %51 : vector<1x128x128xbf16> to vector<128x128xbf16>
    %cst_53 = arith.constant dense<0.000000e+00> : vector<18x128xf32>
    %53 = tpu.matmul %50, %52, %cst_53 {dimension_numbers = #tpu.dot_dimension_numbers<[1], [0], [0], [1], [0, 0, 1, 1], [], []>} : vector<18x128xbf16>, vector<128x128xbf16>, vector<18x128xf32> -> vector<18x128xf32>
    %54 = arith.addf %48, %53 : vector<18x128xf32>
    %c0_54 = arith.constant 0 : index
    %c0_55 = arith.constant 0 : index
    %55 = vector.load %arg3[%c0_54, %c0_55] : memref<1x128xf32, #tpu.memory_space<vmem>>, vector<1x128xf32>
    %56 = vector.broadcast %55 : vector<1x128xf32> to vector<18x128xf32>
    %57 = arith.addf %54, %56 : vector<18x128xf32>
    %cst_56 = arith.constant 0.000000e+00 : f32
    %58 = vector.broadcast %cst_56 : f32 to vector<18x128xf32>
    %59 = arith.maximumf %57, %58 : vector<18x128xf32>
    %60 = vector.shape_cast %59 : vector<18x128xf32> to vector<1x18x128xf32>
    %61 = arith.truncf %60 : vector<1x18x128xf32> to vector<1x18x128xbf16>
    %c0_57 = arith.constant 0 : index
    %c0_58 = arith.constant 0 : index
    %c0_59 = arith.constant 0 : index
    %62 = vector.load %arg4[%c0_57, %c0_58, %c0_59] : memref<1x18x128xbf16, #tpu.memory_space<vmem>>, vector<1x18x128xbf16>
    tpu.vector_store %arg4[%c0_57, %c0_58, %c0_59], %61 {strides = array<i32>} : memref<1x18x128xbf16, #tpu.memory_space<vmem>>, vector<1x18x128xbf16>,
    return
  }
  func.func @transform_0(%arg0: i32) -> (i32, i32, i32) {
    %c0_i32 = arith.constant 0 : i32
    %c0_i32_0 = arith.constant 0 : i32
    %c0_i32_1 = arith.constant 0 : i32
    return %arg0, %c0_i32, %c0_i32_0 : i32, i32, i32
  }
  func.func @transform_1(%arg0: i32) -> (i32, i32, i32) {
    %c0_i32 = arith.constant 0 : i32
    %c0_i32_0 = arith.constant 0 : i32
    %c0_i32_1 = arith.constant 0 : i32
    %c0_i32_2 = arith.constant 0 : i32
    return %c0_i32, %c0_i32_0, %c0_i32_1 : i32, i32, i32
  }
  func.func @transform_2(%arg0: i32) -> (i32, i32) {
    %c0_i32 = arith.constant 0 : i32
    %c0_i32_0 = arith.constant 0 : i32
    %c0_i32_1 = arith.constant 0 : i32
    return %c0_i32, %c0_i32_0 : i32, i32
  }
  func.func @transform_3(%arg0: i32) -> (i32, i32, i32) {
    %c0_i32 = arith.constant 0 : i32
    %c0_i32_0 = arith.constant 0 : i32
    %c0_i32_1 = arith.constant 0 : i32
    return %arg0, %c0_i32, %c0_i32_0 : i32, i32, i32
  }
}

module attributes {stable_mosaic.version = 11 : i64} {
  func.func @_rowconv_kernel(%arg0: i32, %arg1: memref<1x26x64xbf16, #tpu.memory_space<vmem>>, %arg2: memref<9x64x128xbf16, #tpu.memory_space<vmem>>, %arg3: memref<1x128xf32, #tpu.memory_space<vmem>>, %arg4: memref<1x18x128xbf16, #tpu.memory_space<vmem>>) attributes {dimension_semantics = [#tpu.dimension_semantics<parallel>], iteration_bounds = array<i64: 6>, scalar_prefetch = 0 : i64, scratch_operands = 0 : i64, tpu.core_type = #tpu.core_type<tc>, window_params = [{transform_indices = @transform_0, window_bounds = array<i64: 1, 26, 64>}, {pipeline_mode = #tpu.pipeline_mode<synchronous>, transform_indices = @transform_1, window_bounds = array<i64: 9, 64, 128>}, {pipeline_mode = #tpu.pipeline_mode<synchronous>, transform_indices = @transform_2, window_bounds = array<i64: 1, 128>}, {transform_indices = @transform_3, window_bounds = array<i64: 1, 18, 128>}]} {
    %cst = arith.constant 0.000000e+00 : f32
    %0 = vector.broadcast %cst : f32 to vector<18x128xf32>
    %c0 = arith.constant 0 : index
    %c0_0 = arith.constant 0 : index
    %c0_1 = arith.constant 0 : index
    %1 = vector.load %arg1[%c0, %c0_0, %c0_1] : memref<1x26x64xbf16, #tpu.memory_space<vmem>>, vector<1x18x64xbf16>
    %2 = vector.shape_cast %1 : vector<1x18x64xbf16> to vector<18x64xbf16>
    %c0_2 = arith.constant 0 : index
    %c0_3 = arith.constant 0 : index
    %c0_4 = arith.constant 0 : index
    %3 = vector.load %arg2[%c0_2, %c0_3, %c0_4] : memref<9x64x128xbf16, #tpu.memory_space<vmem>>, vector<1x64x128xbf16>
    %4 = vector.shape_cast %3 : vector<1x64x128xbf16> to vector<64x128xbf16>
    %cst_5 = arith.constant dense<0.000000e+00> : vector<18x128xf32>
    %5 = tpu.matmul %2, %4, %cst_5 {dimension_numbers = #tpu.dot_dimension_numbers<[1], [0], [0], [1], [0, 0, 1, 1], [], []>} : vector<18x64xbf16>, vector<64x128xbf16>, vector<18x128xf32> -> vector<18x128xf32>
    %6 = arith.addf %0, %5 : vector<18x128xf32>
    %c0_6 = arith.constant 0 : index
    %c1 = arith.constant 1 : index
    %c0_7 = arith.constant 0 : index
    %7 = vector.load %arg1[%c0_6, %c1, %c0_7] : memref<1x26x64xbf16, #tpu.memory_space<vmem>>, vector<1x18x64xbf16>
    %8 = vector.shape_cast %7 : vector<1x18x64xbf16> to vector<18x64xbf16>
    %c1_8 = arith.constant 1 : index
    %c0_9 = arith.constant 0 : index
    %c0_10 = arith.constant 0 : index
    %9 = vector.load %arg2[%c1_8, %c0_9, %c0_10] : memref<9x64x128xbf16, #tpu.memory_space<vmem>>, vector<1x64x128xbf16>
    %10 = vector.shape_cast %9 : vector<1x64x128xbf16> to vector<64x128xbf16>
    %cst_11 = arith.constant dense<0.000000e+00> : vector<18x128xf32>
    %11 = tpu.matmul %8, %10, %cst_11 {dimension_numbers = #tpu.dot_dimension_numbers<[1], [0], [0], [1], [0, 0, 1, 1], [], []>} : vector<18x64xbf16>, vector<64x128xbf16>, vector<18x128xf32> -> vector<18x128xf32>
    %12 = arith.addf %6, %11 : vector<18x128xf32>
    %c0_12 = arith.constant 0 : index
    %c2 = arith.constant 2 : index
    %c0_13 = arith.constant 0 : index
    %13 = vector.load %arg1[%c0_12, %c2, %c0_13] : memref<1x26x64xbf16, #tpu.memory_space<vmem>>, vector<1x18x64xbf16>
    %14 = vector.shape_cast %13 : vector<1x18x64xbf16> to vector<18x64xbf16>
    %c2_14 = arith.constant 2 : index
    %c0_15 = arith.constant 0 : index
    %c0_16 = arith.constant 0 : index
    %15 = vector.load %arg2[%c2_14, %c0_15, %c0_16] : memref<9x64x128xbf16, #tpu.memory_space<vmem>>, vector<1x64x128xbf16>
    %16 = vector.shape_cast %15 : vector<1x64x128xbf16> to vector<64x128xbf16>
    %cst_17 = arith.constant dense<0.000000e+00> : vector<18x128xf32>
    %17 = tpu.matmul %14, %16, %cst_17 {dimension_numbers = #tpu.dot_dimension_numbers<[1], [0], [0], [1], [0, 0, 1, 1], [], []>} : vector<18x64xbf16>, vector<64x128xbf16>, vector<18x128xf32> -> vector<18x128xf32>
    %18 = arith.addf %12, %17 : vector<18x128xf32>
    %c0_18 = arith.constant 0 : index
    %c3 = arith.constant 3 : index
    %c0_19 = arith.constant 0 : index
    %19 = vector.load %arg1[%c0_18, %c3, %c0_19] : memref<1x26x64xbf16, #tpu.memory_space<vmem>>, vector<1x18x64xbf16>
    %20 = vector.shape_cast %19 : vector<1x18x64xbf16> to vector<18x64xbf16>
    %c3_20 = arith.constant 3 : index
    %c0_21 = arith.constant 0 : index
    %c0_22 = arith.constant 0 : index
    %21 = vector.load %arg2[%c3_20, %c0_21, %c0_22] : memref<9x64x128xbf16, #tpu.memory_space<vmem>>, vector<1x64x128xbf16>
    %22 = vector.shape_cast %21 : vector<1x64x128xbf16> to vector<64x128xbf16>
    %cst_23 = arith.constant dense<0.000000e+00> : vector<18x128xf32>
    %23 = tpu.matmul %20, %22, %cst_23 {dimension_numbers = #tpu.dot_dimension_numbers<[1], [0], [0], [1], [0, 0, 1, 1], [], []>} : vector<18x64xbf16>, vector<64x128xbf16>, vector<18x128xf32> -> vector<18x128xf32>
    %24 = arith.addf %18, %23 : vector<18x128xf32>
    %c0_24 = arith.constant 0 : index
    %c4 = arith.constant 4 : index
    %c0_25 = arith.constant 0 : index
    %25 = vector.load %arg1[%c0_24, %c4, %c0_25] : memref<1x26x64xbf16, #tpu.memory_space<vmem>>, vector<1x18x64xbf16>
    %26 = vector.shape_cast %25 : vector<1x18x64xbf16> to vector<18x64xbf16>
    %c4_26 = arith.constant 4 : index
    %c0_27 = arith.constant 0 : index
    %c0_28 = arith.constant 0 : index
    %27 = vector.load %arg2[%c4_26, %c0_27, %c0_28] : memref<9x64x128xbf16, #tpu.memory_space<vmem>>, vector<1x64x128xbf16>
    %28 = vector.shape_cast %27 : vector<1x64x128xbf16> to vector<64x128xbf16>
    %cst_29 = arith.constant dense<0.000000e+00> : vector<18x128xf32>
    %29 = tpu.matmul %26, %28, %cst_29 {dimension_numbers = #tpu.dot_dimension_numbers<[1], [0], [0], [1], [0, 0, 1, 1], [], []>} : vector<18x64xbf16>, vector<64x128xbf16>, vector<18x128xf32> -> vector<18x128xf32>
    %30 = arith.addf %24, %29 : vector<18x128xf32>
    %c0_30 = arith.constant 0 : index
    %c5 = arith.constant 5 : index
    %c0_31 = arith.constant 0 : index
    %31 = vector.load %arg1[%c0_30, %c5, %c0_31] : memref<1x26x64xbf16, #tpu.memory_space<vmem>>, vector<1x18x64xbf16>
    %32 = vector.shape_cast %31 : vector<1x18x64xbf16> to vector<18x64xbf16>
    %c5_32 = arith.constant 5 : index
    %c0_33 = arith.constant 0 : index
    %c0_34 = arith.constant 0 : index
    %33 = vector.load %arg2[%c5_32, %c0_33, %c0_34] : memref<9x64x128xbf16, #tpu.memory_space<vmem>>, vector<1x64x128xbf16>
    %34 = vector.shape_cast %33 : vector<1x64x128xbf16> to vector<64x128xbf16>
    %cst_35 = arith.constant dense<0.000000e+00> : vector<18x128xf32>
    %35 = tpu.matmul %32, %34, %cst_35 {dimension_numbers = #tpu.dot_dimension_numbers<[1], [0], [0], [1], [0, 0, 1, 1], [], []>} : vector<18x64xbf16>, vector<64x128xbf16>, vector<18x128xf32> -> vector<18x128xf32>
    %36 = arith.addf %30, %35 : vector<18x128xf32>
    %c0_36 = arith.constant 0 : index
    %c6 = arith.constant 6 : index
    %c0_37 = arith.constant 0 : index
    %37 = vector.load %arg1[%c0_36, %c6, %c0_37] : memref<1x26x64xbf16, #tpu.memory_space<vmem>>, vector<1x18x64xbf16>
    %38 = vector.shape_cast %37 : vector<1x18x64xbf16> to vector<18x64xbf16>
    %c6_38 = arith.constant 6 : index
    %c0_39 = arith.constant 0 : index
    %c0_40 = arith.constant 0 : index
    %39 = vector.load %arg2[%c6_38, %c0_39, %c0_40] : memref<9x64x128xbf16, #tpu.memory_space<vmem>>, vector<1x64x128xbf16>
    %40 = vector.shape_cast %39 : vector<1x64x128xbf16> to vector<64x128xbf16>
    %cst_41 = arith.constant dense<0.000000e+00> : vector<18x128xf32>
    %41 = tpu.matmul %38, %40, %cst_41 {dimension_numbers = #tpu.dot_dimension_numbers<[1], [0], [0], [1], [0, 0, 1, 1], [], []>} : vector<18x64xbf16>, vector<64x128xbf16>, vector<18x128xf32> -> vector<18x128xf32>
    %42 = arith.addf %36, %41 : vector<18x128xf32>
    %c0_42 = arith.constant 0 : index
    %c7 = arith.constant 7 : index
    %c0_43 = arith.constant 0 : index
    %43 = vector.load %arg1[%c0_42, %c7, %c0_43] : memref<1x26x64xbf16, #tpu.memory_space<vmem>>, vector<1x18x64xbf16>
    %44 = vector.shape_cast %43 : vector<1x18x64xbf16> to vector<18x64xbf16>
    %c7_44 = arith.constant 7 : index
    %c0_45 = arith.constant 0 : index
    %c0_46 = arith.constant 0 : index
    %45 = vector.load %arg2[%c7_44, %c0_45, %c0_46] : memref<9x64x128xbf16, #tpu.memory_space<vmem>>, vector<1x64x128xbf16>
    %46 = vector.shape_cast %45 : vector<1x64x128xbf16> to vector<64x128xbf16>
    %cst_47 = arith.constant dense<0.000000e+00> : vector<18x128xf32>
    %47 = tpu.matmul %44, %46, %cst_47 {dimension_numbers = #tpu.dot_dimension_numbers<[1], [0], [0], [1], [0, 0, 1, 1], [], []>} : vector<18x64xbf16>, vector<64x128xbf16>, vector<18x128xf32> -> vector<18x128xf32>
    %48 = arith.addf %42, %47 : vector<18x128xf32>
    %c0_48 = arith.constant 0 : index
    %c8 = arith.constant 8 : index
    %c0_49 = arith.constant 0 : index
    %49 = vector.load %arg1[%c0_48, %c8, %c0_49] : memref<1x26x64xbf16, #tpu.memory_space<vmem>>, vector<1x18x64xbf16>
    %50 = vector.shape_cast %49 : vector<1x18x64xbf16> to vector<18x64xbf16>
    %c8_50 = arith.constant 8 : index
    %c0_51 = arith.constant 0 : index
    %c0_52 = arith.constant 0 : index
    %51 = vector.load %arg2[%c8_50, %c0_51, %c0_52] : memref<9x64x128xbf16, #tpu.memory_space<vmem>>, vector<1x64x128xbf16>
    %52 = vector.shape_cast %51 : vector<1x64x128xbf16> to vector<64x128xbf16>
    %cst_53 = arith.constant dense<0.000000e+00> : vector<18x128xf32>
    %53 = tpu.matmul %50, %52, %cst_53 {dimension_numbers = #tpu.dot_dimension_numbers<[1], [0], [0], [1], [0, 0, 1, 1], [], []>} : vector<18x64xbf16>, vector<64x128xbf16>, vector<18x128xf32> -> vector<18x128xf32>
    %54 = arith.addf %48, %53 : vector<18x128xf32>
    %c0_54 = arith.constant 0 : index
    %c0_55 = arith.constant 0 : index
    %55 = vector.load %arg3[%c0_54, %c0_55] : memref<1x128xf32, #tpu.memory_space<vmem>>, vector<1x128xf32>
    %56 = vector.broadcast %55 : vector<1x128xf32> to vector<18x128xf32>
    %57 = arith.addf %54, %56 : vector<18x128xf32>
    %cst_56 = arith.constant 0.000000e+00 : f32
    %58 = vector.broadcast %cst_56 : f32 to vector<18x128xf32>
    %59 = arith.maximumf %57, %58 : vector<18x128xf32>
    %60 = vector.shape_cast %59 : vector<18x128xf32> to vector<1x18x128xf32>
    %61 = arith.truncf %60 : vector<1x18x128xf32> to vector<1x18x128xbf16>
    %c0_57 = arith.constant 0 : index
    %c0_58 = arith.constant 0 : index
    %c0_59 = arith.constant 0 : index
    %62 = vector.load %arg4[%c0_57, %c0_58, %c0_59] : memref<1x18x128xbf16, #tpu.memory_space<vmem>>, vector<1x18x128xbf16>
    tpu.vector_store %arg4[%c0_57, %c0_58, %c0_59], %61 {strides = array<i32>} : memref<1x18x128xbf16, #tpu.memory_space<vmem>>, vector<1x18x128xbf16>,
    return
  }
  func.func @transform_0(%arg0: i32) -> (i32, i32, i32) {
    %c0_i32 = arith.constant 0 : i32
    %c0_i32_0 = arith.constant 0 : i32
    %c0_i32_1 = arith.constant 0 : i32
    return %arg0, %c0_i32, %c0_i32_0 : i32, i32, i32
  }
  func.func @transform_1(%arg0: i32) -> (i32, i32, i32) {
    %c0_i32 = arith.constant 0 : i32
    %c0_i32_0 = arith.constant 0 : i32
    %c0_i32_1 = arith.constant 0 : i32
    %c0_i32_2 = arith.constant 0 : i32
    return %c0_i32, %c0_i32_0, %c0_i32_1 : i32, i32, i32
  }
  func.func @transform_2(%arg0: i32) -> (i32, i32) {
    %c0_i32 = arith.constant 0 : i32
    %c0_i32_0 = arith.constant 0 : i32
    %c0_i32_1 = arith.constant 0 : i32
    return %c0_i32, %c0_i32_0 : i32, i32
  }
  func.func @transform_3(%arg0: i32) -> (i32, i32, i32) {
    %c0_i32 = arith.constant 0 : i32
    %c0_i32_0 = arith.constant 0 : i32
    %c0_i32_1 = arith.constant 0 : i32
    return %arg0, %c0_i32, %c0_i32_0 : i32, i32, i32
  }
}

module attributes {stable_mosaic.version = 11 : i64} {
  func.func @_maxpool3_kernel(%arg0: i32, %arg1: memref<36x3x128xbf16, #tpu.memory_space<vmem>>, %arg2: memref<36x128xbf16, #tpu.memory_space<vmem>>) attributes {dimension_semantics = [#tpu.dimension_semantics<parallel>], iteration_bounds = array<i64: 1>, scalar_prefetch = 0 : i64, scratch_operands = 0 : i64, tpu.core_type = #tpu.core_type<tc>, window_params = [{transform_indices = @transform_0, window_bounds = array<i64: 36, 3, 128>}, {transform_indices = @transform_1, window_bounds = array<i64: 36, 128>}]} {
    %c0 = arith.constant 0 : index
    %c0_0 = arith.constant 0 : index
    %c0_1 = arith.constant 0 : index
    %0 = vector.load %arg1[%c0, %c0_0, %c0_1] : memref<36x3x128xbf16, #tpu.memory_space<vmem>>, vector<36x1x128xbf16>
    %c0_2 = arith.constant 0 : index
    %c1 = arith.constant 1 : index
    %c0_3 = arith.constant 0 : index
    %1 = vector.load %arg1[%c0_2, %c1, %c0_3] : memref<36x3x128xbf16, #tpu.memory_space<vmem>>, vector<36x1x128xbf16>
    %2 = arith.maximumf %0, %1 : vector<36x1x128xbf16>
    %c0_4 = arith.constant 0 : index
    %c2 = arith.constant 2 : index
    %c0_5 = arith.constant 0 : index
    %3 = vector.load %arg1[%c0_4, %c2, %c0_5] : memref<36x3x128xbf16, #tpu.memory_space<vmem>>, vector<36x1x128xbf16>
    %4 = arith.maximumf %2, %3 : vector<36x1x128xbf16>
    %5 = vector.shape_cast %4 : vector<36x1x128xbf16> to vector<36x128xbf16>
    %c0_6 = arith.constant 0 : index
    %c0_7 = arith.constant 0 : index
    %6 = vector.load %arg2[%c0_6, %c0_7] : memref<36x128xbf16, #tpu.memory_space<vmem>>, vector<36x128xbf16>
    tpu.vector_store %arg2[%c0_6, %c0_7], %5 {strides = array<i32>} : memref<36x128xbf16, #tpu.memory_space<vmem>>, vector<36x128xbf16>,
    return
  }
  func.func @transform_0(%arg0: i32) -> (i32, i32, i32) {
    %c0_i32 = arith.constant 0 : i32
    %c0_i32_0 = arith.constant 0 : i32
    %c0_i32_1 = arith.constant 0 : i32
    return %arg0, %c0_i32, %c0_i32_0 : i32, i32, i32
  }
  func.func @transform_1(%arg0: i32) -> (i32, i32) {
    %c0_i32 = arith.constant 0 : i32
    %c0_i32_0 = arith.constant 0 : i32
    return %arg0, %c0_i32 : i32, i32
  }
}

module attributes {stable_mosaic.version = 11 : i64} {
  func.func @_rowconv_kernel(%arg0: i32, %arg1: memref<1x14x128xbf16, #tpu.memory_space<vmem>>, %arg2: memref<9x128x64xbf16, #tpu.memory_space<vmem>>, %arg3: memref<1x64xf32, #tpu.memory_space<vmem>>, %arg4: memref<1x6x64xbf16, #tpu.memory_space<vmem>>) attributes {dimension_semantics = [#tpu.dimension_semantics<parallel>], iteration_bounds = array<i64: 6>, scalar_prefetch = 0 : i64, scratch_operands = 0 : i64, tpu.core_type = #tpu.core_type<tc>, window_params = [{transform_indices = @transform_0, window_bounds = array<i64: 1, 14, 128>}, {pipeline_mode = #tpu.pipeline_mode<synchronous>, transform_indices = @transform_1, window_bounds = array<i64: 9, 128, 64>}, {pipeline_mode = #tpu.pipeline_mode<synchronous>, transform_indices = @transform_2, window_bounds = array<i64: 1, 64>}, {transform_indices = @transform_3, window_bounds = array<i64: 1, 6, 64>}]} {
    %cst = arith.constant 0.000000e+00 : f32
    %0 = vector.broadcast %cst : f32 to vector<6x64xf32>
    %c0 = arith.constant 0 : index
    %c0_0 = arith.constant 0 : index
    %c0_1 = arith.constant 0 : index
    %1 = vector.load %arg1[%c0, %c0_0, %c0_1] : memref<1x14x128xbf16, #tpu.memory_space<vmem>>, vector<1x6x128xbf16>
    %2 = vector.shape_cast %1 : vector<1x6x128xbf16> to vector<6x128xbf16>
    %c0_2 = arith.constant 0 : index
    %c0_3 = arith.constant 0 : index
    %c0_4 = arith.constant 0 : index
    %3 = vector.load %arg2[%c0_2, %c0_3, %c0_4] : memref<9x128x64xbf16, #tpu.memory_space<vmem>>, vector<1x128x64xbf16>
    %4 = vector.shape_cast %3 : vector<1x128x64xbf16> to vector<128x64xbf16>
    %cst_5 = arith.constant dense<0.000000e+00> : vector<6x64xf32>
    %5 = tpu.matmul %2, %4, %cst_5 {dimension_numbers = #tpu.dot_dimension_numbers<[1], [0], [0], [1], [0, 0, 1, 1], [], []>} : vector<6x128xbf16>, vector<128x64xbf16>, vector<6x64xf32> -> vector<6x64xf32>
    %6 = arith.addf %0, %5 : vector<6x64xf32>
    %c0_6 = arith.constant 0 : index
    %c1 = arith.constant 1 : index
    %c0_7 = arith.constant 0 : index
    %7 = vector.load %arg1[%c0_6, %c1, %c0_7] : memref<1x14x128xbf16, #tpu.memory_space<vmem>>, vector<1x6x128xbf16>
    %8 = vector.shape_cast %7 : vector<1x6x128xbf16> to vector<6x128xbf16>
    %c1_8 = arith.constant 1 : index
    %c0_9 = arith.constant 0 : index
    %c0_10 = arith.constant 0 : index
    %9 = vector.load %arg2[%c1_8, %c0_9, %c0_10] : memref<9x128x64xbf16, #tpu.memory_space<vmem>>, vector<1x128x64xbf16>
    %10 = vector.shape_cast %9 : vector<1x128x64xbf16> to vector<128x64xbf16>
    %cst_11 = arith.constant dense<0.000000e+00> : vector<6x64xf32>
    %11 = tpu.matmul %8, %10, %cst_11 {dimension_numbers = #tpu.dot_dimension_numbers<[1], [0], [0], [1], [0, 0, 1, 1], [], []>} : vector<6x128xbf16>, vector<128x64xbf16>, vector<6x64xf32> -> vector<6x64xf32>
    %12 = arith.addf %6, %11 : vector<6x64xf32>
    %c0_12 = arith.constant 0 : index
    %c2 = arith.constant 2 : index
    %c0_13 = arith.constant 0 : index
    %13 = vector.load %arg1[%c0_12, %c2, %c0_13] : memref<1x14x128xbf16, #tpu.memory_space<vmem>>, vector<1x6x128xbf16>
    %14 = vector.shape_cast %13 : vector<1x6x128xbf16> to vector<6x128xbf16>
    %c2_14 = arith.constant 2 : index
    %c0_15 = arith.constant 0 : index
    %c0_16 = arith.constant 0 : index
    %15 = vector.load %arg2[%c2_14, %c0_15, %c0_16] : memref<9x128x64xbf16, #tpu.memory_space<vmem>>, vector<1x128x64xbf16>
    %16 = vector.shape_cast %15 : vector<1x128x64xbf16> to vector<128x64xbf16>
    %cst_17 = arith.constant dense<0.000000e+00> : vector<6x64xf32>
    %17 = tpu.matmul %14, %16, %cst_17 {dimension_numbers = #tpu.dot_dimension_numbers<[1], [0], [0], [1], [0, 0, 1, 1], [], []>} : vector<6x128xbf16>, vector<128x64xbf16>, vector<6x64xf32> -> vector<6x64xf32>
    %18 = arith.addf %12, %17 : vector<6x64xf32>
    %c0_18 = arith.constant 0 : index
    %c3 = arith.constant 3 : index
    %c0_19 = arith.constant 0 : index
    %19 = vector.load %arg1[%c0_18, %c3, %c0_19] : memref<1x14x128xbf16, #tpu.memory_space<vmem>>, vector<1x6x128xbf16>
    %20 = vector.shape_cast %19 : vector<1x6x128xbf16> to vector<6x128xbf16>
    %c3_20 = arith.constant 3 : index
    %c0_21 = arith.constant 0 : index
    %c0_22 = arith.constant 0 : index
    %21 = vector.load %arg2[%c3_20, %c0_21, %c0_22] : memref<9x128x64xbf16, #tpu.memory_space<vmem>>, vector<1x128x64xbf16>
    %22 = vector.shape_cast %21 : vector<1x128x64xbf16> to vector<128x64xbf16>
    %cst_23 = arith.constant dense<0.000000e+00> : vector<6x64xf32>
    %23 = tpu.matmul %20, %22, %cst_23 {dimension_numbers = #tpu.dot_dimension_numbers<[1], [0], [0], [1], [0, 0, 1, 1], [], []>} : vector<6x128xbf16>, vector<128x64xbf16>, vector<6x64xf32> -> vector<6x64xf32>
    %24 = arith.addf %18, %23 : vector<6x64xf32>
    %c0_24 = arith.constant 0 : index
    %c4 = arith.constant 4 : index
    %c0_25 = arith.constant 0 : index
    %25 = vector.load %arg1[%c0_24, %c4, %c0_25] : memref<1x14x128xbf16, #tpu.memory_space<vmem>>, vector<1x6x128xbf16>
    %26 = vector.shape_cast %25 : vector<1x6x128xbf16> to vector<6x128xbf16>
    %c4_26 = arith.constant 4 : index
    %c0_27 = arith.constant 0 : index
    %c0_28 = arith.constant 0 : index
    %27 = vector.load %arg2[%c4_26, %c0_27, %c0_28] : memref<9x128x64xbf16, #tpu.memory_space<vmem>>, vector<1x128x64xbf16>
    %28 = vector.shape_cast %27 : vector<1x128x64xbf16> to vector<128x64xbf16>
    %cst_29 = arith.constant dense<0.000000e+00> : vector<6x64xf32>
    %29 = tpu.matmul %26, %28, %cst_29 {dimension_numbers = #tpu.dot_dimension_numbers<[1], [0], [0], [1], [0, 0, 1, 1], [], []>} : vector<6x128xbf16>, vector<128x64xbf16>, vector<6x64xf32> -> vector<6x64xf32>
    %30 = arith.addf %24, %29 : vector<6x64xf32>
    %c0_30 = arith.constant 0 : index
    %c5 = arith.constant 5 : index
    %c0_31 = arith.constant 0 : index
    %31 = vector.load %arg1[%c0_30, %c5, %c0_31] : memref<1x14x128xbf16, #tpu.memory_space<vmem>>, vector<1x6x128xbf16>
    %32 = vector.shape_cast %31 : vector<1x6x128xbf16> to vector<6x128xbf16>
    %c5_32 = arith.constant 5 : index
    %c0_33 = arith.constant 0 : index
    %c0_34 = arith.constant 0 : index
    %33 = vector.load %arg2[%c5_32, %c0_33, %c0_34] : memref<9x128x64xbf16, #tpu.memory_space<vmem>>, vector<1x128x64xbf16>
    %34 = vector.shape_cast %33 : vector<1x128x64xbf16> to vector<128x64xbf16>
    %cst_35 = arith.constant dense<0.000000e+00> : vector<6x64xf32>
    %35 = tpu.matmul %32, %34, %cst_35 {dimension_numbers = #tpu.dot_dimension_numbers<[1], [0], [0], [1], [0, 0, 1, 1], [], []>} : vector<6x128xbf16>, vector<128x64xbf16>, vector<6x64xf32> -> vector<6x64xf32>
    %36 = arith.addf %30, %35 : vector<6x64xf32>
    %c0_36 = arith.constant 0 : index
    %c6 = arith.constant 6 : index
    %c0_37 = arith.constant 0 : index
    %37 = vector.load %arg1[%c0_36, %c6, %c0_37] : memref<1x14x128xbf16, #tpu.memory_space<vmem>>, vector<1x6x128xbf16>
    %38 = vector.shape_cast %37 : vector<1x6x128xbf16> to vector<6x128xbf16>
    %c6_38 = arith.constant 6 : index
    %c0_39 = arith.constant 0 : index
    %c0_40 = arith.constant 0 : index
    %39 = vector.load %arg2[%c6_38, %c0_39, %c0_40] : memref<9x128x64xbf16, #tpu.memory_space<vmem>>, vector<1x128x64xbf16>
    %40 = vector.shape_cast %39 : vector<1x128x64xbf16> to vector<128x64xbf16>
    %cst_41 = arith.constant dense<0.000000e+00> : vector<6x64xf32>
    %41 = tpu.matmul %38, %40, %cst_41 {dimension_numbers = #tpu.dot_dimension_numbers<[1], [0], [0], [1], [0, 0, 1, 1], [], []>} : vector<6x128xbf16>, vector<128x64xbf16>, vector<6x64xf32> -> vector<6x64xf32>
    %42 = arith.addf %36, %41 : vector<6x64xf32>
    %c0_42 = arith.constant 0 : index
    %c7 = arith.constant 7 : index
    %c0_43 = arith.constant 0 : index
    %43 = vector.load %arg1[%c0_42, %c7, %c0_43] : memref<1x14x128xbf16, #tpu.memory_space<vmem>>, vector<1x6x128xbf16>
    %44 = vector.shape_cast %43 : vector<1x6x128xbf16> to vector<6x128xbf16>
    %c7_44 = arith.constant 7 : index
    %c0_45 = arith.constant 0 : index
    %c0_46 = arith.constant 0 : index
    %45 = vector.load %arg2[%c7_44, %c0_45, %c0_46] : memref<9x128x64xbf16, #tpu.memory_space<vmem>>, vector<1x128x64xbf16>
    %46 = vector.shape_cast %45 : vector<1x128x64xbf16> to vector<128x64xbf16>
    %cst_47 = arith.constant dense<0.000000e+00> : vector<6x64xf32>
    %47 = tpu.matmul %44, %46, %cst_47 {dimension_numbers = #tpu.dot_dimension_numbers<[1], [0], [0], [1], [0, 0, 1, 1], [], []>} : vector<6x128xbf16>, vector<128x64xbf16>, vector<6x64xf32> -> vector<6x64xf32>
    %48 = arith.addf %42, %47 : vector<6x64xf32>
    %c0_48 = arith.constant 0 : index
    %c8 = arith.constant 8 : index
    %c0_49 = arith.constant 0 : index
    %49 = vector.load %arg1[%c0_48, %c8, %c0_49] : memref<1x14x128xbf16, #tpu.memory_space<vmem>>, vector<1x6x128xbf16>
    %50 = vector.shape_cast %49 : vector<1x6x128xbf16> to vector<6x128xbf16>
    %c8_50 = arith.constant 8 : index
    %c0_51 = arith.constant 0 : index
    %c0_52 = arith.constant 0 : index
    %51 = vector.load %arg2[%c8_50, %c0_51, %c0_52] : memref<9x128x64xbf16, #tpu.memory_space<vmem>>, vector<1x128x64xbf16>
    %52 = vector.shape_cast %51 : vector<1x128x64xbf16> to vector<128x64xbf16>
    %cst_53 = arith.constant dense<0.000000e+00> : vector<6x64xf32>
    %53 = tpu.matmul %50, %52, %cst_53 {dimension_numbers = #tpu.dot_dimension_numbers<[1], [0], [0], [1], [0, 0, 1, 1], [], []>} : vector<6x128xbf16>, vector<128x64xbf16>, vector<6x64xf32> -> vector<6x64xf32>
    %54 = arith.addf %48, %53 : vector<6x64xf32>
    %c0_54 = arith.constant 0 : index
    %c0_55 = arith.constant 0 : index
    %55 = vector.load %arg3[%c0_54, %c0_55] : memref<1x64xf32, #tpu.memory_space<vmem>>, vector<1x64xf32>
    %56 = vector.broadcast %55 : vector<1x64xf32> to vector<6x64xf32>
    %57 = arith.addf %54, %56 : vector<6x64xf32>
    %cst_56 = arith.constant 0.000000e+00 : f32
    %58 = vector.broadcast %cst_56 : f32 to vector<6x64xf32>
    %59 = arith.maximumf %57, %58 : vector<6x64xf32>
    %60 = vector.shape_cast %59 : vector<6x64xf32> to vector<1x6x64xf32>
    %61 = arith.truncf %60 : vector<1x6x64xf32> to vector<1x6x64xbf16>
    %c0_57 = arith.constant 0 : index
    %c0_58 = arith.constant 0 : index
    %c0_59 = arith.constant 0 : index
    %62 = vector.load %arg4[%c0_57, %c0_58, %c0_59] : memref<1x6x64xbf16, #tpu.memory_space<vmem>>, vector<1x6x64xbf16>
    tpu.vector_store %arg4[%c0_57, %c0_58, %c0_59], %61 {strides = array<i32>} : memref<1x6x64xbf16, #tpu.memory_space<vmem>>, vector<1x6x64xbf16>,
    return
  }
  func.func @transform_0(%arg0: i32) -> (i32, i32, i32) {
    %c0_i32 = arith.constant 0 : i32
    %c0_i32_0 = arith.constant 0 : i32
    %c0_i32_1 = arith.constant 0 : i32
    return %arg0, %c0_i32, %c0_i32_0 : i32, i32, i32
  }
  func.func @transform_1(%arg0: i32) -> (i32, i32, i32) {
    %c0_i32 = arith.constant 0 : i32
    %c0_i32_0 = arith.constant 0 : i32
    %c0_i32_1 = arith.constant 0 : i32
    %c0_i32_2 = arith.constant 0 : i32
    return %c0_i32, %c0_i32_0, %c0_i32_1 : i32, i32, i32
  }
  func.func @transform_2(%arg0: i32) -> (i32, i32) {
    %c0_i32 = arith.constant 0 : i32
    %c0_i32_0 = arith.constant 0 : i32
    %c0_i32_1 = arith.constant 0 : i32
    return %c0_i32, %c0_i32_0 : i32, i32
  }
  func.func @transform_3(%arg0: i32) -> (i32, i32, i32) {
    %c0_i32 = arith.constant 0 : i32
    %c0_i32_0 = arith.constant 0 : i32
    %c0_i32_1 = arith.constant 0 : i32
    return %arg0, %c0_i32, %c0_i32_0 : i32, i32, i32
  }
}

module attributes {stable_mosaic.version = 11 : i64} {
  func.func @_rowconv_kernel(%arg0: i32, %arg1: memref<1x14x64xbf16, #tpu.memory_space<vmem>>, %arg2: memref<9x64x64xbf16, #tpu.memory_space<vmem>>, %arg3: memref<1x64xf32, #tpu.memory_space<vmem>>, %arg4: memref<1x6x64xbf16, #tpu.memory_space<vmem>>) attributes {dimension_semantics = [#tpu.dimension_semantics<parallel>], iteration_bounds = array<i64: 6>, scalar_prefetch = 0 : i64, scratch_operands = 0 : i64, tpu.core_type = #tpu.core_type<tc>, window_params = [{transform_indices = @transform_0, window_bounds = array<i64: 1, 14, 64>}, {pipeline_mode = #tpu.pipeline_mode<synchronous>, transform_indices = @transform_1, window_bounds = array<i64: 9, 64, 64>}, {pipeline_mode = #tpu.pipeline_mode<synchronous>, transform_indices = @transform_2, window_bounds = array<i64: 1, 64>}, {transform_indices = @transform_3, window_bounds = array<i64: 1, 6, 64>}]} {
    %cst = arith.constant 0.000000e+00 : f32
    %0 = vector.broadcast %cst : f32 to vector<6x64xf32>
    %c0 = arith.constant 0 : index
    %c0_0 = arith.constant 0 : index
    %c0_1 = arith.constant 0 : index
    %1 = vector.load %arg1[%c0, %c0_0, %c0_1] : memref<1x14x64xbf16, #tpu.memory_space<vmem>>, vector<1x6x64xbf16>
    %2 = vector.shape_cast %1 : vector<1x6x64xbf16> to vector<6x64xbf16>
    %c0_2 = arith.constant 0 : index
    %c0_3 = arith.constant 0 : index
    %c0_4 = arith.constant 0 : index
    %3 = vector.load %arg2[%c0_2, %c0_3, %c0_4] : memref<9x64x64xbf16, #tpu.memory_space<vmem>>, vector<1x64x64xbf16>
    %4 = vector.shape_cast %3 : vector<1x64x64xbf16> to vector<64x64xbf16>
    %cst_5 = arith.constant dense<0.000000e+00> : vector<6x64xf32>
    %5 = tpu.matmul %2, %4, %cst_5 {dimension_numbers = #tpu.dot_dimension_numbers<[1], [0], [0], [1], [0, 0, 1, 1], [], []>} : vector<6x64xbf16>, vector<64x64xbf16>, vector<6x64xf32> -> vector<6x64xf32>
    %6 = arith.addf %0, %5 : vector<6x64xf32>
    %c0_6 = arith.constant 0 : index
    %c1 = arith.constant 1 : index
    %c0_7 = arith.constant 0 : index
    %7 = vector.load %arg1[%c0_6, %c1, %c0_7] : memref<1x14x64xbf16, #tpu.memory_space<vmem>>, vector<1x6x64xbf16>
    %8 = vector.shape_cast %7 : vector<1x6x64xbf16> to vector<6x64xbf16>
    %c1_8 = arith.constant 1 : index
    %c0_9 = arith.constant 0 : index
    %c0_10 = arith.constant 0 : index
    %9 = vector.load %arg2[%c1_8, %c0_9, %c0_10] : memref<9x64x64xbf16, #tpu.memory_space<vmem>>, vector<1x64x64xbf16>
    %10 = vector.shape_cast %9 : vector<1x64x64xbf16> to vector<64x64xbf16>
    %cst_11 = arith.constant dense<0.000000e+00> : vector<6x64xf32>
    %11 = tpu.matmul %8, %10, %cst_11 {dimension_numbers = #tpu.dot_dimension_numbers<[1], [0], [0], [1], [0, 0, 1, 1], [], []>} : vector<6x64xbf16>, vector<64x64xbf16>, vector<6x64xf32> -> vector<6x64xf32>
    %12 = arith.addf %6, %11 : vector<6x64xf32>
    %c0_12 = arith.constant 0 : index
    %c2 = arith.constant 2 : index
    %c0_13 = arith.constant 0 : index
    %13 = vector.load %arg1[%c0_12, %c2, %c0_13] : memref<1x14x64xbf16, #tpu.memory_space<vmem>>, vector<1x6x64xbf16>
    %14 = vector.shape_cast %13 : vector<1x6x64xbf16> to vector<6x64xbf16>
    %c2_14 = arith.constant 2 : index
    %c0_15 = arith.constant 0 : index
    %c0_16 = arith.constant 0 : index
    %15 = vector.load %arg2[%c2_14, %c0_15, %c0_16] : memref<9x64x64xbf16, #tpu.memory_space<vmem>>, vector<1x64x64xbf16>
    %16 = vector.shape_cast %15 : vector<1x64x64xbf16> to vector<64x64xbf16>
    %cst_17 = arith.constant dense<0.000000e+00> : vector<6x64xf32>
    %17 = tpu.matmul %14, %16, %cst_17 {dimension_numbers = #tpu.dot_dimension_numbers<[1], [0], [0], [1], [0, 0, 1, 1], [], []>} : vector<6x64xbf16>, vector<64x64xbf16>, vector<6x64xf32> -> vector<6x64xf32>
    %18 = arith.addf %12, %17 : vector<6x64xf32>
    %c0_18 = arith.constant 0 : index
    %c3 = arith.constant 3 : index
    %c0_19 = arith.constant 0 : index
    %19 = vector.load %arg1[%c0_18, %c3, %c0_19] : memref<1x14x64xbf16, #tpu.memory_space<vmem>>, vector<1x6x64xbf16>
    %20 = vector.shape_cast %19 : vector<1x6x64xbf16> to vector<6x64xbf16>
    %c3_20 = arith.constant 3 : index
    %c0_21 = arith.constant 0 : index
    %c0_22 = arith.constant 0 : index
    %21 = vector.load %arg2[%c3_20, %c0_21, %c0_22] : memref<9x64x64xbf16, #tpu.memory_space<vmem>>, vector<1x64x64xbf16>
    %22 = vector.shape_cast %21 : vector<1x64x64xbf16> to vector<64x64xbf16>
    %cst_23 = arith.constant dense<0.000000e+00> : vector<6x64xf32>
    %23 = tpu.matmul %20, %22, %cst_23 {dimension_numbers = #tpu.dot_dimension_numbers<[1], [0], [0], [1], [0, 0, 1, 1], [], []>} : vector<6x64xbf16>, vector<64x64xbf16>, vector<6x64xf32> -> vector<6x64xf32>
    %24 = arith.addf %18, %23 : vector<6x64xf32>
    %c0_24 = arith.constant 0 : index
    %c4 = arith.constant 4 : index
    %c0_25 = arith.constant 0 : index
    %25 = vector.load %arg1[%c0_24, %c4, %c0_25] : memref<1x14x64xbf16, #tpu.memory_space<vmem>>, vector<1x6x64xbf16>
    %26 = vector.shape_cast %25 : vector<1x6x64xbf16> to vector<6x64xbf16>
    %c4_26 = arith.constant 4 : index
    %c0_27 = arith.constant 0 : index
    %c0_28 = arith.constant 0 : index
    %27 = vector.load %arg2[%c4_26, %c0_27, %c0_28] : memref<9x64x64xbf16, #tpu.memory_space<vmem>>, vector<1x64x64xbf16>
    %28 = vector.shape_cast %27 : vector<1x64x64xbf16> to vector<64x64xbf16>
    %cst_29 = arith.constant dense<0.000000e+00> : vector<6x64xf32>
    %29 = tpu.matmul %26, %28, %cst_29 {dimension_numbers = #tpu.dot_dimension_numbers<[1], [0], [0], [1], [0, 0, 1, 1], [], []>} : vector<6x64xbf16>, vector<64x64xbf16>, vector<6x64xf32> -> vector<6x64xf32>
    %30 = arith.addf %24, %29 : vector<6x64xf32>
    %c0_30 = arith.constant 0 : index
    %c5 = arith.constant 5 : index
    %c0_31 = arith.constant 0 : index
    %31 = vector.load %arg1[%c0_30, %c5, %c0_31] : memref<1x14x64xbf16, #tpu.memory_space<vmem>>, vector<1x6x64xbf16>
    %32 = vector.shape_cast %31 : vector<1x6x64xbf16> to vector<6x64xbf16>
    %c5_32 = arith.constant 5 : index
    %c0_33 = arith.constant 0 : index
    %c0_34 = arith.constant 0 : index
    %33 = vector.load %arg2[%c5_32, %c0_33, %c0_34] : memref<9x64x64xbf16, #tpu.memory_space<vmem>>, vector<1x64x64xbf16>
    %34 = vector.shape_cast %33 : vector<1x64x64xbf16> to vector<64x64xbf16>
    %cst_35 = arith.constant dense<0.000000e+00> : vector<6x64xf32>
    %35 = tpu.matmul %32, %34, %cst_35 {dimension_numbers = #tpu.dot_dimension_numbers<[1], [0], [0], [1], [0, 0, 1, 1], [], []>} : vector<6x64xbf16>, vector<64x64xbf16>, vector<6x64xf32> -> vector<6x64xf32>
    %36 = arith.addf %30, %35 : vector<6x64xf32>
    %c0_36 = arith.constant 0 : index
    %c6 = arith.constant 6 : index
    %c0_37 = arith.constant 0 : index
    %37 = vector.load %arg1[%c0_36, %c6, %c0_37] : memref<1x14x64xbf16, #tpu.memory_space<vmem>>, vector<1x6x64xbf16>
    %38 = vector.shape_cast %37 : vector<1x6x64xbf16> to vector<6x64xbf16>
    %c6_38 = arith.constant 6 : index
    %c0_39 = arith.constant 0 : index
    %c0_40 = arith.constant 0 : index
    %39 = vector.load %arg2[%c6_38, %c0_39, %c0_40] : memref<9x64x64xbf16, #tpu.memory_space<vmem>>, vector<1x64x64xbf16>
    %40 = vector.shape_cast %39 : vector<1x64x64xbf16> to vector<64x64xbf16>
    %cst_41 = arith.constant dense<0.000000e+00> : vector<6x64xf32>
    %41 = tpu.matmul %38, %40, %cst_41 {dimension_numbers = #tpu.dot_dimension_numbers<[1], [0], [0], [1], [0, 0, 1, 1], [], []>} : vector<6x64xbf16>, vector<64x64xbf16>, vector<6x64xf32> -> vector<6x64xf32>
    %42 = arith.addf %36, %41 : vector<6x64xf32>
    %c0_42 = arith.constant 0 : index
    %c7 = arith.constant 7 : index
    %c0_43 = arith.constant 0 : index
    %43 = vector.load %arg1[%c0_42, %c7, %c0_43] : memref<1x14x64xbf16, #tpu.memory_space<vmem>>, vector<1x6x64xbf16>
    %44 = vector.shape_cast %43 : vector<1x6x64xbf16> to vector<6x64xbf16>
    %c7_44 = arith.constant 7 : index
    %c0_45 = arith.constant 0 : index
    %c0_46 = arith.constant 0 : index
    %45 = vector.load %arg2[%c7_44, %c0_45, %c0_46] : memref<9x64x64xbf16, #tpu.memory_space<vmem>>, vector<1x64x64xbf16>
    %46 = vector.shape_cast %45 : vector<1x64x64xbf16> to vector<64x64xbf16>
    %cst_47 = arith.constant dense<0.000000e+00> : vector<6x64xf32>
    %47 = tpu.matmul %44, %46, %cst_47 {dimension_numbers = #tpu.dot_dimension_numbers<[1], [0], [0], [1], [0, 0, 1, 1], [], []>} : vector<6x64xbf16>, vector<64x64xbf16>, vector<6x64xf32> -> vector<6x64xf32>
    %48 = arith.addf %42, %47 : vector<6x64xf32>
    %c0_48 = arith.constant 0 : index
    %c8 = arith.constant 8 : index
    %c0_49 = arith.constant 0 : index
    %49 = vector.load %arg1[%c0_48, %c8, %c0_49] : memref<1x14x64xbf16, #tpu.memory_space<vmem>>, vector<1x6x64xbf16>
    %50 = vector.shape_cast %49 : vector<1x6x64xbf16> to vector<6x64xbf16>
    %c8_50 = arith.constant 8 : index
    %c0_51 = arith.constant 0 : index
    %c0_52 = arith.constant 0 : index
    %51 = vector.load %arg2[%c8_50, %c0_51, %c0_52] : memref<9x64x64xbf16, #tpu.memory_space<vmem>>, vector<1x64x64xbf16>
    %52 = vector.shape_cast %51 : vector<1x64x64xbf16> to vector<64x64xbf16>
    %cst_53 = arith.constant dense<0.000000e+00> : vector<6x64xf32>
    %53 = tpu.matmul %50, %52, %cst_53 {dimension_numbers = #tpu.dot_dimension_numbers<[1], [0], [0], [1], [0, 0, 1, 1], [], []>} : vector<6x64xbf16>, vector<64x64xbf16>, vector<6x64xf32> -> vector<6x64xf32>
    %54 = arith.addf %48, %53 : vector<6x64xf32>
    %c0_54 = arith.constant 0 : index
    %c0_55 = arith.constant 0 : index
    %55 = vector.load %arg3[%c0_54, %c0_55] : memref<1x64xf32, #tpu.memory_space<vmem>>, vector<1x64xf32>
    %56 = vector.broadcast %55 : vector<1x64xf32> to vector<6x64xf32>
    %57 = arith.addf %54, %56 : vector<6x64xf32>
    %cst_56 = arith.constant 0.000000e+00 : f32
    %58 = vector.broadcast %cst_56 : f32 to vector<6x64xf32>
    %59 = arith.maximumf %57, %58 : vector<6x64xf32>
    %60 = vector.shape_cast %59 : vector<6x64xf32> to vector<1x6x64xf32>
    %61 = arith.truncf %60 : vector<1x6x64xf32> to vector<1x6x64xbf16>
    %c0_57 = arith.constant 0 : index
    %c0_58 = arith.constant 0 : index
    %c0_59 = arith.constant 0 : index
    %62 = vector.load %arg4[%c0_57, %c0_58, %c0_59] : memref<1x6x64xbf16, #tpu.memory_space<vmem>>, vector<1x6x64xbf16>
    tpu.vector_store %arg4[%c0_57, %c0_58, %c0_59], %61 {strides = array<i32>} : memref<1x6x64xbf16, #tpu.memory_space<vmem>>, vector<1x6x64xbf16>,
    return
  }
  func.func @transform_0(%arg0: i32) -> (i32, i32, i32) {
    %c0_i32 = arith.constant 0 : i32
    %c0_i32_0 = arith.constant 0 : i32
    %c0_i32_1 = arith.constant 0 : i32
    return %arg0, %c0_i32, %c0_i32_0 : i32, i32, i32
  }
  func.func @transform_1(%arg0: i32) -> (i32, i32, i32) {
    %c0_i32 = arith.constant 0 : i32
    %c0_i32_0 = arith.constant 0 : i32
    %c0_i32_1 = arith.constant 0 : i32
    %c0_i32_2 = arith.constant 0 : i32
    return %c0_i32, %c0_i32_0, %c0_i32_1 : i32, i32, i32
  }
  func.func @transform_2(%arg0: i32) -> (i32, i32) {
    %c0_i32 = arith.constant 0 : i32
    %c0_i32_0 = arith.constant 0 : i32
    %c0_i32_1 = arith.constant 0 : i32
    return %c0_i32, %c0_i32_0 : i32, i32
  }
  func.func @transform_3(%arg0: i32) -> (i32, i32, i32) {
    %c0_i32 = arith.constant 0 : i32
    %c0_i32_0 = arith.constant 0 : i32
    %c0_i32_1 = arith.constant 0 : i32
    return %arg0, %c0_i32, %c0_i32_0 : i32, i32, i32
  }
}

module attributes {stable_mosaic.version = 11 : i64} {
  func.func @_maxpool3_kernel(%arg0: i32, %arg1: memref<12x3x64xbf16, #tpu.memory_space<vmem>>, %arg2: memref<12x64xbf16, #tpu.memory_space<vmem>>) attributes {dimension_semantics = [#tpu.dimension_semantics<parallel>], iteration_bounds = array<i64: 1>, scalar_prefetch = 0 : i64, scratch_operands = 0 : i64, tpu.core_type = #tpu.core_type<tc>, window_params = [{transform_indices = @transform_0, window_bounds = array<i64: 12, 3, 64>}, {transform_indices = @transform_1, window_bounds = array<i64: 12, 64>}]} {
    %c0 = arith.constant 0 : index
    %c0_0 = arith.constant 0 : index
    %c0_1 = arith.constant 0 : index
    %0 = vector.load %arg1[%c0, %c0_0, %c0_1] : memref<12x3x64xbf16, #tpu.memory_space<vmem>>, vector<12x1x64xbf16>
    %c0_2 = arith.constant 0 : index
    %c1 = arith.constant 1 : index
    %c0_3 = arith.constant 0 : index
    %1 = vector.load %arg1[%c0_2, %c1, %c0_3] : memref<12x3x64xbf16, #tpu.memory_space<vmem>>, vector<12x1x64xbf16>
    %2 = arith.maximumf %0, %1 : vector<12x1x64xbf16>
    %c0_4 = arith.constant 0 : index
    %c2 = arith.constant 2 : index
    %c0_5 = arith.constant 0 : index
    %3 = vector.load %arg1[%c0_4, %c2, %c0_5] : memref<12x3x64xbf16, #tpu.memory_space<vmem>>, vector<12x1x64xbf16>
    %4 = arith.maximumf %2, %3 : vector<12x1x64xbf16>
    %5 = vector.shape_cast %4 : vector<12x1x64xbf16> to vector<12x64xbf16>
    %c0_6 = arith.constant 0 : index
    %c0_7 = arith.constant 0 : index
    %6 = vector.load %arg2[%c0_6, %c0_7] : memref<12x64xbf16, #tpu.memory_space<vmem>>, vector<12x64xbf16>
    tpu.vector_store %arg2[%c0_6, %c0_7], %5 {strides = array<i32>} : memref<12x64xbf16, #tpu.memory_space<vmem>>, vector<12x64xbf16>,
    return
  }
  func.func @transform_0(%arg0: i32) -> (i32, i32, i32) {
    %c0_i32 = arith.constant 0 : i32
    %c0_i32_0 = arith.constant 0 : i32
    %c0_i32_1 = arith.constant 0 : i32
    return %arg0, %c0_i32, %c0_i32_0 : i32, i32, i32
  }
  func.func @transform_1(%arg0: i32) -> (i32, i32) {
    %c0_i32 = arith.constant 0 : i32
    %c0_i32_0 = arith.constant 0 : i32
    return %arg0, %c0_i32 : i32, i32
  }
}

module attributes {stable_mosaic.version = 11 : i64} {
  func.func @_matmul_bias_act_kernel(%arg0: i32, %arg1: memref<2x384xbf16, #tpu.memory_space<vmem>>, %arg2: memref<384x256xbf16, #tpu.memory_space<vmem>>, %arg3: memref<1x256xf32, #tpu.memory_space<vmem>>, %arg4: memref<2x256xbf16, #tpu.memory_space<vmem>>) attributes {dimension_semantics = [#tpu.dimension_semantics<parallel>], iteration_bounds = array<i64: 1>, scalar_prefetch = 0 : i64, scratch_operands = 0 : i64, tpu.core_type = #tpu.core_type<tc>, window_params = [{transform_indices = @transform_0, window_bounds = array<i64: 2, 384>}, {pipeline_mode = #tpu.pipeline_mode<synchronous>, transform_indices = @transform_1, window_bounds = array<i64: 384, 256>}, {pipeline_mode = #tpu.pipeline_mode<synchronous>, transform_indices = @transform_2, window_bounds = array<i64: 1, 256>}, {transform_indices = @transform_3, window_bounds = array<i64: 2, 256>}]} {
    %c0 = arith.constant 0 : index
    %c0_0 = arith.constant 0 : index
    %0 = vector.load %arg1[%c0, %c0_0] : memref<2x384xbf16, #tpu.memory_space<vmem>>, vector<2x384xbf16>
    %c0_1 = arith.constant 0 : index
    %c0_2 = arith.constant 0 : index
    %1 = vector.load %arg2[%c0_1, %c0_2] : memref<384x256xbf16, #tpu.memory_space<vmem>>, vector<384x256xbf16>
    %cst = arith.constant dense<0.000000e+00> : vector<2x256xf32>
    %2 = tpu.matmul %0, %1, %cst {dimension_numbers = #tpu.dot_dimension_numbers<[1], [0], [0], [1], [0, 0, 1, 1], [], []>} : vector<2x384xbf16>, vector<384x256xbf16>, vector<2x256xf32> -> vector<2x256xf32>
    %c0_3 = arith.constant 0 : index
    %c0_4 = arith.constant 0 : index
    %3 = vector.load %arg3[%c0_3, %c0_4] : memref<1x256xf32, #tpu.memory_space<vmem>>, vector<1x256xf32>
    %4 = vector.broadcast %3 : vector<1x256xf32> to vector<2x256xf32>
    %5 = arith.addf %2, %4 : vector<2x256xf32>
    %cst_5 = arith.constant 0.000000e+00 : f32
    %6 = vector.broadcast %cst_5 : f32 to vector<2x256xf32>
    %7 = arith.maximumf %5, %6 : vector<2x256xf32>
    %8 = arith.truncf %7 : vector<2x256xf32> to vector<2x256xbf16>
    %c0_6 = arith.constant 0 : index
    %c0_7 = arith.constant 0 : index
    %9 = vector.load %arg4[%c0_6, %c0_7] : memref<2x256xbf16, #tpu.memory_space<vmem>>, vector<2x256xbf16>
    tpu.vector_store %arg4[%c0_6, %c0_7], %8 {strides = array<i32>} : memref<2x256xbf16, #tpu.memory_space<vmem>>, vector<2x256xbf16>,
    return
  }
  func.func @transform_0(%arg0: i32) -> (i32, i32) {
    %c0_i32 = arith.constant 0 : i32
    %c0_i32_0 = arith.constant 0 : i32
    return %arg0, %c0_i32 : i32, i32
  }
  func.func @transform_1(%arg0: i32) -> (i32, i32) {
    %c0_i32 = arith.constant 0 : i32
    %c0_i32_0 = arith.constant 0 : i32
    %c0_i32_1 = arith.constant 0 : i32
    return %c0_i32, %c0_i32_0 : i32, i32
  }
  func.func @transform_2(%arg0: i32) -> (i32, i32) {
    %c0_i32 = arith.constant 0 : i32
    %c0_i32_0 = arith.constant 0 : i32
    %c0_i32_1 = arith.constant 0 : i32
    return %c0_i32, %c0_i32_0 : i32, i32
  }
  func.func @transform_3(%arg0: i32) -> (i32, i32) {
    %c0_i32 = arith.constant 0 : i32
    %c0_i32_0 = arith.constant 0 : i32
    return %arg0, %c0_i32 : i32, i32
  }
}

module attributes {stable_mosaic.version = 11 : i64} {
  func.func @_matmul_bias_act_kernel(%arg0: i32, %arg1: memref<2x256xbf16, #tpu.memory_space<vmem>>, %arg2: memref<256x128xbf16, #tpu.memory_space<vmem>>, %arg3: memref<1x128xf32, #tpu.memory_space<vmem>>, %arg4: memref<2x128xf32, #tpu.memory_space<vmem>>) attributes {dimension_semantics = [#tpu.dimension_semantics<parallel>], iteration_bounds = array<i64: 1>, scalar_prefetch = 0 : i64, scratch_operands = 0 : i64, tpu.core_type = #tpu.core_type<tc>, window_params = [{transform_indices = @transform_0, window_bounds = array<i64: 2, 256>}, {pipeline_mode = #tpu.pipeline_mode<synchronous>, transform_indices = @transform_1, window_bounds = array<i64: 256, 128>}, {pipeline_mode = #tpu.pipeline_mode<synchronous>, transform_indices = @transform_2, window_bounds = array<i64: 1, 128>}, {transform_indices = @transform_3, window_bounds = array<i64: 2, 128>}]} {
    %c0 = arith.constant 0 : index
    %c0_0 = arith.constant 0 : index
    %0 = vector.load %arg1[%c0, %c0_0] : memref<2x256xbf16, #tpu.memory_space<vmem>>, vector<2x256xbf16>
    %c0_1 = arith.constant 0 : index
    %c0_2 = arith.constant 0 : index
    %1 = vector.load %arg2[%c0_1, %c0_2] : memref<256x128xbf16, #tpu.memory_space<vmem>>, vector<256x128xbf16>
    %cst = arith.constant dense<0.000000e+00> : vector<2x128xf32>
    %2 = tpu.matmul %0, %1, %cst {dimension_numbers = #tpu.dot_dimension_numbers<[1], [0], [0], [1], [0, 0, 1, 1], [], []>} : vector<2x256xbf16>, vector<256x128xbf16>, vector<2x128xf32> -> vector<2x128xf32>
    %c0_3 = arith.constant 0 : index
    %c0_4 = arith.constant 0 : index
    %3 = vector.load %arg3[%c0_3, %c0_4] : memref<1x128xf32, #tpu.memory_space<vmem>>, vector<1x128xf32>
    %4 = vector.broadcast %3 : vector<1x128xf32> to vector<2x128xf32>
    %5 = arith.addf %2, %4 : vector<2x128xf32>
    %cst_5 = arith.constant 0.000000e+00 : f32
    %6 = vector.broadcast %cst_5 : f32 to vector<2x128xf32>
    %7 = arith.maximumf %5, %6 : vector<2x128xf32>
    %c0_6 = arith.constant 0 : index
    %c0_7 = arith.constant 0 : index
    %8 = vector.load %arg4[%c0_6, %c0_7] : memref<2x128xf32, #tpu.memory_space<vmem>>, vector<2x128xf32>
    tpu.vector_store %arg4[%c0_6, %c0_7], %7 {strides = array<i32>} : memref<2x128xf32, #tpu.memory_space<vmem>>, vector<2x128xf32>,
    return
  }
  func.func @transform_0(%arg0: i32) -> (i32, i32) {
    %c0_i32 = arith.constant 0 : i32
    %c0_i32_0 = arith.constant 0 : i32
    return %arg0, %c0_i32 : i32, i32
  }
  func.func @transform_1(%arg0: i32) -> (i32, i32) {
    %c0_i32 = arith.constant 0 : i32
    %c0_i32_0 = arith.constant 0 : i32
    %c0_i32_1 = arith.constant 0 : i32
    return %c0_i32, %c0_i32_0 : i32, i32
  }
  func.func @transform_2(%arg0: i32) -> (i32, i32) {
    %c0_i32 = arith.constant 0 : i32
    %c0_i32_0 = arith.constant 0 : i32
    %c0_i32_1 = arith.constant 0 : i32
    return %c0_i32, %c0_i32_0 : i32, i32
  }
  func.func @transform_3(%arg0: i32) -> (i32, i32) {
    %c0_i32 = arith.constant 0 : i32
    %c0_i32_0 = arith.constant 0 : i32
    return %arg0, %c0_i32 : i32, i32
  }
}

</mosaic_0001>

<bundles_post_ra>
// kernel: forward.11
= control target key start
LH: loop header
LB: loop body
LE: loop exit
PB: predicated region body
PF: predicated region fallthrough
CT: control target
= control target key end

     0   :  { %vm250_vm0 = vcmask 1041408   ;;  %v981_v0 = vmov 0.0   ;;  %vm982_vm1 = vmmov 0   ;;  %vm186_vm2 = vcmask 293888   ;;  %s1353_s1 = inlined_call_operand.vmem [shape: bf16[36,64], index: 1, kind: input, shape index: {}]   ;;  %s1354_s0 = inlined_call_operand.vmem [shape: bf16[324,36], index: 0, kind: input, shape index: {}]   ;;  %s1355_s2 = inlined_call_operand.vmem [shape: f32[1,64], index: 2, kind: input, shape index: {}]   ;;  %s1356_s3 = inlined_call_operand.vmem [shape: bf16[324,64], index: 3, kind: output, shape index: {}]  }
   0x1   :  { %859 = vmatprep.subr.bf16.mxu0 %v981_v0  ;;  %v957_v1 = vld [vmem:[%s1353_s1 + $0x10] ss:$0 sps:$4 sm:$0x33]   ;;  %949 = vmatprep.subr.bf16.mxu1 %v981_v0  ;;  %v958_v3 = vld [vmem:[%s1353_s1 + $0x8] sm:$0xff]   ;;  %v959_v4 = vld [vmem:[%s1353_s1] sm:$0xff]   ;;  %vm660_vm3 = vcmask 519168  }
   0x2   :  { %865 = vmatprep.mubr.msk.bf16.mxu0 %vm982_vm1, %v981_v0  ;;  %909 = vmatprep.mubr.msk.bf16.mxu1 %vm982_vm1, %v981_v0  ;;  %v252_v2 = vsel %vm250_vm0, %v957_v1, 0  ;;  %v960_v5 = vld [vmem:[%s1354_s0] sm:$0xff]   ;;  %v961_v6 = vld [vmem:[%s1354_s0 + $0x58] sm:$0xff]   ;;  %v962_v7 = vld [vmem:[%s1354_s0 + $0x8] sm:$0xff]   ;;  %vm701_vm4 = vcmask 517120  }
   0x3   :  { %860 = vmatpush3.bf16.msra.mxu0 %v252_v2  ;;  %952 = vmatpush3.bf16.msra.mxu1 %v252_v2  ;;  %v963_v8 = vld [vmem:[%s1354_s0 + $0x60] sm:$0xff]   ;;  %v964_v9 = vld [vmem:[%s1354_s0 + $0x10] sm:$0xff]   ;;  %v965_v10 = vld [vmem:[%s1354_s0 + $0x68] sm:$0xff]  }
   0x4   :  { %861 = vmatprep.subr.bf16.mxu0 %v981_v0  ;;  %950 = vmatprep.subr.bf16.mxu1 %v981_v0  ;;  %v966_v11 = vld [vmem:[%s1354_s0 + $0x18] sm:$0xff]   ;;  %v967_v12 = vld [vmem:[%s1354_s0 + $0x70] sm:$0xff]   ;;  %v968_v13 = vld [vmem:[%s1354_s0 + $0x20] sm:$0xff]  }
   0x5   :  { %v969_v14 = vld [vmem:[%s1354_s0 + $0x78] sm:$0xff]   ;;  %v970_v15 = vld [vmem:[%s1354_s0 + $0x28] sm:$0xff]   ;;  %v971_v16 = vld [vmem:[%s1354_s0 + $0x80] sm:$0xff]  }
   0x6   :  { %v972_v17 = vld [vmem:[%s1354_s0 + $0x30] sm:$0xff]   ;;  %v973_v18 = vld [vmem:[%s1354_s0 + $0x88] sm:$0xff]   ;;  %v974_v19 = vld [vmem:[%s1354_s0 + $0x38] sm:$0xff]  }
   0x7   :  { %862 = vmatpush3.bf16.msra.mxu0 %v958_v3  ;;  %953 = vmatpush3.bf16.msra.mxu1 %v958_v3  ;;  %v975_v20 = vld [vmem:[%s1354_s0 + $0x90] sm:$0xff]   ;;  %v976_v21 = vld [vmem:[%s1354_s0 + $0x40] sm:$0xff]   ;;  %v977_v22 = vld [vmem:[%s1354_s0 + $0x98] sm:$0xff]  }
   0x8   :  { %863 = vmatprep.subr.bf16.mxu0 %v981_v0  ;;  %951 = vmatprep.subr.bf16.mxu1 %v981_v0  ;;  %v978_v23 = vld [vmem:[%s1354_s0 + $0x48] sm:$0xff]   ;;  %v979_v24 = vld [vmem:[%s1354_s0 + $0xa0] ss:$0 sps:$4 sm:$0x33]   ;;  %v980_v25 = vld [vmem:[%s1354_s0 + $0x50] sm:$0xff]  }
   0x9   :  { %v1147_v26 = vld [vmem:[%s1355_s2] ss:$0 sm:$0xff] }
   0xb   :  { %864 = vmatpush3.bf16.msra.mxu0 %v959_v4  ;;  %954 = vmatpush3.bf16.msra.mxu1 %v959_v4 }
   0xe   :  { %866 = vmatmul.mubr.msk.bf16.vlgmr.msra.gmra.mxu0 %vm186_vm2, %v960_v5  ;;  %910 = vmatmul.mubr.msk.bf16.vlgmr.msra.gmra.mxu1 %vm186_vm2, %v961_v6 }
   0xf   :  { %869 = vmatprep.mubr.msk.bf16.mxu0 %vm982_vm1, %v981_v0  ;;  %913 = vmatprep.mubr.msk.bf16.mxu1 %vm982_vm1, %v981_v0 }
  0x16   :  { %870 = vmatmul.mubr.msk.bf16.gmra.mxu0 %vm186_vm2, %v962_v7  ;;  %914 = vmatmul.mubr.msk.bf16.gmra.mxu1 %vm186_vm2, %v963_v8 }
  0x17   :  { %873 = vmatprep.mubr.msk.bf16.mxu0 %vm982_vm1, %v981_v0  ;;  %917 = vmatprep.mubr.msk.bf16.mxu1 %vm982_vm1, %v981_v0 }
  0x1e   :  { %874 = vmatmul.mubr.msk.bf16.gmra.mxu0 %vm186_vm2, %v964_v9  ;;  %918 = vmatmul.mubr.msk.bf16.gmra.mxu1 %vm186_vm2, %v965_v10 }
  0x1f   :  { %877 = vmatprep.mubr.msk.bf16.mxu0 %vm982_vm1, %v981_v0  ;;  %921 = vmatprep.mubr.msk.bf16.mxu1 %vm982_vm1, %v981_v0 }
  0x26   :  { %878 = vmatmul.mubr.msk.bf16.gmra.mxu0 %vm186_vm2, %v966_v11  ;;  %922 = vmatmul.mubr.msk.bf16.gmra.mxu1 %vm186_vm2, %v967_v12 }
  0x27   :  { %881 = vmatprep.mubr.msk.bf16.mxu0 %vm982_vm1, %v981_v0  ;;  %925 = vmatprep.mubr.msk.bf16.mxu1 %vm982_vm1, %v981_v0 }
  0x2e   :  { %882 = vmatmul.mubr.msk.bf16.gmra.mxu0 %vm186_vm2, %v968_v13  ;;  %926 = vmatmul.mubr.msk.bf16.gmra.mxu1 %vm186_vm2, %v969_v14 }
  0x2f   :  { %885 = vmatprep.mubr.msk.bf16.mxu0 %vm982_vm1, %v981_v0  ;;  %929 = vmatprep.mubr.msk.bf16.mxu1 %vm982_vm1, %v981_v0 }
  0x36   :  { %886 = vmatmul.mubr.msk.bf16.gmra.mxu0 %vm186_vm2, %v970_v15  ;;  %930 = vmatmul.mubr.msk.bf16.gmra.mxu1 %vm186_vm2, %v971_v16 }
  0x37   :  { %889 = vmatprep.mubr.msk.bf16.mxu0 %vm982_vm1, %v981_v0  ;;  %933 = vmatprep.mubr.msk.bf16.mxu1 %vm982_vm1, %v981_v0 }
  0x3e   :  { %890 = vmatmul.mubr.msk.bf16.gmra.mxu0 %vm186_vm2, %v972_v17  ;;  %934 = vmatmul.mubr.msk.bf16.gmra.mxu1 %vm186_vm2, %v973_v18 }
  0x3f   :  { %893 = vmatprep.mubr.msk.bf16.mxu0 %vm982_vm1, %v981_v0  ;;  %937 = vmatprep.mubr.msk.bf16.mxu1 %vm982_vm1, %v981_v0 }
  0x46   :  { %894 = vmatmul.mubr.msk.bf16.gmra.mxu0 %vm186_vm2, %v974_v19  ;;  %938 = vmatmul.mubr.msk.bf16.gmra.mxu1 %vm186_vm2, %v975_v20 }
  0x47   :  { %897 = vmatprep.mubr.msk.bf16.mxu0 %vm982_vm1, %v981_v0  ;;  %941 = vmatprep.mubr.msk.bf16.mxu1 %vm982_vm1, %v981_v0 }
  0x4e   :  { %898 = vmatmul.mubr.msk.bf16.gmra.mxu0 %vm186_vm2, %v976_v21  ;;  %942 = vmatmul.mubr.msk.bf16.gmra.mxu1 %vm186_vm2, %v977_v22 }
  0x4f   :  { %901 = vmatprep.mubr.msk.bf16.mxu0 %vm982_vm1, %v981_v0  ;;  %945 = vmatprep.mubr.msk.bf16.mxu1 %vm982_vm1, %v981_v0 }
  0x56   :  { %902 = vmatmul.mubr.msk.bf16.gmra.mxu0 %vm186_vm2, %v978_v23  ;;  %946 = vmatmul.mubr.msk.bf16.gmra.mxu1 %vm186_vm2, %v979_v24 }
  0x57   :  { %905 = vmatprep.mubr.msk.bf16.mxu0 %vm982_vm1, %v981_v0 }
  0x5e   :  { %906 = vmatmul.mubr.msk.bf16.gmra.mxu0 %vm186_vm2, %v980_v25 }
  0xce   :  { %v288_v27 = vpop.f32.mrf.mxu0  ;;  %v376_v28 = vpop.f32.mrf.mxu1 }
  0xcf   :  { %v289_v29 = vadd.f32 %v1147_v26, %v288_v27  ;;  %v377_v30 = vadd.f32 %v1147_v26, %v376_v28 }
  0xd0   :  { %v867_v31 = vpop.f32.mrf.mxu0  ;;  %v911_v32 = vpop.f32.mrf.mxu1 }
  0xd1   :  { %v454_v33 = vmax.f32 %v289_v29, 0.0  ;;  %v476_v34 = vmax.f32 %v377_v30, 0.0 }
  0xd2   :  { %v291_v35 = vpop.f32.mrf.mxu0  ;;  %v379_v36 = vpop.f32.mrf.mxu1 }
  0xd3   :  { %v794_v37 = vpack.c.bf16 %v454_v33, %v454_v33  ;;  %v292_v38 = vadd.f32 %v1147_v26, %v291_v35  ;;  %v816_v39 = vpack.c.bf16 %v476_v34, %v476_v34  ;;  %v380_v40 = vadd.f32 %v1147_v26, %v379_v36 }
  0xd4   :  { %v868_v41 = vpop.f32.mrf.mxu0  ;;  %v912_v42 = vpop.f32.mrf.mxu1 }
  0xd5   :  { %661 = vst.msk [vmem:[%s1356_s3] sm:$0xf] %vm660_vm3, %v794_v37  ;;  %v455_v43 = vmax.f32 %v292_v38, 0.0  ;;  %683 = vst.msk [vmem:[%s1356_s3 + $0x58] sm:$0xf] %vm660_vm3, %v816_v39  ;;  %v477_v44 = vmax.f32 %v380_v40, 0.0 }
  0xd6   :  { %v296_v45 = vpop.f32.mrf.mxu0  ;;  %v384_v46 = vpop.f32.mrf.mxu1 }
  0xd7   :  { %v795_v47 = vpack.c.bf16 %v455_v43, %v455_v43  ;;  %v297_v48 = vadd.f32 %v1147_v26, %v296_v45  ;;  %v817_v49 = vpack.c.bf16 %v477_v44, %v477_v44  ;;  %v385_v50 = vadd.f32 %v1147_v26, %v384_v46 }
  0xd8   :  { %v871_v51 = vpop.f32.mrf.mxu0  ;;  %v915_v52 = vpop.f32.mrf.mxu1 }
  0xd9   :  { %662 = vst.msk [vmem:[%s1356_s3 + $0x4] sm:$0xf] %vm660_vm3, %v795_v47  ;;  %v456_v53 = vmax.f32 %v297_v48, 0.0  ;;  %684 = vst.msk [vmem:[%s1356_s3 + $0x5c] sm:$0xf] %vm660_vm3, %v817_v49  ;;  %v478_v54 = vmax.f32 %v385_v50, 0.0 }
  0xda   :  { %v299_v55 = vpop.f32.mrf.mxu0  ;;  %v387_v56 = vpop.f32.mrf.mxu1 }
  0xdb   :  { %v796_v57 = vpack.c.bf16 %v456_v53, %v456_v53  ;;  %v300_v58 = vadd.f32 %v1147_v26, %v299_v55  ;;  %v818_v59 = vpack.c.bf16 %v478_v54, %v478_v54  ;;  %v388_v60 = vadd.f32 %v1147_v26, %v387_v56 }
  0xdc   :  { %v872_v61 = vpop.f32.mrf.mxu0  ;;  %v916_v62 = vpop.f32.mrf.mxu1 }
  0xdd   :  { %663 = vst.msk [vmem:[%s1356_s3 + $0x8] sm:$0xf] %vm660_vm3, %v796_v57  ;;  %v457_v63 = vmax.f32 %v300_v58, 0.0  ;;  %685 = vst.msk [vmem:[%s1356_s3 + $0x60] sm:$0xf] %vm660_vm3, %v818_v59  ;;  %v479_v0 = vmax.f32 %v388_v60, 0.0 }
  0xde   :  { %v304_v1 = vpop.f32.mrf.mxu0  ;;  %v392_v2 = vpop.f32.mrf.mxu1 }
  0xdf   :  { %v797_v3 = vpack.c.bf16 %v457_v63, %v457_v63  ;;  %v305_v4 = vadd.f32 %v1147_v26, %v304_v1  ;;  %v819_v5 = vpack.c.bf16 %v479_v0, %v479_v0  ;;  %v393_v6 = vadd.f32 %v1147_v26, %v392_v2 }
  0xe0   :  { %v875_v7 = vpop.f32.mrf.mxu0  ;;  %v919_v8 = vpop.f32.mrf.mxu1 }
  0xe1   :  { %664 = vst.msk [vmem:[%s1356_s3 + $0xc] sm:$0xf] %vm660_vm3, %v797_v3  ;;  %v458_v9 = vmax.f32 %v305_v4, 0.0  ;;  %686 = vst.msk [vmem:[%s1356_s3 + $0x64] sm:$0xf] %vm660_vm3, %v819_v5  ;;  %v480_v10 = vmax.f32 %v393_v6, 0.0 }
  0xe2   :  { %v307_v11 = vpop.f32.mrf.mxu0  ;;  %v395_v12 = vpop.f32.mrf.mxu1 }
  0xe3   :  { %v798_v13 = vpack.c.bf16 %v458_v9, %v458_v9  ;;  %v308_v14 = vadd.f32 %v1147_v26, %v307_v11  ;;  %v820_v15 = vpack.c.bf16 %v480_v10, %v480_v10  ;;  %v396_v16 = vadd.f32 %v1147_v26, %v395_v12 }
  0xe4   :  { %v876_v17 = vpop.f32.mrf.mxu0  ;;  %v920_v18 = vpop.f32.mrf.mxu1 }
  0xe5   :  { %665 = vst.msk [vmem:[%s1356_s3 + $0x10] sm:$0xf] %vm660_vm3, %v798_v13  ;;  %v459_v19 = vmax.f32 %v308_v14, 0.0  ;;  %687 = vst.msk [vmem:[%s1356_s3 + $0x68] sm:$0xf] %vm660_vm3, %v820_v15  ;;  %v481_v20 = vmax.f32 %v396_v16, 0.0 }
  0xe6   :  { %v312_v21 = vpop.f32.mrf.mxu0  ;;  %v400_v22 = vpop.f32.mrf.mxu1 }
  0xe7   :  { %v799_v23 = vpack.c.bf16 %v459_v19, %v459_v19  ;;  %v313_v24 = vadd.f32 %v1147_v26, %v312_v21  ;;  %v821_v25 = vpack.c.bf16 %v481_v20, %v481_v20  ;;  %v401_v27 = vadd.f32 %v1147_v26, %v400_v22 }
  0xe8   :  { %v879_v28 = vpop.f32.mrf.mxu0  ;;  %v923_v29 = vpop.f32.mrf.mxu1 }
  0xe9   :  { %666 = vst.msk [vmem:[%s1356_s3 + $0x14] sm:$0xf] %vm660_vm3, %v799_v23  ;;  %v460_v30 = vmax.f32 %v313_v24, 0.0  ;;  %688 = vst.msk [vmem:[%s1356_s3 + $0x6c] sm:$0xf] %vm660_vm3, %v821_v25  ;;  %v482_v31 = vmax.f32 %v401_v27, 0.0 }
  0xea   :  { %v315_v32 = vpop.f32.mrf.mxu0  ;;  %v403_v33 = vpop.f32.mrf.mxu1 }
  0xeb   :  { %v800_v34 = vpack.c.bf16 %v460_v30, %v460_v30  ;;  %v316_v35 = vadd.f32 %v1147_v26, %v315_v32  ;;  %v822_v36 = vpack.c.bf16 %v482_v31, %v482_v31  ;;  %v404_v37 = vadd.f32 %v1147_v26, %v403_v33 }
  0xec   :  { %v880_v38 = vpop.f32.mrf.mxu0  ;;  %v924_v39 = vpop.f32.mrf.mxu1 }
  0xed   :  { %667 = vst.msk [vmem:[%s1356_s3 + $0x18] sm:$0xf] %vm660_vm3, %v800_v34  ;;  %v461_v40 = vmax.f32 %v316_v35, 0.0  ;;  %689 = vst.msk [vmem:[%s1356_s3 + $0x70] sm:$0xf] %vm660_vm3, %v822_v36  ;;  %v483_v41 = vmax.f32 %v404_v37, 0.0 }
  0xee   :  { %v320_v42 = vpop.f32.mrf.mxu0  ;;  %v408_v43 = vpop.f32.mrf.mxu1 }
  0xef   :  { %v801_v44 = vpack.c.bf16 %v461_v40, %v461_v40  ;;  %v321_v45 = vadd.f32 %v1147_v26, %v320_v42  ;;  %v823_v46 = vpack.c.bf16 %v483_v41, %v483_v41  ;;  %v409_v47 = vadd.f32 %v1147_v26, %v408_v43 }
  0xf0   :  { %v883_v48 = vpop.f32.mrf.mxu0  ;;  %v927_v49 = vpop.f32.mrf.mxu1 }
  0xf1   :  { %668 = vst.msk [vmem:[%s1356_s3 + $0x1c] sm:$0xf] %vm660_vm3, %v801_v44  ;;  %v462_v50 = vmax.f32 %v321_v45, 0.0  ;;  %690 = vst.msk [vmem:[%s1356_s3 + $0x74] sm:$0xf] %vm660_vm3, %v823_v46  ;;  %v484_v51 = vmax.f32 %v409_v47, 0.0 }
  0xf2   :  { %v323_v52 = vpop.f32.mrf.mxu0  ;;  %v411_v53 = vpop.f32.mrf.mxu1 }
  0xf3   :  { %v802_v54 = vpack.c.bf16 %v462_v50, %v462_v50  ;;  %v324_v55 = vadd.f32 %v1147_v26, %v323_v52  ;;  %v824_v56 = vpack.c.bf16 %v484_v51, %v484_v51  ;;  %v412_v57 = vadd.f32 %v1147_v26, %v411_v53 }
  0xf4   :  { %v884_v58 = vpop.f32.mrf.mxu0  ;;  %v928_v59 = vpop.f32.mrf.mxu1 }
  0xf5   :  { %669 = vst.msk [vmem:[%s1356_s3 + $0x20] sm:$0xf] %vm660_vm3, %v802_v54  ;;  %v463_v60 = vmax.f32 %v324_v55, 0.0  ;;  %691 = vst.msk [vmem:[%s1356_s3 + $0x78] sm:$0xf] %vm660_vm3, %v824_v56  ;;  %v485_v61 = vmax.f32 %v412_v57, 0.0 }
  0xf6   :  { %v328_v62 = vpop.f32.mrf.mxu0  ;;  %v416_v63 = vpop.f32.mrf.mxu1 }
  0xf7   :  { %v803_v0 = vpack.c.bf16 %v463_v60, %v463_v60  ;;  %v329_v1 = vadd.f32 %v1147_v26, %v328_v62  ;;  %v825_v2 = vpack.c.bf16 %v485_v61, %v485_v61  ;;  %v417_v3 = vadd.f32 %v1147_v26, %v416_v63 }
  0xf8   :  { %v887_v4 = vpop.f32.mrf.mxu0  ;;  %v931_v5 = vpop.f32.mrf.mxu1 }
  0xf9   :  { %670 = vst.msk [vmem:[%s1356_s3 + $0x24] sm:$0xf] %vm660_vm3, %v803_v0  ;;  %v464_v6 = vmax.f32 %v329_v1, 0.0  ;;  %692 = vst.msk [vmem:[%s1356_s3 + $0x7c] sm:$0xf] %vm660_vm3, %v825_v2  ;;  %v486_v7 = vmax.f32 %v417_v3, 0.0 }
  0xfa   :  { %v331_v8 = vpop.f32.mrf.mxu0  ;;  %v419_v9 = vpop.f32.mrf.mxu1 }
  0xfb   :  { %v804_v10 = vpack.c.bf16 %v464_v6, %v464_v6  ;;  %v332_v11 = vadd.f32 %v1147_v26, %v331_v8  ;;  %v826_v12 = vpack.c.bf16 %v486_v7, %v486_v7  ;;  %v420_v13 = vadd.f32 %v1147_v26, %v419_v9 }
  0xfc   :  { %v888_v14 = vpop.f32.mrf.mxu0  ;;  %v932_v15 = vpop.f32.mrf.mxu1 }
  0xfd   :  { %671 = vst.msk [vmem:[%s1356_s3 + $0x28] sm:$0xf] %vm660_vm3, %v804_v10  ;;  %v465_v16 = vmax.f32 %v332_v11, 0.0  ;;  %693 = vst.msk [vmem:[%s1356_s3 + $0x80] sm:$0xf] %vm660_vm3, %v826_v12  ;;  %v487_v17 = vmax.f32 %v420_v13, 0.0 }
  0xfe   :  { %v336_v18 = vpop.f32.mrf.mxu0  ;;  %v424_v19 = vpop.f32.mrf.mxu1 }
  0xff   :  { %v805_v20 = vpack.c.bf16 %v465_v16, %v465_v16  ;;  %v337_v21 = vadd.f32 %v1147_v26, %v336_v18  ;;  %v827_v22 = vpack.c.bf16 %v487_v17, %v487_v17  ;;  %v425_v23 = vadd.f32 %v1147_v26, %v424_v19 }
 0x100   :  { %v891_v24 = vpop.f32.mrf.mxu0  ;;  %v935_v25 = vpop.f32.mrf.mxu1 }
 0x101   :  { %672 = vst.msk [vmem:[%s1356_s3 + $0x2c] sm:$0xf] %vm660_vm3, %v805_v20  ;;  %v466_v27 = vmax.f32 %v337_v21, 0.0  ;;  %694 = vst.msk [vmem:[%s1356_s3 + $0x84] sm:$0xf] %vm660_vm3, %v827_v22  ;;  %v488_v28 = vmax.f32 %v425_v23, 0.0 }
 0x102   :  { %v339_v29 = vpop.f32.mrf.mxu0  ;;  %v427_v30 = vpop.f32.mrf.mxu1 }
 0x103   :  { %v806_v31 = vpack.c.bf16 %v466_v27, %v466_v27  ;;  %v340_v32 = vadd.f32 %v1147_v26, %v339_v29  ;;  %v828_v33 = vpack.c.bf16 %v488_v28, %v488_v28  ;;  %v428_v34 = vadd.f32 %v1147_v26, %v427_v30 }
 0x104   :  { %v892_v35 = vpop.f32.mrf.mxu0  ;;  %v936_v36 = vpop.f32.mrf.mxu1 }
 0x105   :  { %673 = vst.msk [vmem:[%s1356_s3 + $0x30] sm:$0xf] %vm660_vm3, %v806_v31  ;;  %v467_v37 = vmax.f32 %v340_v32, 0.0  ;;  %695 = vst.msk [vmem:[%s1356_s3 + $0x88] sm:$0xf] %vm660_vm3, %v828_v33  ;;  %v489_v38 = vmax.f32 %v428_v34, 0.0 }
 0x106   :  { %v344_v39 = vpop.f32.mrf.mxu0  ;;  %v432_v40 = vpop.f32.mrf.mxu1 }
 0x107   :  { %v807_v41 = vpack.c.bf16 %v467_v37, %v467_v37  ;;  %v345_v42 = vadd.f32 %v1147_v26, %v344_v39  ;;  %v829_v43 = vpack.c.bf16 %v489_v38, %v489_v38  ;;  %v433_v44 = vadd.f32 %v1147_v26, %v432_v40 }
 0x108   :  { %v895_v45 = vpop.f32.mrf.mxu0  ;;  %v939_v46 = vpop.f32.mrf.mxu1 }
 0x109   :  { %674 = vst.msk [vmem:[%s1356_s3 + $0x34] sm:$0xf] %vm660_vm3, %v807_v41  ;;  %v468_v47 = vmax.f32 %v345_v42, 0.0  ;;  %696 = vst.msk [vmem:[%s1356_s3 + $0x8c] sm:$0xf] %vm660_vm3, %v829_v43  ;;  %v490_v48 = vmax.f32 %v433_v44, 0.0 }
 0x10a   :  { %v347_v49 = vpop.f32.mrf.mxu0  ;;  %v435_v50 = vpop.f32.mrf.mxu1 }
 0x10b   :  { %v808_v51 = vpack.c.bf16 %v468_v47, %v468_v47  ;;  %v348_v52 = vadd.f32 %v1147_v26, %v347_v49  ;;  %v830_v53 = vpack.c.bf16 %v490_v48, %v490_v48  ;;  %v436_v54 = vadd.f32 %v1147_v26, %v435_v50 }
 0x10c   :  { %v896_v55 = vpop.f32.mrf.mxu0  ;;  %v940_v56 = vpop.f32.mrf.mxu1 }
 0x10d   :  { %675 = vst.msk [vmem:[%s1356_s3 + $0x38] sm:$0xf] %vm660_vm3, %v808_v51  ;;  %v469_v57 = vmax.f32 %v348_v52, 0.0  ;;  %697 = vst.msk [vmem:[%s1356_s3 + $0x90] sm:$0xf] %vm660_vm3, %v830_v53  ;;  %v491_v58 = vmax.f32 %v436_v54, 0.0 }
 0x10e   :  { %v352_v59 = vpop.f32.mrf.mxu0  ;;  %v440_v60 = vpop.f32.mrf.mxu1 }
 0x10f   :  { %v809_v61 = vpack.c.bf16 %v469_v57, %v469_v57  ;;  %v353_v62 = vadd.f32 %v1147_v26, %v352_v59  ;;  %v831_v63 = vpack.c.bf16 %v491_v58, %v491_v58  ;;  %v441_v0 = vadd.f32 %v1147_v26, %v440_v60 }
 0x110   :  { %v899_v1 = vpop.f32.mrf.mxu0  ;;  %v943_v2 = vpop.f32.mrf.mxu1 }
 0x111   :  { %676 = vst.msk [vmem:[%s1356_s3 + $0x3c] sm:$0xf] %vm660_vm3, %v809_v61  ;;  %v470_v3 = vmax.f32 %v353_v62, 0.0  ;;  %698 = vst.msk [vmem:[%s1356_s3 + $0x94] sm:$0xf] %vm660_vm3, %v831_v63  ;;  %v492_v4 = vmax.f32 %v441_v0, 0.0 }
 0x112   :  { %v355_v5 = vpop.f32.mrf.mxu0  ;;  %v443_v6 = vpop.f32.mrf.mxu1 }
 0x113   :  { %v810_v7 = vpack.c.bf16 %v470_v3, %v470_v3  ;;  %v356_v8 = vadd.f32 %v1147_v26, %v355_v5  ;;  %v832_v9 = vpack.c.bf16 %v492_v4, %v492_v4  ;;  %v444_v10 = vadd.f32 %v1147_v26, %v443_v6 }
 0x114   :  { %v900_v11 = vpop.f32.mrf.mxu0  ;;  %v944_v12 = vpop.f32.mrf.mxu1 }
 0x115   :  { %677 = vst.msk [vmem:[%s1356_s3 + $0x40] sm:$0xf] %vm660_vm3, %v810_v7  ;;  %v471_v13 = vmax.f32 %v356_v8, 0.0  ;;  %699 = vst.msk [vmem:[%s1356_s3 + $0x98] sm:$0xf] %vm660_vm3, %v832_v9  ;;  %v493_v14 = vmax.f32 %v444_v10, 0.0 }
 0x116   :  { %v360_v15 = vpop.f32.mrf.mxu0  ;;  %v448_v16 = vpop.f32.mrf.mxu1 }
 0x117   :  { %v811_v17 = vpack.c.bf16 %v471_v13, %v471_v13  ;;  %v361_v18 = vadd.f32 %v1147_v26, %v360_v15  ;;  %v833_v19 = vpack.c.bf16 %v493_v14, %v493_v14  ;;  %v449_v20 = vadd.f32 %v1147_v26, %v448_v16 }
 0x118   :  { %v903_v21 = vpop.f32.mrf.mxu0  ;;  %v947_v22 = vpop.f32.mrf.mxu1 }
 0x119   :  { %678 = vst.msk [vmem:[%s1356_s3 + $0x44] sm:$0xf] %vm660_vm3, %v811_v17  ;;  %v472_v23 = vmax.f32 %v361_v18, 0.0  ;;  %700 = vst.msk [vmem:[%s1356_s3 + $0x9c] sm:$0xf] %vm660_vm3, %v833_v19  ;;  %v494_v24 = vmax.f32 %v449_v20, 0.0 }
 0x11a   :  { %v363_v25 = vpop.f32.mrf.mxu0  ;;  %v451_v27 = vpop.f32.mrf.mxu1 }
 0x11b   :  { %v812_v28 = vpack.c.bf16 %v472_v23, %v472_v23  ;;  %v364_v29 = vadd.f32 %v1147_v26, %v363_v25  ;;  %v834_v30 = vpack.c.bf16 %v494_v24, %v494_v24 }
 0x11c   :  { %v904_v31 = vpop.f32.mrf.mxu0  ;;  %v948_v32 = vpop.f32.mrf.mxu1 }
 0x11d   :  { %679 = vst.msk [vmem:[%s1356_s3 + $0x48] sm:$0xf] %vm660_vm3, %v812_v28  ;;  %v473_v33 = vmax.f32 %v364_v29, 0.0 }
 0x11e   :  { %702 = vst.msk [vmem:[%s1356_s3 + $0xa0] sm:$0x3] %vm701_vm4, %v834_v30  ;;  %v368_v34 = vpop.f32.mrf.mxu0 }
 0x11f   :  { %v813_v35 = vpack.c.bf16 %v473_v33, %v473_v33  ;;  %v369_v36 = vadd.f32 %v1147_v26, %v368_v34 }
 0x120   :  { %v907_v37 = vpop.f32.mrf.mxu0 }
 0x121   :  { %680 = vst.msk [vmem:[%s1356_s3 + $0x4c] sm:$0xf] %vm660_vm3, %v813_v35  ;;  %v474_v38 = vmax.f32 %v369_v36, 0.0 }
 0x122   :  { %v371_v39 = vpop.f32.mrf.mxu0 }
 0x123   :  { %v814_v40 = vpack.c.bf16 %v474_v38, %v474_v38  ;;  %v372_v41 = vadd.f32 %v1147_v26, %v371_v39 }
 0x124   :  { %v908_v42 = vpop.f32.mrf.mxu0 }
 0x125   :  { %681 = vst.msk [vmem:[%s1356_s3 + $0x50] sm:$0xf] %vm660_vm3, %v814_v40  ;;  %v475_v43 = vmax.f32 %v372_v41, 0.0 }
 0x127   :  { %v815_v44 = vpack.c.bf16 %v475_v43, %v475_v43 }
 0x129   :  { %682 = vst.msk [vmem:[%s1356_s3 + $0x54] sm:$0xf] %vm660_vm3, %v815_v44 }

// kernel: forward.12
= control target key start
LH: loop header
LB: loop body
LE: loop exit
PB: predicated region body
PF: predicated region fallthrough
CT: control target
= control target key end

     0   :  { %s2033_s12 = smov 0   ;;  %s2348_s0 = inlined_call_operand.vmem [shape: bf16[6,62,64], index: 0, kind: input, shape index: {}]   ;;  %s2349_s1 = inlined_call_operand.vmem [shape: bf16[9,64,64], index: 1, kind: input, shape index: {}]   ;;  %s2350_s2 = inlined_call_operand.vmem [shape: f32[1,64], index: 2, kind: input, shape index: {}]   ;;  %s2351_s3 = inlined_call_operand.vmem [shape: bf16[6,54,64], index: 3, kind: output, shape index: {}]  }
   0x1 LB: > { %s1538_s13 = sadd.s32 4294967295, %s2011_s12   ;;  %p1542_p0 = scmp.ge.s32.totalorder %s2011_s12, 1  ;;  %s2011_s12 = sphi %s2033_s12, %s13_s12  }
   0x2   : > { %p137_p1 = scmp.lt.s32.totalorder %s2011_s12, 7 }
   0x4   : > { %p138_p2 = pnand %p1542_p0, %p137_p1 }
   0x5   : > { %p161_p3 = scmp.lt.s32.totalorder (!%p138_p2), %s1538_s13, 5 }
   0x6   : > { %141 = sbr.rel (%p138_p2) target bundleno = 301 (0x12d), region = 32 }
   0xb   : > { %v1951_v0 = vld [vmem:[%s2349_s1 + $0x38] sm:$0xff]   ;;  %v1953_v2 = vld [vmem:[%s2349_s1 + $0x30] sm:$0xff]   ;;  %s2353_s13 = smov (!%p161_p3, %s1538_s13), 5  ;;  %v1955_v4 = vld [vmem:[%s2349_s1 + $0x28] sm:$0xff]   ;;  %vm271_vm0 = vcmask 523264   ;;  %vm461_vm2 = vcmask 1046528  }
   0xc   : > { %v1952_v1 = vld [vmem:[%s2349_s1 + $0x18] sm:$0xff]   ;;  %1790 = vmatprep.subr.bf16.mxu0 %v1951_v0  ;;  %v1954_v3 = vld [vmem:[%s2349_s1 + $0x10] sm:$0xff]   ;;  %s1710_s24 = sshll.u32 %s2353_s13, 5  ;;  %v1956_v5 = vld [vmem:[%s2349_s1 + $0x8] sm:$0xff]   ;;  %vm215_vm1 = vsmask.f32 7424 }
   0xd   : > { %1806 = vmatprep.subr.bf16.mxu1 %v1952_v1  ;;  %1791 = vmatpush3.bf16.msra.mxu0 %v1951_v0  ;;  %s2065_s29 = scalar_lea.vmem %s2348_s0, %s1710_s24  ;;  %v1957_v6 = vld [vmem:[%s2349_s1 + $0x20] sm:$0xff]   ;;  %v1962_v18 = vld [vmem:[%s2349_s1 + $0x58] sm:$0xff]   ;;  %v1964_v26 = vld [vmem:[%s2349_s1 + $0x50] sm:$0xff]   ;;  %vm613_vm3 = vsmask.f32 6400  ;;  %vm769_vm4 = vcmask 1045504  }
   0xe   : > { %1807 = vmatpush3.bf16.msra.mxu1 %v1952_v1  ;;  %1792 = vmatprep.subr.bf16.mxu0 %v1953_v2  ;;  %v1958_v7 = vld [vmem:[%s2349_s1] sm:$0xff]   ;;  %v2079_v11 = vld [vmem:[%s2065_s29 + $0x8] sm:$0xff]   ;;  %v2082_v12 = vld [vmem:[%s2065_s29 + $0x10] sm:$0xff]   ;;  %vm897_vm5 = vsmask.f32 5376  ;;  %vm1043_vm6 = vcmask 1044480  }
   0xf   : > { %1808 = vmatprep.subr.bf16.mxu1 %v1954_v3  ;;  %v172_v8 = vld [vmem:[%s2065_s29] sm:$0xf]  ;;  %v2075_v9 = vld [vmem:[%s2065_s29 + $0x4] sm:$0xf]  ;;  %v224_v15 = vshll.u32 %v2079_v11, 16  ;;  %v228_v16 = vshrl.u32 %v2079_v11, 16 }
  0x10   : > { %v1554_v10 = vcombine.low %v172_v8, %v2075_v9  ;;  %v232_v17 = vshll.u32 %v2082_v12, 16  ;;  %v1963_v21 = vld [vmem:[%s2349_s1 + $0x78] sm:$0xff]   ;;  %v236_v27 = vshrl.u32 %v2082_v12, 16  ;;  %v1965_v30 = vld [vmem:[%s2349_s1 + $0x70] sm:$0xff]   ;;  %v1968_v35 = vld [vmem:[%s2349_s1 + $0x48] sm:$0xff]   ;;  %v463_v40 = vrot.slane %v2079_v11, 1 }
  0x11   : > { %1793 = vmatpush3.bf16.msra.mxu0 %v1953_v2  ;;  %v226_v20 = vrot.slane %v224_v15, 1  ;;  %v2095_v25 = vld [vmem:[%s2065_s29 + $0x18] ss:$0 sps:$4 sm:$0xff]   ;;  %v1969_v38 = vld [vmem:[%s2349_s1 + $0x68] sm:$0xff]   ;;  %v448_v39 = vld [vmem:[%s2065_s29] sm:$0xe] }
  0x12   : > { %1809 = vmatpush3.bf16.msra.mxu1 %v1954_v3  ;;  %1794 = vmatprep.subr.bf16.mxu0 %v1955_v4  ;;  %v217_v13 = vshrl.u32 %v1554_v10, 16  ;;  %v219_v14 = vshll.u32 %v1554_v10, 16  ;;  %v234_v22 = vrot.slane %v232_v17, 1  ;;  %v240_v31 = vshll.u32 %v2095_v25, 16  ;;  %v576_v41 = vld [vmem:[%s2065_s29] sm:$0xe] }
  0x13   : > { %1810 = vmatprep.subr.bf16.mxu1 %v1956_v5  ;;  %1814 = vmatprep.mubr.msk.bf16.mxu1 %vm271_vm0, %v1554_v10  ;;  %v230_v24 = vor.u32 %v228_v16, %v226_v20  ;;  %v244_v34 = vshrl.u32 %v2095_v25, 16  ;;  %v1967_v37 = vld [vmem:[%s2065_s29 + $0x18] ss:$0 sps:$4 sm:$0x77]   ;;  %v1583_v42 = vcombine.low %v448_v39, %v2075_v9  ;;  %v2128_v43 = vld [vmem:[%s2065_s29 + $0x4] sm:$0xf] }
  0x14   : > { %v221_v19 = vrot.slane %v219_v14, 1  ;;  %v238_v32 = vor.u32 %v236_v27, %v234_v22  ;;  %v242_v33 = vrot.slane %v240_v31, 1  ;;  %v2131_v44 = vld [vmem:[%s2065_s29 + $0x8] sm:$0xf]  ;;  %v2134_v45 = vld [vmem:[%s2065_s29 + $0xc] sm:$0xf]  ;;  %v1600_v51 = vcombine.low %v576_v41, %v2128_v43 }
  0x15   : > { %1795 = vmatpush3.bf16.msra.mxu0 %v1955_v4  ;;  %v235_v29 = vsel %vm215_vm1, %v230_v24, %v234_v22  ;;  %v1970_v47 = vld [vmem:[%s2349_s1 + $0x40] sm:$0xff]   ;;  %v465_v48 = vrot.slane %v2082_v12, 1  ;;  %v2141_v49 = vld [vmem:[%s2065_s29 + $0x10] sm:$0xf]  ;;  %v2144_v50 = vld [vmem:[%s2065_s29 + $0x14] sm:$0xf]  ;;  %v2149_v52 = vcombine.low %v2131_v44, %v2134_v45 }
  0x16   : > { %1811 = vmatpush3.bf16.msra.mxu1 %v1956_v5  ;;  %1796 = vmatprep.subr.bf16.mxu0 %v1957_v6  ;;  %v222_v23 = vor.u32 %v221_v19, %v217_v13  ;;  %v243_v36 = vsel %vm215_vm1, %v238_v32, %v242_v33  ;;  %v246_v46 = vor.u32 %v244_v34, %v242_v33  ;;  %v1971_v53 = vld [vmem:[%s2349_s1 + $0x60] sm:$0xff]   ;;  %v462_v54 = vrot.slane %v1583_v42, 1  ;;  %v1976_v3 = vld [vmem:[%s2349_s1 + $0x98] sm:$0xff]   ;;  %v1978_v17 = vld [vmem:[%s2349_s1 + $0x90] sm:$0xff]   ;;  %s1942_s18 = smul.u32 28, %s2353_s13 }
  0x17   : > { %1812 = vmatprep.subr.bf16.mxu1 %v1958_v7  ;;  %v2156_v55 = vcombine.low %v2141_v49, %v2144_v50  ;;  %v615_v56 = vshrl.u32 %v1600_v51, 16  ;;  %v618_v57 = vshll.u32 %v1600_v51, 16  ;;  %v2159_v58 = vshrl.u32 %v2149_v52, 16  ;;  %v1977_v8 = vld [vmem:[%s2349_s1 + $0xb8] sm:$0xff]   ;;  %v756_v22 = vld [vmem:[%s2065_s29] sm:$0xc] }
  0x18   : > { %v227_v28 = vsel %vm215_vm1, %v222_v23, %v226_v20  ;;  %v2162_v59 = vshll.u32 %v2149_v52, 16  ;;  %v464_v60 = vsel %vm461_vm2, %v462_v54, %v463_v40  ;;  %v467_v9 = vrot.slane %v2095_v25, 1  ;;  %v2185_v10 = vld [vmem:[%s2065_s29 + $0x18] sm:$0xf]  ;;  %v1982_v33 = vld [vmem:[%s2349_s1 + $0xa8] sm:$0xff]   ;;  %s170_s13 = scalar_lea.vmem %s2351_s3, %s1942_s18 }
  0x19   : > { %1797 = vmatpush3.bf16.msra.mxu0 %v1957_v6  ;;  %1798 = vmatprep.mubr.msk.bf16.mxu0 %vm271_vm0, %v227_v28  ;;  %v2166_v61 = vshrl.u32 %v2156_v55, 16  ;;  %v2169_v62 = vshll.u32 %v2156_v55, 16  ;;  %v617_v63 = vrot.slane %v615_v56, 1  ;;  %v620_v0 = vrot.slane %v618_v57, 2  ;;  %v1981_v28 = vld [vmem:[%s2349_s1 + $0x88] sm:$0xff]  }
  0x1a   : > { %1813 = vmatpush3.bf16.msra.mxu1 %v1958_v7  ;;  %1822 = vmatprep.subr.bf16.mxu0 %v1962_v18  ;;  %v625_v1 = vrot.slane %v2159_v58, 1  ;;  %v628_v2 = vrot.slane %v2162_v59, 2  ;;  %v466_v15 = vsel %vm461_vm2, %v463_v40, %v465_v48  ;;  %v906_v23 = vrot.slane %v2159_v58, 2  ;;  %v884_v42 = vld [vmem:[%s2065_s29 + $0x1c] sm:$0x3] }
  0x1b   : > { %1838 = vmatprep.subr.bf16.mxu1 %v1963_v21  ;;  %v634_v4 = vrot.slane %v2166_v61, 1  ;;  %v637_v5 = vrot.slane %v2169_v62, 2  ;;  %v621_v6 = vor.u32 %v620_v0, %v617_v63  ;;  %v907_v27 = vrot.slane %v2162_v59, 3  ;;  %v1030_v63 = vld [vmem:[%s2065_s29] sm:$0x8]  ;;  %v1986_v0 = vld [vmem:[%s2349_s1 + $0xd8] sm:$0xff]  }
  0x1c   : > { %1799 = vmatmul.mubr.msk.bf16.vlgmr.msra.gmra.mxu0 %vm271_vm0, %v235_v29  ;;  %v629_v7 = vor.u32 %v628_v2, %v625_v1  ;;  %v771_v29 = vrot.slane %v2149_v52, 2  ;;  %v910_v40 = vrot.slane %v2166_v61, 2  ;;  %v911_v41 = vrot.slane %v2169_v62, 3  ;;  %v1987_v1 = vld [vmem:[%s2349_s1 + $0xf8] sm:$0xff]  }
  0x1d   : > { %1815 = vmatmul.mubr.msk.bf16.vlgmr.msra.gmra.mxu1 %vm271_vm0, %v2079_v11  ;;  %1823 = vmatpush3.bf16.msra.mxu0 %v1962_v18  ;;  %v638_v11 = vor.u32 %v637_v5, %v634_v4  ;;  %v1979_v18 = vld [vmem:[%s2349_s1 + $0xb0] sm:$0xff]   ;;  %v908_v39 = vor.u32 %v907_v27, %v906_v23  ;;  %v773_v51 = vrot.slane %v2156_v55, 2  ;;  %v1654_v4 = vcombine.low %v1030_v63, %v2128_v43 }
  0x1e   : > { %1839 = vmatpush3.bf16.msra.mxu1 %v1963_v21  ;;  %1824 = vmatprep.subr.bf16.mxu0 %v1964_v26  ;;  %v630_v13 = vsel %vm613_vm3, %v621_v6, %v629_v7  ;;  %v468_v21 = vsel %vm461_vm2, %v465_v48, %v467_v9  ;;  %v2231_v48 = vcombine.low %v2185_v10, %v884_v42  ;;  %v1045_v23 = vrot.slane %v2149_v52, 3  ;;  %v1994_v52 = vld [vmem:[%s2349_s1 + $0xe0] sm:$0xff]   ;;  %v2000_v42 = vld [vmem:[%s2349_s1 + $0x108] sm:$0xff]  }
  0x1f   : > { %1840 = vmatprep.subr.bf16.mxu1 %v1965_v30  ;;  %1802 = vmatprep.mubr.msk.bf16.mxu0 %vm271_vm0, %v243_v36  ;;  %v639_v16 = vsel %vm613_vm3, %v629_v7, %v638_v11  ;;  %v1983_v36 = vld [vmem:[%s2349_s1 + $0x80] sm:$0xff]   ;;  %v1173_v7 = vshrl.u32 %v1654_v4, 16  ;;  %vm1171_vm7 = vsmask.f32 4352  ;;  %vm1474_vm8 = vcmask 519168  }
  0x20   : > { %1818 = vmatprep.mubr.msk.bf16.mxu1 %vm271_vm0, %v2082_v12  ;;  %v583_v12 = vld [vmem:[%s2065_s29 + $0x1c] sm:$0x1]  ;;  %v915_v56 = vshrl.u32 %v2231_v48, 16  ;;  %v918_v57 = vshll.u32 %v2231_v48, 16  ;;  %vm1481_vm9 = vcmask 518144  }
  0x21   : > { %1825 = vmatpush3.bf16.msra.mxu0 %v1964_v26  ;;  %v2191_v14 = vcombine.low %v2185_v10, %v583_v12  ;;  %v1620_v26 = vcombine.low %v756_v22, %v2128_v43  ;;  %v1988_v12 = vld [vmem:[%s2349_s1 + $0xd0] sm:$0xff]   ;;  %v1044_v22 = vrot.slane %v1654_v4, 3 }
  0x22   : > { %1841 = vmatpush3.bf16.msra.mxu1 %v1965_v30  ;;  %1826 = vmatprep.subr.bf16.mxu0 %v1968_v35  ;;  %v917_v2 = vrot.slane %v915_v56, 2 }
  0x23   : > { %1842 = vmatprep.subr.bf16.mxu1 %v1969_v38  ;;  %v641_v19 = vshrl.u32 %v2191_v14, 16  ;;  %v644_v20 = vshll.u32 %v2191_v14, 16  ;;  %v899_v31 = vshrl.u32 %v1620_v26, 16  ;;  %v902_v32 = vshll.u32 %v1620_v26, 16 }
  0x24   : > { %1803 = vmatmul.mubr.msk.bf16.gmra.mxu0 %vm271_vm0, %v246_v46  ;;  %v770_v34 = vrot.slane %v1620_v26, 2  ;;  %v1984_v46 = vld [vmem:[%s2349_s1 + $0xa0] sm:$0xff]   ;;  %v775_v5 = vrot.slane %v2191_v14, 2  ;;  %v1989_v14 = vld [vmem:[%s2349_s1 + $0xf0] sm:$0xff]  }
  0x25   : > { %1819 = vmatmul.mubr.msk.bf16.gmra.mxu1 %vm271_vm0, %v1967_v37  ;;  %1827 = vmatpush3.bf16.msra.mxu0 %v1968_v35  ;;  %v643_v24 = vrot.slane %v641_v19, 1  ;;  %v646_v25 = vrot.slane %v644_v20, 2  ;;  %v901_v37 = vrot.slane %v899_v31, 2  ;;  %v1175_v19 = vrot.slane %v1173_v7, 3 }
  0x26   : > { %1843 = vmatpush3.bf16.msra.mxu1 %v1969_v38  ;;  %1828 = vmatprep.subr.bf16.mxu0 %v1970_v47  ;;  %v904_v38 = vrot.slane %v902_v32, 3  ;;  %v1046_v31 = vsel %vm1043_vm6, %v1044_v22, %v1045_v23 }
  0x27   : > { %1844 = vmatprep.subr.bf16.mxu1 %v1971_v53  ;;  %1830 = vmatprep.mubr.msk.bf16.mxu0 %vm271_vm0, %v464_v60  ;;  %v647_v30 = vor.u32 %v646_v25, %v643_v24  ;;  %v912_v60 = vor.u32 %v911_v41, %v910_v40 }
  0x28   : > { %1846 = vmatprep.mubr.msk.bf16.mxu1 %vm271_vm0, %v630_v13  ;;  %v2257_v13 = vld [vmem:[%s2065_s29 + $0x1c] sm:$0x7] }
  0x29   : > { %1829 = vmatpush3.bf16.msra.mxu0 %v1970_v47  ;;  %v648_v35 = vsel %vm613_vm3, %v638_v11, %v647_v30  ;;  %v905_v47 = vor.u32 %v904_v38, %v901_v37  ;;  %v913_v11 = vsel %vm897_vm5, %v908_v39, %v912_v60 }
  0x2a   : > { %1845 = vmatpush3.bf16.msra.mxu1 %v1971_v53  ;;  %1854 = vmatprep.subr.bf16.mxu0 %v1976_v3  ;;  %v772_v53 = vsel %vm769_vm4, %v770_v34, %v771_v29 }
  0x2b   : > { %1870 = vmatprep.subr.bf16.mxu1 %v1977_v8  ;;  %v909_v54 = vsel %vm897_vm5, %v905_v47, %v908_v39  ;;  %v1997_v39 = vld [vmem:[%s2349_s1 + $0x110] sm:$0xff]   ;;  %v1688_v47 = vcombine.low %v2128_v43, %v2131_v44  ;;  %v1689_v43 = vcombine.low %v2134_v45, %v2141_v49 }
  0x2c   : > { %1831 = vmatmul.mubr.msk.bf16.vlgmr.msra.gmra.mxu0 %vm271_vm0, %v466_v15  ;;  %v776_v15 = vsel %vm769_vm4, %v773_v51, %v775_v5 }
  0x2d   : > { %1847 = vmatmul.mubr.msk.bf16.vlgmr.msra.gmra.mxu1 %vm271_vm0, %v639_v16  ;;  %1855 = vmatpush3.bf16.msra.mxu0 %v1976_v3  ;;  %v920_v3 = vrot.slane %v918_v57, 3  ;;  %v1180_v16 = vrot.slane %v2159_v58, 3  ;;  %v1991_v58 = vld [vmem:[%s2349_s1 + $0xc8] sm:$0xff]  }
  0x2e   : > { %1871 = vmatpush3.bf16.msra.mxu1 %v1977_v8  ;;  %1856 = vmatprep.subr.bf16.mxu0 %v1978_v17  ;;  %v1176_v8 = vshll.u32 %v1654_v4, 16 }
  0x2f   : > { %1872 = vmatprep.subr.bf16.mxu1 %v1979_v18  ;;  %1834 = vmatprep.mubr.msk.bf16.mxu0 %vm271_vm0, %v468_v21  ;;  %v921_v6 = vor.u32 %v920_v3, %v917_v2  ;;  %v1671_v21 = vcombine.low %v2185_v10, %v2257_v13 }
  0x30   : > { %1850 = vmatprep.mubr.msk.bf16.mxu1 %vm271_vm0, %v648_v35  ;;  %v1178_v20 = vrot.slane %v1176_v8, 4  ;;  %v1996_v35 = vld [vmem:[%s2349_s1 + $0x118] sm:$0xff]  }
  0x31   : > { %1857 = vmatpush3.bf16.msra.mxu0 %v1978_v17  ;;  %v1181_v17 = vrot.slane %v2162_v59, 4  ;;  %v1992_v59 = vld [vmem:[%s2349_s1 + $0xe8] sm:$0xff]   ;;  %v1189_v26 = vshrl.u32 %v1671_v21, 16  ;;  %v1192_v27 = vshll.u32 %v1671_v21, 16 }
  0x32   : > { %1873 = vmatpush3.bf16.msra.mxu1 %v1979_v18  ;;  %1858 = vmatprep.subr.bf16.mxu0 %v1981_v28  ;;  %v922_v18 = vsel %vm897_vm5, %v912_v60, %v921_v6  ;;  %v1179_v24 = vor.u32 %v1178_v20, %v1175_v19 }
  0x33   : > { %1874 = vmatprep.subr.bf16.mxu1 %v1982_v33  ;;  %v1182_v25 = vor.u32 %v1181_v17, %v1180_v16  ;;  %v1191_v32 = vrot.slane %v1189_v26, 3 }
  0x34   : > { %1835 = vmatmul.mubr.msk.bf16.gmra.mxu0 %vm271_vm0, %v467_v9  ;;  %v774_v9 = vsel %vm769_vm4, %v771_v29, %v773_v51  ;;  %v1185_v29 = vrot.slane %v2169_v62, 4  ;;  %v1194_v62 = vrot.slane %v1192_v27, 4  ;;  %v1691_v51 = vcombine.low %v2257_v13, %v2257_v13 }
  0x35   : > { %1851 = vmatmul.mubr.msk.bf16.gmra.mxu1 %vm271_vm0, %v647_v30  ;;  %1859 = vmatpush3.bf16.msra.mxu0 %v1981_v28  ;;  %v1184_v28 = vrot.slane %v2166_v61, 3  ;;  %v1993_v30 = vld [vmem:[%s2349_s1 + $0xc0] sm:$0xff]   ;;  %v1183_v61 = vsel %vm1171_vm7, %v1179_v24, %v1182_v25 }
  0x36   : > { %1875 = vmatpush3.bf16.msra.mxu1 %v1982_v33  ;;  %1860 = vmatprep.subr.bf16.mxu0 %v1983_v36  ;;  %v1047_v33 = vrot.slane %v2156_v55, 3  ;;  %v1195_v37 = vor.u32 %v1194_v62, %v1191_v32 }
  0x37   : > { %1876 = vmatprep.subr.bf16.mxu1 %v1984_v46  ;;  %1862 = vmatprep.mubr.msk.bf16.mxu0 %vm271_vm0, %v772_v53  ;;  %v1186_v34 = vor.u32 %v1185_v29, %v1184_v28 }
  0x38   : > { %1878 = vmatprep.mubr.msk.bf16.mxu1 %vm271_vm0, %v909_v54  ;;  %v1048_v38 = vsel %vm1043_vm6, %v1045_v23, %v1047_v33 }
  0x39   : > { %1861 = vmatpush3.bf16.msra.mxu0 %v1983_v36  ;;  %v1049_v36 = vrot.slane %v2231_v48, 3  ;;  %v1187_v55 = vsel %vm1171_vm7, %v1182_v25, %v1186_v34  ;;  %v1196_v41 = vsel %vm1171_vm7, %v1186_v34, %v1195_v37  ;;  %v1690_v48 = vcombine.low %v2144_v50, %v2185_v10 }
  0x3a   : > { %1877 = vmatpush3.bf16.msra.mxu1 %v1984_v46  ;;  %1886 = vmatprep.subr.bf16.mxu0 %v1986_v0  ;;  %v2001_v46 = vld [vmem:[%s2349_s1 + $0x100] sm:$0xff]  }
  0x3b   : > { %1902 = vmatprep.subr.bf16.mxu1 %v1987_v1  ;;  %v1050_v40 = vsel %vm1043_vm6, %v1047_v33, %v1049_v36 }
  0x3c   : > { %1863 = vmatmul.mubr.msk.bf16.vlgmr.msra.gmra.mxu0 %vm271_vm0, %v774_v9 }
  0x3d   : > { %1879 = vmatmul.mubr.msk.bf16.vlgmr.msra.gmra.mxu1 %vm271_vm0, %v913_v11  ;;  %1887 = vmatpush3.bf16.msra.mxu0 %v1986_v0 }
  0x3e   : > { %1903 = vmatpush3.bf16.msra.mxu1 %v1987_v1  ;;  %1888 = vmatprep.subr.bf16.mxu0 %v1988_v12 }
  0x3f   : > { %1904 = vmatprep.subr.bf16.mxu1 %v1989_v14  ;;  %1866 = vmatprep.mubr.msk.bf16.mxu0 %vm271_vm0, %v776_v15 }
  0x40   : > { %1882 = vmatprep.mubr.msk.bf16.mxu1 %vm271_vm0, %v922_v18 }
  0x41   : > { %1889 = vmatpush3.bf16.msra.mxu0 %v1988_v12 }
  0x42   : > { %1905 = vmatpush3.bf16.msra.mxu1 %v1989_v14  ;;  %1890 = vmatprep.subr.bf16.mxu0 %v1991_v58 }
  0x43   : > { %1906 = vmatprep.subr.bf16.mxu1 %v1992_v59 }
  0x44   : > { %1867 = vmatmul.mubr.msk.bf16.gmra.mxu0 %vm271_vm0, %v775_v5 }
  0x45   : > { %1883 = vmatmul.mubr.msk.bf16.gmra.mxu1 %vm271_vm0, %v921_v6  ;;  %1891 = vmatpush3.bf16.msra.mxu0 %v1991_v58 }
  0x46   : > { %1907 = vmatpush3.bf16.msra.mxu1 %v1992_v59  ;;  %1892 = vmatprep.subr.bf16.mxu0 %v1993_v30 }
  0x47   : > { %1908 = vmatprep.subr.bf16.mxu1 %v1994_v52  ;;  %1894 = vmatprep.mubr.msk.bf16.mxu0 %vm271_vm0, %v1046_v31 }
  0x48   : > { %1910 = vmatprep.mubr.msk.bf16.mxu1 %vm271_vm0, %v1183_v61 }
  0x49   : > { %1893 = vmatpush3.bf16.msra.mxu0 %v1993_v30 }
  0x4a   : > { %1909 = vmatpush3.bf16.msra.mxu1 %v1994_v52  ;;  %1918 = vmatprep.subr.bf16.mxu0 %v1996_v35 }
  0x4b   : > { %1934 = vmatprep.subr.bf16.mxu1 %v1996_v35 }
  0x4c   : > { %1895 = vmatmul.mubr.msk.bf16.vlgmr.msra.gmra.mxu0 %vm271_vm0, %v1048_v38 }
  0x4d   : > { %1911 = vmatmul.mubr.msk.bf16.vlgmr.msra.gmra.mxu1 %vm271_vm0, %v1187_v55  ;;  %1919 = vmatpush3.bf16.msra.mxu0 %v1996_v35 }
  0x4e   : > { %1938 = vmatpush3.bf16.msra.mxu1 %v1996_v35  ;;  %1920 = vmatprep.subr.bf16.mxu0 %v1997_v39 }
  0x4f   : > { %1935 = vmatprep.subr.bf16.mxu1 %v1997_v39  ;;  %1898 = vmatprep.mubr.msk.bf16.mxu0 %vm271_vm0, %v1050_v40 }
  0x50   : > { %1914 = vmatprep.mubr.msk.bf16.mxu1 %vm271_vm0, %v1196_v41 }
  0x51   : > { %1921 = vmatpush3.bf16.msra.mxu0 %v1997_v39 }
  0x52   : > { %1939 = vmatpush3.bf16.msra.mxu1 %v1997_v39  ;;  %1922 = vmatprep.subr.bf16.mxu0 %v2000_v42 }
  0x53   : > { %1936 = vmatprep.subr.bf16.mxu1 %v2000_v42 }
  0x54   : > { %1899 = vmatmul.mubr.msk.bf16.gmra.mxu0 %vm271_vm0, %v1049_v36 }
  0x55   : > { %1915 = vmatmul.mubr.msk.bf16.gmra.mxu1 %vm271_vm0, %v1195_v37  ;;  %1923 = vmatpush3.bf16.msra.mxu0 %v2000_v42 }
  0x56   : > { %1940 = vmatpush3.bf16.msra.mxu1 %v2000_v42  ;;  %1924 = vmatprep.subr.bf16.mxu0 %v2001_v46 }
  0x57   : > { %1937 = vmatprep.subr.bf16.mxu1 %v2001_v46  ;;  %1926 = vmatprep.mubr.msk.bf16.mxu0 %vm271_vm0, %v1688_v47 }
  0x58   : > { %1930 = vmatprep.mubr.msk.bf16.mxu1 %vm271_vm0, %v1690_v48 }
  0x59   : > { %1925 = vmatpush3.bf16.msra.mxu0 %v2001_v46 }
  0x5a   : > { %1941 = vmatpush3.bf16.msra.mxu1 %v2001_v46 }
  0x5c   : > { %1927 = vmatmul.mubr.msk.bf16.vlgmr.msra.gmra.mxu0 %vm271_vm0, %v1689_v43 }
  0x5d   : > { %1931 = vmatmul.mubr.msk.bf16.vlgmr.msra.gmra.mxu1 %vm271_vm0, %v1691_v51 }
  0xdc   : > { %v1800_v44 = vpop.f32.mrf.mxu0 }
  0xdd   : > { %v1816_v50 = vpop.f32.mrf.mxu1 }
  0xde   : > { %v318_v10 = vpop.f32.mrf.mxu0  ;;  %v427_v32 = vadd.f32 %v1816_v50, %v1800_v44 }
  0xdf   : > { %v418_v53 = vpop.f32.mrf.mxu1 }
  0xe0   : > { %v1801_v54 = vpop.f32.mrf.mxu0  ;;  %v419_v35 = vadd.f32 %v418_v53, %v318_v10 }
  0xe1   : > { %v1817_v56 = vpop.f32.mrf.mxu1 }
  0xe2   : > { %v321_v57 = vpop.f32.mrf.mxu0  ;;  %v430_v42 = vadd.f32 %v1817_v56, %v1801_v54 }
  0xe3   : > { %v421_v60 = vpop.f32.mrf.mxu1 }
  0xe4   : > { %v1804_v63 = vpop.f32.mrf.mxu0  ;;  %v422_v43 = vadd.f32 %v421_v60, %v321_v57 }
  0xe5   : > { %v1820_v0 = vpop.f32.mrf.mxu1 }
  0xe6   : > { %v334_v1 = vpop.f32.mrf.mxu0  ;;  %v443_v62 = vadd.f32 %v1820_v0, %v1804_v63 }
  0xe7   : > { %v434_v2 = vpop.f32.mrf.mxu1 }
  0xe8   : > { %v1805_v3 = vpop.f32.mrf.mxu0  ;;  %v435_v36 = vadd.f32 %v434_v2, %v334_v1 }
  0xe9   : > { %v1821_v45 = vpop.f32.mrf.mxu1 }
  0xea   : > { %v337_v49 = vpop.f32.mrf.mxu0 }
  0xeb   : > { %v437_v4 = vpop.f32.mrf.mxu1 }
  0xec   : > { %v1832_v5 = vpop.f32.mrf.mxu0  ;;  %v438_v3 = vadd.f32 %v437_v4, %v337_v49 }
  0xed   : > { %v1848_v6 = vpop.f32.mrf.mxu1  ;;  %v571_v37 = vadd.f32 %v1832_v5, %v427_v32 }
  0xee   : > { %v539_v7 = vpop.f32.mrf.mxu0 }
  0xef   : > { %v719_v8 = vpop.f32.mrf.mxu1  ;;  %v569_v40 = vadd.f32 %v539_v7, %v419_v35  ;;  %v751_v48 = vadd.f32 %v1848_v6, %v571_v37 }
  0xf0   : > { %v1833_v9 = vpop.f32.mrf.mxu0 }
  0xf1   : > { %v1849_v11 = vpop.f32.mrf.mxu1  ;;  %v572_v45 = vadd.f32 %v1833_v9, %v430_v42  ;;  %v749_v63 = vadd.f32 %v719_v8, %v569_v40 }
  0xf2   : > { %v542_v12 = vpop.f32.mrf.mxu0 }
  0xf3   : > { %v722_v13 = vpop.f32.mrf.mxu1  ;;  %v570_v1 = vadd.f32 %v542_v12, %v422_v43  ;;  %v752_v54 = vadd.f32 %v1849_v11, %v572_v45 }
  0xf4   : > { %v1836_v14 = vpop.f32.mrf.mxu0 }
  0xf5   : > { %v1852_v15 = vpop.f32.mrf.mxu1  ;;  %v575_v38 = vadd.f32 %v1836_v14, %v443_v62  ;;  %v750_v57 = vadd.f32 %v722_v13, %v570_v1 }
  0xf6   : > { %v555_v16 = vpop.f32.mrf.mxu0 }
  0xf7   : > { %v735_v17 = vpop.f32.mrf.mxu1  ;;  %v573_v41 = vadd.f32 %v555_v16, %v435_v36  ;;  %v755_v51 = vadd.f32 %v1852_v15, %v575_v38 }
  0xf8   : > { %v1837_v18 = vpop.f32.mrf.mxu0 }
  0xf9   : > { %v1853_v19 = vpop.f32.mrf.mxu1  ;;  %v753_v0 = vadd.f32 %v735_v17, %v573_v41 }
  0xfa   : > { %v558_v20 = vpop.f32.mrf.mxu0 }
  0xfb   : > { %v738_v21 = vpop.f32.mrf.mxu1  ;;  %v574_v2 = vadd.f32 %v558_v20, %v438_v3 }
  0xfc   : > { %v1864_v58 = vpop.f32.mrf.mxu0 }
  0xfd   : > { %v1880_v59 = vpop.f32.mrf.mxu1  ;;  %v879_v10 = vadd.f32 %v1864_v58, %v751_v48  ;;  %v754_v60 = vadd.f32 %v738_v21, %v574_v2 }
  0xfe   : > { %v847_v22 = vpop.f32.mrf.mxu0 }
  0xff   : > { %v993_v23 = vpop.f32.mrf.mxu1  ;;  %v877_v7 = vadd.f32 %v847_v22, %v749_v63  ;;  %v1025_v6 = vadd.f32 %v1880_v59, %v879_v10 }
 0x100   : > { %v1865_v24 = vpop.f32.mrf.mxu0 }
 0x101   : > { %v1881_v25 = vpop.f32.mrf.mxu1  ;;  %v880_v49 = vadd.f32 %v1865_v24, %v752_v54  ;;  %v1023_v8 = vadd.f32 %v993_v23, %v877_v7 }
 0x102   : > { %v850_v26 = vpop.f32.mrf.mxu0 }
 0x103   : > { %v2329_v27 = vpop.f32.mrf.mxu1  ;;  %v878_v12 = vadd.f32 %v850_v26, %v750_v57  ;;  %v1026_v11 = vadd.f32 %v1881_v25, %v880_v49  ;;  %v1700_v26 = vld [vmem:[%s2350_s2] ss:$0 sm:$0xff] }
 0x104   : > { %v1868_v28 = vpop.f32.mrf.mxu0 }
 0x105   : > { %v1884_v29 = vpop.f32.mrf.mxu1  ;;  %v883_v53 = vadd.f32 %v1868_v28, %v755_v51  ;;  %v1024_v21 = vadd.f32 %v2329_v27, %v878_v12 }
 0x106   : > { %v863_v30 = vpop.f32.mrf.mxu0 }
 0x107   : > { %v1009_v52 = vpop.f32.mrf.mxu1  ;;  %v881_v16 = vadd.f32 %v863_v30, %v753_v0  ;;  %v1029_v15 = vadd.f32 %v1884_v29, %v883_v53 }
 0x108   : > { %v1869_v31 = vpop.f32.mrf.mxu0 }
 0x109   : > { %v1885_v61 = vpop.f32.mrf.mxu1  ;;  %v1027_v17 = vadd.f32 %v1009_v52, %v881_v16 }
 0x10a   : > { %v866_v33 = vpop.f32.mrf.mxu0 }
 0x10b   : > { %v1012_v34 = vpop.f32.mrf.mxu1  ;;  %v882_v20 = vadd.f32 %v866_v33, %v754_v60 }
 0x10c   : > { %v1896_v55 = vpop.f32.mrf.mxu0 }
 0x10d   : > { %v1912_v39 = vpop.f32.mrf.mxu1  ;;  %v1153_v19 = vadd.f32 %v1896_v55, %v1025_v6  ;;  %v1028_v24 = vadd.f32 %v1012_v34, %v882_v20 }
 0x10e   : > { %v1121_v46 = vpop.f32.mrf.mxu0 }
 0x10f   : > { %v1267_v47 = vpop.f32.mrf.mxu1  ;;  %v1151_v22 = vadd.f32 %v1121_v46, %v1023_v8  ;;  %v1299_v29 = vadd.f32 %v1912_v39, %v1153_v19 }
 0x110   : > { %v1897_v44 = vpop.f32.mrf.mxu0 }
 0x111   : > { %v1913_v50 = vpop.f32.mrf.mxu1  ;;  %v1154_v32 = vadd.f32 %v1897_v44, %v1026_v11  ;;  %v1297_v62 = vadd.f32 %v1267_v47, %v1151_v22 }
 0x112   : > { %v1124_v5 = vpop.f32.mrf.mxu0 }
 0x113   : > { %v1270_v14 = vpop.f32.mrf.mxu1  ;;  %v1152_v25 = vadd.f32 %v1124_v5, %v1024_v21  ;;  %v1300_v41 = vadd.f32 %v1913_v50, %v1154_v32 }
 0x114   : > { %v1900_v56 = vpop.f32.mrf.mxu0 }
 0x115   : > { %v1916_v18 = vpop.f32.mrf.mxu1  ;;  %v1157_v58 = vadd.f32 %v1900_v56, %v1029_v15  ;;  %v1298_v3 = vadd.f32 %v1270_v14, %v1152_v25 }
 0x116   : > { %v1137_v4 = vpop.f32.mrf.mxu0 }
 0x117   : > { %v1283_v9 = vpop.f32.mrf.mxu1  ;;  %v1155_v30 = vadd.f32 %v1137_v4, %v1027_v17  ;;  %v1303_v13 = vadd.f32 %v1916_v18, %v1157_v58 }
 0x118   : > { %v1901_v28 = vpop.f32.mrf.mxu0 }
 0x119   : > { %v1917_v31 = vpop.f32.mrf.mxu1  ;;  %v1301_v33 = vadd.f32 %v1283_v9, %v1155_v30 }
 0x11a   : > { %v1140_v61 = vpop.f32.mrf.mxu0 }
 0x11b   : > { %v1286_v59 = vpop.f32.mrf.mxu1  ;;  %v1156_v37 = vadd.f32 %v1140_v61, %v1028_v24 }
 0x11c   : > { %v1928_v23 = vpop.f32.mrf.mxu0 }
 0x11d   : > { %v1932_v52 = vpop.f32.mrf.mxu1  ;;  %v1419_v35 = vadd.f32 %v1928_v23, %v1299_v29  ;;  %v1302_v45 = vadd.f32 %v1286_v59, %v1156_v37 }
 0x11e   : > { %v1423_v36 = vadd.f32 %v1932_v52, %v1303_v13  ;;  %v1387_v38 = vpop.f32.mrf.mxu0 }
 0x11f   : > { %v1403_v55 = vpop.f32.mrf.mxu1  ;;  %v1433_v39 = vadd.f32 %v1700_v26, %v1419_v35  ;;  %v1417_v27 = vadd.f32 %v1387_v38, %v1297_v62 }
 0x120   : > { %v1437_v40 = vadd.f32 %v1700_v26, %v1423_v36  ;;  %v1421_v34 = vadd.f32 %v1403_v55, %v1301_v33  ;;  %v1929_v42 = vpop.f32.mrf.mxu0 }
 0x121   : > { %v1933_v46 = vpop.f32.mrf.mxu1  ;;  %v1440_v48 = vmax.f32 %v1433_v39, 0.0  ;;  %v1431_v43 = vadd.f32 %v1700_v26, %v1417_v27  ;;  %v1420_v44 = vadd.f32 %v1929_v42, %v1300_v41 }
 0x122   : > { %v1444_v51 = vmax.f32 %v1437_v40, 0.0  ;;  %v1435_v47 = vadd.f32 %v1700_v26, %v1421_v34  ;;  %v1390_v63 = vpop.f32.mrf.mxu0 }
 0x123   : > { %v1406_v0 = vpop.f32.mrf.mxu1  ;;  %v1713_v10 = vpack.c.bf16 %v1440_v48, %v1440_v48  ;;  %v1438_v50 = vmax.f32 %v1431_v43, 0.0  ;;  %v1434_v2 = vadd.f32 %v1700_v26, %v1420_v44  ;;  %v1418_v5 = vadd.f32 %v1390_v63, %v1298_v3 }
 0x124   : > { %v1717_v53 = vpack.c.bf16 %v1444_v51, %v1444_v51  ;;  %v1442_v1 = vmax.f32 %v1435_v47, 0.0  ;;  %v1422_v7 = vadd.f32 %v1406_v0, %v1302_v45 }
 0x125   : > { %1477 = vst.msk [vmem:[%s170_s13 + $0x8] sm:$0xf] %vm1474_vm8, %v1713_v10  ;;  %v1711_v14 = vpack.c.bf16 %v1438_v50, %v1438_v50  ;;  %v1441_v54 = vmax.f32 %v1434_v2, 0.0  ;;  %v1432_v56 = vadd.f32 %v1700_v26, %v1418_v5 }
 0x126   : > { %1482 = vst.msk [vmem:[%s170_s13 + $0x18] sm:$0x7] %vm1481_vm9, %v1717_v53  ;;  %v1715_v16 = vpack.c.bf16 %v1442_v1, %v1442_v1  ;;  %v1436_v18 = vadd.f32 %v1700_v26, %v1422_v7 }
 0x127   : > { %1475 = vst.msk [vmem:[%s170_s13] sm:$0xf] %vm1474_vm8, %v1711_v14  ;;  %v1714_v6 = vpack.c.bf16 %v1441_v54, %v1441_v54  ;;  %v1439_v15 = vmax.f32 %v1432_v56, 0.0 }
 0x128   : > { %1479 = vst.msk [vmem:[%s170_s13 + $0x10] sm:$0xf] %vm1474_vm8, %v1715_v16  ;;  %v1443_v57 = vmax.f32 %v1436_v18, 0.0 }
 0x129   : > { %1478 = vst.msk [vmem:[%s170_s13 + $0xc] sm:$0xf] %vm1474_vm8, %v1714_v6  ;;  %v1712_v60 = vpack.c.bf16 %v1439_v15, %v1439_v15 }
 0x12a   : > { %v1716_v49 = vpack.c.bf16 %v1443_v57, %v1443_v57 }
 0x12b   : > { %1476 = vst.msk [vmem:[%s170_s13 + $0x4] sm:$0xf] %vm1474_vm8, %v1712_v60 }
 0x12c   : > { %1480 = vst.msk [vmem:[%s170_s13 + $0x14] sm:$0xf] %vm1474_vm8, %v1716_v49 }
 0x12d PF: > { %s13_s12 = sadd.s32 1, %s2011_s12  }
 0x12e   : > { %p10_p4 = scmp.ge.s32.totalorder %s13_s12, 8  }
 0x130   :  { %12 = sbr.rel (!%p10_p4) target bundleno = 1 (0x1), region = 70 }

// kernel: forward.14
= control target key start
LH: loop header
LB: loop body
LE: loop exit
PB: predicated region body
PF: predicated region fallthrough
CT: control target
= control target key end

     0   :  { %s1592_s12 = smov 0   ;;  %s1796_s0 = inlined_call_operand.vmem [shape: bf16[6,26,64], index: 0, kind: input, shape index: {}]   ;;  %s1797_s1 = inlined_call_operand.vmem [shape: bf16[9,64,128], index: 1, kind: input, shape index: {}]   ;;  %s1798_s2 = inlined_call_operand.vmem [shape: f32[1,128], index: 2, kind: input, shape index: {}]   ;;  %s1799_s3 = inlined_call_operand.vmem [shape: bf16[6,18,128], index: 3, kind: output, shape index: {}]  }
   0x1 LB: > { %s1192_s13 = sadd.s32 4294967295, %s1570_s12   ;;  %p1196_p0 = scmp.ge.s32.totalorder %s1570_s12, 1  ;;  %s1570_s12 = sphi %s1592_s12, %s13_s12  }
   0x2   : > { %p137_p1 = scmp.lt.s32.totalorder %s1570_s12, 7 }
   0x4   : > { %p138_p2 = pnand %p1196_p0, %p137_p1 }
   0x5   : > { %p161_p3 = scmp.lt.s32.totalorder (!%p138_p2), %s1192_s13, 5 }
   0x6   : > { %141 = sbr.rel (%p138_p2) target bundleno = 300 (0x12c), region = 32 }
   0xb   : > { %v1516_v0 = vld [vmem:[%s1797_s1 + $0x38] sm:$0xff]   ;;  %v1518_v2 = vld [vmem:[%s1797_s1 + $0x30] sm:$0xff]   ;;  %s1801_s13 = smov (!%p161_p3, %s1192_s13), 5  ;;  %v1520_v4 = vld [vmem:[%s1797_s1 + $0x28] sm:$0xff]   ;;  %vm241_vm0 = vcmask 523264   ;;  %vm389_vm2 = vcmask 1046528  }
   0xc   : > { %v1517_v1 = vld [vmem:[%s1797_s1 + $0x18] sm:$0xff]   ;;  %1399 = vmatprep.subr.bf16.mxu0 %v1516_v0  ;;  %v1519_v3 = vld [vmem:[%s1797_s1 + $0x10] sm:$0xff]   ;;  %s1336_s24 = sshll.u32 %s1801_s13, 4  ;;  %v1521_v5 = vld [vmem:[%s1797_s1 + $0x8] sm:$0xff]   ;;  %vm201_vm1 = vsmask.f32 7424 }
   0xd   : > { %1411 = vmatprep.subr.bf16.mxu1 %v1517_v1  ;;  %1400 = vmatpush3.bf16.msra.mxu0 %v1516_v0  ;;  %s1624_s29 = scalar_lea.vmem %s1796_s0, %s1336_s24  ;;  %v1522_v6 = vld [vmem:[%s1797_s1 + $0x20] sm:$0xff]   ;;  %v1527_v12 = vld [vmem:[%s1797_s1 + $0x58] sm:$0xff]   ;;  %v1529_v23 = vld [vmem:[%s1797_s1 + $0x50] sm:$0xff]   ;;  %vm487_vm3 = vsmask.f32 6400  ;;  %vm599_vm4 = vcmask 1045504  }
   0xe   : > { %1412 = vmatpush3.bf16.msra.mxu1 %v1517_v1  ;;  %1401 = vmatprep.subr.bf16.mxu0 %v1518_v2  ;;  %v172_v7 = vld [vmem:[%s1624_s29] sm:$0xf]  ;;  %v1631_v8 = vld [vmem:[%s1624_s29 + $0x4] sm:$0xf]  ;;  %v1528_v17 = vld [vmem:[%s1797_s1 + $0x78] sm:$0xff]   ;;  %vm809_vm6 = vcmask 1044480  }
   0xf   : > { %1413 = vmatprep.subr.bf16.mxu1 %v1519_v3  ;;  %v1523_v9 = vld [vmem:[%s1797_s1] sm:$0xff]   ;;  %v1208_v10 = vcombine.low %v172_v7, %v1631_v8  ;;  %v1638_v11 = vld [vmem:[%s1624_s29 + $0x8] ss:$0 sps:$4 sm:$0x33]   ;;  %v1530_v25 = vld [vmem:[%s1797_s1 + $0x70] sm:$0xff]   ;;  %s1507_s18 = smul.u32 12, %s1801_s13 }
  0x10   : > { %v210_v15 = vshll.u32 %v1638_v11, 16  ;;  %v214_v16 = vshrl.u32 %v1638_v11, 16  ;;  %v1526_v20 = vld [vmem:[%s1624_s29 + $0x8] ss:$0 sps:$4 sm:$0x11]   ;;  %v391_v28 = vrot.slane %v1638_v11, 1 }
  0x11   : > { %1402 = vmatpush3.bf16.msra.mxu0 %v1518_v2  ;;  %v203_v13 = vshrl.u32 %v1208_v10, 16  ;;  %v205_v14 = vshll.u32 %v1208_v10, 16  ;;  %1419 = vmatprep.mubr.msk.bf16.mxu1 %vm241_vm0, %v1208_v10  ;;  %v376_v26 = vld [vmem:[%s1624_s29] sm:$0xe]  ;;  %v1531_v29 = vld [vmem:[%s1797_s1 + $0x48] sm:$0xff]   ;;  %v1536_v46 = vld [vmem:[%s1797_s1 + $0x98] sm:$0xff]   ;;  %s170_s20 = scalar_lea.vmem %s1799_s3, %s1507_s18 }
  0x12   : > { %1414 = vmatpush3.bf16.msra.mxu1 %v1519_v3  ;;  %1403 = vmatprep.subr.bf16.mxu0 %v1520_v4  ;;  %v212_v19 = vrot.slane %v210_v15, 1  ;;  %v1231_v27 = vcombine.low %v376_v26, %v1631_v8  ;;  %v1532_v30 = vld [vmem:[%s1797_s1 + $0x68] sm:$0xff]   ;;  %v1533_v35 = vld [vmem:[%s1797_s1 + $0x40] sm:$0xff]   ;;  %v1538_v48 = vld [vmem:[%s1797_s1 + $0xb8] sm:$0xff]   ;;  %vm697_vm5 = vsmask.f32 5376 }
  0x13   : > { %1415 = vmatprep.subr.bf16.mxu1 %v1521_v5  ;;  %v207_v18 = vrot.slane %v205_v14, 1  ;;  %v1669_v31 = vld [vmem:[%s1624_s29 + $0x8] ss:$0 sps:$4 sm:$0x77]   ;;  %v1534_v36 = vld [vmem:[%s1797_s1 + $0x60] sm:$0xff]   ;;  %v1539_v51 = vld [vmem:[%s1797_s1 + $0x90] sm:$0xff]  }
  0x14   : > { %v216_v22 = vor.u32 %v214_v16, %v212_v19  ;;  %v390_v32 = vrot.slane %v1231_v27, 1  ;;  %v489_v33 = vshrl.u32 %v1231_v27, 16  ;;  %v492_v34 = vshll.u32 %v1231_v27, 16  ;;  %v586_v49 = vld [vmem:[%s1624_s29] sm:$0xc]  ;;  %v1540_v54 = vld [vmem:[%s1797_s1 + $0xb0] sm:$0xff]  }
  0x15   : > { %1404 = vmatpush3.bf16.msra.mxu0 %v1520_v4  ;;  %v208_v21 = vor.u32 %v207_v18, %v203_v13  ;;  %v497_v37 = vshrl.u32 %v1669_v31, 16  ;;  %v500_v38 = vshll.u32 %v1669_v31, 16  ;;  %v1261_v50 = vcombine.low %v586_v49, %v1631_v8  ;;  %v1694_v53 = vld [vmem:[%s1624_s29 + $0x8] ss:$0 sps:$4 sm:$0xff]   ;;  %v796_v7 = vld [vmem:[%s1624_s29] sm:$0x8] }
  0x16   : > { %1416 = vmatpush3.bf16.msra.mxu1 %v1521_v5  ;;  %1405 = vmatprep.subr.bf16.mxu0 %v1522_v6  ;;  %v392_v39 = vsel %vm389_vm2, %v390_v32, %v391_v28  ;;  %v491_v40 = vrot.slane %v489_v33, 1  ;;  %v494_v41 = vrot.slane %v492_v34, 2  ;;  %v601_v52 = vrot.slane %v1669_v31, 2  ;;  %v1541_v62 = vld [vmem:[%s1797_s1 + $0x88] sm:$0xff]   ;;  %v1543_v5 = vld [vmem:[%s1797_s1 + $0x80] sm:$0xff]  }
  0x17   : > { %1417 = vmatprep.subr.bf16.mxu1 %v1523_v9  ;;  %v213_v24 = vsel %vm201_vm1, %v208_v21, %v212_v19  ;;  %v499_v42 = vrot.slane %v497_v37, 1  ;;  %v502_v43 = vrot.slane %v500_v38, 2  ;;  %v600_v55 = vrot.slane %v1261_v50, 2  ;;  %v1542_v3 = vld [vmem:[%s1797_s1 + $0xa8] sm:$0xff]   ;;  %v894_v10 = vld [vmem:[%s1624_s29] sm:$0x8] }
  0x18   : > { %1407 = vmatprep.mubr.msk.bf16.mxu0 %vm241_vm0, %v213_v24  ;;  %v495_v44 = vor.u32 %v494_v41, %v491_v40  ;;  %v699_v56 = vshrl.u32 %v1261_v50, 16  ;;  %v702_v57 = vshll.u32 %v1261_v50, 16  ;;  %v707_v58 = vshrl.u32 %v1694_v53, 16  ;;  %v1722_v11 = vld [vmem:[%s1624_s29 + $0x4] sm:$0xf]  ;;  %v1546_v19 = vld [vmem:[%s1797_s1 + $0xd8] sm:$0xff]  }
  0x19   : > { %1406 = vmatpush3.bf16.msra.mxu0 %v1522_v6  ;;  %v503_v45 = vor.u32 %v502_v43, %v499_v42  ;;  %v710_v59 = vshll.u32 %v1694_v53, 16  ;;  %v602_v63 = vsel %vm599_vm4, %v600_v55, %v601_v52  ;;  %v1729_v13 = vld [vmem:[%s1624_s29 + $0xc] sm:$0x1]  ;;  %v1306_v14 = vcombine.low %v894_v10, %v1722_v11  ;;  %v1553_v31 = vld [vmem:[%s1797_s1 + $0xc0] sm:$0xff]   ;;  %v1556_v38 = vld [vmem:[%s1797_s1 + $0x118] sm:$0xff]  }
  0x1a   : > { %1418 = vmatpush3.bf16.msra.mxu1 %v1523_v9  ;;  %1423 = vmatprep.subr.bf16.mxu0 %v1527_v12  ;;  %v701_v60 = vrot.slane %v699_v56, 2  ;;  %v704_v61 = vrot.slane %v702_v57, 3  ;;  %v709_v0 = vrot.slane %v707_v58, 2  ;;  %v1544_v9 = vld [vmem:[%s1797_s1 + $0xa0] sm:$0xff]   ;;  %v1291_v15 = vcombine.low %v796_v7, %v1631_v8  ;;  %v1559_v40 = vld [vmem:[%s1797_s1 + $0x110] sm:$0xff]   ;;  %v1560_v41 = vld [vmem:[%s1797_s1 + $0x108] sm:$0xff]  }
  0x1b   : > { %1435 = vmatprep.subr.bf16.mxu1 %v1528_v17  ;;  %v504_v47 = vsel %vm487_vm3, %v495_v44, %v503_v45  ;;  %v712_v1 = vrot.slane %v710_v59, 3  ;;  %v922_v18 = vshll.u32 %v1306_v14, 16  ;;  %vm917_vm7 = vsmask.f32 4352  ;;  %v1554_v37 = vld [vmem:[%s1797_s1 + $0xe0] sm:$0xff]  }
  0x1c   : > { %1408 = vmatmul.mubr.msk.bf16.vlgmr.msra.gmra.mxu0 %vm241_vm0, %v216_v22  ;;  %v705_v2 = vor.u32 %v704_v61, %v701_v60  ;;  %v810_v24 = vrot.slane %v1291_v15, 3  ;;  %v1561_v42 = vld [vmem:[%s1797_s1 + $0x100] sm:$0xff]   ;;  %v1323_v43 = vcombine.low %v1729_v13, %v1729_v13 }
  0x1d   : > { %1420 = vmatmul.mubr.msk.bf16.vlgmr.msra.gmra.mxu1 %vm241_vm0, %v1526_v20  ;;  %1424 = vmatpush3.bf16.msra.mxu0 %v1527_v12  ;;  %v713_v4 = vor.u32 %v712_v1, %v709_v0  ;;  %v1726_v12 = vld [vmem:[%s1624_s29 + $0x8] sm:$0xf]  ;;  %v1548_v20 = vld [vmem:[%s1797_s1 + $0xf8] sm:$0xff]  }
  0x1e   : > { %1436 = vmatpush3.bf16.msra.mxu1 %v1528_v17  ;;  %1425 = vmatprep.subr.bf16.mxu0 %v1529_v23  ;;  %v1307_v16 = vcombine.low %v1726_v12, %v1729_v13  ;;  %v919_v17 = vshrl.u32 %v1306_v14, 16 }
  0x1f   : > { %1437 = vmatprep.subr.bf16.mxu1 %v1530_v25  ;;  %1431 = vmatprep.mubr.msk.bf16.mxu0 %vm241_vm0, %v392_v39  ;;  %v714_v6 = vsel %vm697_vm5, %v705_v2, %v713_v4  ;;  %v1322_v39 = vcombine.low %v1722_v11, %v1726_v12 }
  0x20   : > { %1443 = vmatprep.mubr.msk.bf16.mxu1 %vm241_vm0, %v504_v47  ;;  %v927_v21 = vshrl.u32 %v1307_v16, 16  ;;  %v930_v22 = vshll.u32 %v1307_v16, 16  ;;  %v921_v8 = vrot.slane %v919_v17, 3 }
  0x21   : > { %1426 = vmatpush3.bf16.msra.mxu0 %v1529_v23  ;;  %v924_v23 = vrot.slane %v922_v18, 4 }
  0x22   : > { %1438 = vmatpush3.bf16.msra.mxu1 %v1530_v25  ;;  %1427 = vmatprep.subr.bf16.mxu0 %v1531_v29  ;;  %v811_v25 = vrot.slane %v1694_v53, 3  ;;  %v929_v26 = vrot.slane %v927_v21, 3  ;;  %v932_v27 = vrot.slane %v930_v22, 4 }
  0x23   : > { %1439 = vmatprep.subr.bf16.mxu1 %v1532_v30 }
  0x24   : > { %v933_v32 = vor.u32 %v932_v27, %v929_v26  ;;  %v812_v33 = vsel %vm809_vm6, %v810_v24, %v811_v25 }
  0x25   : > { %1428 = vmatpush3.bf16.msra.mxu0 %v1531_v29  ;;  %v1549_v29 = vld [vmem:[%s1797_s1 + $0xd0] sm:$0xff]  }
  0x26   : > { %1440 = vmatpush3.bf16.msra.mxu1 %v1532_v30  ;;  %1429 = vmatprep.subr.bf16.mxu0 %v1533_v35  ;;  %v1550_v30 = vld [vmem:[%s1797_s1 + $0xf0] sm:$0xff]  }
  0x27   : > { %1441 = vmatprep.subr.bf16.mxu1 %v1534_v36 }
  0x29   : > { %1430 = vmatpush3.bf16.msra.mxu0 %v1533_v35  ;;  %v1551_v35 = vld [vmem:[%s1797_s1 + $0xc8] sm:$0xff]  }
  0x2a   : > { %1442 = vmatpush3.bf16.msra.mxu1 %v1534_v36  ;;  %1447 = vmatprep.subr.bf16.mxu0 %v1536_v46  ;;  %v1552_v36 = vld [vmem:[%s1797_s1 + $0xe8] sm:$0xff]  }
  0x2b   : > { %1459 = vmatprep.subr.bf16.mxu1 %v1538_v48 }
  0x2c   : > { %1432 = vmatmul.mubr.msk.bf16.vlgmr.msra.gmra.mxu0 %vm241_vm0, %v391_v28  ;;  %v925_v28 = vor.u32 %v924_v23, %v921_v8 }
  0x2d   : > { %1444 = vmatmul.mubr.msk.bf16.vlgmr.msra.gmra.mxu1 %vm241_vm0, %v503_v45  ;;  %1448 = vmatpush3.bf16.msra.mxu0 %v1536_v46 }
  0x2e   : > { %1460 = vmatpush3.bf16.msra.mxu1 %v1538_v48  ;;  %1449 = vmatprep.subr.bf16.mxu0 %v1539_v51  ;;  %v934_v34 = vsel %vm917_vm7, %v925_v28, %v933_v32 }
  0x2f   : > { %1461 = vmatprep.subr.bf16.mxu1 %v1540_v54  ;;  %1455 = vmatprep.mubr.msk.bf16.mxu0 %vm241_vm0, %v602_v63 }
  0x30   : > { %1467 = vmatprep.mubr.msk.bf16.mxu1 %vm241_vm0, %v714_v6 }
  0x31   : > { %1450 = vmatpush3.bf16.msra.mxu0 %v1539_v51 }
  0x32   : > { %1462 = vmatpush3.bf16.msra.mxu1 %v1540_v54  ;;  %1451 = vmatprep.subr.bf16.mxu0 %v1541_v62 }
  0x33   : > { %1463 = vmatprep.subr.bf16.mxu1 %v1542_v3 }
  0x35   : > { %1452 = vmatpush3.bf16.msra.mxu0 %v1541_v62 }
  0x36   : > { %1464 = vmatpush3.bf16.msra.mxu1 %v1542_v3  ;;  %1453 = vmatprep.subr.bf16.mxu0 %v1543_v5 }
  0x37   : > { %1465 = vmatprep.subr.bf16.mxu1 %v1544_v9 }
  0x39   : > { %1454 = vmatpush3.bf16.msra.mxu0 %v1543_v5 }
  0x3a   : > { %1466 = vmatpush3.bf16.msra.mxu1 %v1544_v9  ;;  %1471 = vmatprep.subr.bf16.mxu0 %v1546_v19 }
  0x3b   : > { %1483 = vmatprep.subr.bf16.mxu1 %v1548_v20 }
  0x3c   : > { %1456 = vmatmul.mubr.msk.bf16.vlgmr.msra.gmra.mxu0 %vm241_vm0, %v601_v52 }
  0x3d   : > { %1468 = vmatmul.mubr.msk.bf16.vlgmr.msra.gmra.mxu1 %vm241_vm0, %v713_v4  ;;  %1472 = vmatpush3.bf16.msra.mxu0 %v1546_v19 }
  0x3e   : > { %1484 = vmatpush3.bf16.msra.mxu1 %v1548_v20  ;;  %1473 = vmatprep.subr.bf16.mxu0 %v1549_v29 }
  0x3f   : > { %1485 = vmatprep.subr.bf16.mxu1 %v1550_v30  ;;  %1479 = vmatprep.mubr.msk.bf16.mxu0 %vm241_vm0, %v812_v33 }
  0x40   : > { %1491 = vmatprep.mubr.msk.bf16.mxu1 %vm241_vm0, %v934_v34 }
  0x41   : > { %1474 = vmatpush3.bf16.msra.mxu0 %v1549_v29 }
  0x42   : > { %1486 = vmatpush3.bf16.msra.mxu1 %v1550_v30  ;;  %1475 = vmatprep.subr.bf16.mxu0 %v1551_v35  ;;  %v1330_v30 = vld [vmem:[%s1798_s2] ss:$0 sm:$0xff] }
  0x43   : > { %1487 = vmatprep.subr.bf16.mxu1 %v1552_v36 }
  0x45   : > { %1476 = vmatpush3.bf16.msra.mxu0 %v1551_v35 }
  0x46   : > { %1488 = vmatpush3.bf16.msra.mxu1 %v1552_v36  ;;  %1477 = vmatprep.subr.bf16.mxu0 %v1553_v31 }
  0x47   : > { %1489 = vmatprep.subr.bf16.mxu1 %v1554_v37 }
  0x49   : > { %1478 = vmatpush3.bf16.msra.mxu0 %v1553_v31 }
  0x4a   : > { %1490 = vmatpush3.bf16.msra.mxu1 %v1554_v37  ;;  %1495 = vmatprep.subr.bf16.mxu0 %v1556_v38 }
  0x4c   : > { %1480 = vmatmul.mubr.msk.bf16.vlgmr.msra.gmra.mxu0 %vm241_vm0, %v811_v25 }
  0x4d   : > { %1492 = vmatmul.mubr.msk.bf16.vlgmr.msra.gmra.mxu1 %vm241_vm0, %v933_v32  ;;  %1496 = vmatpush3.bf16.msra.mxu0 %v1556_v38 }
  0x4e   : > { %1503 = vmatprep.mubr.msk.bf16.mxu0 %vm241_vm0, %v1322_v39  ;;  %1497 = vmatprep.subr.bf16.mxu0 %v1559_v40 }
  0x51   : > { %1498 = vmatpush3.bf16.msra.mxu0 %v1559_v40 }
  0x52   : > { %1499 = vmatprep.subr.bf16.mxu0 %v1560_v41 }
  0x55   : > { %1500 = vmatpush3.bf16.msra.mxu0 %v1560_v41 }
  0x56   : > { %1501 = vmatprep.subr.bf16.mxu0 %v1561_v42 }
  0x59   : > { %1502 = vmatpush3.bf16.msra.mxu0 %v1561_v42 }
  0x5c   : > { %1504 = vmatmul.mubr.msk.bf16.vlgmr.msra.gmra.mxu0 %vm241_vm0, %v1323_v43 }
  0xdc   : > { %v1409_v44 = vpop.f32.mrf.mxu0 }
  0xdd   : > { %v1421_v45 = vpop.f32.mrf.mxu1 }
  0xde   : > { %v282_v46 = vpop.f32.mrf.mxu0  ;;  %v371_v2 = vadd.f32 %v1421_v45, %v1409_v44 }
  0xdf   : > { %v362_v47 = vpop.f32.mrf.mxu1 }
  0xe0   : > { %v1410_v48 = vpop.f32.mrf.mxu0  ;;  %v363_v5 = vadd.f32 %v362_v47, %v282_v46 }
  0xe1   : > { %v1422_v49 = vpop.f32.mrf.mxu1 }
  0xe2   : > { %v285_v50 = vpop.f32.mrf.mxu0 }
  0xe3   : > { %v365_v51 = vpop.f32.mrf.mxu1 }
  0xe4   : > { %v366_v13 = vadd.f32 %v365_v51, %v285_v50 }
  0xec   : > { %v1433_v52 = vpop.f32.mrf.mxu0 }
  0xed   : > { %v1445_v53 = vpop.f32.mrf.mxu1  ;;  %v473_v6 = vadd.f32 %v1433_v52, %v371_v2 }
  0xee   : > { %v457_v54 = vpop.f32.mrf.mxu0 }
  0xef   : > { %v569_v55 = vpop.f32.mrf.mxu1  ;;  %v471_v10 = vadd.f32 %v457_v54, %v363_v5  ;;  %v585_v14 = vadd.f32 %v1445_v53, %v473_v6 }
  0xf0   : > { %v1434_v56 = vpop.f32.mrf.mxu0 }
  0xf1   : > { %v1446_v57 = vpop.f32.mrf.mxu1  ;;  %v583_v17 = vadd.f32 %v569_v55, %v471_v10 }
  0xf2   : > { %v460_v58 = vpop.f32.mrf.mxu0 }
  0xf3   : > { %v572_v59 = vpop.f32.mrf.mxu1  ;;  %v472_v18 = vadd.f32 %v460_v58, %v366_v13 }
  0xf5   : > { %v584_v21 = vadd.f32 %v572_v59, %v472_v18 }
  0xfc   : > { %v1457_v60 = vpop.f32.mrf.mxu0 }
  0xfd   : > { %v1469_v61 = vpop.f32.mrf.mxu1  ;;  %v683_v19 = vadd.f32 %v1457_v60, %v585_v14 }
  0xfe   : > { %v667_v62 = vpop.f32.mrf.mxu0 }
  0xff   : > { %v779_v63 = vpop.f32.mrf.mxu1  ;;  %v681_v20 = vadd.f32 %v667_v62, %v583_v17  ;;  %v795_v22 = vadd.f32 %v1469_v61, %v683_v19 }
 0x100   : > { %v1458_v0 = vpop.f32.mrf.mxu0 }
 0x101   : > { %v1470_v1 = vpop.f32.mrf.mxu1  ;;  %v793_v8 = vadd.f32 %v779_v63, %v681_v20 }
 0x102   : > { %v670_v3 = vpop.f32.mrf.mxu0 }
 0x103   : > { %v782_v4 = vpop.f32.mrf.mxu1  ;;  %v682_v23 = vadd.f32 %v670_v3, %v584_v21 }
 0x105   : > { %v794_v27 = vadd.f32 %v782_v4, %v682_v23 }
 0x10c   : > { %v1481_v7 = vpop.f32.mrf.mxu0 }
 0x10d   : > { %v1493_v9 = vpop.f32.mrf.mxu1  ;;  %v893_v24 = vadd.f32 %v1481_v7, %v795_v22 }
 0x10e   : > { %v877_v11 = vpop.f32.mrf.mxu0 }
 0x10f   : > { %v999_v12 = vpop.f32.mrf.mxu1  ;;  %v891_v25 = vadd.f32 %v877_v11, %v793_v8  ;;  %v1015_v28 = vadd.f32 %v1493_v9, %v893_v24 }
 0x110   : > { %v1482_v15 = vpop.f32.mrf.mxu0 }
 0x111   : > { %v1494_v16 = vpop.f32.mrf.mxu1  ;;  %v1013_v32 = vadd.f32 %v999_v12, %v891_v25 }
 0x112   : > { %v880_v26 = vpop.f32.mrf.mxu0 }
 0x113   : > { %v892_v33 = vadd.f32 %v880_v26, %v794_v27  ;;  %v1002_v35 = vpop.f32.mrf.mxu1 }
 0x115   : > { %v1014_v39 = vadd.f32 %v1002_v35, %v892_v33 }
 0x11c   : > { %v1505_v29 = vpop.f32.mrf.mxu0 }
 0x11d   : > { %v1107_v34 = vadd.f32 %v1505_v29, %v1015_v28 }
 0x11e   : > { %v1091_v36 = vpop.f32.mrf.mxu0 }
 0x11f   : > { %v1117_v31 = vadd.f32 %v1330_v30, %v1107_v34  ;;  %v1105_v37 = vadd.f32 %v1091_v36, %v1013_v32 }
 0x120   : > { %v1506_v38 = vpop.f32.mrf.mxu0 }
 0x121   : > { %v1120_v40 = vmax.f32 %v1117_v31, 0.0  ;;  %v1115_v43 = vadd.f32 %v1330_v30, %v1105_v37 }
 0x122   : > { %v1094_v41 = vpop.f32.mrf.mxu0 }
 0x123   : > { %v1339_v42 = vpack.c.bf16 %v1120_v40, %v1120_v40  ;;  %v1106_v44 = vadd.f32 %v1094_v41, %v1014_v39  ;;  %v1118_v46 = vmax.f32 %v1115_v43, 0.0 }
 0x125   : > { %1136 = vst [vmem:[%s170_s20 + $0x8] sm:$0x1] %v1339_v42  ;;  %v1116_v45 = vadd.f32 %v1330_v30, %v1106_v44 }
 0x127   : > { %v1119_v47 = vmax.f32 %v1116_v45, 0.0 }
 0x129   : > { %v1343_v48 = vpack.c.bf16 %v1119_v47, %v1118_v46 }
 0x12b   : > { %1344 = vst [vmem:[%s170_s20] sm:$0xff] %v1343_v48  }
 0x12c PF: > { %s13_s12 = sadd.s32 1, %s1570_s12  }
 0x12d   : > { %p10_p4 = scmp.ge.s32.totalorder %s13_s12, 8  }
 0x12f   :  { %12 = sbr.rel (!%p10_p4) target bundleno = 1 (0x1), region = 70 }

// kernel: forward.15
= control target key start
LH: loop header
LB: loop body
LE: loop exit
PB: predicated region body
PF: predicated region fallthrough
CT: control target
= control target key end

     0   :  { %s2070_s12 = smov 0   ;;  %s2375_s0 = inlined_call_operand.vmem [shape: bf16[6,26,128], index: 0, kind: input, shape index: {}]   ;;  %s2376_s1 = inlined_call_operand.vmem [shape: bf16[9,128,128], index: 1, kind: input, shape index: {}]   ;;  %s2377_s2 = inlined_call_operand.vmem [shape: f32[1,128], index: 2, kind: input, shape index: {}]   ;;  %s2378_s3 = inlined_call_operand.vmem [shape: bf16[6,18,128], index: 3, kind: output, shape index: {}]  }
   0x1 LB: > { %s1444_s13 = sadd.s32 4294967295, %s2048_s12   ;;  %p1448_p0 = scmp.ge.s32.totalorder %s2048_s12, 1  ;;  %s2048_s12 = sphi %s2070_s12, %s13_s12  }
   0x2   : > { %p137_p1 = scmp.lt.s32.totalorder %s2048_s12, 7 }
   0x4   : > { %p138_p2 = pnand %p1448_p0, %p137_p1 }
   0x5   : > { %p161_p3 = scmp.lt.s32.totalorder (!%p138_p2), %s1444_s13, 5 }
   0x6   : > { %141 = sbr.rel (%p138_p2) target bundleno = 380 (0x17c), region = 32 }
   0xb   : > { %v1958_v0 = vld [vmem:[%s2376_s1 + $0x78] sm:$0xff]   ;;  %v1960_v2 = vld [vmem:[%s2376_s1 + $0x70] sm:$0xff]   ;;  %v1962_v4 = vld [vmem:[%s2376_s1 + $0x68] sm:$0xff]   ;;  %s2380_s13 = smov (!%p161_p3, %s1444_s13), 5  ;;  %vm217_vm0 = vsmask.f32 7424 }
   0xc   : > { %v1959_v1 = vld [vmem:[%s2376_s1 + $0x38] sm:$0xff]   ;;  %1769 = vmatprep.subr.bf16.mxu0 %v1958_v0  ;;  %v1961_v3 = vld [vmem:[%s2376_s1 + $0x30] sm:$0xff]   ;;  %v1963_v5 = vld [vmem:[%s2376_s1 + $0x28] sm:$0xff]   ;;  %s1670_s30 = sshll.u32 %s2380_s13, 4  ;;  %vm453_vm1 = vcmask 1046528   ;;  %vm719_vm3 = vcmask 1045504  }
   0xd   : > { %1789 = vmatprep.subr.bf16.mxu1 %v1959_v1  ;;  %1770 = vmatpush3.bf16.msra.mxu0 %v1958_v0  ;;  %v1964_v6 = vld [vmem:[%s2376_s1 + $0x60] sm:$0xff]   ;;  %v1966_v8 = vld [vmem:[%s2376_s1 + $0x58] sm:$0xff]   ;;  %s2114_s10 = scalar_lea.vmem %s2375_s0, %s1670_s30  ;;  %v1968_v10 = vld [vmem:[%s2376_s1 + $0x50] sm:$0xff]   ;;  %vm579_vm2 = vsmask.f32 6400  ;;  %vm985_vm5 = vcmask 1044480  }
   0xe   : > { %1790 = vmatpush3.bf16.msra.mxu1 %v1959_v1  ;;  %1771 = vmatprep.subr.bf16.mxu0 %v1960_v2  ;;  %v1965_v7 = vld [vmem:[%s2376_s1 + $0x20] sm:$0xff]   ;;  %v1967_v9 = vld [vmem:[%s2376_s1 + $0x18] sm:$0xff]   ;;  %v1969_v13 = vld [vmem:[%s2376_s1 + $0x10] sm:$0xff]   ;;  %vm845_vm4 = vsmask.f32 5376  ;;  %s1949_s16 = smul.u32 12, %s2380_s13 }
   0xf   : > { %1791 = vmatprep.subr.bf16.mxu1 %v1961_v3  ;;  %v172_v11 = vld [vmem:[%s2114_s10] sm:$0xf]  ;;  %v2121_v12 = vld [vmem:[%s2114_s10 + $0x4] sm:$0xf]  ;;  %v1970_v16 = vld [vmem:[%s2376_s1 + $0x48] sm:$0xff]  }
  0x10   : > { %v1468_v14 = vcombine.low %v172_v11, %v2121_v12  ;;  %v2128_v15 = vld [vmem:[%s2114_s10 + $0x8] ss:$0 sps:$4 sm:$0x33]   ;;  %v1972_v24 = vld [vmem:[%s2376_s1 + $0x40] sm:$0xff]   ;;  %v1977_v28 = vld [vmem:[%s2376_s1 + $0xb8] sm:$0xff]   ;;  %s170_s19 = scalar_lea.vmem %s2378_s3, %s1949_s16 }
  0x11   : > { %1772 = vmatpush3.bf16.msra.mxu0 %v1960_v2  ;;  %v1971_v17 = vld [vmem:[%s2376_s1 + $0x8] sm:$0xff]   ;;  %v226_v20 = vshll.u32 %v2128_v15, 16  ;;  %v1973_v25 = vld [vmem:[%s2376_s1] sm:$0xff]   ;;  %v230_v27 = vshrl.u32 %v2128_v15, 16  ;;  %v1978_v30 = vld [vmem:[%s2376_s1 + $0xf8] sm:$0xff]   ;;  %v455_v37 = vrot.slane %v2128_v15, 1 }
  0x12   : > { %1792 = vmatpush3.bf16.msra.mxu1 %v1961_v3  ;;  %1773 = vmatprep.subr.bf16.mxu0 %v1962_v4  ;;  %v219_v18 = vshrl.u32 %v1468_v14, 16  ;;  %v221_v19 = vshll.u32 %v1468_v14, 16  ;;  %v1976_v29 = vld [vmem:[%s2114_s10 + $0x8] ss:$0 sps:$4 sm:$0x11]   ;;  %v1979_v32 = vld [vmem:[%s2376_s1 + $0xb0] sm:$0xff]  }
  0x13   : > { %1793 = vmatprep.subr.bf16.mxu1 %v1963_v5  ;;  %1805 = vmatprep.mubr.bf16.mxu1 %v1468_v14  ;;  %v228_v22 = vrot.slane %v226_v20, 1  ;;  %v1980_v33 = vld [vmem:[%s2376_s1 + $0xf0] sm:$0xff]   ;;  %v432_v34 = vld [vmem:[%s2114_s10] sm:$0xe]  ;;  %v1981_v35 = vld [vmem:[%s2376_s1 + $0xa8] sm:$0xff]  }
  0x14   : > { %v223_v21 = vrot.slane %v221_v19, 1  ;;  %v1503_v36 = vcombine.low %v432_v34, %v2121_v12  ;;  %v1982_v38 = vld [vmem:[%s2376_s1 + $0xe8] sm:$0xff]   ;;  %v1983_v40 = vld [vmem:[%s2376_s1 + $0xa0] sm:$0xff]   ;;  %v1985_v54 = vld [vmem:[%s2376_s1 + $0x98] sm:$0xff]   ;;  %vm1121_vm6 = vsmask.f32 4352 }
  0x15   : > { %1774 = vmatpush3.bf16.msra.mxu0 %v1962_v4  ;;  %v232_v31 = vor.u32 %v230_v27, %v228_v22  ;;  %v2167_v39 = vld [vmem:[%s2114_s10 + $0x8] ss:$0 sps:$4 sm:$0x77]   ;;  %v1984_v44 = vld [vmem:[%s2376_s1 + $0xe0] sm:$0xff]   ;;  %v1986_v55 = vld [vmem:[%s2376_s1 + $0xd8] sm:$0xff]  }
  0x16   : > { %1794 = vmatpush3.bf16.msra.mxu1 %v1963_v5  ;;  %1775 = vmatprep.subr.bf16.mxu0 %v1964_v6  ;;  %v224_v23 = vor.u32 %v223_v21, %v219_v18  ;;  %v454_v41 = vrot.slane %v1503_v36, 1  ;;  %v581_v42 = vshrl.u32 %v1503_v36, 16  ;;  %v584_v43 = vshll.u32 %v1503_v36, 16  ;;  %v1987_v57 = vld [vmem:[%s2376_s1 + $0x90] sm:$0xff]   ;;  %v1989_v59 = vld [vmem:[%s2376_s1 + $0x88] sm:$0xff]   ;;  %v1991_v0 = vld [vmem:[%s2376_s1 + $0x80] sm:$0xff]  }
  0x17   : > { %1795 = vmatprep.subr.bf16.mxu1 %v1965_v7  ;;  %v589_v45 = vshrl.u32 %v2167_v39, 16  ;;  %v592_v46 = vshll.u32 %v2167_v39, 16  ;;  %v1988_v58 = vld [vmem:[%s2376_s1 + $0xd0] sm:$0xff]   ;;  %v1990_v60 = vld [vmem:[%s2376_s1 + $0xc8] sm:$0xff]   ;;  %v698_v61 = vld [vmem:[%s2114_s10] sm:$0xc] }
  0x18   : > { %v229_v26 = vsel %vm217_vm0, %v224_v23, %v228_v22  ;;  %v456_v47 = vsel %vm453_vm1, %v454_v41, %v455_v37  ;;  %v583_v48 = vrot.slane %v581_v42, 1  ;;  %v586_v49 = vrot.slane %v584_v43, 2  ;;  %v2200_v63 = vld [vmem:[%s2114_s10 + $0x8] ss:$0 sps:$4 sm:$0xff]   ;;  %v1992_v1 = vld [vmem:[%s2376_s1 + $0xc0] sm:$0xff]   ;;  %v1996_v11 = vld [vmem:[%s2376_s1 + $0x178] sm:$0xff]  }
  0x19   : > { %1776 = vmatpush3.bf16.msra.mxu0 %v1964_v6  ;;  %1785 = vmatprep.mubr.bf16.mxu0 %v229_v26  ;;  %v591_v50 = vrot.slane %v589_v45, 1  ;;  %v594_v51 = vrot.slane %v592_v46, 2  ;;  %v1553_v62 = vcombine.low %v698_v61, %v2121_v12  ;;  %v855_v4 = vshrl.u32 %v2200_v63, 16  ;;  %v1998_v19 = vld [vmem:[%s2376_s1 + $0x170] sm:$0xff]   ;;  %v1999_v22 = vld [vmem:[%s2376_s1 + $0x128] sm:$0xff]   ;;  %v2001_v23 = vld [vmem:[%s2376_s1 + $0x120] sm:$0xff]  }
  0x1a   : > { %1796 = vmatpush3.bf16.msra.mxu1 %v1965_v7  ;;  %1777 = vmatprep.subr.bf16.mxu0 %v1966_v8  ;;  %v587_v52 = vor.u32 %v586_v49, %v583_v48  ;;  %v858_v5 = vshll.u32 %v2200_v63, 16  ;;  %v721_v14 = vrot.slane %v2167_v39, 2  ;;  %v2000_v15 = vld [vmem:[%s2376_s1 + $0x168] sm:$0xff]   ;;  %v2003_v27 = vld [vmem:[%s2376_s1 + $0x118] sm:$0xff]   ;;  %v2009_v43 = vld [vmem:[%s2376_s1 + $0x100] sm:$0xff]  }
  0x1b   : > { %1797 = vmatprep.subr.bf16.mxu1 %v1967_v9  ;;  %v595_v53 = vor.u32 %v594_v51, %v591_v50  ;;  %v847_v2 = vshrl.u32 %v1553_v62, 16  ;;  %v850_v3 = vshll.u32 %v1553_v62, 16  ;;  %v2007_v36 = vld [vmem:[%s2376_s1 + $0x108] sm:$0xff]   ;;  %v2012_v49 = vld [vmem:[%s2376_s1 + $0x1b8] sm:$0xff]   ;;  %v2019_v39 = vld [vmem:[%s2376_s1 + $0x1a0] sm:$0xff]  }
  0x1c   : > { %v2014_v50 = vld [vmem:[%s2376_s1 + $0x1f8] sm:$0xff]   ;;  %v2020_v61 = vld [vmem:[%s2376_s1 + $0x1e0] sm:$0xff]  }
  0x1d   : > { %1778 = vmatpush3.bf16.msra.mxu0 %v1966_v8  ;;  %v596_v56 = vsel %vm579_vm2, %v587_v52, %v595_v53  ;;  %v849_v6 = vrot.slane %v847_v2, 2  ;;  %v852_v7 = vrot.slane %v850_v3, 3  ;;  %v857_v8 = vrot.slane %v855_v4, 2  ;;  %v2024_v2 = vld [vmem:[%s2376_s1 + $0x1d0] sm:$0xff]   ;;  %v2025_v3 = vld [vmem:[%s2376_s1 + $0x188] sm:$0xff]  }
  0x1e   : > { %1798 = vmatpush3.bf16.msra.mxu1 %v1967_v9  ;;  %1779 = vmatprep.subr.bf16.mxu0 %v1968_v10  ;;  %v860_v9 = vrot.slane %v858_v5, 3  ;;  %v987_v52 = vrot.slane %v2200_v63, 3  ;;  %v2026_v4 = vld [vmem:[%s2376_s1 + $0x1c8] sm:$0xff]   ;;  %v2027_v5 = vld [vmem:[%s2376_s1 + $0x180] sm:$0xff]   ;;  %v2036_v63 = vld [vmem:[%s2376_s1 + $0x218] sm:$0xff]  }
  0x1f   : > { %1799 = vmatprep.subr.bf16.mxu1 %v1969_v13 }
  0x20   : > { %v2220_v18 = vor.u32 %v860_v9, %v857_v8  ;;  %v2033_v8 = vld [vmem:[%s2376_s1 + $0x230] sm:$0xff]  }
  0x21   : > { %1780 = vmatpush3.bf16.msra.mxu0 %v1968_v10  ;;  %v1994_v10 = vld [vmem:[%s2376_s1 + $0x138] sm:$0xff]  }
  0x22   : > { %1800 = vmatpush3.bf16.msra.mxu1 %v1969_v13  ;;  %1781 = vmatprep.subr.bf16.mxu0 %v1970_v16  ;;  %v720_v13 = vrot.slane %v1553_v62, 2  ;;  %v2021_v62 = vld [vmem:[%s2376_s1 + $0x198] sm:$0xff]  }
  0x23   : > { %1801 = vmatprep.subr.bf16.mxu1 %v1971_v17 }
  0x24   : > { %v722_v20 = vsel %vm719_vm3, %v720_v13, %v721_v14  ;;  %v2037_v13 = vld [vmem:[%s2376_s1 + $0x210] sm:$0xff]  }
  0x25   : > { %1782 = vmatpush3.bf16.msra.mxu0 %v1970_v16  ;;  %v1997_v16 = vld [vmem:[%s2376_s1 + $0x130] sm:$0xff]  }
  0x26   : > { %1802 = vmatpush3.bf16.msra.mxu1 %v1971_v17  ;;  %1783 = vmatprep.subr.bf16.mxu0 %v1972_v24  ;;  %v853_v17 = vor.u32 %v852_v7, %v849_v6  ;;  %v2028_v6 = vld [vmem:[%s2376_s1 + $0x1c0] sm:$0xff]   ;;  %v2030_v7 = vld [vmem:[%s2376_s1 + $0x238] sm:$0xff]  }
  0x27   : > { %1803 = vmatprep.subr.bf16.mxu1 %v1973_v25 }
  0x28   : > { %v862_v21 = vsel %vm845_vm4, %v853_v17, %v2220_v18 }
  0x29   : > { %1784 = vmatpush3.bf16.msra.mxu0 %v1972_v24  ;;  %v964_v24 = vld [vmem:[%s2114_s10] sm:$0x8] }
  0x2a   : > { %1804 = vmatpush3.bf16.msra.mxu1 %v1973_v25  ;;  %1809 = vmatprep.subr.bf16.mxu0 %v1977_v28  ;;  %v2002_v25 = vld [vmem:[%s2376_s1 + $0x160] sm:$0xff]   ;;  %v1603_v26 = vcombine.low %v964_v24, %v2121_v12  ;;  %v2258_v12 = vld [vmem:[%s2114_s10 + $0x8] sm:$0xf] }
  0x2b   : > { %1829 = vmatprep.subr.bf16.mxu1 %v1978_v30 }
  0x2c   : > { %1786 = vmatmul.mubr.bf16.vlgmr.msra.gmra.mxu0 %v232_v31  ;;  %v2255_v31 = vld [vmem:[%s2114_s10 + $0x4] sm:$0xf]  ;;  %v986_v51 = vrot.slane %v1603_v26, 3 }
  0x2d   : > { %1806 = vmatmul.mubr.bf16.vlgmr.msra.gmra.mxu1 %v1976_v29  ;;  %1810 = vmatpush3.bf16.msra.mxu0 %v1977_v28  ;;  %v2004_v28 = vld [vmem:[%s2376_s1 + $0x158] sm:$0xff]   ;;  %v2005_v29 = vld [vmem:[%s2376_s1 + $0x110] sm:$0xff]   ;;  %v1654_v9 = vcombine.low %v2255_v31, %v2258_v12 }
  0x2e   : > { %1830 = vmatpush3.bf16.msra.mxu1 %v1978_v30  ;;  %1811 = vmatprep.subr.bf16.mxu0 %v1979_v32  ;;  %v1090_v30 = vld [vmem:[%s2114_s10] sm:$0x8] }
  0x2f   : > { %1831 = vmatprep.subr.bf16.mxu1 %v1980_v33  ;;  %1825 = vmatprep.mubr.bf16.mxu0 %v456_v47  ;;  %v1628_v34 = vcombine.low %v1090_v30, %v2255_v31 }
  0x30   : > { %1845 = vmatprep.mubr.bf16.mxu1 %v596_v56  ;;  %v2016_v56 = vld [vmem:[%s2376_s1 + $0x1f0] sm:$0xff]  }
  0x31   : > { %1812 = vmatpush3.bf16.msra.mxu0 %v1979_v32  ;;  %v2261_v32 = vld [vmem:[%s2114_s10 + $0xc] sm:$0x1] }
  0x32   : > { %1832 = vmatpush3.bf16.msra.mxu1 %v1980_v33  ;;  %1813 = vmatprep.subr.bf16.mxu0 %v1981_v35  ;;  %v2006_v33 = vld [vmem:[%s2376_s1 + $0x150] sm:$0xff]   ;;  %v1655_v17 = vcombine.low %v2261_v32, %v2261_v32 }
  0x33   : > { %1833 = vmatprep.subr.bf16.mxu1 %v1982_v38 }
  0x35   : > { %1814 = vmatpush3.bf16.msra.mxu0 %v1981_v35  ;;  %v1629_v35 = vcombine.low %v2258_v12, %v2261_v32 }
  0x36   : > { %1834 = vmatpush3.bf16.msra.mxu1 %v1982_v38  ;;  %1815 = vmatprep.subr.bf16.mxu0 %v1983_v40  ;;  %v1123_v38 = vshrl.u32 %v1628_v34, 16 }
  0x37   : > { %1835 = vmatprep.subr.bf16.mxu1 %v1984_v44  ;;  %v1131_v41 = vshrl.u32 %v1629_v35, 16  ;;  %v1134_v42 = vshll.u32 %v1629_v35, 16 }
  0x38   : > { %v1125_v45 = vrot.slane %v1123_v38, 3 }
  0x39   : > { %1816 = vmatpush3.bf16.msra.mxu0 %v1983_v40  ;;  %v1126_v40 = vshll.u32 %v1628_v34, 16  ;;  %v1133_v47 = vrot.slane %v1131_v41, 3  ;;  %v1136_v48 = vrot.slane %v1134_v42, 4 }
  0x3a   : > { %1836 = vmatpush3.bf16.msra.mxu1 %v1984_v44  ;;  %1817 = vmatprep.subr.bf16.mxu0 %v1985_v54  ;;  %v2010_v44 = vld [vmem:[%s2376_s1 + $0x140] sm:$0xff]  }
  0x3b   : > { %1837 = vmatprep.subr.bf16.mxu1 %v1986_v55  ;;  %v1128_v46 = vrot.slane %v1126_v40, 4 }
  0x3d   : > { %1818 = vmatpush3.bf16.msra.mxu0 %v1985_v54  ;;  %v1137_v54 = vor.u32 %v1136_v48, %v1133_v47 }
  0x3e   : > { %1838 = vmatpush3.bf16.msra.mxu1 %v1986_v55  ;;  %1819 = vmatprep.subr.bf16.mxu0 %v1987_v57  ;;  %v2015_v55 = vld [vmem:[%s2376_s1 + $0x1b0] sm:$0xff]  }
  0x3f   : > { %1839 = vmatprep.subr.bf16.mxu1 %v1988_v58 }
  0x41   : > { %1820 = vmatpush3.bf16.msra.mxu0 %v1987_v57  ;;  %v988_v57 = vsel %vm985_vm5, %v986_v51, %v987_v52 }
  0x42   : > { %1840 = vmatpush3.bf16.msra.mxu1 %v1988_v58  ;;  %1821 = vmatprep.subr.bf16.mxu0 %v1989_v59 }
  0x43   : > { %1841 = vmatprep.subr.bf16.mxu1 %v1990_v60 }
  0x45   : > { %1822 = vmatpush3.bf16.msra.mxu0 %v1989_v59  ;;  %v2017_v59 = vld [vmem:[%s2376_s1 + $0x1a8] sm:$0xff]  }
  0x46   : > { %1842 = vmatpush3.bf16.msra.mxu1 %v1990_v60  ;;  %1823 = vmatprep.subr.bf16.mxu0 %v1991_v0  ;;  %v2018_v60 = vld [vmem:[%s2376_s1 + $0x1e8] sm:$0xff]  }
  0x47   : > { %1843 = vmatprep.subr.bf16.mxu1 %v1992_v1 }
  0x49   : > { %1824 = vmatpush3.bf16.msra.mxu0 %v1991_v0  ;;  %v2022_v0 = vld [vmem:[%s2376_s1 + $0x1d8] sm:$0xff]  }
  0x4a   : > { %1844 = vmatpush3.bf16.msra.mxu1 %v1992_v1  ;;  %1849 = vmatprep.subr.bf16.mxu0 %v1994_v10  ;;  %v2023_v1 = vld [vmem:[%s2376_s1 + $0x190] sm:$0xff]  }
  0x4b   : > { %1869 = vmatprep.subr.bf16.mxu1 %v1996_v11 }
  0x4c   : > { %1826 = vmatmul.mubr.bf16.vlgmr.msra.gmra.mxu0 %v455_v37  ;;  %v2008_v37 = vld [vmem:[%s2376_s1 + $0x148] sm:$0xff]  }
  0x4d   : > { %1850 = vmatpush3.bf16.msra.mxu0 %v1994_v10  ;;  %1846 = vmatmul.mubr.bf16.vlgmr.msra.gmra.mxu1 %v595_v53  ;;  %v1129_v53 = vor.u32 %v1128_v46, %v1125_v45  ;;  %v2034_v10 = vld [vmem:[%s2376_s1 + $0x228] sm:$0xff]  }
  0x4e   : > { %1870 = vmatpush3.bf16.msra.mxu1 %v1996_v11  ;;  %1851 = vmatprep.subr.bf16.mxu0 %v1997_v16  ;;  %v2035_v11 = vld [vmem:[%s2376_s1 + $0x220] sm:$0xff]  }
  0x4f   : > { %1871 = vmatprep.subr.bf16.mxu1 %v1998_v19  ;;  %1865 = vmatprep.mubr.bf16.mxu0 %v722_v20  ;;  %v1138_v58 = vsel %vm1121_vm6, %v1129_v53, %v1137_v54 }
  0x50   : > { %1885 = vmatprep.mubr.bf16.mxu1 %v862_v21 }
  0x51   : > { %1852 = vmatpush3.bf16.msra.mxu0 %v1997_v16  ;;  %v2039_v16 = vld [vmem:[%s2376_s1 + $0x200] sm:$0xff]  }
  0x52   : > { %1872 = vmatpush3.bf16.msra.mxu1 %v1998_v19  ;;  %1853 = vmatprep.subr.bf16.mxu0 %v1999_v22 }
  0x53   : > { %1873 = vmatprep.subr.bf16.mxu1 %v2000_v15 }
  0x55   : > { %1854 = vmatpush3.bf16.msra.mxu0 %v1999_v22 }
  0x56   : > { %1874 = vmatpush3.bf16.msra.mxu1 %v2000_v15  ;;  %1855 = vmatprep.subr.bf16.mxu0 %v2001_v23 }
  0x57   : > { %1875 = vmatprep.subr.bf16.mxu1 %v2002_v25 }
  0x59   : > { %1856 = vmatpush3.bf16.msra.mxu0 %v2001_v23 }
  0x5a   : > { %1876 = vmatpush3.bf16.msra.mxu1 %v2002_v25  ;;  %1857 = vmatprep.subr.bf16.mxu0 %v2003_v27 }
  0x5b   : > { %1877 = vmatprep.subr.bf16.mxu1 %v2004_v28 }
  0x5d   : > { %1858 = vmatpush3.bf16.msra.mxu0 %v2003_v27 }
  0x5e   : > { %1878 = vmatpush3.bf16.msra.mxu1 %v2004_v28  ;;  %1859 = vmatprep.subr.bf16.mxu0 %v2005_v29 }
  0x5f   : > { %1879 = vmatprep.subr.bf16.mxu1 %v2006_v33 }
  0x61   : > { %1860 = vmatpush3.bf16.msra.mxu0 %v2005_v29 }
  0x62   : > { %1880 = vmatpush3.bf16.msra.mxu1 %v2006_v33  ;;  %1861 = vmatprep.subr.bf16.mxu0 %v2007_v36 }
  0x63   : > { %1881 = vmatprep.subr.bf16.mxu1 %v2008_v37 }
  0x65   : > { %1862 = vmatpush3.bf16.msra.mxu0 %v2007_v36 }
  0x66   : > { %1882 = vmatpush3.bf16.msra.mxu1 %v2008_v37  ;;  %1863 = vmatprep.subr.bf16.mxu0 %v2009_v43 }
  0x67   : > { %1883 = vmatprep.subr.bf16.mxu1 %v2010_v44 }
  0x69   : > { %1864 = vmatpush3.bf16.msra.mxu0 %v2009_v43 }
  0x6a   : > { %1884 = vmatpush3.bf16.msra.mxu1 %v2010_v44  ;;  %1889 = vmatprep.subr.bf16.mxu0 %v2012_v49 }
  0x6b   : > { %1909 = vmatprep.subr.bf16.mxu1 %v2014_v50 }
  0x6c   : > { %1866 = vmatmul.mubr.bf16.vlgmr.msra.gmra.mxu0 %v721_v14  ;;  %v2038_v14 = vld [vmem:[%s2376_s1 + $0x208] sm:$0xff]  }
  0x6d   : > { %1890 = vmatpush3.bf16.msra.mxu0 %v2012_v49  ;;  %1886 = vmatmul.mubr.bf16.vlgmr.msra.gmra.mxu1 %v2220_v18 }
  0x6e   : > { %1910 = vmatpush3.bf16.msra.mxu1 %v2014_v50  ;;  %1891 = vmatprep.subr.bf16.mxu0 %v2015_v55 }
  0x6f   : > { %1911 = vmatprep.subr.bf16.mxu1 %v2016_v56  ;;  %1905 = vmatprep.mubr.bf16.mxu0 %v988_v57 }
  0x70   : > { %1925 = vmatprep.mubr.bf16.mxu1 %v1138_v58 }
  0x71   : > { %1892 = vmatpush3.bf16.msra.mxu0 %v2015_v55 }
  0x72   : > { %1912 = vmatpush3.bf16.msra.mxu1 %v2016_v56  ;;  %1893 = vmatprep.subr.bf16.mxu0 %v2017_v59 }
  0x73   : > { %1913 = vmatprep.subr.bf16.mxu1 %v2018_v60 }
  0x75   : > { %1894 = vmatpush3.bf16.msra.mxu0 %v2017_v59 }
  0x76   : > { %1914 = vmatpush3.bf16.msra.mxu1 %v2018_v60  ;;  %1895 = vmatprep.subr.bf16.mxu0 %v2019_v39 }
  0x77   : > { %1915 = vmatprep.subr.bf16.mxu1 %v2020_v61 }
  0x79   : > { %1896 = vmatpush3.bf16.msra.mxu0 %v2019_v39 }
  0x7a   : > { %1916 = vmatpush3.bf16.msra.mxu1 %v2020_v61  ;;  %1897 = vmatprep.subr.bf16.mxu0 %v2021_v62 }
  0x7b   : > { %1917 = vmatprep.subr.bf16.mxu1 %v2022_v0 }
  0x7d   : > { %1898 = vmatpush3.bf16.msra.mxu0 %v2021_v62 }
  0x7e   : > { %1918 = vmatpush3.bf16.msra.mxu1 %v2022_v0  ;;  %1899 = vmatprep.subr.bf16.mxu0 %v2023_v1 }
  0x7f   : > { %1919 = vmatprep.subr.bf16.mxu1 %v2024_v2 }
  0x81   : > { %1900 = vmatpush3.bf16.msra.mxu0 %v2023_v1 }
  0x82   : > { %1920 = vmatpush3.bf16.msra.mxu1 %v2024_v2  ;;  %1901 = vmatprep.subr.bf16.mxu0 %v2025_v3 }
  0x83   : > { %1921 = vmatprep.subr.bf16.mxu1 %v2026_v4 }
  0x85   : > { %1902 = vmatpush3.bf16.msra.mxu0 %v2025_v3  ;;  %v1664_v3 = vld [vmem:[%s2377_s2] ss:$0 sm:$0xff] }
  0x86   : > { %1922 = vmatpush3.bf16.msra.mxu1 %v2026_v4  ;;  %1903 = vmatprep.subr.bf16.mxu0 %v2027_v5 }
  0x87   : > { %1923 = vmatprep.subr.bf16.mxu1 %v2028_v6 }
  0x89   : > { %1904 = vmatpush3.bf16.msra.mxu0 %v2027_v5 }
  0x8a   : > { %1924 = vmatpush3.bf16.msra.mxu1 %v2028_v6  ;;  %1929 = vmatprep.subr.bf16.mxu0 %v2030_v7 }
  0x8c   : > { %1906 = vmatmul.mubr.bf16.vlgmr.msra.gmra.mxu0 %v987_v52 }
  0x8d   : > { %1930 = vmatpush3.bf16.msra.mxu0 %v2030_v7  ;;  %1926 = vmatmul.mubr.bf16.vlgmr.msra.gmra.mxu1 %v1137_v54 }
  0x8e   : > { %1931 = vmatprep.subr.bf16.mxu0 %v2033_v8  ;;  %1945 = vmatprep.mubr.bf16.mxu0 %v1654_v9 }
  0x91   : > { %1932 = vmatpush3.bf16.msra.mxu0 %v2033_v8 }
  0x92   : > { %1933 = vmatprep.subr.bf16.mxu0 %v2034_v10 }
  0x95   : > { %1934 = vmatpush3.bf16.msra.mxu0 %v2034_v10 }
  0x96   : > { %1935 = vmatprep.subr.bf16.mxu0 %v2035_v11 }
  0x99   : > { %1936 = vmatpush3.bf16.msra.mxu0 %v2035_v11 }
  0x9a   : > { %1937 = vmatprep.subr.bf16.mxu0 %v2036_v63 }
  0x9d   : > { %1938 = vmatpush3.bf16.msra.mxu0 %v2036_v63 }
  0x9e   : > { %1939 = vmatprep.subr.bf16.mxu0 %v2037_v13 }
  0xa1   : > { %1940 = vmatpush3.bf16.msra.mxu0 %v2037_v13 }
  0xa2   : > { %1941 = vmatprep.subr.bf16.mxu0 %v2038_v14 }
  0xa5   : > { %1942 = vmatpush3.bf16.msra.mxu0 %v2038_v14 }
  0xa6   : > { %1943 = vmatprep.subr.bf16.mxu0 %v2039_v16 }
  0xa9   : > { %1944 = vmatpush3.bf16.msra.mxu0 %v2039_v16 }
  0xac   : > { %1946 = vmatmul.mubr.bf16.vlgmr.msra.gmra.mxu0 %v1655_v17 }
  0xec   : > { %v1787_v18 = vpop.f32.mrf.mxu0 }
  0xed   : > { %v1807_v19 = vpop.f32.mrf.mxu1 }
  0xee   : > { %v427_v20 = vadd.f32 %v1807_v19, %v1787_v18  ;;  %v317_v21 = vpop.f32.mrf.mxu0 }
  0xef   : > { %v418_v22 = vpop.f32.mrf.mxu1 }
  0xf0   : > { %v419_v15 = vadd.f32 %v418_v22, %v317_v21  ;;  %v1788_v23 = vpop.f32.mrf.mxu0 }
  0xf1   : > { %v1808_v24 = vpop.f32.mrf.mxu1 }
  0xf2   : > { %v320_v25 = vpop.f32.mrf.mxu0 }
  0xf3   : > { %v421_v26 = vpop.f32.mrf.mxu1 }
  0xf4   : > { %v422_v27 = vadd.f32 %v421_v26, %v320_v25 }
 0x10c   : > { %v1827_v28 = vpop.f32.mrf.mxu0 }
 0x10d   : > { %v557_v29 = vadd.f32 %v1827_v28, %v427_v20  ;;  %v1847_v30 = vpop.f32.mrf.mxu1 }
 0x10e   : > { %v541_v31 = vpop.f32.mrf.mxu0 }
 0x10f   : > { %v555_v12 = vadd.f32 %v541_v31, %v419_v15  ;;  %v697_v33 = vadd.f32 %v1847_v30, %v557_v29  ;;  %v681_v32 = vpop.f32.mrf.mxu1 }
 0x110   : > { %v1828_v34 = vpop.f32.mrf.mxu0 }
 0x111   : > { %v695_v35 = vadd.f32 %v681_v32, %v555_v12  ;;  %v1848_v36 = vpop.f32.mrf.mxu1 }
 0x112   : > { %v544_v37 = vpop.f32.mrf.mxu0 }
 0x113   : > { %v684_v38 = vpop.f32.mrf.mxu1  ;;  %v556_v54 = vadd.f32 %v544_v37, %v422_v27 }
 0x115   : > { %v696_v57 = vadd.f32 %v684_v38, %v556_v54 }
 0x12c   : > { %v1867_v40 = vpop.f32.mrf.mxu0 }
 0x12d   : > { %v1887_v41 = vpop.f32.mrf.mxu1  ;;  %v823_v55 = vadd.f32 %v1867_v40, %v697_v33 }
 0x12e   : > { %v807_v42 = vpop.f32.mrf.mxu0 }
 0x12f   : > { %v947_v43 = vpop.f32.mrf.mxu1  ;;  %v821_v56 = vadd.f32 %v807_v42, %v695_v35  ;;  %v963_v58 = vadd.f32 %v1887_v41, %v823_v55 }
 0x130   : > { %v1868_v44 = vpop.f32.mrf.mxu0 }
 0x131   : > { %v1888_v45 = vpop.f32.mrf.mxu1  ;;  %v961_v59 = vadd.f32 %v947_v43, %v821_v56 }
 0x132   : > { %v810_v46 = vpop.f32.mrf.mxu0 }
 0x133   : > { %v950_v47 = vpop.f32.mrf.mxu1  ;;  %v822_v60 = vadd.f32 %v810_v46, %v696_v57 }
 0x135   : > { %v962_v0 = vadd.f32 %v950_v47, %v822_v60 }
 0x14c   : > { %v1907_v48 = vpop.f32.mrf.mxu0 }
 0x14d   : > { %v1927_v49 = vpop.f32.mrf.mxu1  ;;  %v1089_v39 = vadd.f32 %v1907_v48, %v963_v58 }
 0x14e   : > { %v1073_v50 = vpop.f32.mrf.mxu0 }
 0x14f   : > { %v1223_v51 = vpop.f32.mrf.mxu1  ;;  %v1087_v61 = vadd.f32 %v1073_v50, %v961_v59  ;;  %v1239_v1 = vadd.f32 %v1927_v49, %v1089_v39 }
 0x150   : > { %v1908_v52 = vpop.f32.mrf.mxu0 }
 0x151   : > { %v1928_v53 = vpop.f32.mrf.mxu1  ;;  %v1237_v4 = vadd.f32 %v1223_v51, %v1087_v61 }
 0x152   : > { %v1076_v62 = vpop.f32.mrf.mxu0 }
 0x153   : > { %v1088_v5 = vadd.f32 %v1076_v62, %v962_v0  ;;  %v1226_v7 = vpop.f32.mrf.mxu1 }
 0x155   : > { %v1238_v63 = vadd.f32 %v1226_v7, %v1088_v5 }
 0x16c   : > { %v1947_v2 = vpop.f32.mrf.mxu0 }
 0x16d   : > { %v1359_v6 = vadd.f32 %v1947_v2, %v1239_v1 }
 0x16e   : > { %v1343_v8 = vpop.f32.mrf.mxu0 }
 0x16f   : > { %v1369_v9 = vadd.f32 %v1664_v3, %v1359_v6  ;;  %v1357_v10 = vadd.f32 %v1343_v8, %v1237_v4 }
 0x170   : > { %v1948_v11 = vpop.f32.mrf.mxu0 }
 0x171   : > { %v1372_v13 = vmax.f32 %v1369_v9, 0.0  ;;  %v1367_v17 = vadd.f32 %v1664_v3, %v1357_v10 }
 0x172   : > { %v1346_v14 = vpop.f32.mrf.mxu0 }
 0x173   : > { %v1673_v16 = vpack.c.bf16 %v1372_v13, %v1372_v13  ;;  %v1358_v18 = vadd.f32 %v1346_v14, %v1238_v63  ;;  %v1370_v20 = vmax.f32 %v1367_v17, 0.0 }
 0x175   : > { %1388 = vst [vmem:[%s170_s19 + $0x8] sm:$0x1] %v1673_v16  ;;  %v1368_v19 = vadd.f32 %v1664_v3, %v1358_v18 }
 0x177   : > { %v1371_v21 = vmax.f32 %v1368_v19, 0.0 }
 0x179   : > { %v1677_v22 = vpack.c.bf16 %v1371_v21, %v1370_v20 }
 0x17b   : > { %1678 = vst [vmem:[%s170_s19] sm:$0xff] %v1677_v22  }
 0x17c PF: > { %s13_s12 = sadd.s32 1, %s2048_s12  }
 0x17d   : > { %p10_p4 = scmp.ge.s32.totalorder %s13_s12, 8  }
 0x17f   :  { %12 = sbr.rel (!%p10_p4) target bundleno = 1 (0x1), region = 70 }

// kernel: forward.13
= control target key start
LH: loop header
LB: loop body
LE: loop exit
PB: predicated region body
PF: predicated region fallthrough
CT: control target
= control target key end

     0   :  { %vm2493_vm0 = vcmask 1041409   ;;  %vm2496_vm1 = vcmask 1042434   ;;  %vm2499_vm2 = vcmask 1043459   ;;  %vm2502_vm3 = vcmask 1044484   ;;  %s6396_s0 = inlined_call_operand.vmem [shape: bf16[108,3,64], index: 0, kind: input, shape index: {}]   ;;  %s6397_s1 = inlined_call_operand.vmem [shape: bf16[108,64], index: 1, kind: output, shape index: {}]  }
   0x1   :  { %v2966_v0 = vld [vmem:[%s6396_s0] sm:$0x1]  ;;  %v2971_v1 = vld [vmem:[%s6396_s0 + $0x2] sm:$0x1]  ;;  %v2976_v2 = vld [vmem:[%s6396_s0 + $0x4] sm:$0x1] }
   0x2   :  { %v2981_v3 = vld [vmem:[%s6396_s0 + $0x6] sm:$0x1]  ;;  %v2986_v4 = vld [vmem:[%s6396_s0 + $0x8] sm:$0x1]  ;;  %v2991_v5 = vld [vmem:[%s6396_s0 + $0xa] sm:$0x1] }
   0x3   :  { %v2996_v6 = vld [vmem:[%s6396_s0 + $0xc] sm:$0x1]  ;;  %v3001_v7 = vld [vmem:[%s6396_s0 + $0xe] sm:$0x1]  ;;  %v3006_v8 = vld [vmem:[%s6396_s0 + $0x10] sm:$0x1] }
   0x4   :  { %v3011_v9 = vld [vmem:[%s6396_s0 + $0x12] sm:$0x1]  ;;  %v3016_v10 = vld [vmem:[%s6396_s0 + $0x14] sm:$0x1]  ;;  %v3021_v11 = vld [vmem:[%s6396_s0 + $0x16] sm:$0x1] }
   0x5   :  { %v3026_v12 = vld [vmem:[%s6396_s0 + $0x18] sm:$0x1]  ;;  %v3031_v13 = vld [vmem:[%s6396_s0 + $0x1a] sm:$0x1]  ;;  %v3036_v14 = vld [vmem:[%s6396_s0 + $0x1c] sm:$0x1] }
   0x6   :  { %v3041_v15 = vld [vmem:[%s6396_s0 + $0x1e] sm:$0x1]  ;;  %v3046_v16 = vld [vmem:[%s6396_s0 + $0x20] sm:$0x1]  ;;  %v3051_v17 = vld [vmem:[%s6396_s0 + $0x22] sm:$0x1] }
   0x7   :  { %v3056_v18 = vld [vmem:[%s6396_s0 + $0x24] sm:$0x1]  ;;  %v3061_v19 = vld [vmem:[%s6396_s0 + $0x26] sm:$0x1]  ;;  %v3066_v20 = vld [vmem:[%s6396_s0 + $0x28] sm:$0x1] }
   0x8   :  { %v3072_v23 = vld [vmem:[%s6396_s0 + $0x2a] sm:$0x1]  ;;  %v3077_v24 = vld [vmem:[%s6396_s0 + $0x2c] sm:$0x1]  ;;  %v3082_v25 = vld [vmem:[%s6396_s0 + $0x2e] sm:$0x1] }
   0x9   :  { %v3087_v26 = vld [vmem:[%s6396_s0 + $0x30] sm:$0x1]  ;;  %v3096_v31 = vld [vmem:[%s6396_s0 + $0x32] sm:$0x1]  ;;  %v3101_v32 = vld [vmem:[%s6396_s0 + $0x34] sm:$0x1] }
   0xa   :  { %v3106_v33 = vld [vmem:[%s6396_s0 + $0x36] sm:$0x1]  ;;  %v3111_v34 = vld [vmem:[%s6396_s0 + $0x38] sm:$0x1]  ;;  %v3120_v39 = vld [vmem:[%s6396_s0 + $0x3a] sm:$0x1] }
   0xb   :  { %v3125_v40 = vld [vmem:[%s6396_s0 + $0x3c] sm:$0x1]  ;;  %v3130_v41 = vld [vmem:[%s6396_s0 + $0x3e] sm:$0x1]  ;;  %v3135_v42 = vld [vmem:[%s6396_s0 + $0x40] sm:$0x1] }
   0xc   :  { %6642 = vst [vmem:[#allocation2_spill] sm:$0xff] %v3130_v41  ;;  %6643 = vst [vmem:[#allocation3_spill] sm:$0xff] %v3135_v42  ;;  %v3144_v47 = vld [vmem:[%s6396_s0 + $0x42] sm:$0x1]  ;;  %v3149_v48 = vld [vmem:[%s6396_s0 + $0x44] sm:$0x1] }
   0xd   :  { %6644 = vst [vmem:[#allocation4_spill] sm:$0xff] %v3144_v47  ;;  %6645 = vst [vmem:[#allocation5_spill] sm:$0xff] %v3149_v48  ;;  %v3154_v49 = vld [vmem:[%s6396_s0 + $0x46] sm:$0x1]  ;;  %v3159_v50 = vld [vmem:[%s6396_s0 + $0x48] sm:$0x1] }
   0xe   :  { %6646 = vst [vmem:[#allocation6_spill] sm:$0xff] %v3154_v49  ;;  %6647 = vst [vmem:[#allocation7_spill] sm:$0xff] %v3159_v50  ;;  %v3168_v55 = vld [vmem:[%s6396_s0 + $0x4a] sm:$0x1]  ;;  %v3173_v56 = vld [vmem:[%s6396_s0 + $0x4c] sm:$0x1] }
   0xf   :  { %6648 = vst [vmem:[#allocation8_spill] sm:$0xff] %v3168_v55  ;;  %6649 = vst [vmem:[#allocation9_spill] sm:$0xff] %v3173_v56  ;;  %v3178_v57 = vld [vmem:[%s6396_s0 + $0x4e] sm:$0x1]  ;;  %v3183_v58 = vld [vmem:[%s6396_s0 + $0x50] sm:$0x1] }
  0x10   :  { %6650 = vst [vmem:[#allocation10_spill] sm:$0xff] %v3178_v57  ;;  %6651 = vst [vmem:[#allocation11_spill] sm:$0xff] %v3183_v58  ;;  %v3192_v63 = vld [vmem:[%s6396_s0 + $0x52] sm:$0x1]  ;;  %v3197_v22 = vld [vmem:[%s6396_s0 + $0x54] sm:$0x1] }
  0x11   :  { %6652 = vst [vmem:[#allocation12_spill] sm:$0xff] %v3192_v63  ;;  %6653 = vst [vmem:[#allocation13_spill] sm:$0xff] %v3197_v22  ;;  %v3202_v59 = vld [vmem:[%s6396_s0 + $0x56] sm:$0x1]  ;;  %v3207_v61 = vld [vmem:[%s6396_s0 + $0x58] sm:$0x1] }
  0x12   :  { %6654 = vst [vmem:[#allocation14_spill] sm:$0xff] %v3202_v59  ;;  %6655 = vst [vmem:[#allocation15_spill] sm:$0xff] %v3207_v61  ;;  %v3216_v52 = vld [vmem:[%s6396_s0 + $0x5a] sm:$0x1]  ;;  %v3221_v51 = vld [vmem:[%s6396_s0 + $0x5c] sm:$0x1] }
  0x13   :  { %6656 = vst [vmem:[#allocation16_spill] sm:$0xff] %v3216_v52  ;;  %6657 = vst [vmem:[#allocation17_spill] sm:$0xff] %v3221_v51  ;;  %v3226_v62 = vld [vmem:[%s6396_s0 + $0x5e] sm:$0x1]  ;;  %v3231_v54 = vld [vmem:[%s6396_s0 + $0x60] sm:$0x1] }
  0x14   :  { %6658 = vst [vmem:[#allocation18_spill] sm:$0xff] %v3226_v62  ;;  %6659 = vst [vmem:[#allocation19_spill] sm:$0xff] %v3231_v54  ;;  %v3240_v44 = vld [vmem:[%s6396_s0 + $0x62] sm:$0x1]  ;;  %v3245_v43 = vld [vmem:[%s6396_s0 + $0x64] sm:$0x1] }
  0x15   :  { %6660 = vst [vmem:[#allocation20_spill] sm:$0xff] %v3240_v44  ;;  %6661 = vst [vmem:[#allocation21_spill] sm:$0xff] %v3245_v43  ;;  %v3250_v53 = vld [vmem:[%s6396_s0 + $0x66] sm:$0x1]  ;;  %v3255_v46 = vld [vmem:[%s6396_s0 + $0x68] sm:$0x1] }
  0x16   :  { %6662 = vst [vmem:[#allocation22_spill] sm:$0xff] %v3250_v53  ;;  %6663 = vst [vmem:[#allocation23_spill] sm:$0xff] %v3255_v46  ;;  %v3264_v36 = vld [vmem:[%s6396_s0 + $0x6a] sm:$0x1]  ;;  %v3269_v35 = vld [vmem:[%s6396_s0 + $0x6c] sm:$0x1] }
  0x17   :  { %6664 = vst [vmem:[#allocation24_spill] sm:$0xff] %v3264_v36  ;;  %6665 = vst [vmem:[#allocation25_spill] sm:$0xff] %v3269_v35  ;;  %v3274_v45 = vld [vmem:[%s6396_s0 + $0x6e] sm:$0x1]  ;;  %v3279_v38 = vld [vmem:[%s6396_s0 + $0x70] sm:$0x1] }
  0x18   :  { %6666 = vst [vmem:[#allocation26_spill] sm:$0xff] %v3274_v45  ;;  %6667 = vst [vmem:[#allocation27_spill] sm:$0xff] %v3279_v38  ;;  %v3288_v28 = vld [vmem:[%s6396_s0 + $0x72] sm:$0x1]  ;;  %v3293_v27 = vld [vmem:[%s6396_s0 + $0x74] sm:$0x1] }
  0x19   :  { %6668 = vst [vmem:[#allocation28_spill] sm:$0xff] %v3288_v28  ;;  %6669 = vst [vmem:[#allocation29_spill] sm:$0xff] %v3293_v27  ;;  %v3298_v37 = vld [vmem:[%s6396_s0 + $0x76] sm:$0x1]  ;;  %v3303_v30 = vld [vmem:[%s6396_s0 + $0x78] sm:$0x1] }
  0x1a   :  { %6670 = vst [vmem:[#allocation30_spill] sm:$0xff] %v3298_v37  ;;  %6671 = vst [vmem:[#allocation31_spill] sm:$0xff] %v3303_v30  ;;  %v3312_v49 = vld [vmem:[%s6396_s0 + $0x7a] sm:$0x1]  ;;  %v3317_v48 = vld [vmem:[%s6396_s0 + $0x7c] sm:$0x1] }
  0x1b   :  { %6672 = vst [vmem:[#allocation32_spill] sm:$0xff] %v3312_v49  ;;  %6673 = vst [vmem:[#allocation33_spill] sm:$0xff] %v3317_v48  ;;  %v3322_v29 = vld [vmem:[%s6396_s0 + $0x7e] sm:$0x1]  ;;  %v3327_v21 = vld [vmem:[%s6396_s0 + $0x80] sm:$0x1] }
  0x1c   :  { %6674 = vst [vmem:[#allocation34_spill] sm:$0xff] %v3322_v29  ;;  %6675 = vst [vmem:[#allocation35_spill] sm:$0xff] %v3327_v21  ;;  %v3336_v56 = vld [vmem:[%s6396_s0 + $0x82] sm:$0x1]  ;;  %v3341_v55 = vld [vmem:[%s6396_s0 + $0x84] sm:$0x1] }
  0x1d   :  { %6676 = vst [vmem:[#allocation36_spill] sm:$0xff] %v3336_v56  ;;  %6677 = vst [vmem:[#allocation37_spill] sm:$0xff] %v3341_v55  ;;  %v3346_v50 = vld [vmem:[%s6396_s0 + $0x86] sm:$0x1]  ;;  %v3351_v58 = vld [vmem:[%s6396_s0 + $0x88] sm:$0x1] }
  0x1e   :  { %6678 = vst [vmem:[#allocation38_spill] sm:$0xff] %v3346_v50  ;;  %6679 = vst [vmem:[#allocation39_spill] sm:$0xff] %v3351_v58  ;;  %v3360_v22 = vld [vmem:[%s6396_s0 + $0x8a] sm:$0x1]  ;;  %v3365_v63 = vld [vmem:[%s6396_s0 + $0x8c] sm:$0x1] }
  0x1f   :  { %6680 = vst [vmem:[#allocation40_spill] sm:$0xff] %v3360_v22  ;;  %6681 = vst [vmem:[#allocation41_spill] sm:$0xff] %v3365_v63  ;;  %v3370_v57 = vld [vmem:[%s6396_s0 + $0x8e] sm:$0x1]  ;;  %v3375_v61 = vld [vmem:[%s6396_s0 + $0x90] sm:$0x1] }
  0x20   :  { %6682 = vst [vmem:[#allocation42_spill] sm:$0xff] %v3370_v57  ;;  %6683 = vst [vmem:[#allocation43_spill] sm:$0xff] %v3375_v61  ;;  %v3384_v51 = vld [vmem:[%s6396_s0 + $0x92] sm:$0x1]  ;;  %v3389_v52 = vld [vmem:[%s6396_s0 + $0x94] sm:$0x1] }
  0x21   :  { %6684 = vst [vmem:[#allocation44_spill] sm:$0xff] %v3384_v51  ;;  %6685 = vst [vmem:[#allocation45_spill] sm:$0xff] %v3389_v52  ;;  %v3394_v59 = vld [vmem:[%s6396_s0 + $0x96] sm:$0x1]  ;;  %v3399_v54 = vld [vmem:[%s6396_s0 + $0x98] sm:$0x1] }
  0x22   :  { %6686 = vst [vmem:[#allocation46_spill] sm:$0xff] %v3394_v59  ;;  %6687 = vst [vmem:[#allocation47_spill] sm:$0xff] %v3399_v54  ;;  %v3408_v43 = vld [vmem:[%s6396_s0 + $0x9a] sm:$0x1]  ;;  %v3413_v44 = vld [vmem:[%s6396_s0 + $0x9c] sm:$0x1] }
  0x23   :  { %6688 = vst [vmem:[#allocation48_spill] sm:$0xff] %v3408_v43  ;;  %6689 = vst [vmem:[#allocation49_spill] sm:$0xff] %v3413_v44  ;;  %v3418_v62 = vld [vmem:[%s6396_s0 + $0x9e] sm:$0x1]  ;;  %v3423_v46 = vld [vmem:[%s6396_s0 + $0xa0] sm:$0x1] }
  0x24   :  { %6690 = vst [vmem:[#allocation50_spill] sm:$0xff] %v3418_v62  ;;  %6691 = vst [vmem:[#allocation51_spill] sm:$0xff] %v3423_v46  ;;  %v3432_v35 = vld [vmem:[%s6396_s0 + $0xa2] sm:$0x1]  ;;  %v3437_v36 = vld [vmem:[%s6396_s0 + $0xa4] sm:$0x1] }
  0x25   :  { %v3442_v53 = vld [vmem:[%s6396_s0 + $0xa6] sm:$0x1]  ;;  %v3447_v38 = vld [vmem:[%s6396_s0 + $0xa8] sm:$0x1]  ;;  %v3456_v27 = vld [vmem:[%s6396_s0 + $0xaa] sm:$0x1] }
  0x26   :  { %6692 = vst [vmem:[#allocation52_spill] sm:$0xff] %v3447_v38  ;;  %v3461_v28 = vld [vmem:[%s6396_s0 + $0xac] sm:$0x1]  ;;  %v3466_v45 = vld [vmem:[%s6396_s0 + $0xae] sm:$0x1]  ;;  %v6696_v46 = vshrl.u32 %v2966_v0, 16 }
  0x27   :  { %v3471_v30 = vld [vmem:[%s6396_s0 + $0xb0] sm:$0x1]  ;;  %v3480_v48 = vld [vmem:[%s6396_s0 + $0xb2] sm:$0x1]  ;;  %v3485_v49 = vld [vmem:[%s6396_s0 + $0xb4] sm:$0x1] }
  0x28   :  { %6693 = vst [vmem:[#allocation53_spill] sm:$0xff] %v3471_v30  ;;  %v3490_v37 = vld [vmem:[%s6396_s0 + $0xb6] sm:$0x1]  ;;  %v3495_v21 = vld [vmem:[%s6396_s0 + $0xb8] sm:$0x1]  ;;  %v3614_v59 = vmax.bf16 %v6696_v46, %v2966_v0  ;;  %v6698_v41 = vshrl.u32 %v2976_v2, 16 }
  0x29   :  { %6694 = vst [vmem:[#allocation54_spill] sm:$0xff] %v3490_v37  ;;  %6695 = vst [vmem:[#allocation55_spill] sm:$0xff] %v3495_v21  ;;  %v3504_v55 = vld [vmem:[%s6396_s0 + $0xba] sm:$0x1]  ;;  %v3509_v56 = vld [vmem:[%s6396_s0 + $0xbc] sm:$0x1] }
  0x2a   :  { %v3514_v29 = vld [vmem:[%s6396_s0 + $0xbe] sm:$0x1]  ;;  %v3519_v58 = vld [vmem:[%s6396_s0 + $0xc0] sm:$0x1]  ;;  %v3528_v63 = vld [vmem:[%s6396_s0 + $0xc2] sm:$0x1]  ;;  %v3624_v42 = vmax.bf16 %v6698_v41, %v2976_v2 }
  0x2b   :  { %v3533_v22 = vld [vmem:[%s6396_s0 + $0xc4] sm:$0x1]  ;;  %v3538_v50 = vld [vmem:[%s6396_s0 + $0xc6] sm:$0x1]  ;;  %v3543_v61 = vld [vmem:[%s6396_s0 + $0xc8] sm:$0x1] }
  0x2c   :  { %v3552_v52 = vld [vmem:[%s6396_s0 + $0xca] sm:$0x1]  ;;  %v3557_v51 = vld [vmem:[%s6396_s0 + $0xcc] sm:$0x1]  ;;  %v3562_v57 = vld [vmem:[%s6396_s0 + $0xce] sm:$0x1] }
  0x2d   :  { %v3567_v54 = vld [vmem:[%s6396_s0 + $0xd0] sm:$0x1]  ;;  %v3576_v44 = vld [vmem:[%s6396_s0 + $0xd2] sm:$0x1]  ;;  %v3585_v60 = vld [vmem:[%s6396_s0 + $0xd4] sm:$0x1] }
  0x2e   :  { %v3594_v47 = vld [vmem:[%s6396_s0 + $0xd6] sm:$0x1]  ;;  %v6697_v21 = vshrl.u32 %v2971_v1, 16  ;;  %v6699_v30 = vshrl.u32 %v2981_v3, 16  ;;  %v6700_v62 = vshrl.u32 %v2986_v4, 16  ;;  %v6701_v46 = vshrl.u32 %v2991_v5, 16 }
  0x2f   :  { %v6703_v41 = vshrl.u32 %v3001_v7, 16  ;;  %vm2505_vm4 = vcmask 1045509   ;;  %vm2508_vm5 = vcmask 1046534   ;;  %vm2511_vm6 = vcmask 1047559  }
  0x30   :  { %v3619_v38 = vmax.bf16 %v6697_v21, %v2971_v1  ;;  %v3629_v43 = vmax.bf16 %v6699_v30, %v2981_v3  ;;  %v3634_v0 = vmax.bf16 %v6700_v62, %v2986_v4  ;;  %v3639_v1 = vmax.bf16 %v6701_v46, %v2991_v5 }
  0x31   :  { %v6702_v21 = vshrl.u32 %v2996_v6, 16  ;;  %v3649_v3 = vmax.bf16 %v6703_v41, %v3001_v7  ;;  %v6704_v30 = vshrl.u32 %v3006_v8, 16  ;;  %v6705_v62 = vshrl.u32 %v3011_v9, 16 }
  0x32   :  { %v6706_v46 = vshrl.u32 %v3016_v10, 16  ;;  %v6708_v41 = vshrl.u32 %v3026_v12, 16  ;;  %vm2715_vm7 = vcmask 519168   ;;  %vm2729_vm8 = vcmask 517120  }
  0x33   :  { %v3644_v2 = vmax.bf16 %v6702_v21, %v2996_v6  ;;  %v3654_v4 = vmax.bf16 %v6704_v30, %v3006_v8  ;;  %v3659_v5 = vmax.bf16 %v6705_v62, %v3011_v9  ;;  %v6707_v21 = vshrl.u32 %v3021_v11, 16 }
  0x34   :  { %v3664_v6 = vmax.bf16 %v6706_v46, %v3016_v10  ;;  %v3674_v8 = vmax.bf16 %v6708_v41, %v3026_v12  ;;  %v6709_v30 = vshrl.u32 %v3031_v13, 16  ;;  %v6710_v62 = vshrl.u32 %v3036_v14, 16 }
  0x35   :  { %v3669_v7 = vmax.bf16 %v6707_v21, %v3021_v11  ;;  %v6711_v46 = vshrl.u32 %v3041_v15, 16  ;;  %v6712_v21 = vshrl.u32 %v3046_v16, 16  ;;  %v6714_v41 = vshrl.u32 %v3051_v17, 16 }
  0x36   :  { %v3679_v9 = vmax.bf16 %v6709_v30, %v3031_v13  ;;  %v3684_v10 = vmax.bf16 %v6710_v62, %v3036_v14  ;;  %v6716_v30 = vshrl.u32 %v3056_v18, 16  ;;  %v6718_v62 = vshrl.u32 %v3061_v19, 16 }
  0x37   :  { %v3689_v11 = vmax.bf16 %v6711_v46, %v3041_v15  ;;  %v3694_v12 = vmax.bf16 %v6712_v21, %v3046_v16  ;;  %v3699_v13 = vmax.bf16 %v6714_v41, %v3051_v17  ;;  %v6720_v46 = vshrl.u32 %v3066_v20, 16 }
  0x38   :  { %v3704_v14 = vmax.bf16 %v6716_v30, %v3056_v18  ;;  %v3709_v15 = vmax.bf16 %v6718_v62, %v3061_v19  ;;  %v6722_v21 = vshrl.u32 %v3072_v23, 16  ;;  %v6724_v41 = vshrl.u32 %v3077_v24, 16 }
  0x39   :  { %6713 = vst [vmem:[#allocation56_spill] sm:$0xff] %v3694_v12  ;;  %6715 = vst [vmem:[#allocation57_spill] sm:$0xff] %v3699_v13  ;;  %v3714_v16 = vmax.bf16 %v6720_v46, %v3066_v20  ;;  %v6726_v30 = vshrl.u32 %v3082_v25, 16  ;;  %v6728_v62 = vshrl.u32 %v3087_v26, 16  ;;  %v6730_v46 = vshrl.u32 %v3096_v31, 16 }
  0x3a   :  { %6717 = vst [vmem:[#allocation58_spill] sm:$0xff] %v3704_v14  ;;  %6719 = vst [vmem:[#allocation59_spill] sm:$0xff] %v3709_v15  ;;  %v3719_v17 = vmax.bf16 %v6722_v21, %v3072_v23  ;;  %v3724_v18 = vmax.bf16 %v6724_v41, %v3077_v24  ;;  %v6732_v21 = vshrl.u32 %v3101_v32, 16  ;;  %v6734_v41 = vshrl.u32 %v3106_v33, 16  ;;  %v4380_v14 = vld [vmem:[%s6396_s0 + $0x52] sm:$0x2] }
  0x3b   :  { %6721 = vst [vmem:[#allocation60_spill] sm:$0xff] %v3714_v16  ;;  %v3729_v19 = vmax.bf16 %v6726_v30, %v3082_v25  ;;  %v3734_v20 = vmax.bf16 %v6728_v62, %v3087_v26  ;;  %v3739_v23 = vmax.bf16 %v6730_v46, %v3096_v31  ;;  %v6736_v30 = vshrl.u32 %v3111_v34, 16  ;;  %6976 = vst [vmem:[#allocation120_spill] sm:$0xff] %v4380_v14  ;;  %v4385_v13 = vld [vmem:[%s6396_s0 + $0x54] sm:$0x2] }
  0x3c   :  { %6723 = vst [vmem:[#allocation61_spill] sm:$0xff] %v3719_v17  ;;  %6725 = vst [vmem:[#allocation62_spill] sm:$0xff] %v3724_v18  ;;  %v3744_v24 = vmax.bf16 %v6732_v21, %v3101_v32  ;;  %v3749_v25 = vmax.bf16 %v6734_v41, %v3106_v33  ;;  %v6738_v62 = vshrl.u32 %v3120_v39, 16  ;;  %v6740_v46 = vshrl.u32 %v3125_v40, 16  ;;  %v6742_v21 = vld [vmem:[#allocation2_spill] sm:$0xff]  ;;  %v6745_v41 = vld [vmem:[#allocation3_spill] sm:$0xff] }
  0x3d   :  { %6727 = vst [vmem:[#allocation63_spill] sm:$0xff] %v3729_v19  ;;  %6729 = vst [vmem:[#allocation64_spill] sm:$0xff] %v3734_v20  ;;  %v3754_v26 = vmax.bf16 %v6736_v30, %v3111_v34  ;;  %v6743_v37 = vshrl.u32 %v6742_v21, 16  ;;  %v6748_v30 = vld [vmem:[#allocation4_spill] sm:$0xff]  ;;  %v4356_v18 = vld [vmem:[%s6396_s0 + $0x4a] sm:$0x2] }
  0x3e   :  { %6731 = vst [vmem:[#allocation65_spill] sm:$0xff] %v3739_v23  ;;  %6733 = vst [vmem:[#allocation66_spill] sm:$0xff] %v3744_v24  ;;  %v3759_v31 = vmax.bf16 %v6738_v62, %v3120_v39  ;;  %v3764_v32 = vmax.bf16 %v6740_v46, %v3125_v40  ;;  %v6751_v62 = vld [vmem:[#allocation5_spill] sm:$0xff]  ;;  %v6754_v46 = vld [vmem:[#allocation6_spill] sm:$0xff] }
  0x3f   :  { %6735 = vst [vmem:[#allocation67_spill] sm:$0xff] %v3749_v25  ;;  %6737 = vst [vmem:[#allocation68_spill] sm:$0xff] %v3754_v26  ;;  %v3769_v33 = vmax.bf16 %v6743_v37, %v6742_v21  ;;  %v6746_v25 = vshrl.u32 %v6745_v41, 16  ;;  %v6749_v26 = vshrl.u32 %v6748_v30, 16  ;;  %v6757_v21 = vld [vmem:[#allocation7_spill] sm:$0xff] }
  0x40   :  { %6739 = vst [vmem:[#allocation69_spill] sm:$0xff] %v3759_v31  ;;  %6741 = vst [vmem:[#allocation70_spill] sm:$0xff] %v3764_v32  ;;  %v6752_v31 = vshrl.u32 %v6751_v62, 16  ;;  %v6755_v32 = vshrl.u32 %v6754_v46, 16  ;;  %v4332_v24 = vld [vmem:[%s6396_s0 + $0x42] sm:$0x2] }
  0x41   :  { %6744 = vst [vmem:[#allocation2_spill] sm:$0xff] %v3769_v33  ;;  %v3774_v34 = vmax.bf16 %v6746_v25, %v6745_v41  ;;  %v3779_v39 = vmax.bf16 %v6749_v26, %v6748_v30  ;;  %v6758_v33 = vshrl.u32 %v6757_v21, 16  ;;  %v6760_v41 = vld [vmem:[#allocation8_spill] sm:$0xff]  ;;  %v6763_v30 = vld [vmem:[#allocation9_spill] sm:$0xff]  ;;  %6968 = vst [vmem:[#allocation112_spill] sm:$0xff] %v4332_v24 }
  0x42   :  { %v3784_v40 = vmax.bf16 %v6752_v31, %v6751_v62  ;;  %v3789_v37 = vmax.bf16 %v6755_v32, %v6754_v46  ;;  %v6766_v62 = vld [vmem:[#allocation10_spill] sm:$0xff]  ;;  %v6769_v46 = vld [vmem:[#allocation11_spill] sm:$0xff]  ;;  %6972 = vst [vmem:[#allocation116_spill] sm:$0xff] %v4356_v18  ;;  %v4371_v20 = vld [vmem:[%s6396_s0 + $0x50] sm:$0x2] }
  0x43   :  { %6747 = vst [vmem:[#allocation3_spill] sm:$0xff] %v3774_v34  ;;  %6750 = vst [vmem:[#allocation4_spill] sm:$0xff] %v3779_v39  ;;  %v3794_v25 = vmax.bf16 %v6758_v33, %v6757_v21  ;;  %v6761_v34 = vshrl.u32 %v6760_v41, 16  ;;  %v6764_v39 = vshrl.u32 %v6763_v30, 16  ;;  %v6772_v21 = vld [vmem:[#allocation12_spill] sm:$0xff] }
  0x44   :  { %6753 = vst [vmem:[#allocation5_spill] sm:$0xff] %v3784_v40  ;;  %6756 = vst [vmem:[#allocation6_spill] sm:$0xff] %v3789_v37  ;;  %v6767_v40 = vshrl.u32 %v6766_v62, 16  ;;  %v6770_v37 = vshrl.u32 %v6769_v46, 16  ;;  %v4337_v23 = vld [vmem:[%s6396_s0 + $0x44] sm:$0x2] }
  0x45   :  { %6759 = vst [vmem:[#allocation7_spill] sm:$0xff] %v3794_v25  ;;  %v3799_v26 = vmax.bf16 %v6761_v34, %v6760_v41  ;;  %v3804_v31 = vmax.bf16 %v6764_v39, %v6763_v30  ;;  %v6773_v25 = vshrl.u32 %v6772_v21, 16  ;;  %v6775_v41 = vld [vmem:[#allocation13_spill] sm:$0xff]  ;;  %v6778_v30 = vld [vmem:[#allocation14_spill] sm:$0xff]  ;;  %6969 = vst [vmem:[#allocation113_spill] sm:$0xff] %v4337_v23 }
  0x46   :  { %v3809_v32 = vmax.bf16 %v6767_v40, %v6766_v62  ;;  %v3814_v33 = vmax.bf16 %v6770_v37, %v6769_v46  ;;  %v6781_v62 = vld [vmem:[#allocation15_spill] sm:$0xff]  ;;  %v6784_v46 = vld [vmem:[#allocation16_spill] sm:$0xff]  ;;  %6975 = vst [vmem:[#allocation119_spill] sm:$0xff] %v4371_v20  ;;  %6977 = vst [vmem:[#allocation121_spill] sm:$0xff] %v4385_v13 }
  0x47   :  { %6762 = vst [vmem:[#allocation8_spill] sm:$0xff] %v3799_v26  ;;  %6765 = vst [vmem:[#allocation9_spill] sm:$0xff] %v3804_v31  ;;  %v3819_v34 = vmax.bf16 %v6773_v25, %v6772_v21  ;;  %v6776_v26 = vshrl.u32 %v6775_v41, 16  ;;  %v6779_v31 = vshrl.u32 %v6778_v30, 16  ;;  %v6787_v21 = vld [vmem:[#allocation17_spill] sm:$0xff] }
  0x48   :  { %6768 = vst [vmem:[#allocation10_spill] sm:$0xff] %v3809_v32  ;;  %6771 = vst [vmem:[#allocation11_spill] sm:$0xff] %v3814_v33  ;;  %v6782_v32 = vshrl.u32 %v6781_v62, 16  ;;  %v6785_v33 = vshrl.u32 %v6784_v46, 16  ;;  %v4361_v17 = vld [vmem:[%s6396_s0 + $0x4c] sm:$0x2] }
  0x49   :  { %6774 = vst [vmem:[#allocation12_spill] sm:$0xff] %v3819_v34  ;;  %v3824_v39 = vmax.bf16 %v6776_v26, %v6775_v41  ;;  %v3829_v40 = vmax.bf16 %v6779_v31, %v6778_v30  ;;  %v6788_v34 = vshrl.u32 %v6787_v21, 16  ;;  %v6790_v41 = vld [vmem:[#allocation18_spill] sm:$0xff]  ;;  %v6793_v30 = vld [vmem:[#allocation19_spill] sm:$0xff]  ;;  %6973 = vst [vmem:[#allocation117_spill] sm:$0xff] %v4361_v17 }
  0x4a   :  { %v3834_v37 = vmax.bf16 %v6782_v32, %v6781_v62  ;;  %v3839_v25 = vmax.bf16 %v6785_v33, %v6784_v46  ;;  %v6796_v62 = vld [vmem:[#allocation20_spill] sm:$0xff]  ;;  %v6799_v46 = vld [vmem:[#allocation21_spill] sm:$0xff]  ;;  %v4524_v17 = vld [vmem:[%s6396_s0 + $0x82] sm:$0x2] }
  0x4b   :  { %6777 = vst [vmem:[#allocation13_spill] sm:$0xff] %v3824_v39  ;;  %6780 = vst [vmem:[#allocation14_spill] sm:$0xff] %v3829_v40  ;;  %v3844_v26 = vmax.bf16 %v6788_v34, %v6787_v21  ;;  %v6791_v39 = vshrl.u32 %v6790_v41, 16  ;;  %v6794_v40 = vshrl.u32 %v6793_v30, 16  ;;  %v6802_v21 = vld [vmem:[#allocation22_spill] sm:$0xff] }
  0x4c   :  { %6783 = vst [vmem:[#allocation15_spill] sm:$0xff] %v3834_v37  ;;  %6786 = vst [vmem:[#allocation16_spill] sm:$0xff] %v3839_v25  ;;  %v6797_v37 = vshrl.u32 %v6796_v62, 16  ;;  %v6800_v25 = vshrl.u32 %v6799_v46, 16  ;;  %v4390_v19 = vld [vmem:[%s6396_s0 + $0x56] sm:$0x2] }
  0x4d   :  { %6789 = vst [vmem:[#allocation17_spill] sm:$0xff] %v3844_v26  ;;  %v3849_v31 = vmax.bf16 %v6791_v39, %v6790_v41  ;;  %v3854_v32 = vmax.bf16 %v6794_v40, %v6793_v30  ;;  %v6803_v26 = vshrl.u32 %v6802_v21, 16  ;;  %v6805_v41 = vld [vmem:[#allocation23_spill] sm:$0xff]  ;;  %v6808_v30 = vld [vmem:[#allocation24_spill] sm:$0xff]  ;;  %6978 = vst [vmem:[#allocation122_spill] sm:$0xff] %v4390_v19 }
  0x4e   :  { %v3859_v33 = vmax.bf16 %v6797_v37, %v6796_v62  ;;  %v3864_v34 = vmax.bf16 %v6800_v25, %v6799_v46  ;;  %v6811_v62 = vld [vmem:[#allocation25_spill] sm:$0xff]  ;;  %v6814_v46 = vld [vmem:[#allocation26_spill] sm:$0xff]  ;;  %7000 = vst [vmem:[#allocation144_spill] sm:$0xff] %v4524_v17  ;;  %v4539_v20 = vld [vmem:[%s6396_s0 + $0x88] sm:$0x2] }
  0x4f   :  { %6792 = vst [vmem:[#allocation18_spill] sm:$0xff] %v3849_v31  ;;  %6795 = vst [vmem:[#allocation19_spill] sm:$0xff] %v3854_v32  ;;  %v3869_v39 = vmax.bf16 %v6803_v26, %v6802_v21  ;;  %v6806_v31 = vshrl.u32 %v6805_v41, 16  ;;  %v6809_v32 = vshrl.u32 %v6808_v30, 16  ;;  %v6817_v21 = vld [vmem:[#allocation27_spill] sm:$0xff] }
  0x50   :  { %6798 = vst [vmem:[#allocation20_spill] sm:$0xff] %v3859_v33  ;;  %6801 = vst [vmem:[#allocation21_spill] sm:$0xff] %v3864_v34  ;;  %v6812_v33 = vshrl.u32 %v6811_v62, 16  ;;  %v6815_v34 = vshrl.u32 %v6814_v46, 16  ;;  %v4395_v16 = vld [vmem:[%s6396_s0 + $0x58] sm:$0x2] }
  0x51   :  { %6804 = vst [vmem:[#allocation22_spill] sm:$0xff] %v3869_v39  ;;  %v3874_v40 = vmax.bf16 %v6806_v31, %v6805_v41  ;;  %v3879_v37 = vmax.bf16 %v6809_v32, %v6808_v30  ;;  %v6818_v39 = vshrl.u32 %v6817_v21, 16  ;;  %v6820_v41 = vld [vmem:[#allocation28_spill] sm:$0xff]  ;;  %v6823_v30 = vld [vmem:[#allocation29_spill] sm:$0xff]  ;;  %6979 = vst [vmem:[#allocation123_spill] sm:$0xff] %v4395_v16 }
  0x52   :  { %v3884_v25 = vmax.bf16 %v6812_v33, %v6811_v62  ;;  %v3889_v26 = vmax.bf16 %v6815_v34, %v6814_v46  ;;  %v6826_v62 = vld [vmem:[#allocation30_spill] sm:$0xff]  ;;  %v6829_v46 = vld [vmem:[#allocation31_spill] sm:$0xff]  ;;  %v4414_v15 = vld [vmem:[%s6396_s0 + $0x5e] sm:$0x2]  ;;  %7003 = vst [vmem:[#allocation147_spill] sm:$0xff] %v4539_v20 }
  0x53   :  { %6807 = vst [vmem:[#allocation23_spill] sm:$0xff] %v3874_v40  ;;  %6810 = vst [vmem:[#allocation24_spill] sm:$0xff] %v3879_v37  ;;  %v3894_v31 = vmax.bf16 %v6818_v39, %v6817_v21  ;;  %v6821_v40 = vshrl.u32 %v6820_v41, 16  ;;  %v6824_v37 = vshrl.u32 %v6823_v30, 16  ;;  %v6832_v21 = vld [vmem:[#allocation32_spill] sm:$0xff] }
  0x54   :  { %6813 = vst [vmem:[#allocation25_spill] sm:$0xff] %v3884_v25  ;;  %6816 = vst [vmem:[#allocation26_spill] sm:$0xff] %v3889_v26  ;;  %v6827_v25 = vshrl.u32 %v6826_v62, 16  ;;  %v6830_v26 = vshrl.u32 %v6829_v46, 16  ;;  %v4500_v23 = vld [vmem:[%s6396_s0 + $0x7a] sm:$0x2] }
  0x55   :  { %6819 = vst [vmem:[#allocation27_spill] sm:$0xff] %v3894_v31  ;;  %v3899_v32 = vmax.bf16 %v6821_v40, %v6820_v41  ;;  %v3904_v33 = vmax.bf16 %v6824_v37, %v6823_v30  ;;  %v6833_v31 = vshrl.u32 %v6832_v21, 16  ;;  %v6835_v41 = vld [vmem:[#allocation33_spill] sm:$0xff]  ;;  %v6838_v30 = vld [vmem:[#allocation34_spill] sm:$0xff]  ;;  %6982 = vst [vmem:[#allocation126_spill] sm:$0xff] %v4414_v15 }
  0x56   :  { %v3909_v34 = vmax.bf16 %v6827_v25, %v6826_v62  ;;  %v3914_v39 = vmax.bf16 %v6830_v26, %v6829_v46  ;;  %v6841_v62 = vld [vmem:[#allocation35_spill] sm:$0xff]  ;;  %v6844_v46 = vld [vmem:[#allocation36_spill] sm:$0xff]  ;;  %6996 = vst [vmem:[#allocation140_spill] sm:$0xff] %v4500_v23  ;;  %v4505_v24 = vld [vmem:[%s6396_s0 + $0x7c] sm:$0x2] }
  0x57   :  { %6822 = vst [vmem:[#allocation28_spill] sm:$0xff] %v3899_v32  ;;  %6825 = vst [vmem:[#allocation29_spill] sm:$0xff] %v3904_v33  ;;  %v3919_v40 = vmax.bf16 %v6833_v31, %v6832_v21  ;;  %v6836_v32 = vshrl.u32 %v6835_v41, 16  ;;  %v6839_v33 = vshrl.u32 %v6838_v30, 16  ;;  %v6847_v21 = vld [vmem:[#allocation37_spill] sm:$0xff] }
  0x58   :  { %6828 = vst [vmem:[#allocation30_spill] sm:$0xff] %v3909_v34  ;;  %6831 = vst [vmem:[#allocation31_spill] sm:$0xff] %v3914_v39  ;;  %v6842_v34 = vshrl.u32 %v6841_v62, 16  ;;  %v6845_v39 = vshrl.u32 %v6844_v46, 16  ;;  %v4529_v18 = vld [vmem:[%s6396_s0 + $0x84] sm:$0x2] }
  0x59   :  { %6834 = vst [vmem:[#allocation32_spill] sm:$0xff] %v3919_v40  ;;  %v3924_v37 = vmax.bf16 %v6836_v32, %v6835_v41  ;;  %v3929_v25 = vmax.bf16 %v6839_v33, %v6838_v30  ;;  %v6848_v40 = vshrl.u32 %v6847_v21, 16  ;;  %v6850_v41 = vld [vmem:[#allocation38_spill] sm:$0xff]  ;;  %v6853_v30 = vld [vmem:[#allocation39_spill] sm:$0xff]  ;;  %6997 = vst [vmem:[#allocation141_spill] sm:$0xff] %v4505_v24 }
  0x5a   :  { %v3934_v26 = vmax.bf16 %v6842_v34, %v6841_v62  ;;  %v3939_v31 = vmax.bf16 %v6845_v39, %v6844_v46  ;;  %v6856_v62 = vld [vmem:[#allocation40_spill] sm:$0xff]  ;;  %v6859_v46 = vld [vmem:[#allocation41_spill] sm:$0xff]  ;;  %7001 = vst [vmem:[#allocation145_spill] sm:$0xff] %v4529_v18  ;;  %v4548_v13 = vld [vmem:[%s6396_s0 + $0x8a] sm:$0x2] }
  0x5b   :  { %6837 = vst [vmem:[#allocation33_spill] sm:$0xff] %v3924_v37  ;;  %6840 = vst [vmem:[#allocation34_spill] sm:$0xff] %v3929_v25  ;;  %v3944_v32 = vmax.bf16 %v6848_v40, %v6847_v21  ;;  %v6851_v37 = vshrl.u32 %v6850_v41, 16  ;;  %v6854_v25 = vshrl.u32 %v6853_v30, 16  ;;  %v6862_v21 = vld [vmem:[#allocation42_spill] sm:$0xff] }
  0x5c   :  { %6843 = vst [vmem:[#allocation35_spill] sm:$0xff] %v3934_v26  ;;  %6846 = vst [vmem:[#allocation36_spill] sm:$0xff] %v3939_v31  ;;  %v6857_v26 = vshrl.u32 %v6856_v62, 16  ;;  %v6860_v31 = vshrl.u32 %v6859_v46, 16  ;;  %v4553_v14 = vld [vmem:[%s6396_s0 + $0x8c] sm:$0x2] }
  0x5d   :  { %6849 = vst [vmem:[#allocation37_spill] sm:$0xff] %v3944_v32  ;;  %v3949_v33 = vmax.bf16 %v6851_v37, %v6850_v41  ;;  %v3954_v34 = vmax.bf16 %v6854_v25, %v6853_v30  ;;  %v6863_v32 = vshrl.u32 %v6862_v21, 16  ;;  %v6865_v41 = vld [vmem:[#allocation43_spill] sm:$0xff]  ;;  %v6868_v30 = vld [vmem:[#allocation44_spill] sm:$0xff]  ;;  %7004 = vst [vmem:[#allocation148_spill] sm:$0xff] %v4548_v13 }
  0x5e   :  { %v3959_v39 = vmax.bf16 %v6857_v26, %v6856_v62  ;;  %v3964_v40 = vmax.bf16 %v6860_v31, %v6859_v46  ;;  %v6871_v62 = vld [vmem:[#allocation45_spill] sm:$0xff]  ;;  %v6874_v46 = vld [vmem:[#allocation46_spill] sm:$0xff]  ;;  %7005 = vst [vmem:[#allocation149_spill] sm:$0xff] %v4553_v14  ;;  %v4563_v16 = vld [vmem:[%s6396_s0 + $0x90] sm:$0x2] }
  0x5f   :  { %6852 = vst [vmem:[#allocation38_spill] sm:$0xff] %v3949_v33  ;;  %6855 = vst [vmem:[#allocation39_spill] sm:$0xff] %v3954_v34  ;;  %v3969_v37 = vmax.bf16 %v6863_v32, %v6862_v21  ;;  %v6866_v33 = vshrl.u32 %v6865_v41, 16  ;;  %v6869_v34 = vshrl.u32 %v6868_v30, 16  ;;  %v6877_v21 = vld [vmem:[#allocation47_spill] sm:$0xff] }
  0x60   :  { %6858 = vst [vmem:[#allocation40_spill] sm:$0xff] %v3959_v39  ;;  %6861 = vst [vmem:[#allocation41_spill] sm:$0xff] %v3964_v40  ;;  %v6872_v39 = vshrl.u32 %v6871_v62, 16  ;;  %v6875_v40 = vshrl.u32 %v6874_v46, 16  ;;  %v4582_v19 = vld [vmem:[%s6396_s0 + $0x96] sm:$0x2] }
  0x61   :  { %6864 = vst [vmem:[#allocation42_spill] sm:$0xff] %v3969_v37  ;;  %v3974_v25 = vmax.bf16 %v6866_v33, %v6865_v41  ;;  %v3979_v26 = vmax.bf16 %v6869_v34, %v6868_v30  ;;  %v6878_v37 = vshrl.u32 %v6877_v21, 16  ;;  %v6880_v41 = vld [vmem:[#allocation48_spill] sm:$0xff]  ;;  %v6883_v30 = vld [vmem:[#allocation49_spill] sm:$0xff]  ;;  %7007 = vst [vmem:[#allocation151_spill] sm:$0xff] %v4563_v16 }
  0x62   :  { %v3984_v31 = vmax.bf16 %v6872_v39, %v6871_v62  ;;  %v3989_v32 = vmax.bf16 %v6875_v40, %v6874_v46  ;;  %v6886_v62 = vld [vmem:[#allocation50_spill] sm:$0xff]  ;;  %v6889_v46 = vld [vmem:[#allocation51_spill] sm:$0xff]  ;;  %7010 = vst [vmem:[#allocation154_spill] sm:$0xff] %v4582_v19  ;;  %v4606_v15 = vld [vmem:[%s6396_s0 + $0x9e] sm:$0x2] }
  0x63   :  { %6867 = vst [vmem:[#allocation43_spill] sm:$0xff] %v3974_v25  ;;  %6870 = vst [vmem:[#allocation44_spill] sm:$0xff] %v3979_v26  ;;  %v3994_v33 = vmax.bf16 %v6878_v37, %v6877_v21  ;;  %v6881_v25 = vshrl.u32 %v6880_v41, 16  ;;  %v6884_v26 = vshrl.u32 %v6883_v30, 16  ;;  %v6892_v21 = vshrl.u32 %v3432_v35, 16 }
  0x64   :  { %6873 = vst [vmem:[#allocation45_spill] sm:$0xff] %v3984_v31  ;;  %6876 = vst [vmem:[#allocation46_spill] sm:$0xff] %v3989_v32  ;;  %v6887_v31 = vshrl.u32 %v6886_v62, 16  ;;  %v6890_v32 = vshrl.u32 %v6889_v46, 16  ;;  %v4668_v24 = vld [vmem:[%s6396_s0 + $0xb2] sm:$0x2] }
  0x65   :  { %6879 = vst [vmem:[#allocation47_spill] sm:$0xff] %v3994_v33  ;;  %v3999_v34 = vmax.bf16 %v6881_v25, %v6880_v41  ;;  %v4004_v39 = vmax.bf16 %v6884_v26, %v6883_v30  ;;  %v4019_v25 = vmax.bf16 %v6892_v21, %v3432_v35  ;;  %v6894_v41 = vshrl.u32 %v3437_v36, 16  ;;  %v4366_v33 = vld [vmem:[%s6396_s0 + $0x4e] sm:$0x2]  ;;  %7014 = vst [vmem:[#allocation158_spill] sm:$0xff] %v4606_v15 }
  0x66   :  { %v4009_v40 = vmax.bf16 %v6887_v31, %v6886_v62  ;;  %v4014_v37 = vmax.bf16 %v6890_v32, %v6889_v46  ;;  %v6896_v30 = vshrl.u32 %v3442_v53, 16  ;;  %v6898_v62 = vld [vmem:[#allocation52_spill] sm:$0xff]  ;;  %v6901_v46 = vshrl.u32 %v3456_v27, 16  ;;  %6974 = vst [vmem:[#allocation118_spill] sm:$0xff] %v4366_v33  ;;  %v4558_v33 = vld [vmem:[%s6396_s0 + $0x8e] sm:$0x2] }
  0x67   :  { %6882 = vst [vmem:[#allocation48_spill] sm:$0xff] %v3999_v34  ;;  %6885 = vst [vmem:[#allocation49_spill] sm:$0xff] %v4004_v39  ;;  %v4024_v26 = vmax.bf16 %v6894_v41, %v3437_v36  ;;  %v6903_v21 = vshrl.u32 %v3461_v28, 16  ;;  %v6905_v41 = vshrl.u32 %v3466_v45, 16  ;;  %v4313_v39 = vld [vmem:[%s6396_s0 + $0x3c] sm:$0x2] }
  0x68   :  { %6888 = vst [vmem:[#allocation50_spill] sm:$0xff] %v4009_v40  ;;  %6891 = vst [vmem:[#allocation51_spill] sm:$0xff] %v4014_v37  ;;  %v4029_v31 = vmax.bf16 %v6896_v30, %v3442_v53  ;;  %v6899_v40 = vshrl.u32 %v6898_v62, 16  ;;  %v4039_v35 = vmax.bf16 %v6901_v46, %v3456_v27  ;;  %v6907_v30 = vld [vmem:[#allocation53_spill] sm:$0xff]  ;;  %v4059_v27 = vld [vmem:[%s6396_s0] sm:$0x2] }
  0x69   :  { %6893 = vst [vmem:[#allocation71_spill] sm:$0xff] %v4019_v25  ;;  %6895 = vst [vmem:[#allocation72_spill] sm:$0xff] %v4024_v26  ;;  %v4044_v36 = vmax.bf16 %v6903_v21, %v3461_v28  ;;  %v4049_v53 = vmax.bf16 %v6905_v41, %v3466_v45  ;;  %v6912_v46 = vshrl.u32 %v3485_v49, 16  ;;  %v6914_v21 = vld [vmem:[#allocation54_spill] sm:$0xff]  ;;  %v4308_v37 = vld [vmem:[%s6396_s0 + $0x3a] sm:$0x2] }
  0x6a   :  { %6897 = vst [vmem:[#allocation73_spill] sm:$0xff] %v4029_v31  ;;  %v4034_v32 = vmax.bf16 %v6899_v40, %v6898_v62  ;;  %6902 = vst [vmem:[#allocation74_spill] sm:$0xff] %v4039_v35  ;;  %v6908_v31 = vshrl.u32 %v6907_v30, 16  ;;  %v6910_v62 = vshrl.u32 %v3480_v48, 16  ;;  %v6915_v41 = vshrl.u32 %v6914_v21, 16 }
  0x6b   :  { %6904 = vst [vmem:[#allocation75_spill] sm:$0xff] %v4044_v36  ;;  %6906 = vst [vmem:[#allocation76_spill] sm:$0xff] %v4049_v53  ;;  %v4069_v45 = vmax.bf16 %v6912_v46, %v3485_v49  ;;  %v4089_v49 = vld [vmem:[%s6396_s0 + $0x4] sm:$0x2]  ;;  %v6920_v46 = vshrl.u32 %v3504_v55, 16 }
  0x6c   :  { %6900 = vst [vmem:[#allocation52_spill] sm:$0xff] %v4034_v32  ;;  %v4054_v40 = vmax.bf16 %v6908_v31, %v6907_v30  ;;  %v4064_v28 = vmax.bf16 %v6910_v62, %v3480_v48  ;;  %v4074_v31 = vmax.bf16 %v6915_v41, %v6914_v21  ;;  %v6917_v30 = vld [vmem:[#allocation55_spill] sm:$0xff]  ;;  %v4084_v48 = vld [vmem:[%s6396_s0 + $0x2] sm:$0x2]  ;;  %v4094_v62 = vld [vmem:[%s6396_s0 + $0x6] sm:$0x2] }
  0x6d   :  { %6913 = vst [vmem:[#allocation78_spill] sm:$0xff] %v4069_v45  ;;  %v4104_v21 = vmax.bf16 %v6920_v46, %v3504_v55  ;;  %v6922_v41 = vshrl.u32 %v3509_v56, 16  ;;  %v6926_v45 = vshrl.u32 %v3519_v58, 16  ;;  %v4124_v55 = vld [vmem:[%s6396_s0 + $0xa] sm:$0x2]  ;;  %v6930_v46 = vshrl.u32 %v3533_v22, 16 }
  0x6e   :  { %6909 = vst [vmem:[#allocation53_spill] sm:$0xff] %v4054_v40  ;;  %6911 = vst [vmem:[#allocation77_spill] sm:$0xff] %v4064_v28  ;;  %v6918_v40 = vshrl.u32 %v6917_v30, 16  ;;  %v4284_v35 = vld [vmem:[%s6396_s0 + $0x32] sm:$0x2] }
  0x6f   :  { %6916 = vst [vmem:[#allocation54_spill] sm:$0xff] %v4074_v31  ;;  %6921 = vst [vmem:[#allocation79_spill] sm:$0xff] %v4104_v21  ;;  %v4119_v28 = vmax.bf16 %v6926_v45, %v3519_v58  ;;  %v4139_v58 = vld [vmem:[%s6396_s0 + $0x10] sm:$0x2]  ;;  %v4289_v32 = vld [vmem:[%s6396_s0 + $0x34] sm:$0x2] }
  0x70   :  { %v4079_v53 = vmax.bf16 %v6918_v40, %v6917_v30  ;;  %v4099_v40 = vld [vmem:[%s6396_s0 + $0x8] sm:$0x2]  ;;  %v4109_v30 = vmax.bf16 %v6922_v41, %v3509_v56  ;;  %v4129_v56 = vld [vmem:[%s6396_s0 + $0xc] sm:$0x2]  ;;  %v4149_v41 = vmax.bf16 %v6930_v46, %v3533_v22  ;;  %v4169_v22 = vld [vmem:[%s6396_s0 + $0x14] sm:$0x2] }
  0x71   :  { %6927 = vst [vmem:[#allocation82_spill] sm:$0xff] %v4119_v28  ;;  %v6932_v28 = vshrl.u32 %v3538_v50, 16  ;;  %6960 = vst [vmem:[#allocation104_spill] sm:$0xff] %v4284_v35  ;;  %v4318_v36 = vld [vmem:[%s6396_s0 + $0x3e] sm:$0x2] }
  0x72   :  { %6919 = vst [vmem:[#allocation55_spill] sm:$0xff] %v4079_v53  ;;  %6923 = vst [vmem:[#allocation80_spill] sm:$0xff] %v4109_v30  ;;  %v6924_v53 = vshrl.u32 %v3514_v29, 16  ;;  %v6934_v30 = vshrl.u32 %v3543_v61, 16  ;;  %v4323_v26 = vld [vmem:[%s6396_s0 + $0x40] sm:$0x2] }
  0x73   :  { %6931 = vst [vmem:[#allocation84_spill] sm:$0xff] %v4149_v41  ;;  %v6942_v41 = vshrl.u32 %v3567_v54, 16  ;;  %6961 = vst [vmem:[#allocation105_spill] sm:$0xff] %v4289_v32  ;;  %v4342_v25 = vld [vmem:[%s6396_s0 + $0x46] sm:$0x2] }
  0x74   :  { %v4114_v31 = vmax.bf16 %v6924_v53, %v3514_v29  ;;  %v4134_v29 = vld [vmem:[%s6396_s0 + $0xe] sm:$0x2]  ;;  %v6928_v53 = vshrl.u32 %v3528_v63, 16  ;;  %v4159_v21 = vmax.bf16 %v6934_v30, %v3543_v61  ;;  %v4179_v61 = vld [vmem:[%s6396_s0 + $0x18] sm:$0x2]  ;;  %6964 = vst [vmem:[#allocation108_spill] sm:$0xff] %v4308_v37 }
  0x75   :  { %6965 = vst [vmem:[#allocation109_spill] sm:$0xff] %v4313_v39  ;;  %6966 = vst [vmem:[#allocation110_spill] sm:$0xff] %v4318_v36  ;;  %v4347_v34 = vld [vmem:[%s6396_s0 + $0x48] sm:$0x2]  ;;  %v4452_v32 = vld [vmem:[%s6396_s0 + $0x6a] sm:$0x2] }
  0x76   :  { %6925 = vst [vmem:[#allocation81_spill] sm:$0xff] %v4114_v31  ;;  %v4144_v45 = vmax.bf16 %v6928_v53, %v3528_v63  ;;  %v4154_v31 = vmax.bf16 %v6932_v28, %v3538_v50  ;;  %6935 = vst [vmem:[#allocation86_spill] sm:$0xff] %v4159_v21  ;;  %v4164_v63 = vld [vmem:[%s6396_s0 + $0x12] sm:$0x2]  ;;  %v4174_v50 = vld [vmem:[%s6396_s0 + $0x16] sm:$0x2] }
  0x77   :  { %v6936_v28 = vshrl.u32 %v3552_v52, 16  ;;  %v6938_v53 = vshrl.u32 %v3557_v51, 16  ;;  %v6940_v21 = vshrl.u32 %v3562_v57, 16  ;;  %6967 = vst [vmem:[#allocation111_spill] sm:$0xff] %v4323_v26  ;;  %6970 = vst [vmem:[#allocation114_spill] sm:$0xff] %v4342_v25 }
  0x78   :  { %6929 = vst [vmem:[#allocation83_spill] sm:$0xff] %v4144_v45  ;;  %6933 = vst [vmem:[#allocation85_spill] sm:$0xff] %v4154_v31  ;;  %v4199_v45 = vmax.bf16 %v6942_v41, %v3567_v54  ;;  %v4219_v54 = vld [vmem:[%s6396_s0 + $0x20] sm:$0x2]  ;;  %v4457_v35 = vld [vmem:[%s6396_s0 + $0x6c] sm:$0x2] }
  0x79   :  { %v4184_v30 = vmax.bf16 %v6936_v28, %v3552_v52  ;;  %v4189_v46 = vmax.bf16 %v6938_v53, %v3557_v51  ;;  %v4194_v31 = vmax.bf16 %v6940_v21, %v3562_v57  ;;  %v4204_v52 = vld [vmem:[%s6396_s0 + $0x1a] sm:$0x2]  ;;  %v4209_v51 = vld [vmem:[%s6396_s0 + $0x1c] sm:$0x2]  ;;  %v4214_v57 = vld [vmem:[%s6396_s0 + $0x1e] sm:$0x2] }
  0x7a   :  { %6943 = vst [vmem:[#allocation90_spill] sm:$0xff] %v4199_v45  ;;  %6944 = vst [vmem:[#allocation91_spill] sm:$0xff] %v4214_v57  ;;  %v6946_v21 = vshrl.u32 %v3576_v44, 16  ;;  %v6948_v28 = vshrl.u32 %v3585_v60, 16  ;;  %v6950_v45 = vshrl.u32 %v3594_v47, 16  ;;  %v7022_v57 = vrot.slane %v4089_v49, 9 }
  0x7b   :  { %6937 = vst [vmem:[#allocation87_spill] sm:$0xff] %v4184_v30  ;;  %6939 = vst [vmem:[#allocation88_spill] sm:$0xff] %v4189_v46  ;;  %v4239_v46 = vld [vmem:[%s6396_s0 + $0x22] sm:$0x2]  ;;  %v4299_v30 = vld [vmem:[%s6396_s0 + $0x38] sm:$0x2] }
  0x7c   :  { %6941 = vst [vmem:[#allocation89_spill] sm:$0xff] %v4194_v31  ;;  %6945 = vst [vmem:[#allocation92_spill] sm:$0xff] %v4219_v54  ;;  %v4224_v41 = vmax.bf16 %v6946_v21, %v3576_v44  ;;  %v4229_v53 = vmax.bf16 %v6948_v28, %v3585_v60  ;;  %v4234_v31 = vmax.bf16 %v6950_v45, %v3594_v47  ;;  %v4244_v44 = vld [vmem:[%s6396_s0 + $0x24] sm:$0x2]  ;;  %v4249_v60 = vld [vmem:[%s6396_s0 + $0x26] sm:$0x2] }
  0x7d   :  { %6952 = vst [vmem:[#allocation96_spill] sm:$0xff] %v4239_v46  ;;  %6953 = vst [vmem:[#allocation97_spill] sm:$0xff] %v4244_v44  ;;  %v4254_v47 = vld [vmem:[%s6396_s0 + $0x28] sm:$0x2]  ;;  %v4260_v21 = vld [vmem:[%s6396_s0 + $0x2a] sm:$0x2]  ;;  %v4812_v12 = vmax.bf16 %v7022_v57, %v3624_v42 }
  0x7e   :  { %6947 = vst [vmem:[#allocation93_spill] sm:$0xff] %v4224_v41  ;;  %6949 = vst [vmem:[#allocation94_spill] sm:$0xff] %v4229_v53  ;;  %v4265_v28 = vld [vmem:[%s6396_s0 + $0x2c] sm:$0x2]  ;;  %v4275_v53 = vld [vmem:[%s6396_s0 + $0x30] sm:$0x2] }
  0x7f   :  { %6951 = vst [vmem:[#allocation95_spill] sm:$0xff] %v4234_v31  ;;  %6954 = vst [vmem:[#allocation98_spill] sm:$0xff] %v4249_v60  ;;  %v4270_v31 = vld [vmem:[%s6396_s0 + $0x2e] sm:$0x2]  ;;  %v4294_v45 = vld [vmem:[%s6396_s0 + $0x36] sm:$0x2] }
  0x80   :  { %6955 = vst [vmem:[#allocation99_spill] sm:$0xff] %v4254_v47  ;;  %6956 = vst [vmem:[#allocation100_spill] sm:$0xff] %v4260_v21  ;;  %v4404_v44 = vld [vmem:[%s6396_s0 + $0x5a] sm:$0x2]  ;;  %v4409_v46 = vld [vmem:[%s6396_s0 + $0x5c] sm:$0x2] }
  0x81   :  { %6957 = vst [vmem:[#allocation101_spill] sm:$0xff] %v4265_v28  ;;  %6958 = vst [vmem:[#allocation102_spill] sm:$0xff] %v4270_v31  ;;  %v4419_v47 = vld [vmem:[%s6396_s0 + $0x60] sm:$0x2]  ;;  %v4428_v28 = vld [vmem:[%s6396_s0 + $0x62] sm:$0x2] }
  0x82   :  { %6959 = vst [vmem:[#allocation103_spill] sm:$0xff] %v4275_v53  ;;  %6962 = vst [vmem:[#allocation106_spill] sm:$0xff] %v4294_v45  ;;  %v4433_v21 = vld [vmem:[%s6396_s0 + $0x64] sm:$0x2]  ;;  %v4438_v60 = vld [vmem:[%s6396_s0 + $0x66] sm:$0x2] }
  0x83   :  { %6963 = vst [vmem:[#allocation107_spill] sm:$0xff] %v4299_v30  ;;  %6971 = vst [vmem:[#allocation115_spill] sm:$0xff] %v4347_v34  ;;  %v4443_v53 = vld [vmem:[%s6396_s0 + $0x68] sm:$0x2]  ;;  %v4462_v31 = vld [vmem:[%s6396_s0 + $0x6e] sm:$0x2] }
  0x84   :  { %6980 = vst [vmem:[#allocation124_spill] sm:$0xff] %v4404_v44  ;;  %6981 = vst [vmem:[#allocation125_spill] sm:$0xff] %v4409_v46  ;;  %v4467_v30 = vld [vmem:[%s6396_s0 + $0x70] sm:$0x2]  ;;  %v4476_v39 = vld [vmem:[%s6396_s0 + $0x72] sm:$0x2] }
  0x85   :  { %6983 = vst [vmem:[#allocation127_spill] sm:$0xff] %v4419_v47  ;;  %6984 = vst [vmem:[#allocation128_spill] sm:$0xff] %v4428_v28  ;;  %v4481_v37 = vld [vmem:[%s6396_s0 + $0x74] sm:$0x2]  ;;  %v4486_v45 = vld [vmem:[%s6396_s0 + $0x76] sm:$0x2] }
  0x86   :  { %6985 = vst [vmem:[#allocation129_spill] sm:$0xff] %v4433_v21  ;;  %6986 = vst [vmem:[#allocation130_spill] sm:$0xff] %v4438_v60  ;;  %v4491_v26 = vld [vmem:[%s6396_s0 + $0x78] sm:$0x2]  ;;  %v4510_v36 = vld [vmem:[%s6396_s0 + $0x7e] sm:$0x2] }
  0x87   :  { %6987 = vst [vmem:[#allocation131_spill] sm:$0xff] %v4443_v53  ;;  %6988 = vst [vmem:[#allocation132_spill] sm:$0xff] %v4452_v32  ;;  %v4515_v34 = vld [vmem:[%s6396_s0 + $0x80] sm:$0x2]  ;;  %v4534_v25 = vld [vmem:[%s6396_s0 + $0x86] sm:$0x2] }
  0x88   :  { %6989 = vst [vmem:[#allocation133_spill] sm:$0xff] %v4457_v35  ;;  %6990 = vst [vmem:[#allocation134_spill] sm:$0xff] %v4462_v31  ;;  %v4572_v46 = vld [vmem:[%s6396_s0 + $0x92] sm:$0x2]  ;;  %v4577_v44 = vld [vmem:[%s6396_s0 + $0x94] sm:$0x2] }
  0x89   :  { %6991 = vst [vmem:[#allocation135_spill] sm:$0xff] %v4467_v30  ;;  %6992 = vst [vmem:[#allocation136_spill] sm:$0xff] %v4476_v39  ;;  %v4587_v47 = vld [vmem:[%s6396_s0 + $0x98] sm:$0x2]  ;;  %v4596_v21 = vld [vmem:[%s6396_s0 + $0x9a] sm:$0x2] }
  0x8a   :  { %6993 = vst [vmem:[#allocation137_spill] sm:$0xff] %v4481_v37  ;;  %6994 = vst [vmem:[#allocation138_spill] sm:$0xff] %v4486_v45  ;;  %v4601_v28 = vld [vmem:[%s6396_s0 + $0x9c] sm:$0x2]  ;;  %v4611_v53 = vld [vmem:[%s6396_s0 + $0xa0] sm:$0x2] }
  0x8b   :  { %6995 = vst [vmem:[#allocation139_spill] sm:$0xff] %v4491_v26  ;;  %6998 = vst [vmem:[#allocation142_spill] sm:$0xff] %v4510_v36  ;;  %v4620_v35 = vld [vmem:[%s6396_s0 + $0xa2] sm:$0x2]  ;;  %v4625_v32 = vld [vmem:[%s6396_s0 + $0xa4] sm:$0x2] }
  0x8c   :  { %6999 = vst [vmem:[#allocation143_spill] sm:$0xff] %v4515_v34  ;;  %7002 = vst [vmem:[#allocation146_spill] sm:$0xff] %v4534_v25  ;;  %v4630_v60 = vld [vmem:[%s6396_s0 + $0xa6] sm:$0x2]  ;;  %v4635_v30 = vld [vmem:[%s6396_s0 + $0xa8] sm:$0x2] }
  0x8d   :  { %7006 = vst [vmem:[#allocation150_spill] sm:$0xff] %v4558_v33  ;;  %7008 = vst [vmem:[#allocation152_spill] sm:$0xff] %v4572_v46  ;;  %v4644_v37 = vld [vmem:[%s6396_s0 + $0xaa] sm:$0x2]  ;;  %v4649_v39 = vld [vmem:[%s6396_s0 + $0xac] sm:$0x2] }
  0x8e   :  { %7009 = vst [vmem:[#allocation153_spill] sm:$0xff] %v4577_v44  ;;  %7011 = vst [vmem:[#allocation155_spill] sm:$0xff] %v4587_v47  ;;  %v4654_v31 = vld [vmem:[%s6396_s0 + $0xae] sm:$0x2]  ;;  %v4659_v26 = vld [vmem:[%s6396_s0 + $0xb0] sm:$0x2] }
  0x8f   :  { %7012 = vst [vmem:[#allocation156_spill] sm:$0xff] %v4596_v21  ;;  %7013 = vst [vmem:[#allocation157_spill] sm:$0xff] %v4601_v28  ;;  %v4673_v23 = vld [vmem:[%s6396_s0 + $0xb4] sm:$0x2]  ;;  %v4678_v45 = vld [vmem:[%s6396_s0 + $0xb6] sm:$0x2] }
  0x90   :  { %7015 = vst [vmem:[#allocation159_spill] sm:$0xff] %v4611_v53  ;;  %7016 = vst [vmem:[#allocation160_spill] sm:$0xff] %v4635_v30  ;;  %v4683_v34 = vld [vmem:[%s6396_s0 + $0xb8] sm:$0x2]  ;;  %v4692_v18 = vld [vmem:[%s6396_s0 + $0xba] sm:$0x2] }
  0x91   :  { %7017 = vst [vmem:[#allocation161_spill] sm:$0xff] %v4659_v26  ;;  %7018 = vst [vmem:[#allocation162_spill] sm:$0xff] %v4678_v45  ;;  %v4697_v17 = vld [vmem:[%s6396_s0 + $0xbc] sm:$0x2]  ;;  %v4702_v36 = vld [vmem:[%s6396_s0 + $0xbe] sm:$0x2] }
  0x92   :  { %7019 = vst [vmem:[#allocation163_spill] sm:$0xff] %v4683_v34  ;;  %v4707_v20 = vld [vmem:[%s6396_s0 + $0xc0] sm:$0x2]  ;;  %v4716_v14 = vld [vmem:[%s6396_s0 + $0xc2] sm:$0x2]  ;;  %v7020_v53 = vrot.slane %v4059_v27, 9 }
  0x93   :  { %v4721_v13 = vld [vmem:[%s6396_s0 + $0xc4] sm:$0x2]  ;;  %v4726_v25 = vld [vmem:[%s6396_s0 + $0xc6] sm:$0x2]  ;;  %v4731_v16 = vld [vmem:[%s6396_s0 + $0xc8] sm:$0x2] }
  0x94   :  { %v4740_v44 = vld [vmem:[%s6396_s0 + $0xca] sm:$0x2]  ;;  %v4745_v46 = vld [vmem:[%s6396_s0 + $0xcc] sm:$0x2]  ;;  %v4750_v33 = vld [vmem:[%s6396_s0 + $0xce] sm:$0x2]  ;;  %v4802_v19 = vmax.bf16 %v7020_v53, %v3614_v59 }
  0x95   :  { %v4755_v47 = vld [vmem:[%s6396_s0 + $0xd0] sm:$0x2]  ;;  %v4764_v28 = vld [vmem:[%s6396_s0 + $0xd2] sm:$0x2]  ;;  %v4773_v41 = vld [vmem:[%s6396_s0 + $0xd4] sm:$0x2] }
  0x96   :  { %v4782_v54 = vld [vmem:[%s6396_s0 + $0xd6] sm:$0x2]  ;;  %v7021_v34 = vrot.slane %v4084_v48, 9  ;;  %v7023_v26 = vrot.slane %v4094_v62, 9  ;;  %v7024_v27 = vrot.slane %v4099_v40, 9  ;;  %v7025_v48 = vrot.slane %v4124_v55, 9 }
  0x97   :  { %v7027_v49 = vrot.slane %v4134_v29, 9  ;;  %v7029_v62 = vrot.slane %v4164_v63, 9  ;;  %v7030_v40 = vrot.slane %v4169_v22, 9  ;;  %v7031_v55 = vrot.slane %v4174_v50, 9  ;;  %v7035_v63 = vld [vmem:[#allocation91_spill] sm:$0xff]  ;;  %v7037_v50 = vld [vmem:[#allocation56_spill] sm:$0xff] }
  0x98   :  { %v4807_v30 = vmax.bf16 %v7021_v34, %v3619_v38  ;;  %v4817_v21 = vmax.bf16 %v7023_v26, %v3629_v43  ;;  %v4822_v59 = vmax.bf16 %v7024_v27, %v3634_v0  ;;  %v4827_v38 = vmax.bf16 %v7025_v48, %v3639_v1  ;;  %v7038_v57 = vld [vmem:[#allocation92_spill] sm:$0xff]  ;;  %v7040_v53 = vld [vmem:[#allocation57_spill] sm:$0xff]  ;;  %v7043_v48 = vld [vmem:[#allocation58_spill] sm:$0xff] }
  0x99   :  { %v7026_v34 = vrot.slane %v4129_v56, 9  ;;  %v4837_v43 = vmax.bf16 %v7027_v49, %v3649_v3  ;;  %v7028_v26 = vrot.slane %v4139_v58, 9  ;;  %v4847_v1 = vmax.bf16 %v7029_v62, %v3659_v5  ;;  %v7041_v27 = vld [vmem:[#allocation96_spill] sm:$0xff]  ;;  %v7046_v49 = vld [vmem:[#allocation59_spill] sm:$0xff]  ;;  %v7071_v15 = vld [vmem:[#allocation105_spill] sm:$0xff] }
  0x9a   :  { %v4857_v3 = vmax.bf16 %v7031_v55, %v3669_v7  ;;  %v7032_v56 = vrot.slane %v4179_v61, 9  ;;  %v7033_v29 = vrot.slane %v4204_v52, 9  ;;  %v7034_v58 = vrot.slane %v4209_v51, 9  ;;  %v7050_v55 = vld [vmem:[#allocation99_spill] sm:$0xff]  ;;  %v7075_v45 = vld [vmem:[#allocation106_spill] sm:$0xff] }
  0x9b   :  { %v4832_v42 = vmax.bf16 %v7026_v34, %v3644_v2  ;;  %v4842_v0 = vmax.bf16 %v7028_v26, %v3654_v4  ;;  %v4852_v2 = vmax.bf16 %v7030_v40, %v3664_v6  ;;  %v7036_v22 = vrot.slane %v7035_v63, 9  ;;  %v7044_v34 = vld [vmem:[#allocation97_spill] sm:$0xff]  ;;  %v7047_v26 = vld [vmem:[#allocation98_spill] sm:$0xff]  ;;  %v7049_v40 = vld [vmem:[#allocation60_spill] sm:$0xff] }
  0x9c   :  { %v4862_v4 = vmax.bf16 %v7032_v56, %v3674_v8  ;;  %v4867_v5 = vmax.bf16 %v7033_v29, %v3679_v9  ;;  %v4872_v6 = vmax.bf16 %v7034_v58, %v3684_v10  ;;  %v7039_v61 = vrot.slane %v7038_v57, 9  ;;  %v7052_v58 = vld [vmem:[#allocation61_spill] sm:$0xff]  ;;  %v7053_v63 = vld [vmem:[#allocation100_spill] sm:$0xff]  ;;  %v7055_v57 = vld [vmem:[#allocation62_spill] sm:$0xff] }
  0x9d   :  { %v4877_v7 = vmax.bf16 %v7036_v22, %v3689_v11  ;;  %v7042_v52 = vrot.slane %v7041_v27, 9  ;;  %v7045_v51 = vrot.slane %v7044_v34, 9  ;;  %v7048_v62 = vrot.slane %v7047_v26, 9  ;;  %v7063_v26 = vld [vmem:[#allocation103_spill] sm:$0xff] }
  0x9e   :  { %v4882_v8 = vmax.bf16 %v7039_v61, %v7037_v50  ;;  %v7051_v56 = vrot.slane %v7050_v55, 9  ;;  %v7054_v22 = vrot.slane %v7053_v63, 9  ;;  %v7056_v61 = vld [vmem:[#allocation101_spill] sm:$0xff] }
  0x9f   :  { %v4887_v9 = vmax.bf16 %v7042_v52, %v7040_v53  ;;  %v4892_v10 = vmax.bf16 %v7045_v51, %v7043_v48  ;;  %v4897_v11 = vmax.bf16 %v7048_v62, %v7046_v49  ;;  %v7057_v53 = vrot.slane %v7056_v61, 9  ;;  %v7058_v52 = vld [vmem:[#allocation63_spill] sm:$0xff]  ;;  %v7059_v48 = vld [vmem:[#allocation102_spill] sm:$0xff]  ;;  %v7062_v49 = vld [vmem:[#allocation64_spill] sm:$0xff] }
  0xa0   :  { %v4902_v29 = vmax.bf16 %v7051_v56, %v7049_v40  ;;  %v4907_v50 = vmax.bf16 %v7054_v22, %v7052_v58  ;;  %v7060_v34 = vrot.slane %v7059_v48, 9  ;;  %v7064_v62 = vrot.slane %v7063_v26, 9  ;;  %v7066_v55 = vld [vmem:[#allocation65_spill] sm:$0xff]  ;;  %v7067_v56 = vld [vmem:[#allocation104_spill] sm:$0xff]  ;;  %v7070_v22 = vld [vmem:[#allocation66_spill] sm:$0xff] }
  0xa1   :  { %v4912_v27 = vmax.bf16 %v7057_v53, %v7055_v57  ;;  %v7068_v63 = vrot.slane %v7067_v56, 9  ;;  %v7072_v61 = vrot.slane %v7071_v15, 9  ;;  %v7074_v53 = vld [vmem:[#allocation67_spill] sm:$0xff]  ;;  %v7076_v48 = vrot.slane %v7075_v45, 9 }
  0xa2   :  { %v4917_v51 = vmax.bf16 %v7060_v34, %v7058_v52  ;;  %v4922_v40 = vmax.bf16 %v7064_v62, %v7062_v49  ;;  %v7078_v34 = vld [vmem:[#allocation68_spill] sm:$0xff]  ;;  %v7082_v62 = vld [vmem:[#allocation69_spill] sm:$0xff] }
  0xa3   :  { %v4927_v58 = vmax.bf16 %v7068_v63, %v7066_v55  ;;  %v4932_v57 = vmax.bf16 %v7072_v61, %v7070_v22  ;;  %v4937_v52 = vmax.bf16 %v7076_v48, %v7074_v53  ;;  %v7086_v63 = vld [vmem:[#allocation70_spill] sm:$0xff]  ;;  %v7094_v48 = vld [vmem:[#allocation3_spill] sm:$0xff] }
  0xa4   :  { %7061 = vst [vmem:[#allocation91_spill] sm:$0xff] %v4917_v51  ;;  %7065 = vst [vmem:[#allocation56_spill] sm:$0xff] %v4922_v40  ;;  %v7079_v51 = vld [vmem:[#allocation107_spill] sm:$0xff]  ;;  %v7083_v40 = vld [vmem:[#allocation108_spill] sm:$0xff] }
  0xa5   :  { %7069 = vst [vmem:[#allocation92_spill] sm:$0xff] %v4927_v58  ;;  %7073 = vst [vmem:[#allocation57_spill] sm:$0xff] %v4932_v57  ;;  %v7080_v26 = vrot.slane %v7079_v51, 9  ;;  %v7084_v56 = vrot.slane %v7083_v40, 9  ;;  %v7087_v58 = vld [vmem:[#allocation109_spill] sm:$0xff]  ;;  %v7090_v61 = vld [vmem:[#allocation2_spill] sm:$0xff] }
  0xa6   :  { %7077 = vst [vmem:[#allocation96_spill] sm:$0xff] %v4937_v52  ;;  %v7088_v15 = vrot.slane %v7087_v58, 9  ;;  %v7091_v57 = vld [vmem:[#allocation110_spill] sm:$0xff]  ;;  %v7095_v52 = vld [vmem:[#allocation111_spill] sm:$0xff] }
  0xa7   :  { %v4942_v49 = vmax.bf16 %v7080_v26, %v7078_v34  ;;  %v4947_v55 = vmax.bf16 %v7084_v56, %v7082_v62  ;;  %v7092_v45 = vrot.slane %v7091_v57, 9  ;;  %v7096_v51 = vrot.slane %v7095_v52, 9  ;;  %v7098_v26 = vld [vmem:[#allocation4_spill] sm:$0xff]  ;;  %v7102_v56 = vld [vmem:[#allocation5_spill] sm:$0xff] }
  0xa8   :  { %v4952_v22 = vmax.bf16 %v7088_v15, %v7086_v63  ;;  %v7106_v15 = vld [vmem:[#allocation6_spill] sm:$0xff] }
  0xa9   :  { %7081 = vst [vmem:[#allocation58_spill] sm:$0xff] %v4942_v49  ;;  %7085 = vst [vmem:[#allocation97_spill] sm:$0xff] %v4947_v55  ;;  %v4957_v53 = vmax.bf16 %v7092_v45, %v7090_v61  ;;  %v4962_v34 = vmax.bf16 %v7096_v51, %v7094_v48  ;;  %v7099_v49 = vld [vmem:[#allocation112_spill] sm:$0xff]  ;;  %v7103_v55 = vld [vmem:[#allocation113_spill] sm:$0xff] }
  0xaa   :  { %7089 = vst [vmem:[#allocation59_spill] sm:$0xff] %v4952_v22  ;;  %v7100_v40 = vrot.slane %v7099_v49, 9  ;;  %v7104_v58 = vrot.slane %v7103_v55, 9  ;;  %v7107_v22 = vld [vmem:[#allocation114_spill] sm:$0xff]  ;;  %v7110_v45 = vld [vmem:[#allocation7_spill] sm:$0xff]  ;;  %v7114_v51 = vld [vmem:[#allocation8_spill] sm:$0xff] }
  0xab   :  { %7093 = vst [vmem:[#allocation98_spill] sm:$0xff] %v4957_v53  ;;  %7097 = vst [vmem:[#allocation60_spill] sm:$0xff] %v4962_v34  ;;  %v7108_v57 = vrot.slane %v7107_v22, 9  ;;  %v7111_v53 = vld [vmem:[#allocation115_spill] sm:$0xff]  ;;  %v7115_v34 = vld [vmem:[#allocation116_spill] sm:$0xff] }
  0xac   :  { %v4967_v62 = vmax.bf16 %v7100_v40, %v7098_v26  ;;  %v4972_v63 = vmax.bf16 %v7104_v58, %v7102_v56  ;;  %v7112_v52 = vrot.slane %v7111_v53, 9  ;;  %v7116_v49 = vrot.slane %v7115_v34, 9  ;;  %v7118_v40 = vld [vmem:[#allocation9_spill] sm:$0xff]  ;;  %v7122_v58 = vld [vmem:[#allocation10_spill] sm:$0xff] }
  0xad   :  { %v4977_v61 = vmax.bf16 %v7108_v57, %v7106_v15  ;;  %v7126_v57 = vld [vmem:[#allocation11_spill] sm:$0xff] }
  0xae   :  { %7101 = vst [vmem:[#allocation99_spill] sm:$0xff] %v4967_v62  ;;  %7105 = vst [vmem:[#allocation61_spill] sm:$0xff] %v4972_v63  ;;  %v4982_v48 = vmax.bf16 %v7112_v52, %v7110_v45  ;;  %v4987_v26 = vmax.bf16 %v7116_v49, %v7114_v51  ;;  %v7119_v62 = vld [vmem:[#allocation117_spill] sm:$0xff]  ;;  %v7123_v63 = vld [vmem:[#allocation118_spill] sm:$0xff] }
  0xaf   :  { %7109 = vst [vmem:[#allocation100_spill] sm:$0xff] %v4977_v61  ;;  %v7120_v55 = vrot.slane %v7119_v62, 9  ;;  %v7124_v22 = vrot.slane %v7123_v63, 9  ;;  %v7127_v61 = vld [vmem:[#allocation119_spill] sm:$0xff]  ;;  %v7130_v52 = vld [vmem:[#allocation12_spill] sm:$0xff]  ;;  %v7134_v49 = vld [vmem:[#allocation13_spill] sm:$0xff] }
  0xb0   :  { %7113 = vst [vmem:[#allocation62_spill] sm:$0xff] %v4982_v48  ;;  %7117 = vst [vmem:[#allocation101_spill] sm:$0xff] %v4987_v26  ;;  %v7128_v53 = vrot.slane %v7127_v61, 9  ;;  %v7131_v48 = vld [vmem:[#allocation120_spill] sm:$0xff]  ;;  %v7135_v26 = vld [vmem:[#allocation121_spill] sm:$0xff] }
  0xb1   :  { %v4992_v56 = vmax.bf16 %v7120_v55, %v7118_v40  ;;  %v4997_v15 = vmax.bf16 %v7124_v22, %v7122_v58  ;;  %v7132_v34 = vrot.slane %v7131_v48, 9  ;;  %v7136_v62 = vrot.slane %v7135_v26, 9  ;;  %v7138_v55 = vld [vmem:[#allocation14_spill] sm:$0xff]  ;;  %v7142_v22 = vld [vmem:[#allocation15_spill] sm:$0xff] }
  0xb2   :  { %v5002_v45 = vmax.bf16 %v7128_v53, %v7126_v57  ;;  %v7146_v53 = vld [vmem:[#allocation16_spill] sm:$0xff] }
  0xb3   :  { %7121 = vst [vmem:[#allocation63_spill] sm:$0xff] %v4992_v56  ;;  %7125 = vst [vmem:[#allocation102_spill] sm:$0xff] %v4997_v15  ;;  %v5007_v51 = vmax.bf16 %v7132_v34, %v7130_v52  ;;  %v5012_v40 = vmax.bf16 %v7136_v62, %v7134_v49  ;;  %v7139_v56 = vld [vmem:[#allocation122_spill] sm:$0xff]  ;;  %v7143_v15 = vld [vmem:[#allocation123_spill] sm:$0xff] }
  0xb4   :  { %7129 = vst [vmem:[#allocation64_spill] sm:$0xff] %v5002_v45  ;;  %v7140_v63 = vrot.slane %v7139_v56, 9  ;;  %v7144_v61 = vrot.slane %v7143_v15, 9  ;;  %v7147_v45 = vld [vmem:[#allocation124_spill] sm:$0xff]  ;;  %v7150_v34 = vld [vmem:[#allocation17_spill] sm:$0xff]  ;;  %v7154_v62 = vld [vmem:[#allocation18_spill] sm:$0xff] }
  0xb5   :  { %7133 = vst [vmem:[#allocation103_spill] sm:$0xff] %v5007_v51  ;;  %7137 = vst [vmem:[#allocation65_spill] sm:$0xff] %v5012_v40  ;;  %v7148_v48 = vrot.slane %v7147_v45, 9  ;;  %v7151_v51 = vld [vmem:[#allocation125_spill] sm:$0xff]  ;;  %v7155_v40 = vld [vmem:[#allocation126_spill] sm:$0xff] }
  0xb6   :  { %v5017_v58 = vmax.bf16 %v7140_v63, %v7138_v55  ;;  %v5022_v57 = vmax.bf16 %v7144_v61, %v7142_v22  ;;  %v7152_v26 = vrot.slane %v7151_v51, 9  ;;  %v7156_v56 = vrot.slane %v7155_v40, 9  ;;  %v7158_v63 = vld [vmem:[#allocation19_spill] sm:$0xff]  ;;  %v7162_v61 = vld [vmem:[#allocation20_spill] sm:$0xff] }
  0xb7   :  { %v5027_v52 = vmax.bf16 %v7148_v48, %v7146_v53  ;;  %v7166_v48 = vld [vmem:[#allocation21_spill] sm:$0xff] }
  0xb8   :  { %7141 = vst [vmem:[#allocation104_spill] sm:$0xff] %v5017_v58  ;;  %7145 = vst [vmem:[#allocation66_spill] sm:$0xff] %v5022_v57  ;;  %v5032_v49 = vmax.bf16 %v7152_v26, %v7150_v34  ;;  %v5037_v55 = vmax.bf16 %v7156_v56, %v7154_v62  ;;  %v7159_v58 = vld [vmem:[#allocation127_spill] sm:$0xff]  ;;  %v7163_v57 = vld [vmem:[#allocation128_spill] sm:$0xff] }
  0xb9   :  { %7149 = vst [vmem:[#allocation105_spill] sm:$0xff] %v5027_v52  ;;  %v7160_v15 = vrot.slane %v7159_v58, 9  ;;  %v7164_v45 = vrot.slane %v7163_v57, 9  ;;  %v7167_v52 = vld [vmem:[#allocation129_spill] sm:$0xff]  ;;  %v7170_v26 = vld [vmem:[#allocation22_spill] sm:$0xff]  ;;  %v7174_v56 = vld [vmem:[#allocation23_spill] sm:$0xff] }
  0xba   :  { %7153 = vst [vmem:[#allocation67_spill] sm:$0xff] %v5032_v49  ;;  %7157 = vst [vmem:[#allocation106_spill] sm:$0xff] %v5037_v55  ;;  %v7168_v51 = vrot.slane %v7167_v52, 9  ;;  %v7171_v49 = vld [vmem:[#allocation130_spill] sm:$0xff]  ;;  %v7175_v55 = vld [vmem:[#allocation131_spill] sm:$0xff] }
  0xbb   :  { %v5042_v22 = vmax.bf16 %v7160_v15, %v7158_v63  ;;  %v5047_v53 = vmax.bf16 %v7164_v45, %v7162_v61  ;;  %v7172_v40 = vrot.slane %v7171_v49, 9  ;;  %v7176_v58 = vrot.slane %v7175_v55, 9  ;;  %v7178_v15 = vld [vmem:[#allocation24_spill] sm:$0xff]  ;;  %v7182_v45 = vld [vmem:[#allocation25_spill] sm:$0xff] }
  0xbc   :  { %v5052_v34 = vmax.bf16 %v7168_v51, %v7166_v48  ;;  %v7186_v51 = vld [vmem:[#allocation26_spill] sm:$0xff] }
  0xbd   :  { %7161 = vst [vmem:[#allocation68_spill] sm:$0xff] %v5042_v22  ;;  %7165 = vst [vmem:[#allocation107_spill] sm:$0xff] %v5047_v53  ;;  %v5057_v62 = vmax.bf16 %v7172_v40, %v7170_v26  ;;  %v5062_v63 = vmax.bf16 %v7176_v58, %v7174_v56  ;;  %v7179_v22 = vld [vmem:[#allocation132_spill] sm:$0xff]  ;;  %v7183_v53 = vld [vmem:[#allocation133_spill] sm:$0xff] }
  0xbe   :  { %7169 = vst [vmem:[#allocation69_spill] sm:$0xff] %v5052_v34  ;;  %v7180_v57 = vrot.slane %v7179_v22, 9  ;;  %v7184_v52 = vrot.slane %v7183_v53, 9  ;;  %v7187_v34 = vld [vmem:[#allocation134_spill] sm:$0xff]  ;;  %v7190_v40 = vld [vmem:[#allocation27_spill] sm:$0xff]  ;;  %v7194_v58 = vld [vmem:[#allocation28_spill] sm:$0xff] }
  0xbf   :  { %7173 = vst [vmem:[#allocation108_spill] sm:$0xff] %v5057_v62  ;;  %7177 = vst [vmem:[#allocation70_spill] sm:$0xff] %v5062_v63  ;;  %v7188_v49 = vrot.slane %v7187_v34, 9  ;;  %v7191_v62 = vld [vmem:[#allocation135_spill] sm:$0xff]  ;;  %v7195_v63 = vld [vmem:[#allocation136_spill] sm:$0xff] }
  0xc0   :  { %v5067_v61 = vmax.bf16 %v7180_v57, %v7178_v15  ;;  %v5072_v48 = vmax.bf16 %v7184_v52, %v7182_v45  ;;  %v7192_v55 = vrot.slane %v7191_v62, 9  ;;  %v7196_v22 = vrot.slane %v7195_v63, 9  ;;  %v7198_v57 = vld [vmem:[#allocation29_spill] sm:$0xff]  ;;  %v7202_v52 = vld [vmem:[#allocation30_spill] sm:$0xff] }
  0xc1   :  { %v5077_v26 = vmax.bf16 %v7188_v49, %v7186_v51  ;;  %v7206_v49 = vld [vmem:[#allocation31_spill] sm:$0xff] }
  0xc2   :  { %7181 = vst [vmem:[#allocation109_spill] sm:$0xff] %v5067_v61  ;;  %7185 = vst [vmem:[#allocation2_spill] sm:$0xff] %v5072_v48  ;;  %v5082_v56 = vmax.bf16 %v7192_v55, %v7190_v40  ;;  %v5087_v15 = vmax.bf16 %v7196_v22, %v7194_v58  ;;  %v7199_v61 = vld [vmem:[#allocation137_spill] sm:$0xff]  ;;  %v7203_v48 = vld [vmem:[#allocation138_spill] sm:$0xff] }
  0xc3   :  { %7189 = vst [vmem:[#allocation110_spill] sm:$0xff] %v5077_v26  ;;  %v7200_v53 = vrot.slane %v7199_v61, 9  ;;  %v7204_v34 = vrot.slane %v7203_v48, 9  ;;  %v7207_v26 = vld [vmem:[#allocation139_spill] sm:$0xff]  ;;  %v7210_v55 = vld [vmem:[#allocation32_spill] sm:$0xff]  ;;  %v7214_v22 = vld [vmem:[#allocation33_spill] sm:$0xff] }
  0xc4   :  { %7193 = vst [vmem:[#allocation3_spill] sm:$0xff] %v5082_v56  ;;  %7197 = vst [vmem:[#allocation111_spill] sm:$0xff] %v5087_v15  ;;  %v7208_v62 = vrot.slane %v7207_v26, 9  ;;  %v7211_v56 = vld [vmem:[#allocation140_spill] sm:$0xff]  ;;  %v7215_v15 = vld [vmem:[#allocation141_spill] sm:$0xff] }
  0xc5   :  { %v5092_v45 = vmax.bf16 %v7200_v53, %v7198_v57  ;;  %v5097_v51 = vmax.bf16 %v7204_v34, %v7202_v52  ;;  %v7212_v63 = vrot.slane %v7211_v56, 9  ;;  %v7216_v61 = vrot.slane %v7215_v15, 9  ;;  %v7218_v53 = vld [vmem:[#allocation34_spill] sm:$0xff]  ;;  %v7222_v34 = vld [vmem:[#allocation35_spill] sm:$0xff] }
  0xc6   :  { %v5102_v40 = vmax.bf16 %v7208_v62, %v7206_v49  ;;  %v7226_v62 = vld [vmem:[#allocation36_spill] sm:$0xff] }
  0xc7   :  { %7201 = vst [vmem:[#allocation4_spill] sm:$0xff] %v5092_v45  ;;  %7205 = vst [vmem:[#allocation112_spill] sm:$0xff] %v5097_v51  ;;  %v5107_v58 = vmax.bf16 %v7212_v63, %v7210_v55  ;;  %v5112_v57 = vmax.bf16 %v7216_v61, %v7214_v22  ;;  %v7219_v45 = vld [vmem:[#allocation142_spill] sm:$0xff]  ;;  %v7223_v51 = vld [vmem:[#allocation143_spill] sm:$0xff] }
  0xc8   :  { %7209 = vst [vmem:[#allocation5_spill] sm:$0xff] %v5102_v40  ;;  %v7220_v48 = vrot.slane %v7219_v45, 9  ;;  %v7224_v26 = vrot.slane %v7223_v51, 9  ;;  %v7227_v40 = vld [vmem:[#allocation144_spill] sm:$0xff]  ;;  %v7230_v63 = vld [vmem:[#allocation37_spill] sm:$0xff]  ;;  %v7234_v61 = vld [vmem:[#allocation38_spill] sm:$0xff] }
  0xc9   :  { %7213 = vst [vmem:[#allocation113_spill] sm:$0xff] %v5107_v58  ;;  %7217 = vst [vmem:[#allocation6_spill] sm:$0xff] %v5112_v57  ;;  %v7228_v56 = vrot.slane %v7227_v40, 9  ;;  %v7231_v58 = vld [vmem:[#allocation145_spill] sm:$0xff]  ;;  %v7235_v57 = vld [vmem:[#allocation146_spill] sm:$0xff] }
  0xca   :  { %v5117_v52 = vmax.bf16 %v7220_v48, %v7218_v53  ;;  %v5122_v49 = vmax.bf16 %v7224_v26, %v7222_v34  ;;  %v7232_v15 = vrot.slane %v7231_v58, 9  ;;  %v7236_v45 = vrot.slane %v7235_v57, 9  ;;  %v7238_v48 = vld [vmem:[#allocation39_spill] sm:$0xff]  ;;  %v7242_v26 = vld [vmem:[#allocation40_spill] sm:$0xff] }
  0xcb   :  { %v5127_v55 = vmax.bf16 %v7228_v56, %v7226_v62  ;;  %v7246_v56 = vld [vmem:[#allocation41_spill] sm:$0xff] }
  0xcc   :  { %7221 = vst [vmem:[#allocation114_spill] sm:$0xff] %v5117_v52  ;;  %7225 = vst [vmem:[#allocation7_spill] sm:$0xff] %v5122_v49  ;;  %v5132_v22 = vmax.bf16 %v7232_v15, %v7230_v63  ;;  %v5137_v53 = vmax.bf16 %v7236_v45, %v7234_v61  ;;  %v7239_v52 = vld [vmem:[#allocation147_spill] sm:$0xff]  ;;  %v7243_v49 = vld [vmem:[#allocation148_spill] sm:$0xff] }
  0xcd   :  { %7229 = vst [vmem:[#allocation115_spill] sm:$0xff] %v5127_v55  ;;  %v7240_v51 = vrot.slane %v7239_v52, 9  ;;  %v7244_v40 = vrot.slane %v7243_v49, 9  ;;  %v7247_v55 = vld [vmem:[#allocation149_spill] sm:$0xff]  ;;  %v7250_v15 = vld [vmem:[#allocation42_spill] sm:$0xff]  ;;  %v7254_v45 = vld [vmem:[#allocation43_spill] sm:$0xff] }
  0xce   :  { %7233 = vst [vmem:[#allocation8_spill] sm:$0xff] %v5132_v22  ;;  %7237 = vst [vmem:[#allocation116_spill] sm:$0xff] %v5137_v53  ;;  %v7248_v58 = vrot.slane %v7247_v55, 9  ;;  %v7251_v22 = vld [vmem:[#allocation150_spill] sm:$0xff]  ;;  %v7255_v53 = vld [vmem:[#allocation151_spill] sm:$0xff] }
  0xcf   :  { %v5142_v34 = vmax.bf16 %v7240_v51, %v7238_v48  ;;  %v5147_v62 = vmax.bf16 %v7244_v40, %v7242_v26  ;;  %v7252_v57 = vrot.slane %v7251_v22, 9  ;;  %v7256_v52 = vrot.slane %v7255_v53, 9  ;;  %v7258_v51 = vld [vmem:[#allocation44_spill] sm:$0xff]  ;;  %v7262_v40 = vld [vmem:[#allocation45_spill] sm:$0xff] }
  0xd0   :  { %v5152_v63 = vmax.bf16 %v7248_v58, %v7246_v56  ;;  %v7266_v58 = vld [vmem:[#allocation46_spill] sm:$0xff] }
  0xd1   :  { %7241 = vst [vmem:[#allocation9_spill] sm:$0xff] %v5142_v34  ;;  %7245 = vst [vmem:[#allocation117_spill] sm:$0xff] %v5147_v62  ;;  %v5157_v61 = vmax.bf16 %v7252_v57, %v7250_v15  ;;  %v5162_v48 = vmax.bf16 %v7256_v52, %v7254_v45  ;;  %v7259_v34 = vld [vmem:[#allocation152_spill] sm:$0xff]  ;;  %v7263_v62 = vld [vmem:[#allocation153_spill] sm:$0xff] }
  0xd2   :  { %7249 = vst [vmem:[#allocation10_spill] sm:$0xff] %v5152_v63  ;;  %v7260_v49 = vrot.slane %v7259_v34, 9  ;;  %v7264_v55 = vrot.slane %v7263_v62, 9  ;;  %v7267_v63 = vld [vmem:[#allocation154_spill] sm:$0xff]  ;;  %v7270_v57 = vld [vmem:[#allocation47_spill] sm:$0xff]  ;;  %v7274_v52 = vld [vmem:[#allocation48_spill] sm:$0xff] }
  0xd3   :  { %7253 = vst [vmem:[#allocation118_spill] sm:$0xff] %v5157_v61  ;;  %7257 = vst [vmem:[#allocation11_spill] sm:$0xff] %v5162_v48  ;;  %v7268_v22 = vrot.slane %v7267_v63, 9  ;;  %v7271_v61 = vld [vmem:[#allocation155_spill] sm:$0xff]  ;;  %v7275_v48 = vld [vmem:[#allocation156_spill] sm:$0xff] }
  0xd4   :  { %v5167_v26 = vmax.bf16 %v7260_v49, %v7258_v51  ;;  %v5172_v56 = vmax.bf16 %v7264_v55, %v7262_v40  ;;  %v7272_v53 = vrot.slane %v7271_v61, 9  ;;  %v7276_v34 = vrot.slane %v7275_v48, 9  ;;  %v7277_v49 = vld [vmem:[#allocation49_spill] sm:$0xff]  ;;  %v7281_v55 = vld [vmem:[#allocation50_spill] sm:$0xff] }
  0xd5   :  { %v5177_v15 = vmax.bf16 %v7268_v22, %v7266_v58  ;;  %v7285_v22 = vld [vmem:[#allocation51_spill] sm:$0xff]  ;;  %v7290_v48 = vrot.slane %v4620_v35, 9  ;;  %v7301_v35 = vrot.slane %v4644_v37, 9  ;;  %v7314_v37 = vrot.slane %v4668_v24, 9 }
  0xd6   :  { %7261 = vst [vmem:[#allocation119_spill] sm:$0xff] %v5167_v26  ;;  %7265 = vst [vmem:[#allocation12_spill] sm:$0xff] %v5172_v56  ;;  %v5182_v45 = vmax.bf16 %v7272_v53, %v7270_v57  ;;  %v5187_v51 = vmax.bf16 %v7276_v34, %v7274_v52  ;;  %v7278_v26 = vld [vmem:[#allocation157_spill] sm:$0xff]  ;;  %v7282_v56 = vld [vmem:[#allocation158_spill] sm:$0xff] }
  0xd7   :  { %7269 = vst [vmem:[#allocation120_spill] sm:$0xff] %v5177_v15  ;;  %v7279_v62 = vrot.slane %v7278_v26, 9  ;;  %v7283_v63 = vrot.slane %v7282_v56, 9  ;;  %v7286_v15 = vld [vmem:[#allocation159_spill] sm:$0xff]  ;;  %v7292_v34 = vld [vmem:[#allocation72_spill] sm:$0xff]  ;;  %v7293_v26 = vrot.slane %v4625_v32, 9 }
  0xd8   :  { %7273 = vst [vmem:[#allocation13_spill] sm:$0xff] %v5182_v45  ;;  %v7287_v61 = vrot.slane %v7286_v15, 9  ;;  %v7289_v53 = vld [vmem:[#allocation71_spill] sm:$0xff]  ;;  %v7295_v56 = vrot.slane %v4630_v60, 9  ;;  %v7304_v32 = vrot.slane %v4649_v39, 9  ;;  %v7307_v60 = vrot.slane %v4654_v31, 9 }
  0xd9   :  { %v5192_v40 = vmax.bf16 %v7279_v62, %v7277_v49  ;;  %v5197_v58 = vmax.bf16 %v7283_v63, %v7281_v55  ;;  %v5207_v52 = vmax.bf16 %v7290_v48, %v7289_v53  ;;  %v5212_v49 = vmax.bf16 %v7293_v26, %v7292_v34  ;;  %v7294_v62 = vld [vmem:[#allocation73_spill] sm:$0xff]  ;;  %v7297_v63 = vld [vmem:[#allocation52_spill] sm:$0xff]  ;;  %v7303_v48 = vld [vmem:[#allocation75_spill] sm:$0xff] }
  0xda   :  { %v5202_v57 = vmax.bf16 %v7287_v61, %v7285_v22  ;;  %v5217_v55 = vmax.bf16 %v7295_v56, %v7294_v62  ;;  %v7300_v61 = vld [vmem:[#allocation74_spill] sm:$0xff]  ;;  %v5232_v34 = vmax.bf16 %v7304_v32, %v7303_v48  ;;  %v7306_v26 = vld [vmem:[#allocation76_spill] sm:$0xff]  ;;  %v7309_v56 = vld [vmem:[#allocation53_spill] sm:$0xff]  ;;  %v7315_v39 = vlaneseq }
  0xdb   :  { %7280 = vst [vmem:[#allocation121_spill] sm:$0xff] %v5192_v40  ;;  %7284 = vst [vmem:[#allocation14_spill] sm:$0xff] %v5197_v58  ;;  %v7298_v58 = vld [vmem:[#allocation160_spill] sm:$0xff]  ;;  %v5227_v53 = vmax.bf16 %v7301_v35, %v7300_v61  ;;  %v5237_v62 = vmax.bf16 %v7307_v60, %v7306_v26  ;;  %v2952_v35 = vmov 1983009808   ;;  %v7316_v32 = vld [vmem:[#allocation78_spill] sm:$0xff] }
  0xdc   :  { %7288 = vst [vmem:[#allocation122_spill] sm:$0xff] %v5202_v57  ;;  %7291 = vst [vmem:[#allocation15_spill] sm:$0xff] %v5207_v52  ;;  %v7299_v15 = vrot.slane %v7298_v58, 9  ;;  %v1632_v48 = vshrl.u32 %v7315_v39, 7  ;;  %v7318_v26 = vld [vmem:[#allocation54_spill] sm:$0xff]  ;;  %v7327_v39 = vld [vmem:[#allocation80_spill] sm:$0xff] }
  0xdd   :  { %7296 = vst [vmem:[#allocation123_spill] sm:$0xff] %v5217_v55  ;;  %7302 = vst [vmem:[#allocation16_spill] sm:$0xff] %v5227_v53  ;;  %v7310_v55 = vld [vmem:[#allocation161_spill] sm:$0xff]  ;;  %v1629_v53 = vunpack.c.l.s4 %v2952_v35  ;;  %v7319_v60 = vld [vmem:[#allocation162_spill] sm:$0xff] }
  0xde   :  { %v5222_v22 = vmax.bf16 %v7299_v15, %v7297_v63  ;;  %7305 = vst [vmem:[#allocation124_spill] sm:$0xff] %v5232_v34  ;;  %7308 = vst [vmem:[#allocation17_spill] sm:$0xff] %v5237_v62  ;;  %v7311_v58 = vrot.slane %v7310_v55, 9  ;;  %v7313_v15 = vld [vmem:[#allocation77_spill] sm:$0xff]  ;;  %v7317_v34 = vrot.slane %v4673_v23, 9  ;;  %v7320_v62 = vrot.slane %v7319_v60, 9 }
  0xdf   :  { %v5247_v61 = vmax.bf16 %v7314_v37, %v7313_v15  ;;  %v7325_v15 = vld [vmem:[#allocation79_spill] sm:$0xff]  ;;  %v7326_v37 = vrot.slane %v4692_v18, 9  ;;  %v7328_v23 = vrot.slane %v4697_v17, 9  ;;  %v7330_v60 = vrot.slane %v4702_v36, 9 }
  0xe0   :  { %v5242_v63 = vmax.bf16 %v7311_v58, %v7309_v56  ;;  %v5253_v31 = vmax.bf16 %v7317_v34, %v7316_v32  ;;  %v5258_v55 = vmax.bf16 %v7320_v62, %v7318_v26  ;;  %v7321_v56 = vld [vmem:[#allocation55_spill] sm:$0xff]  ;;  %v7329_v32 = vld [vmem:[#allocation81_spill] sm:$0xff]  ;;  %v7331_v26 = vld [vmem:[#allocation82_spill] sm:$0xff]  ;;  %v7334_v18 = vrot.slane %v4716_v14, 9 }
  0xe1   :  { %v7322_v58 = vld [vmem:[#allocation163_spill] sm:$0xff]  ;;  %v5268_v35 = vmax.bf16 %v7326_v37, %v7325_v15  ;;  %v5273_v34 = vmax.bf16 %v7328_v23, %v7327_v39  ;;  %v5278_v62 = vmax.bf16 %v7330_v60, %v7329_v32  ;;  %v7335_v37 = vld [vmem:[#allocation84_spill] sm:$0xff]  ;;  %v7336_v17 = vrot.slane %v4721_v13, 9  ;;  %v7337_v23 = vld [vmem:[#allocation85_spill] sm:$0xff] }
  0xe2   :  { %7312 = vst [vmem:[#allocation125_spill] sm:$0xff] %v5242_v63  ;;  %v7323_v63 = vrot.slane %v7322_v58, 9  ;;  %v7332_v58 = vrot.slane %v4707_v20, 9  ;;  %v7338_v36 = vrot.slane %v4726_v25, 9  ;;  %v7339_v60 = vld [vmem:[#allocation86_spill] sm:$0xff]  ;;  %v7340_v20 = vrot.slane %v4731_v16, 9 }
  0xe3   :  { %v5293_v39 = vmax.bf16 %v7336_v17, %v7335_v37  ;;  %v7342_v14 = vrot.slane %v4740_v44, 9  ;;  %v7345_v13 = vrot.slane %v4745_v46, 9  ;;  %v7346_v37 = vld [vmem:[#allocation89_spill] sm:$0xff]  ;;  %v7347_v25 = vrot.slane %v4750_v33, 9  ;;  %v7348_v16 = vld [vmem:[#allocation90_spill] sm:$0xff]  ;;  %v7355_v33 = vld [vmem:[#allocation95_spill] sm:$0xff] }
  0xe4   :  { %v5263_v24 = vmax.bf16 %v7323_v63, %v7321_v56  ;;  %v5283_v63 = vmax.bf16 %v7332_v58, %v7331_v26  ;;  %v1630_v56 = vunpack.c.0.s8 %v1629_v53  ;;  %v5298_v32 = vmax.bf16 %v7338_v36, %v7337_v23  ;;  %v7341_v53 = vld [vmem:[#allocation87_spill] sm:$0xff]  ;;  %v7344_v58 = vld [vmem:[#allocation88_spill] sm:$0xff]  ;;  %v7350_v44 = vld [vmem:[#allocation93_spill] sm:$0xff] }
  0xe5   :  { %v5303_v26 = vmax.bf16 %v7340_v20, %v7339_v60  ;;  %v5318_v17 = vmax.bf16 %v7347_v25, %v7346_v37  ;;  %v7349_v36 = vrot.slane %v4755_v47, 9  ;;  %v7351_v20 = vrot.slane %v4764_v28, 9  ;;  %v7352_v46 = vld [vmem:[#allocation94_spill] sm:$0xff]  ;;  %v7407_v25 = vld [vmem:[#allocation119_spill] sm:$0xff]  ;;  %v7445_v47 = vld [vmem:[#allocation56_spill] sm:$0xff] }
  0xe6   :  { %7324 = vst [vmem:[#allocation18_spill] sm:$0xff] %v5263_v24  ;;  %v7333_v24 = vld [vmem:[#allocation83_spill] sm:$0xff]  ;;  %v5320_v23 = vsub.s32 %v1630_v56, %v1632_v48 }
  0xe7   :  { %v5288_v15 = vmax.bf16 %v7334_v18, %v7333_v24  ;;  %v5308_v24 = vmax.bf16 %v7342_v14, %v7341_v53  ;;  %v5313_v18 = vmax.bf16 %v7345_v13, %v7344_v58  ;;  %v5325_v60 = vmax.bf16 %v7349_v36, %v7348_v16  ;;  %v7405_v36 = vld [vmem:[#allocation118_spill] sm:$0xff]  ;;  %v7411_v37 = vld [vmem:[#allocation123_spill] sm:$0xff]  ;;  %v7413_v16 = vld [vmem:[#allocation124_spill] sm:$0xff] }
  0xe8   :  { %v5330_v53 = vmax.bf16 %v7351_v20, %v7350_v44  ;;  %v7353_v14 = vrot.slane %v4773_v41, 9  ;;  %v7356_v13 = vrot.slane %v4782_v54, 9  ;;  %v7357_v44 = vld [vmem:[#allocation91_spill] sm:$0xff]  ;;  %v7408_v54 = vld [vmem:[#allocation12_spill] sm:$0xff]  ;;  %v7414_v20 = vld [vmem:[#allocation17_spill] sm:$0xff]  ;;  %v7417_v57 = vrot.slane %v4802_v19, %v5320_v23 }
  0xe9   :  { %7343 = vst [vmem:[#allocation126_spill] sm:$0xff] %v5308_v24  ;;  %v7409_v41 = vld [vmem:[#allocation120_spill] sm:$0xff]  ;;  %v7419_v45 = vrot.slane %v4812_v12, %v5320_v23  ;;  %v7420_v56 = vrot.slane %v4817_v21, %v5320_v23  ;;  %v7421_v19 = vrot.slane %v4822_v59, %v5320_v23  ;;  %v7423_v12 = vrot.slane %v4832_v42, %v5320_v23 }
  0xea   :  { %v5335_v58 = vmax.bf16 %v7353_v14, %v7352_v46  ;;  %v5340_v48 = vmax.bf16 %v7356_v13, %v7355_v33  ;;  %v7403_v33 = vld [vmem:[#allocation117_spill] sm:$0xff]  ;;  %v7404_v13 = vld [vmem:[#allocation10_spill] sm:$0xff]  ;;  %v5561_v24 = vunpack.c.l.b16 %v7417_v57  ;;  %v7418_v14 = vrot.slane %v4807_v30, %v5320_v23 }
  0xeb   :  { %v7415_v46 = vld [vmem:[#allocation125_spill] sm:$0xff]  ;;  %v5571_v28 = vunpack.c.l.b16 %v7419_v45  ;;  %v5581_v57 = vunpack.c.l.b16 %v7421_v19  ;;  %v7422_v30 = vrot.slane %v4827_v38, %v5320_v23  ;;  %v5591_v45 = vunpack.c.l.b16 %v7423_v12 }
  0xec   :  { %7354 = vst [vmem:[#allocation19_spill] sm:$0xff] %v5335_v58  ;;  %v5566_v52 = vunpack.c.l.b16 %v7418_v14  ;;  %v5576_v58 = vunpack.c.l.b16 %v7420_v56  ;;  %v7424_v21 = vrot.slane %v4837_v43, %v5320_v23  ;;  %v7425_v59 = vrot.slane %v4842_v0, %v5320_v23 }
  0xed   :  { %v7416_v40 = vld [vmem:[#allocation18_spill] sm:$0xff]  ;;  %v5586_v14 = vunpack.c.l.b16 %v7422_v30  ;;  %v7426_v38 = vrot.slane %v4847_v1, %v5320_v23  ;;  %v7427_v42 = vrot.slane %v4852_v2, %v5320_v23  ;;  %v7428_v43 = vrot.slane %v4857_v3, %v5320_v23 }
  0xee   :  { %v5596_v56 = vunpack.c.l.b16 %v7424_v21  ;;  %v5601_v19 = vunpack.c.l.b16 %v7425_v59  ;;  %v7429_v0 = vrot.slane %v4862_v4, %v5320_v23  ;;  %v7430_v1 = vrot.slane %v4867_v5, %v5320_v23 }
  0xef   :  { %v5606_v30 = vunpack.c.l.b16 %v7426_v38  ;;  %v5611_v12 = vunpack.c.l.b16 %v7427_v42  ;;  %v5616_v21 = vunpack.c.l.b16 %v7428_v43  ;;  %v7431_v2 = vrot.slane %v4872_v6, %v5320_v23 }
  0xf0   :  { %v5621_v59 = vunpack.c.l.b16 %v7429_v0  ;;  %v5626_v38 = vunpack.c.l.b16 %v7430_v1  ;;  %v7432_v3 = vrot.slane %v4877_v7, %v5320_v23  ;;  %v7433_v4 = vrot.slane %v4882_v8, %v5320_v23 }
  0xf1   :  { %v5631_v42 = vunpack.c.l.b16 %v7431_v2  ;;  %v7434_v5 = vrot.slane %v4887_v9, %v5320_v23  ;;  %v7435_v6 = vrot.slane %v4892_v10, %v5320_v23  ;;  %v7436_v7 = vrot.slane %v4897_v11, %v5320_v23 }
  0xf2   :  { %v5636_v43 = vunpack.c.l.b16 %v7432_v3  ;;  %v5641_v0 = vunpack.c.l.b16 %v7433_v4  ;;  %v7437_v8 = vrot.slane %v4902_v29, %v5320_v23  ;;  %v7439_v9 = vrot.slane %v4907_v50, %v5320_v23 }
  0xf3   :  { %v5646_v1 = vunpack.c.l.b16 %v7434_v5  ;;  %v5651_v2 = vunpack.c.l.b16 %v7435_v6  ;;  %v5656_v3 = vunpack.c.l.b16 %v7436_v7  ;;  %v7441_v10 = vrot.slane %v4912_v27, %v5320_v23 }
  0xf4   :  { %v5661_v4 = vunpack.c.l.b16 %v7437_v8  ;;  %v5666_v5 = vunpack.c.l.b16 %v7439_v9  ;;  %v7443_v11 = vrot.slane %v7357_v44, %v5320_v23  ;;  %v7446_v29 = vrot.slane %v7445_v47, %v5320_v23 }
  0xf5   :  { %v5671_v6 = vunpack.c.l.b16 %v7441_v10 }
  0xf6   :  { %7438 = vst [vmem:[#allocation127_spill] sm:$0xff] %v5661_v4  ;;  %7440 = vst [vmem:[#allocation20_spill] sm:$0xff] %v5666_v5  ;;  %v5676_v7 = vunpack.c.l.b16 %v7443_v11  ;;  %v5681_v8 = vunpack.c.l.b16 %v7446_v29  ;;  %v7448_v4 = vld [vmem:[#allocation92_spill] sm:$0xff]  ;;  %v7451_v5 = vld [vmem:[#allocation57_spill] sm:$0xff] }
  0xf7   :  { %7442 = vst [vmem:[#allocation128_spill] sm:$0xff] %v5671_v6  ;;  %v7449_v50 = vrot.slane %v7448_v4, %v5320_v23  ;;  %v7452_v27 = vrot.slane %v7451_v5, %v5320_v23  ;;  %v7454_v6 = vld [vmem:[#allocation96_spill] sm:$0xff] }
  0xf8   :  { %7444 = vst [vmem:[#allocation21_spill] sm:$0xff] %v5676_v7  ;;  %7447 = vst [vmem:[#allocation129_spill] sm:$0xff] %v5681_v8  ;;  %v7455_v44 = vrot.slane %v7454_v6, %v5320_v23  ;;  %v7457_v7 = vld [vmem:[#allocation58_spill] sm:$0xff]  ;;  %v7460_v8 = vld [vmem:[#allocation97_spill] sm:$0xff] }
  0xf9   :  { %v5686_v9 = vunpack.c.l.b16 %v7449_v50  ;;  %v5691_v10 = vunpack.c.l.b16 %v7452_v27  ;;  %v7458_v47 = vrot.slane %v7457_v7, %v5320_v23  ;;  %v7461_v4 = vrot.slane %v7460_v8, %v5320_v23 }
  0xfa   :  { %v5696_v11 = vunpack.c.l.b16 %v7455_v44 }
  0xfb   :  { %7450 = vst [vmem:[#allocation22_spill] sm:$0xff] %v5686_v9  ;;  %7453 = vst [vmem:[#allocation130_spill] sm:$0xff] %v5691_v10  ;;  %v5701_v29 = vunpack.c.l.b16 %v7458_v47  ;;  %v5706_v50 = vunpack.c.l.b16 %v7461_v4  ;;  %v7463_v9 = vld [vmem:[#allocation59_spill] sm:$0xff]  ;;  %v7466_v10 = vld [vmem:[#allocation98_spill] sm:$0xff] }
  0xfc   :  { %7456 = vst [vmem:[#allocation23_spill] sm:$0xff] %v5696_v11  ;;  %v7464_v5 = vrot.slane %v7463_v9, %v5320_v23  ;;  %v7467_v6 = vrot.slane %v7466_v10, %v5320_v23  ;;  %v7469_v11 = vld [vmem:[#allocation60_spill] sm:$0xff] }
  0xfd   :  { %7459 = vst [vmem:[#allocation131_spill] sm:$0xff] %v5701_v29  ;;  %7462 = vst [vmem:[#allocation24_spill] sm:$0xff] %v5706_v50  ;;  %v7470_v7 = vrot.slane %v7469_v11, %v5320_v23  ;;  %v7472_v29 = vld [vmem:[#allocation99_spill] sm:$0xff]  ;;  %v7475_v50 = vld [vmem:[#allocation61_spill] sm:$0xff] }
  0xfe   :  { %v5711_v27 = vunpack.c.l.b16 %v7464_v5  ;;  %v5716_v44 = vunpack.c.l.b16 %v7467_v6  ;;  %v7473_v8 = vrot.slane %v7472_v29, %v5320_v23  ;;  %v7476_v9 = vrot.slane %v7475_v50, %v5320_v23 }
  0xff   :  { %v5721_v47 = vunpack.c.l.b16 %v7470_v7 }
 0x100   :  { %7465 = vst [vmem:[#allocation132_spill] sm:$0xff] %v5711_v27  ;;  %7468 = vst [vmem:[#allocation25_spill] sm:$0xff] %v5716_v44  ;;  %v5726_v4 = vunpack.c.l.b16 %v7473_v8  ;;  %v5731_v5 = vunpack.c.l.b16 %v7476_v9  ;;  %v7478_v27 = vld [vmem:[#allocation100_spill] sm:$0xff]  ;;  %v7481_v44 = vld [vmem:[#allocation62_spill] sm:$0xff] }
 0x101   :  { %7471 = vst [vmem:[#allocation133_spill] sm:$0xff] %v5721_v47  ;;  %v7479_v10 = vrot.slane %v7478_v27, %v5320_v23  ;;  %v7482_v11 = vrot.slane %v7481_v44, %v5320_v23  ;;  %v7484_v47 = vld [vmem:[#allocation101_spill] sm:$0xff] }
 0x102   :  { %7474 = vst [vmem:[#allocation26_spill] sm:$0xff] %v5726_v4  ;;  %7477 = vst [vmem:[#allocation134_spill] sm:$0xff] %v5731_v5  ;;  %v7485_v29 = vrot.slane %v7484_v47, %v5320_v23  ;;  %v7487_v4 = vld [vmem:[#allocation63_spill] sm:$0xff]  ;;  %v7490_v5 = vld [vmem:[#allocation102_spill] sm:$0xff] }
 0x103   :  { %v5736_v6 = vunpack.c.l.b16 %v7479_v10  ;;  %v5741_v7 = vunpack.c.l.b16 %v7482_v11  ;;  %v7488_v50 = vrot.slane %v7487_v4, %v5320_v23  ;;  %v7491_v27 = vrot.slane %v7490_v5, %v5320_v23 }
 0x104   :  { %v5746_v8 = vunpack.c.l.b16 %v7485_v29 }
 0x105   :  { %7480 = vst [vmem:[#allocation27_spill] sm:$0xff] %v5736_v6  ;;  %7483 = vst [vmem:[#allocation135_spill] sm:$0xff] %v5741_v7  ;;  %v5751_v9 = vunpack.c.l.b16 %v7488_v50  ;;  %v5756_v10 = vunpack.c.l.b16 %v7491_v27  ;;  %v7493_v6 = vld [vmem:[#allocation64_spill] sm:$0xff]  ;;  %v7496_v7 = vld [vmem:[#allocation103_spill] sm:$0xff] }
 0x106   :  { %7486 = vst [vmem:[#allocation28_spill] sm:$0xff] %v5746_v8  ;;  %v7494_v44 = vrot.slane %v7493_v6, %v5320_v23  ;;  %v7497_v47 = vrot.slane %v7496_v7, %v5320_v23  ;;  %v7499_v8 = vld [vmem:[#allocation65_spill] sm:$0xff] }
 0x107   :  { %7489 = vst [vmem:[#allocation136_spill] sm:$0xff] %v5751_v9  ;;  %7492 = vst [vmem:[#allocation29_spill] sm:$0xff] %v5756_v10  ;;  %v7500_v4 = vrot.slane %v7499_v8, %v5320_v23  ;;  %v7502_v9 = vld [vmem:[#allocation104_spill] sm:$0xff]  ;;  %v7505_v10 = vld [vmem:[#allocation66_spill] sm:$0xff] }
 0x108   :  { %v5761_v11 = vunpack.c.l.b16 %v7494_v44  ;;  %v5766_v29 = vunpack.c.l.b16 %v7497_v47  ;;  %v7503_v5 = vrot.slane %v7502_v9, %v5320_v23  ;;  %v7506_v6 = vrot.slane %v7505_v10, %v5320_v23 }
 0x109   :  { %v5771_v50 = vunpack.c.l.b16 %v7500_v4 }
 0x10a   :  { %7495 = vst [vmem:[#allocation137_spill] sm:$0xff] %v5761_v11  ;;  %7498 = vst [vmem:[#allocation30_spill] sm:$0xff] %v5766_v29  ;;  %v5776_v27 = vunpack.c.l.b16 %v7503_v5  ;;  %v5781_v44 = vunpack.c.l.b16 %v7506_v6  ;;  %v7508_v11 = vld [vmem:[#allocation105_spill] sm:$0xff]  ;;  %v7511_v29 = vld [vmem:[#allocation67_spill] sm:$0xff] }
 0x10b   :  { %7501 = vst [vmem:[#allocation138_spill] sm:$0xff] %v5771_v50  ;;  %v7509_v7 = vrot.slane %v7508_v11, %v5320_v23  ;;  %v7512_v8 = vrot.slane %v7511_v29, %v5320_v23  ;;  %v7514_v50 = vld [vmem:[#allocation106_spill] sm:$0xff] }
 0x10c   :  { %7504 = vst [vmem:[#allocation31_spill] sm:$0xff] %v5776_v27  ;;  %7507 = vst [vmem:[#allocation139_spill] sm:$0xff] %v5781_v44  ;;  %v7515_v9 = vrot.slane %v7514_v50, %v5320_v23  ;;  %v7517_v27 = vld [vmem:[#allocation68_spill] sm:$0xff]  ;;  %v7520_v44 = vld [vmem:[#allocation107_spill] sm:$0xff] }
 0x10d   :  { %v5786_v47 = vunpack.c.l.b16 %v7509_v7  ;;  %v5791_v4 = vunpack.c.l.b16 %v7512_v8  ;;  %v7518_v10 = vrot.slane %v7517_v27, %v5320_v23  ;;  %v7521_v11 = vrot.slane %v7520_v44, %v5320_v23 }
 0x10e   :  { %v5796_v5 = vunpack.c.l.b16 %v7515_v9 }
 0x10f   :  { %7510 = vst [vmem:[#allocation32_spill] sm:$0xff] %v5786_v47  ;;  %7513 = vst [vmem:[#allocation140_spill] sm:$0xff] %v5791_v4  ;;  %v5801_v6 = vunpack.c.l.b16 %v7518_v10  ;;  %v5806_v7 = vunpack.c.l.b16 %v7521_v11  ;;  %v7523_v47 = vld [vmem:[#allocation69_spill] sm:$0xff]  ;;  %v7526_v4 = vld [vmem:[#allocation108_spill] sm:$0xff] }
 0x110   :  { %7516 = vst [vmem:[#allocation33_spill] sm:$0xff] %v5796_v5  ;;  %v7524_v29 = vrot.slane %v7523_v47, %v5320_v23  ;;  %v7527_v50 = vrot.slane %v7526_v4, %v5320_v23  ;;  %v7529_v5 = vld [vmem:[#allocation70_spill] sm:$0xff] }
 0x111   :  { %7519 = vst [vmem:[#allocation141_spill] sm:$0xff] %v5801_v6  ;;  %7522 = vst [vmem:[#allocation34_spill] sm:$0xff] %v5806_v7  ;;  %v7530_v27 = vrot.slane %v7529_v5, %v5320_v23  ;;  %v7532_v6 = vld [vmem:[#allocation109_spill] sm:$0xff]  ;;  %v7535_v7 = vld [vmem:[#allocation2_spill] sm:$0xff] }
 0x112   :  { %v5811_v8 = vunpack.c.l.b16 %v7524_v29  ;;  %v5816_v9 = vunpack.c.l.b16 %v7527_v50  ;;  %v7533_v44 = vrot.slane %v7532_v6, %v5320_v23  ;;  %v7536_v47 = vrot.slane %v7535_v7, %v5320_v23 }
 0x113   :  { %v5821_v10 = vunpack.c.l.b16 %v7530_v27 }
 0x114   :  { %7525 = vst [vmem:[#allocation142_spill] sm:$0xff] %v5811_v8  ;;  %7528 = vst [vmem:[#allocation35_spill] sm:$0xff] %v5816_v9  ;;  %v5826_v11 = vunpack.c.l.b16 %v7533_v44  ;;  %v5831_v29 = vunpack.c.l.b16 %v7536_v47  ;;  %v7538_v8 = vld [vmem:[#allocation110_spill] sm:$0xff]  ;;  %v7541_v9 = vld [vmem:[#allocation3_spill] sm:$0xff] }
 0x115   :  { %7531 = vst [vmem:[#allocation143_spill] sm:$0xff] %v5821_v10  ;;  %v7539_v4 = vrot.slane %v7538_v8, %v5320_v23  ;;  %v7542_v5 = vrot.slane %v7541_v9, %v5320_v23  ;;  %v7544_v10 = vld [vmem:[#allocation111_spill] sm:$0xff] }
 0x116   :  { %7534 = vst [vmem:[#allocation36_spill] sm:$0xff] %v5826_v11  ;;  %7537 = vst [vmem:[#allocation144_spill] sm:$0xff] %v5831_v29  ;;  %v7545_v6 = vrot.slane %v7544_v10, %v5320_v23  ;;  %v7547_v11 = vld [vmem:[#allocation4_spill] sm:$0xff] }
 0x117   :  { %v5836_v50 = vunpack.c.l.b16 %v7539_v4  ;;  %v5841_v27 = vunpack.c.l.b16 %v7542_v5  ;;  %v7548_v7 = vrot.slane %v7547_v11, %v5320_v23  ;;  %v7550_v29 = vld [vmem:[#allocation112_spill] sm:$0xff] }
 0x118   :  { %v5846_v44 = vunpack.c.l.b16 %v7545_v6  ;;  %v7551_v8 = vrot.slane %v7550_v29, %v5320_v23 }
 0x119   :  { %7540 = vst [vmem:[#allocation37_spill] sm:$0xff] %v5836_v50  ;;  %7543 = vst [vmem:[#allocation145_spill] sm:$0xff] %v5841_v27  ;;  %v5851_v47 = vunpack.c.l.b16 %v7548_v7  ;;  %v7553_v50 = vld [vmem:[#allocation5_spill] sm:$0xff] }
 0x11a   :  { %7546 = vst [vmem:[#allocation38_spill] sm:$0xff] %v5846_v44  ;;  %v5856_v4 = vunpack.c.l.b16 %v7551_v8  ;;  %v7554_v9 = vrot.slane %v7553_v50, %v5320_v23  ;;  %v7556_v27 = vld [vmem:[#allocation113_spill] sm:$0xff]  ;;  %v7559_v44 = vld [vmem:[#allocation6_spill] sm:$0xff] }
 0x11b   :  { %7549 = vst [vmem:[#allocation146_spill] sm:$0xff] %v5851_v47  ;;  %v7557_v10 = vrot.slane %v7556_v27, %v5320_v23  ;;  %v7560_v11 = vrot.slane %v7559_v44, %v5320_v23  ;;  %v7562_v47 = vld [vmem:[#allocation114_spill] sm:$0xff] }
 0x11c   :  { %7552 = vst [vmem:[#allocation39_spill] sm:$0xff] %v5856_v4  ;;  %v5861_v5 = vunpack.c.l.b16 %v7554_v9  ;;  %v7563_v29 = vrot.slane %v7562_v47, %v5320_v23  ;;  %v7565_v4 = vld [vmem:[#allocation7_spill] sm:$0xff] }
 0x11d   :  { %v5866_v6 = vunpack.c.l.b16 %v7557_v10  ;;  %v5871_v7 = vunpack.c.l.b16 %v7560_v11  ;;  %v7566_v50 = vrot.slane %v7565_v4, %v5320_v23 }
 0x11e   :  { %7555 = vst [vmem:[#allocation147_spill] sm:$0xff] %v5861_v5  ;;  %v5876_v8 = vunpack.c.l.b16 %v7563_v29  ;;  %v7568_v5 = vld [vmem:[#allocation115_spill] sm:$0xff] }
 0x11f   :  { %7558 = vst [vmem:[#allocation40_spill] sm:$0xff] %v5866_v6  ;;  %7561 = vst [vmem:[#allocation148_spill] sm:$0xff] %v5871_v7  ;;  %v5881_v9 = vunpack.c.l.b16 %v7566_v50  ;;  %v7569_v27 = vrot.slane %v7568_v5, %v5320_v23  ;;  %v7570_v6 = vld [vmem:[#allocation8_spill] sm:$0xff]  ;;  %v7576_v5 = vrot.slane %v7403_v33, %v5320_v23  ;;  %v7583_v33 = vrot.slane %v7407_v25, %v5320_v23 }
 0x120   :  { %7564 = vst [vmem:[#allocation41_spill] sm:$0xff] %v5876_v8  ;;  %v7571_v44 = vrot.slane %v7570_v6, %v5320_v23  ;;  %v7572_v7 = vld [vmem:[#allocation116_spill] sm:$0xff]  ;;  %v7574_v8 = vld [vmem:[#allocation9_spill] sm:$0xff]  ;;  %v7577_v6 = vrot.slane %v7404_v13, %v5320_v23  ;;  %v7584_v13 = vrot.slane %v7408_v54, %v5320_v23  ;;  %v7591_v25 = vrot.slane %v5187_v51, %v5320_v23 }
 0x121   :  { %7567 = vst [vmem:[#allocation149_spill] sm:$0xff] %v5881_v9  ;;  %v5886_v10 = vunpack.c.l.b16 %v7569_v27  ;;  %v7573_v47 = vrot.slane %v7572_v7, %v5320_v23  ;;  %v7575_v4 = vrot.slane %v7574_v8, %v5320_v23  ;;  %v5906_v27 = vunpack.c.l.b16 %v7576_v5  ;;  %v7580_v9 = vld [vmem:[#allocation11_spill] sm:$0xff] }
 0x122   :  { %v5891_v11 = vunpack.c.l.b16 %v7571_v44  ;;  %v5911_v44 = vunpack.c.l.b16 %v7577_v6  ;;  %v7578_v7 = vrot.slane %v7405_v36, %v5320_v23  ;;  %v7581_v8 = vrot.slane %v7580_v9, %v5320_v23 }
 0x123   :  { %v5896_v29 = vunpack.c.l.b16 %v7573_v47  ;;  %v5901_v50 = vunpack.c.l.b16 %v7575_v4  ;;  %v5926_v5 = vunpack.c.l.b16 %v7583_v33  ;;  %v5931_v6 = vunpack.c.l.b16 %v7584_v13 }
 0x124   :  { %v5916_v47 = vunpack.c.l.b16 %v7578_v7  ;;  %v5921_v4 = vunpack.c.l.b16 %v7581_v8  ;;  %v7586_v36 = vrot.slane %v7409_v41, %v5320_v23  ;;  %v5946_v33 = vunpack.c.l.b16 %v7591_v25 }
 0x125   :  { %7585 = vst [vmem:[#allocation43_spill] sm:$0xff] %v5931_v6  ;;  %v7594_v6 = vld [vmem:[#allocation14_spill] sm:$0xff] }
 0x126   :  { %7579 = vst [vmem:[#allocation42_spill] sm:$0xff] %v5916_v47  ;;  %7582 = vst [vmem:[#allocation150_spill] sm:$0xff] %v5921_v4  ;;  %v5936_v7 = vunpack.c.l.b16 %v7586_v36  ;;  %v7588_v47 = vld [vmem:[#allocation13_spill] sm:$0xff]  ;;  %v7595_v41 = vrot.slane %v7594_v6, %v5320_v23  ;;  %v7602_v6 = vrot.slane %v7411_v37, %v5320_v23  ;;  %v7607_v37 = vrot.slane %v7414_v20, %v5320_v23 }
 0x127   :  { %v7589_v9 = vrot.slane %v7588_v47, %v5320_v23  ;;  %v7592_v4 = vld [vmem:[#allocation121_spill] sm:$0xff]  ;;  %v7611_v20 = vrot.slane %v5258_v55, %v5320_v23  ;;  %v7615_v55 = vrot.slane %v5278_v62, %v5320_v23  ;;  %v7620_v62 = vrot.slane %v5298_v32, %v5320_v23 }
 0x128   :  { %7587 = vst [vmem:[#allocation151_spill] sm:$0xff] %v5936_v7  ;;  %v7593_v54 = vrot.slane %v7592_v4, %v5320_v23  ;;  %v5956_v36 = vunpack.c.l.b16 %v7595_v41  ;;  %v7596_v7 = vld [vmem:[#allocation122_spill] sm:$0xff]  ;;  %v7601_v4 = vrot.slane %v5212_v49, %v5320_v23  ;;  %v5976_v41 = vunpack.c.l.b16 %v7602_v6 }
 0x129   :  { %v5941_v8 = vunpack.c.l.b16 %v7589_v9  ;;  %v7597_v47 = vrot.slane %v7596_v7, %v5320_v23  ;;  %v7603_v7 = vrot.slane %v5222_v22, %v5320_v23  ;;  %v7606_v49 = vrot.slane %v7413_v16, %v5320_v23 }
 0x12a   :  { %v5951_v13 = vunpack.c.l.b16 %v7593_v54  ;;  %v5971_v54 = vunpack.c.l.b16 %v7601_v4  ;;  %v5996_v6 = vunpack.c.l.b16 %v7607_v37  ;;  %v7608_v22 = vrot.slane %v7415_v46, %v5320_v23 }
 0x12b   :  { %7590 = vst [vmem:[#allocation44_spill] sm:$0xff] %v5941_v8  ;;  %v5961_v9 = vunpack.c.l.b16 %v7597_v47  ;;  %v7599_v8 = vld [vmem:[#allocation15_spill] sm:$0xff]  ;;  %v5981_v47 = vunpack.c.l.b16 %v7603_v7  ;;  %v5991_v4 = vunpack.c.l.b16 %v7606_v49  ;;  %v7610_v16 = vrot.slane %v5253_v31, %v5320_v23 }
 0x12c   :  { %v7600_v51 = vrot.slane %v7599_v8, %v5320_v23  ;;  %v6001_v7 = vunpack.c.l.b16 %v7608_v22  ;;  %v6016_v37 = vunpack.c.l.b16 %v7611_v20  ;;  %v7612_v46 = vrot.slane %v7416_v40, %v5320_v23 }
 0x12d   :  { %7598 = vst [vmem:[#allocation152_spill] sm:$0xff] %v5961_v9  ;;  %v7604_v9 = vld [vmem:[#allocation16_spill] sm:$0xff]  ;;  %v6011_v49 = vunpack.c.l.b16 %v7610_v16  ;;  %v7614_v31 = vrot.slane %v5273_v34, %v5320_v23  ;;  %v6036_v20 = vunpack.c.l.b16 %v7615_v55  ;;  %v7616_v40 = vrot.slane %v5283_v63, %v5320_v23 }
 0x12e   :  { %v5966_v25 = vunpack.c.l.b16 %v7600_v51  ;;  %v7605_v8 = vrot.slane %v7604_v9, %v5320_v23  ;;  %v7609_v9 = vrot.slane %v5247_v61, %v5320_v23  ;;  %v6021_v22 = vunpack.c.l.b16 %v7612_v46 }
 0x12f   :  { %v7613_v61 = vrot.slane %v5268_v35, %v5320_v23  ;;  %v6031_v16 = vunpack.c.l.b16 %v7614_v31  ;;  %v6041_v46 = vunpack.c.l.b16 %v7616_v40  ;;  %v7618_v35 = vrot.slane %v5288_v15, %v5320_v23 }
 0x130   :  { %v5986_v51 = vunpack.c.l.b16 %v7605_v8  ;;  %v6006_v8 = vunpack.c.l.b16 %v7609_v9  ;;  %v7619_v34 = vrot.slane %v5293_v39, %v5320_v23  ;;  %v6056_v55 = vunpack.c.l.b16 %v7620_v62 }
 0x131   :  { %v6026_v9 = vunpack.c.l.b16 %v7613_v61  ;;  %7617 = vst [vmem:[#allocation45_spill] sm:$0xff] %v6041_v46  ;;  %v6046_v61 = vunpack.c.l.b16 %v7618_v35  ;;  %v7621_v63 = vrot.slane %v5303_v26, %v5320_v23  ;;  %v7622_v46 = vld [vmem:[#allocation126_spill] sm:$0xff]  ;;  %v7625_v39 = vrot.slane %v5313_v18, %v5320_v23 }
 0x132   :  { %v6051_v31 = vunpack.c.l.b16 %v7619_v34  ;;  %v7623_v15 = vrot.slane %v7622_v46, %v5320_v23  ;;  %v7626_v32 = vrot.slane %v5318_v17, %v5320_v23  ;;  %v7628_v26 = vrot.slane %v5325_v60, %v5320_v23 }
 0x133   :  { %v6061_v40 = vunpack.c.l.b16 %v7621_v63  ;;  %v6071_v34 = vunpack.c.l.b16 %v7625_v39  ;;  %v7630_v46 = vrot.slane %v5330_v53, %v5320_v23  ;;  %v7633_v17 = vrot.slane %v5340_v48, %v5320_v23 }
 0x134   :  { %v6066_v35 = vunpack.c.l.b16 %v7623_v15  ;;  %v6076_v62 = vunpack.c.l.b16 %v7626_v32  ;;  %v6081_v63 = vunpack.c.l.b16 %v7628_v26  ;;  %v2495_v60 = vrot.slane %v5571_v28, 6 }
 0x135   :  { %v6086_v15 = vunpack.c.l.b16 %v7630_v46  ;;  %v6096_v32 = vunpack.c.l.b16 %v7633_v17  ;;  %v2498_v26 = vrot.slane %v5576_v58, 5  ;;  %v2501_v53 = vrot.slane %v5581_v57, 4 }
 0x136   :  { %7624 = vst [vmem:[#allocation153_spill] sm:$0xff] %v6066_v35  ;;  %7627 = vst [vmem:[#allocation46_spill] sm:$0xff] %v6076_v62  ;;  %v7631_v35 = vld [vmem:[#allocation19_spill] sm:$0xff]  ;;  %v2492_v62 = vrot.slane %v5566_v52, 7  ;;  %v2504_v46 = vrot.slane %v5586_v14, 3  ;;  %v2515_v48 = vrot.slane %v5611_v12, 6 }
 0x137   :  { %7629 = vst [vmem:[#allocation154_spill] sm:$0xff] %v6081_v63  ;;  %v7632_v18 = vrot.slane %v7631_v35, %v5320_v23  ;;  %v2507_v63 = vrot.slane %v5591_v45, 2  ;;  %v2510_v35 = vrot.slane %v5596_v56, 1  ;;  %v2517_v52 = vrot.slane %v5616_v21, 5 }
 0x138   :  { %v2494_v23 = vsel %vm2493_vm0, %v2492_v62, %v5561_v24  ;;  %v2519_v28 = vrot.slane %v5621_v59, 4  ;;  %v2521_v14 = vrot.slane %v5626_v38, 3  ;;  %v2523_v45 = vrot.slane %v5631_v42, 2 }
 0x139   :  { %v6091_v39 = vunpack.c.l.b16 %v7632_v18  ;;  %v2513_v18 = vrot.slane %v5606_v30, 7  ;;  %v2497_v58 = vsel %vm2496_vm1, %v2495_v60, %v2494_v23  ;;  %v2525_v24 = vrot.slane %v5636_v43, 1  ;;  %v7634_v60 = vld [vmem:[#allocation127_spill] sm:$0xff] }
 0x13a   :  { %v2500_v56 = vsel %vm2499_vm2, %v2498_v26, %v2497_v58  ;;  %v2527_v12 = vrot.slane %v5646_v1, 7  ;;  %v2529_v62 = vrot.slane %v5651_v2, 6  ;;  %v2533_v26 = vrot.slane %v7634_v60, 4 }
 0x13b   :  { %v2514_v57 = vsel %vm2493_vm0, %v2513_v18, %v5601_v19  ;;  %v2503_v21 = vsel %vm2502_vm3, %v2501_v53, %v2500_v56  ;;  %v2531_v19 = vrot.slane %v5656_v3, 5  ;;  %v7635_v18 = vld [vmem:[#allocation20_spill] sm:$0xff] }
 0x13c   :  { %v2516_v30 = vsel %vm2496_vm1, %v2515_v48, %v2514_v57  ;;  %v2506_v38 = vsel %vm2505_vm4, %v2504_v46, %v2503_v21  ;;  %v2528_v17 = vsel %vm2493_vm0, %v2527_v12, %v5641_v0  ;;  %v2535_v23 = vrot.slane %v7635_v18, 3  ;;  %v7636_v48 = vld [vmem:[#allocation128_spill] sm:$0xff]  ;;  %v7638_v57 = vld [vmem:[#allocation22_spill] sm:$0xff]  ;;  %v7640_v12 = vld [vmem:[#allocation23_spill] sm:$0xff] }
 0x13d   :  { %v2518_v59 = vsel %vm2499_vm2, %v2517_v52, %v2516_v30  ;;  %v2509_v43 = vsel %vm2508_vm5, %v2507_v63, %v2506_v38  ;;  %v2530_v53 = vsel %vm2496_vm1, %v2529_v62, %v2528_v17  ;;  %v2537_v52 = vrot.slane %v7636_v48, 2  ;;  %v7639_v30 = vld [vmem:[#allocation130_spill] sm:$0xff]  ;;  %v7643_v38 = vld [vmem:[#allocation24_spill] sm:$0xff] }
 0x13e   :  { %v2520_v42 = vsel %vm2502_vm3, %v2519_v28, %v2518_v59  ;;  %v6134_v2 = vsel %vm2511_vm6, %v2510_v35, %v2509_v43  ;;  %v2532_v46 = vsel %vm2499_vm2, %v2531_v19, %v2530_v53  ;;  %v7637_v28 = vld [vmem:[#allocation21_spill] sm:$0xff]  ;;  %v2543_v35 = vrot.slane %v7639_v30, 6  ;;  %v7644_v17 = vld [vmem:[#allocation132_spill] sm:$0xff]  ;;  %v7646_v18 = vld [vmem:[#allocation26_spill] sm:$0xff] }
 0x13f   :  { %v2522_v1 = vsel %vm2505_vm4, %v2521_v14, %v2520_v42  ;;  %v2534_v63 = vsel %vm2502_vm3, %v2533_v26, %v2532_v46  ;;  %v2539_v58 = vrot.slane %v7637_v28, 1  ;;  %v2541_v14 = vrot.slane %v7638_v57, 7  ;;  %v7642_v19 = vld [vmem:[#allocation129_spill] sm:$0xff]  ;;  %v7647_v46 = vld [vmem:[#allocation134_spill] sm:$0xff]  ;;  %v7649_v28 = vld [vmem:[#allocation135_spill] sm:$0xff] }
 0x140   :  { %v2524_v3 = vsel %vm2508_vm5, %v2523_v45, %v2522_v1  ;;  %v2536_v56 = vsel %vm2505_vm4, %v2535_v23, %v2534_v63  ;;  %v2545_v21 = vrot.slane %v7640_v12, 5  ;;  %v7641_v45 = vld [vmem:[#allocation131_spill] sm:$0xff]  ;;  %v2549_v42 = vrot.slane %v7643_v38, 3  ;;  %v7645_v1 = vld [vmem:[#allocation25_spill] sm:$0xff]  ;;  %v7651_v30 = vld [vmem:[#allocation28_spill] sm:$0xff] }
 0x141   :  { %v6140_v0 = vsel %vm2511_vm6, %v2525_v24, %v2524_v3  ;;  %v2547_v59 = vrot.slane %v7641_v45, 4  ;;  %v2538_v62 = vsel %vm2508_vm5, %v2537_v52, %v2536_v56  ;;  %v2542_v24 = vsel %vm2493_vm0, %v2541_v14, %v7642_v19  ;;  %v7648_v52 = vld [vmem:[#allocation27_spill] sm:$0xff]  ;;  %v7650_v56 = vld [vmem:[#allocation133_spill] sm:$0xff]  ;;  %v7654_v38 = vld [vmem:[#allocation30_spill] sm:$0xff] }
 0x142   :  { %v2551_v60 = vrot.slane %v7644_v17, 2  ;;  %v6155_v26 = vsel %vm2511_vm6, %v2539_v58, %v2538_v62  ;;  %v2544_v43 = vsel %vm2496_vm1, %v2543_v35, %v2542_v24  ;;  %v2553_v53 = vrot.slane %v7645_v1, 1  ;;  %v7652_v35 = vld [vmem:[#allocation136_spill] sm:$0xff] }
 0x143   :  { %v2555_v23 = vrot.slane %v7646_v18, 7  ;;  %v2546_v3 = vsel %vm2499_vm2, %v2545_v21, %v2544_v43  ;;  %v2557_v48 = vrot.slane %v7647_v46, 6  ;;  %v2559_v63 = vrot.slane %v7648_v52, 5  ;;  %v7653_v21 = vld [vmem:[#allocation29_spill] sm:$0xff] }
 0x144   :  { %v2561_v57 = vrot.slane %v7649_v28, 4  ;;  %v2548_v14 = vsel %vm2502_vm3, %v2547_v59, %v2546_v3  ;;  %v2563_v12 = vrot.slane %v7651_v30, 3  ;;  %v2565_v45 = vrot.slane %v7652_v35, 2  ;;  %v7655_v59 = vld [vmem:[#allocation138_spill] sm:$0xff]  ;;  %v7656_v3 = vld [vmem:[#allocation31_spill] sm:$0xff]  ;;  %v7660_v30 = vld [vmem:[#allocation140_spill] sm:$0xff] }
 0x145   :  { %v2556_v58 = vsel %vm2493_vm0, %v2555_v23, %v7650_v56  ;;  %v2550_v62 = vsel %vm2505_vm4, %v2549_v42, %v2548_v14  ;;  %v2567_v24 = vrot.slane %v7653_v21, 1  ;;  %v2569_v17 = vrot.slane %v7654_v38, 7  ;;  %v7657_v42 = vld [vmem:[#allocation137_spill] sm:$0xff]  ;;  %v7658_v28 = vld [vmem:[#allocation139_spill] sm:$0xff] }
 0x146   :  { %v2558_v19 = vsel %vm2496_vm1, %v2557_v48, %v2556_v58  ;;  %v2552_v43 = vsel %vm2508_vm5, %v2551_v60, %v2550_v62  ;;  %v2571_v18 = vrot.slane %v7655_v59, 6  ;;  %v2573_v23 = vrot.slane %v7656_v3, 5  ;;  %v7659_v58 = vld [vmem:[#allocation32_spill] sm:$0xff]  ;;  %v7664_v59 = vld [vmem:[#allocation35_spill] sm:$0xff] }
 0x147   :  { %v2560_v1 = vsel %vm2499_vm2, %v2559_v63, %v2558_v19  ;;  %v6178_v46 = vsel %vm2511_vm6, %v2553_v53, %v2552_v43  ;;  %v2570_v48 = vsel %vm2493_vm0, %v2569_v17, %v7657_v42  ;;  %v2575_v14 = vrot.slane %v7658_v28, 4  ;;  %v7661_v19 = vld [vmem:[#allocation33_spill] sm:$0xff]  ;;  %v7666_v42 = vld [vmem:[#allocation143_spill] sm:$0xff] }
 0x148   :  { %v2562_v52 = vsel %vm2502_vm3, %v2561_v57, %v2560_v1  ;;  %v2572_v60 = vsel %vm2496_vm1, %v2571_v18, %v2570_v48  ;;  %v2577_v63 = vrot.slane %v7659_v58, 3  ;;  %v2579_v35 = vrot.slane %v7660_v30, 2  ;;  %v7662_v57 = vld [vmem:[#allocation34_spill] sm:$0xff]  ;;  %v7667_v48 = vld [vmem:[#allocation36_spill] sm:$0xff] }
 0x149   :  { %v2564_v56 = vsel %vm2505_vm4, %v2563_v12, %v2562_v52  ;;  %v2574_v53 = vsel %vm2499_vm2, %v2573_v23, %v2572_v60  ;;  %v2581_v21 = vrot.slane %v7661_v19, 1  ;;  %v2583_v38 = vrot.slane %v7662_v57, 7  ;;  %v7663_v12 = vld [vmem:[#allocation142_spill] sm:$0xff]  ;;  %v7665_v52 = vld [vmem:[#allocation141_spill] sm:$0xff]  ;;  %v7668_v60 = vld [vmem:[#allocation144_spill] sm:$0xff] }
 0x14a   :  { %v2566_v62 = vsel %vm2508_vm5, %v2565_v45, %v2564_v56  ;;  %v2576_v43 = vsel %vm2502_vm3, %v2575_v14, %v2574_v53  ;;  %v2585_v1 = vrot.slane %v7663_v12, 6  ;;  %v2587_v18 = vrot.slane %v7664_v59, 5  ;;  %v7669_v14 = vld [vmem:[#allocation37_spill] sm:$0xff]  ;;  %v7670_v53 = vld [vmem:[#allocation38_spill] sm:$0xff]  ;;  %v7672_v12 = vld [vmem:[#allocation39_spill] sm:$0xff] }
 0x14b   :  { %v6193_v17 = vsel %vm2511_vm6, %v2567_v24, %v2566_v62  ;;  %v2578_v3 = vsel %vm2505_vm4, %v2577_v63, %v2576_v43  ;;  %v2584_v45 = vsel %vm2493_vm0, %v2583_v38, %v7665_v52  ;;  %v2589_v23 = vrot.slane %v7666_v42, 4  ;;  %v7671_v57 = vld [vmem:[#allocation146_spill] sm:$0xff]  ;;  %v7675_v42 = vld [vmem:[#allocation145_spill] sm:$0xff] }
 0x14c   :  { %v2591_v28 = vrot.slane %v7667_v48, 3  ;;  %v2580_v56 = vsel %vm2508_vm5, %v2579_v35, %v2578_v3  ;;  %v2586_v24 = vsel %vm2496_vm1, %v2585_v1, %v2584_v45  ;;  %v2593_v58 = vrot.slane %v7668_v60, 2  ;;  %v7673_v35 = vld [vmem:[#allocation147_spill] sm:$0xff]  ;;  %v7674_v1 = vld [vmem:[#allocation40_spill] sm:$0xff] }
 0x14d   :  { %v2595_v30 = vrot.slane %v7669_v14, 1  ;;  %v6208_v62 = vsel %vm2511_vm6, %v2581_v21, %v2580_v56  ;;  %v2588_v63 = vsel %vm2499_vm2, %v2587_v18, %v2586_v24  ;;  %v2597_v19 = vrot.slane %v7670_v53, 7  ;;  %v7676_v48 = vld [vmem:[#allocation148_spill] sm:$0xff]  ;;  %v7677_v18 = vld [vmem:[#allocation41_spill] sm:$0xff] }
 0x14e   :  { %v2599_v38 = vrot.slane %v7671_v57, 6  ;;  %v2590_v43 = vsel %vm2502_vm3, %v2589_v23, %v2588_v63  ;;  %v2601_v59 = vrot.slane %v7672_v12, 5  ;;  %v2603_v3 = vrot.slane %v7673_v35, 4  ;;  %v7678_v12 = vld [vmem:[#allocation149_spill] sm:$0xff]  ;;  %v7679_v35 = vld [vmem:[#allocation42_spill] sm:$0xff] }
 0x14f   :  { %v2605_v52 = vrot.slane %v7674_v1, 3  ;;  %v2592_v45 = vsel %vm2505_vm4, %v2591_v28, %v2590_v43  ;;  %v2598_v21 = vsel %vm2493_vm0, %v2597_v19, %v7675_v42  ;;  %v2607_v56 = vrot.slane %v7676_v48, 2  ;;  %v7681_v42 = vld [vmem:[#allocation151_spill] sm:$0xff] }
 0x150   :  { %v2609_v24 = vrot.slane %v7677_v18, 1  ;;  %v2594_v60 = vsel %vm2508_vm5, %v2593_v58, %v2592_v45  ;;  %v2600_v14 = vsel %vm2496_vm1, %v2599_v38, %v2598_v21  ;;  %v2611_v23 = vrot.slane %v5886_v10, 7  ;;  %v7683_v18 = vld [vmem:[#allocation44_spill] sm:$0xff] }
 0x151   :  { %v2613_v63 = vrot.slane %v5891_v11, 6  ;;  %v6227_v53 = vsel %vm2511_vm6, %v2595_v30, %v2594_v60  ;;  %v2602_v28 = vsel %vm2499_vm2, %v2601_v59, %v2600_v14  ;;  %v2615_v57 = vrot.slane %v5896_v29, 5 }
 0x152   :  { %v2617_v19 = vrot.slane %v5901_v50, 4  ;;  %v2604_v43 = vsel %vm2502_vm3, %v2603_v3, %v2602_v28  ;;  %v2612_v58 = vsel %vm2493_vm0, %v2611_v23, %v7678_v12  ;;  %v2619_v38 = vrot.slane %v5906_v27, 3  ;;  %v7680_v3 = vld [vmem:[#allocation43_spill] sm:$0xff] }
 0x153   :  { %v2621_v10 = vrot.slane %v5911_v44, 2  ;;  %v2606_v11 = vsel %vm2505_vm4, %v2605_v52, %v2604_v43  ;;  %v2614_v30 = vsel %vm2496_vm1, %v2613_v63, %v2612_v58  ;;  %v2623_v1 = vrot.slane %v7679_v35, 1  ;;  %v7682_v52 = vld [vmem:[#allocation150_spill] sm:$0xff] }
 0x154   :  { %v2625_v59 = vrot.slane %v5926_v5, 7  ;;  %v2608_v29 = vsel %vm2508_vm5, %v2607_v56, %v2606_v11  ;;  %v2616_v50 = vsel %vm2499_vm2, %v2615_v57, %v2614_v30  ;;  %v2627_v45 = vrot.slane %v7680_v3, 6 }
 0x155   :  { %v2629_v21 = vrot.slane %v7681_v42, 5  ;;  %v6246_v27 = vsel %vm2511_vm6, %v2609_v24, %v2608_v29  ;;  %v2618_v44 = vsel %vm2502_vm3, %v2617_v19, %v2616_v50  ;;  %v2631_v60 = vrot.slane %v7683_v18, 4 }
 0x156   :  { %v2626_v48 = vsel %vm2493_vm0, %v2625_v59, %v7682_v52  ;;  %v2620_v5 = vsel %vm2505_vm4, %v2619_v38, %v2618_v44  ;;  %v2633_v14 = vrot.slane %v5946_v33, 3  ;;  %v2635_v23 = vrot.slane %v5951_v13, 2  ;;  %v7684_v13 = vld [vmem:[#allocation152_spill] sm:$0xff]  ;;  %v7686_v52 = vld [vmem:[#allocation153_spill] sm:$0xff] }
 0x157   :  { %v2628_v56 = vsel %vm2496_vm1, %v2627_v45, %v2626_v48  ;;  %v2622_v63 = vsel %vm2508_vm5, %v2621_v10, %v2620_v5  ;;  %v2637_v28 = vrot.slane %v5956_v36, 1  ;;  %v2639_v57 = vrot.slane %v5966_v25, 7 }
 0x158   :  { %v2630_v24 = vsel %vm2499_vm2, %v2629_v21, %v2628_v56  ;;  %v6261_v19 = vsel %vm2511_vm6, %v2623_v1, %v2622_v63  ;;  %v2641_v12 = vrot.slane %v5971_v54, 6  ;;  %v2643_v58 = vrot.slane %v5976_v41, 5 }
 0x159   :  { %v2632_v43 = vsel %vm2502_vm3, %v2631_v60, %v2630_v24  ;;  %v2640_v38 = vsel %vm2493_vm0, %v2639_v57, %v7684_v13  ;;  %v2645_v10 = vrot.slane %v5981_v47, 4  ;;  %v2647_v36 = vrot.slane %v5986_v51, 3  ;;  %v7687_v60 = vld [vmem:[#allocation46_spill] sm:$0xff] }
 0x15a   :  { %v2634_v33 = vsel %vm2505_vm4, %v2633_v14, %v2632_v43  ;;  %v2642_v11 = vsel %vm2496_vm1, %v2641_v12, %v2640_v38  ;;  %v2649_v30 = vrot.slane %v5991_v4, 2  ;;  %v2651_v35 = vrot.slane %v5996_v6, 1  ;;  %v7688_v24 = vld [vmem:[#allocation154_spill] sm:$0xff] }
 0x15b   :  { %v2636_v25 = vsel %vm2508_vm5, %v2635_v23, %v2634_v33  ;;  %v2644_v41 = vsel %vm2499_vm2, %v2643_v58, %v2642_v11  ;;  %v2653_v1 = vrot.slane %v6006_v8, 7  ;;  %v2655_v47 = vrot.slane %v6011_v49, 6 }
 0x15c   :  { %v6276_v54 = vsel %vm2511_vm6, %v2637_v28, %v2636_v25  ;;  %v2646_v51 = vsel %vm2502_vm3, %v2645_v10, %v2644_v41  ;;  %v2657_v59 = vrot.slane %v6016_v37, 5  ;;  %v2659_v29 = vrot.slane %v6021_v22, 4 }
 0x15d   :  { %v2661_v4 = vrot.slane %v6026_v9, 3  ;;  %v2648_v6 = vsel %vm2505_vm4, %v2647_v36, %v2646_v51  ;;  %v2654_v50 = vsel %vm2493_vm0, %v2653_v1, %v6001_v7  ;;  %v2663_v3 = vrot.slane %v6031_v16, 2 }
 0x15e   :  { %v2665_v45 = vrot.slane %v6036_v20, 1  ;;  %v2650_v8 = vsel %vm2508_vm5, %v2649_v30, %v2648_v6  ;;  %v2656_v49 = vsel %vm2496_vm1, %v2655_v47, %v2654_v50  ;;  %v2667_v42 = vrot.slane %v6046_v61, 7  ;;  %v7685_v20 = vld [vmem:[#allocation45_spill] sm:$0xff] }
 0x15f   :  { %v2669_v37 = vrot.slane %v6051_v31, 6  ;;  %v2652_v22 = vsel %vm2511_vm6, %v2651_v35, %v2650_v8  ;;  %v2658_v9 = vsel %vm2499_vm2, %v2657_v59, %v2656_v49  ;;  %v2671_v21 = vrot.slane %v6056_v55, 5 }
 0x160   :  { %v2673_v7 = vrot.slane %v6061_v40, 4  ;;  %v2660_v16 = vsel %vm2502_vm3, %v2659_v29, %v2658_v9  ;;  %v2668_v44 = vsel %vm2493_vm0, %v2667_v42, %v7685_v20  ;;  %v2675_v48 = vrot.slane %v7686_v52, 3 }
 0x161   :  { %v2677_v61 = vrot.slane %v6071_v34, 2  ;;  %v2662_v31 = vsel %vm2505_vm4, %v2661_v4, %v2660_v16  ;;  %v2670_v18 = vsel %vm2496_vm1, %v2669_v37, %v2668_v44  ;;  %v2679_v5 = vrot.slane %v7687_v60, 1 }
 0x162   :  { %v2681_v55 = vrot.slane %v6086_v15, 7  ;;  %v2664_v40 = vsel %vm2508_vm5, %v2663_v3, %v2662_v31  ;;  %v2672_v56 = vsel %vm2499_vm2, %v2671_v21, %v2670_v18  ;;  %v2683_v14 = vrot.slane %v6091_v39, 6 }
 0x163   :  { %v2685_v23 = vrot.slane %v6096_v32, 5  ;;  %v2666_v63 = vsel %vm2511_vm6, %v2665_v45, %v2664_v40  ;;  %v2674_v34 = vsel %vm2502_vm3, %v2673_v7, %v2672_v56  ;;  %v2687_v57 = vpack.c.b16 %v6134_v2, %v6134_v2 }
 0x164   :  { %v2682_v28 = vsel %vm2493_vm0, %v2681_v55, %v7688_v24  ;;  %v2676_v15 = vsel %vm2505_vm4, %v2675_v48, %v2674_v34  ;;  %v2688_v12 = vpack.c.b16 %v6140_v0, %v6140_v0  ;;  %v2689_v39 = vpack.c.b16 %v6155_v26, %v6155_v26 }
 0x165   :  { %v2684_v43 = vsel %vm2496_vm1, %v2683_v14, %v2682_v28  ;;  %v2678_v32 = vsel %vm2508_vm5, %v2677_v61, %v2676_v15  ;;  %v2690_v33 = vpack.c.b16 %v6178_v46, %v6178_v46  ;;  %v2691_v2 = vpack.c.b16 %v6193_v17, %v6193_v17  ;;  %2716 = vst.msk [vmem:[%s6397_s1] sm:$0xf] %vm2715_vm7, %v2687_v57 }
 0x166   :  { %v2686_v58 = vsel %vm2499_vm2, %v2685_v23, %v2684_v43  ;;  %v2680_v0 = vsel %vm2511_vm6, %v2679_v5, %v2678_v32  ;;  %v2692_v26 = vpack.c.b16 %v6208_v62, %v6208_v62  ;;  %v2693_v13 = vpack.c.b16 %v6227_v53, %v6227_v53  ;;  %2717 = vst.msk [vmem:[%s6397_s1 + $0x4] sm:$0xf] %vm2715_vm7, %v2688_v12 }
 0x167   :  { %v2694_v38 = vpack.c.b16 %v6246_v27, %v6246_v27  ;;  %2718 = vst.msk [vmem:[%s6397_s1 + $0x8] sm:$0xf] %vm2715_vm7, %v2689_v39  ;;  %v2695_v46 = vpack.c.b16 %v6261_v19, %v6261_v19  ;;  %v2696_v17 = vpack.c.b16 %v6276_v54, %v6276_v54  ;;  %v2697_v62 = vpack.c.b16 %v2652_v22, %v2652_v22 }
 0x168   :  { %v2698_v53 = vpack.c.b16 %v2666_v63, %v2666_v63  ;;  %2719 = vst.msk [vmem:[%s6397_s1 + $0xc] sm:$0xf] %vm2715_vm7, %v2690_v33  ;;  %2720 = vst.msk [vmem:[%s6397_s1 + $0x10] sm:$0xf] %vm2715_vm7, %v2691_v2  ;;  %v2699_v27 = vpack.c.b16 %v2680_v0, %v2680_v0  ;;  %v2700_v10 = vpack.c.b16 %v2686_v58, %v2686_v58 }
 0x169   :  { %2721 = vst.msk [vmem:[%s6397_s1 + $0x14] sm:$0xf] %vm2715_vm7, %v2692_v26  ;;  %2722 = vst.msk [vmem:[%s6397_s1 + $0x18] sm:$0xf] %vm2715_vm7, %v2693_v13 }
 0x16a   :  { %2723 = vst.msk [vmem:[%s6397_s1 + $0x1c] sm:$0xf] %vm2715_vm7, %v2694_v38  ;;  %2724 = vst.msk [vmem:[%s6397_s1 + $0x20] sm:$0xf] %vm2715_vm7, %v2695_v46 }
 0x16b   :  { %2725 = vst.msk [vmem:[%s6397_s1 + $0x24] sm:$0xf] %vm2715_vm7, %v2696_v17  ;;  %2726 = vst.msk [vmem:[%s6397_s1 + $0x28] sm:$0xf] %vm2715_vm7, %v2697_v62 }
 0x16c   :  { %2727 = vst.msk [vmem:[%s6397_s1 + $0x2c] sm:$0xf] %vm2715_vm7, %v2698_v53  ;;  %2728 = vst.msk [vmem:[%s6397_s1 + $0x30] sm:$0xf] %vm2715_vm7, %v2699_v27 }
 0x16d   :  { %2730 = vst.msk [vmem:[%s6397_s1 + $0x34] sm:$0x3] %vm2729_vm8, %v2700_v10 }

// kernel: forward.16
= control target key start
LH: loop header
LB: loop body
LE: loop exit
PB: predicated region body
PF: predicated region fallthrough
CT: control target
= control target key end

     0   :  { %v997_v6 = vmov 1983009808   ;;  %vm837_vm0 = vcmask 1041409   ;;  %vm840_vm1 = vcmask 1042434   ;;  %vm843_vm2 = vcmask 1043459   ;;  %s1818_s0 = inlined_call_operand.vmem [shape: bf16[36,3,128], index: 0, kind: input, shape index: {}]   ;;  %s1819_s1 = inlined_call_operand.vmem [shape: bf16[36,128], index: 1, kind: output, shape index: {}]  }
   0x1   :  { %v1011_v0 = vld [vmem:[%s1818_s0] sm:$0x1]  ;;  %v1016_v1 = vld [vmem:[%s1818_s0 + $0x2] sm:$0x1]  ;;  %v1021_v2 = vld [vmem:[%s1818_s0 + $0x4] sm:$0x1]  ;;  %v1038_v7 = vunpack.c.l.s4 %v997_v6 }
   0x2   :  { %v1026_v3 = vld [vmem:[%s1818_s0 + $0x6] sm:$0x1]  ;;  %v1031_v4 = vld [vmem:[%s1818_s0 + $0x8] sm:$0x1]  ;;  %v1036_v5 = vld [vmem:[%s1818_s0 + $0xa] sm:$0x1] }
   0x3   :  { %1836 = vst [vmem:[#allocation2_spill] sm:$0xff] %v1038_v7  ;;  %v1043_v8 = vld [vmem:[%s1818_s0 + $0xc] sm:$0x1]  ;;  %v1048_v9 = vld [vmem:[%s1818_s0 + $0xe] sm:$0x1]  ;;  %v45_v24 = vshrl.u32 %v1011_v0, 16 }
   0x4   :  { %v1053_v10 = vld [vmem:[%s1818_s0 + $0x10] sm:$0x1]  ;;  %v1058_v11 = vld [vmem:[%s1818_s0 + $0x12] sm:$0x1]  ;;  %v1063_v12 = vld [vmem:[%s1818_s0 + $0x14] sm:$0x1] }
   0x5   :  { %v1068_v13 = vld [vmem:[%s1818_s0 + $0x16] sm:$0x1]  ;;  %v1073_v14 = vld [vmem:[%s1818_s0 + $0x18] sm:$0x1]  ;;  %v1078_v15 = vld [vmem:[%s1818_s0 + $0x1a] sm:$0x1] }
   0x6   :  { %v1083_v16 = vld [vmem:[%s1818_s0 + $0x1c] sm:$0x1]  ;;  %v1088_v17 = vld [vmem:[%s1818_s0 + $0x1e] sm:$0x1]  ;;  %v1093_v18 = vld [vmem:[%s1818_s0 + $0x20] sm:$0x1] }
   0x7   :  { %v1098_v19 = vld [vmem:[%s1818_s0 + $0x22] sm:$0x1]  ;;  %v1103_v20 = vld [vmem:[%s1818_s0 + $0x24] sm:$0x1]  ;;  %v1108_v21 = vld [vmem:[%s1818_s0 + $0x26] sm:$0x1] }
   0x8   :  { %1837 = vst [vmem:[#allocation3_spill] sm:$0xff] %v1103_v20  ;;  %1838 = vst [vmem:[#allocation4_spill] sm:$0xff] %v1108_v21  ;;  %v1113_v22 = vld [vmem:[%s1818_s0 + $0x28] sm:$0x1]  ;;  %v1118_v23 = vld [vmem:[%s1818_s0 + $0x2a] sm:$0x1] }
   0x9   :  { %1839 = vst [vmem:[#allocation5_spill] sm:$0xff] %v1113_v22  ;;  %1840 = vst [vmem:[#allocation6_spill] sm:$0xff] %v1118_v23  ;;  %v50_v25 = vshrl.u32 %v1016_v1, 16  ;;  %v1126_v28 = vld [vmem:[%s1818_s0 + $0x2c] sm:$0x1]  ;;  %v55_v32 = vshrl.u32 %v1021_v2, 16 }
   0xa   :  { %1841 = vst [vmem:[#allocation7_spill] sm:$0xff] %v1126_v28  ;;  %v1131_v29 = vld [vmem:[%s1818_s0 + $0x2e] sm:$0x1]  ;;  %v1136_v30 = vld [vmem:[%s1818_s0 + $0x30] sm:$0x1]  ;;  %v60_v33 = vshrl.u32 %v1026_v3, 16 }
   0xb   :  { %1842 = vst [vmem:[#allocation8_spill] sm:$0xff] %v1131_v29  ;;  %1843 = vst [vmem:[#allocation9_spill] sm:$0xff] %v1136_v30  ;;  %v1141_v31 = vld [vmem:[%s1818_s0 + $0x32] sm:$0x1]  ;;  %v65_v34 = vshrl.u32 %v1031_v4, 16  ;;  %v70_v35 = vshrl.u32 %v1036_v5, 16 }
   0xc   :  { %1844 = vst [vmem:[#allocation10_spill] sm:$0xff] %v1141_v31  ;;  %v1150_v36 = vld [vmem:[%s1818_s0 + $0x34] sm:$0x1]  ;;  %v1155_v37 = vld [vmem:[%s1818_s0 + $0x36] sm:$0x1]  ;;  %v75_v40 = vshrl.u32 %v1043_v8, 16 }
   0xd   :  { %1845 = vst [vmem:[#allocation11_spill] sm:$0xff] %v1150_v36  ;;  %1846 = vst [vmem:[#allocation12_spill] sm:$0xff] %v1155_v37  ;;  %v1160_v38 = vld [vmem:[%s1818_s0 + $0x38] sm:$0x1]  ;;  %v1165_v39 = vld [vmem:[%s1818_s0 + $0x3a] sm:$0x1] }
   0xe   :  { %1847 = vst [vmem:[#allocation13_spill] sm:$0xff] %v1165_v39  ;;  %v80_v41 = vshrl.u32 %v1048_v9, 16  ;;  %v85_v42 = vshrl.u32 %v1053_v10, 16  ;;  %v90_v43 = vshrl.u32 %v1058_v11, 16  ;;  %v1174_v44 = vld [vmem:[%s1818_s0 + $0x3c] sm:$0x1] }
   0xf   :  { %1848 = vst [vmem:[#allocation14_spill] sm:$0xff] %v1174_v44  ;;  %v1179_v45 = vld [vmem:[%s1818_s0 + $0x3e] sm:$0x1]  ;;  %v1184_v46 = vld [vmem:[%s1818_s0 + $0x40] sm:$0x1]  ;;  %v95_v47 = vshrl.u32 %v1063_v12, 16 }
  0x10   :  { %1849 = vst [vmem:[#allocation15_spill] sm:$0xff] %v1184_v46  ;;  %v100_v48 = vshrl.u32 %v1068_v13, 16  ;;  %v105_v49 = vshrl.u32 %v1073_v14, 16  ;;  %v110_v50 = vshrl.u32 %v1078_v15, 16  ;;  %v1193_v51 = vld [vmem:[%s1818_s0 + $0x42] sm:$0x1] }
  0x11   :  { %1850 = vst [vmem:[#allocation16_spill] sm:$0xff] %v1193_v51  ;;  %v115_v52 = vshrl.u32 %v1083_v16, 16  ;;  %v120_v53 = vshrl.u32 %v1088_v17, 16  ;;  %v125_v54 = vshrl.u32 %v1093_v18, 16  ;;  %v130_v55 = vshrl.u32 %v1098_v19, 16 }
  0x12   :  { %v1202_v56 = vld [vmem:[%s1818_s0 + $0x44] sm:$0x1]  ;;  %v135_v57 = vshrl.u32 %v1103_v20, 16  ;;  %v140_v58 = vshrl.u32 %v1108_v21, 16  ;;  %v145_v59 = vshrl.u32 %v1113_v22, 16  ;;  %v150_v60 = vshrl.u32 %v1118_v23, 16 }
  0x13   :  { %v1211_v61 = vld [vmem:[%s1818_s0 + $0x46] sm:$0x1]  ;;  %v155_v62 = vshrl.u32 %v1126_v28, 16  ;;  %v160_v63 = vshrl.u32 %v1131_v29, 16  ;;  %v165_v6 = vshrl.u32 %v1136_v30, 16  ;;  %v170_v26 = vshrl.u32 %v1141_v31, 16 }
  0x14   :  { %1851 = vst [vmem:[#allocation17_spill] sm:$0xff] %v1211_v61  ;;  %v175_v27 = vshrl.u32 %v1150_v36, 16  ;;  %v180_v7 = vshrl.u32 %v1155_v37, 16  ;;  %v185_v22 = vshrl.u32 %v1160_v38, 16  ;;  %v190_v23 = vshrl.u32 %v1165_v39, 16 }
  0x15   :  { %v195_v21 = vshrl.u32 %v1174_v44, 16  ;;  %v200_v20 = vshrl.u32 %v1179_v45, 16  ;;  %v205_v28 = vshrl.u32 %v1184_v46, 16  ;;  %v210_v29 = vshrl.u32 %v1193_v51, 16 }
  0x16   :  { %v215_v30 = vshrl.u32 %v1202_v56, 16  ;;  %v220_v31 = vshrl.u32 %v1211_v61, 16  ;;  %v1228_v36 = vmax.bf16 %v45_v24, %v1011_v0  ;;  %v1231_v37 = vmax.bf16 %v50_v25, %v1016_v1 }
  0x17   :  { %v1234_v39 = vmax.bf16 %v55_v32, %v1021_v2  ;;  %v1237_v44 = vmax.bf16 %v60_v33, %v1026_v3  ;;  %v1240_v46 = vmax.bf16 %v65_v34, %v1031_v4  ;;  %v1243_v51 = vmax.bf16 %v70_v35, %v1036_v5  ;;  %v1306_v33 = vld [vmem:[%s1818_s0 + $0x4] sm:$0x2]  ;;  %v1311_v34 = vld [vmem:[%s1818_s0 + $0x6] sm:$0x2]  ;;  %v1316_v35 = vld [vmem:[%s1818_s0 + $0x8] sm:$0x2] }
  0x18   :  { %v1246_v61 = vmax.bf16 %v75_v40, %v1043_v8  ;;  %v1249_v0 = vmax.bf16 %v80_v41, %v1048_v9  ;;  %v1252_v1 = vmax.bf16 %v85_v42, %v1053_v10  ;;  %v1255_v2 = vmax.bf16 %v90_v43, %v1058_v11  ;;  %v1321_v40 = vld [vmem:[%s1818_s0 + $0xa] sm:$0x2]  ;;  %v1864_v43 = vld [vmem:[#allocation8_spill] sm:$0xff] }
  0x19   :  { %v1258_v3 = vmax.bf16 %v95_v47, %v1063_v12  ;;  %v1261_v4 = vmax.bf16 %v100_v48, %v1068_v13  ;;  %v1264_v5 = vmax.bf16 %v105_v49, %v1073_v14  ;;  %v1267_v8 = vmax.bf16 %v110_v50, %v1078_v15  ;;  %v1284_v13 = vld [vmem:[%s1818_s0] sm:$0x2]  ;;  %v1289_v14 = vld [vmem:[%s1818_s0 + $0x2] sm:$0x2]  ;;  %v1854_v15 = vld [vmem:[#allocation3_spill] sm:$0xff] }
  0x1a   :  { %v1270_v9 = vmax.bf16 %v115_v52, %v1083_v16  ;;  %v1273_v10 = vmax.bf16 %v120_v53, %v1088_v17  ;;  %v1276_v11 = vmax.bf16 %v125_v54, %v1093_v18  ;;  %v1279_v12 = vmax.bf16 %v130_v55, %v1098_v19  ;;  %v1856_v17 = vld [vmem:[#allocation4_spill] sm:$0xff]  ;;  %v1858_v18 = vld [vmem:[#allocation5_spill] sm:$0xff]  ;;  %v1860_v19 = vld [vmem:[#allocation6_spill] sm:$0xff] }
  0x1b   :  { %v1292_v16 = vmax.bf16 %v135_v57, %v1854_v15  ;;  %v1295_v24 = vmax.bf16 %v140_v58, %v1856_v17  ;;  %v1298_v25 = vmax.bf16 %v145_v59, %v1858_v18  ;;  %v1301_v32 = vmax.bf16 %v150_v60, %v1860_v19  ;;  %v1862_v41 = vld [vmem:[#allocation7_spill] sm:$0xff]  ;;  %v1866_v48 = vld [vmem:[#allocation9_spill] sm:$0xff]  ;;  %v1868_v50 = vld [vmem:[#allocation10_spill] sm:$0xff] }
  0x1c   :  { %1852 = vst [vmem:[#allocation18_spill] sm:$0xff] %v1276_v11  ;;  %1853 = vst [vmem:[#allocation19_spill] sm:$0xff] %v1279_v12  ;;  %v1324_v42 = vmax.bf16 %v155_v62, %v1862_v41  ;;  %v1327_v47 = vmax.bf16 %v160_v63, %v1864_v43  ;;  %v1330_v49 = vmax.bf16 %v165_v6, %v1866_v48  ;;  %v1338_v53 = vld [vmem:[%s1818_s0 + $0xc] sm:$0x2]  ;;  %v1343_v54 = vld [vmem:[%s1818_s0 + $0xe] sm:$0x2] }
  0x1d   :  { %1855 = vst [vmem:[#allocation3_spill] sm:$0xff] %v1292_v16  ;;  %1857 = vst [vmem:[#allocation4_spill] sm:$0xff] %v1295_v24  ;;  %v1333_v52 = vmax.bf16 %v170_v26, %v1868_v50  ;;  %v1348_v55 = vld [vmem:[%s1818_s0 + $0x10] sm:$0x2]  ;;  %v1353_v26 = vld [vmem:[%s1818_s0 + $0x12] sm:$0x2]  ;;  %v1362_v62 = vmax.bf16 %v185_v22, %v1160_v38  ;;  %v1391_v38 = vmax.bf16 %v200_v20, %v1179_v45 }
  0x1e   :  { %1859 = vst [vmem:[#allocation5_spill] sm:$0xff] %v1298_v25  ;;  %1861 = vst [vmem:[#allocation6_spill] sm:$0xff] %v1301_v32  ;;  %v1870_v57 = vld [vmem:[#allocation11_spill] sm:$0xff]  ;;  %v1872_v59 = vld [vmem:[#allocation12_spill] sm:$0xff]  ;;  %vm846_vm3 = vcmask 1044484   ;;  %vm849_vm4 = vcmask 1045509  }
  0x1f   :  { %1863 = vst [vmem:[#allocation7_spill] sm:$0xff] %v1324_v42  ;;  %1865 = vst [vmem:[#allocation8_spill] sm:$0xff] %v1327_v47  ;;  %v1356_v58 = vmax.bf16 %v175_v27, %v1870_v57  ;;  %v1359_v60 = vmax.bf16 %v180_v7, %v1872_v59  ;;  %v1875_v63 = vld [vmem:[#allocation13_spill] sm:$0xff]  ;;  %v1370_v15 = vld [vmem:[%s1818_s0 + $0x14] sm:$0x2]  ;;  %vm852_vm5 = vcmask 1046534  }
  0x20   :  { %1867 = vst [vmem:[#allocation9_spill] sm:$0xff] %v1330_v49  ;;  %1869 = vst [vmem:[#allocation10_spill] sm:$0xff] %v1333_v52  ;;  %v1365_v6 = vmax.bf16 %v190_v23, %v1875_v63  ;;  %v1375_v17 = vld [vmem:[%s1818_s0 + $0x16] sm:$0x2]  ;;  %v1380_v7 = vld [vmem:[%s1818_s0 + $0x18] sm:$0x2] }
  0x21   :  { %1871 = vst [vmem:[#allocation11_spill] sm:$0xff] %v1356_v58  ;;  %1873 = vst [vmem:[#allocation12_spill] sm:$0xff] %v1359_v60  ;;  %v1385_v22 = vld [vmem:[%s1818_s0 + $0x1a] sm:$0x2]  ;;  %v1877_v23 = vld [vmem:[#allocation14_spill] sm:$0xff]  ;;  %vm855_vm6 = vcmask 1047559  }
  0x22   :  { %1874 = vst [vmem:[#allocation20_spill] sm:$0xff] %v1362_v62  ;;  %1876 = vst [vmem:[#allocation13_spill] sm:$0xff] %v1365_v6  ;;  %v1388_v27 = vmax.bf16 %v195_v21, %v1877_v23  ;;  %v1880_v18 = vld [vmem:[#allocation15_spill] sm:$0xff]  ;;  %v1882_v41 = vld [vmem:[#allocation16_spill] sm:$0xff]  ;;  %v973_v60 = vrot.slane %v1385_v22, 9 }
  0x23   :  { %1879 = vst [vmem:[#allocation21_spill] sm:$0xff] %v1391_v38  ;;  %v1394_v19 = vmax.bf16 %v205_v28, %v1880_v18  ;;  %v1397_v43 = vmax.bf16 %v210_v29, %v1882_v41  ;;  %v1402_v48 = vld [vmem:[%s1818_s0 + $0x1c] sm:$0x2]  ;;  %v1407_v50 = vld [vmem:[%s1818_s0 + $0x1e] sm:$0x2]  ;;  %v1420_v28 = vmax.bf16 %v215_v30, %v1202_v56  ;;  %v961_v56 = vrot.slane %v1289_v14, 9 }
  0x24   :  { %1878 = vst [vmem:[#allocation14_spill] sm:$0xff] %v1388_v27  ;;  %v1412_v20 = vld [vmem:[%s1818_s0 + $0x20] sm:$0x2]  ;;  %v1417_v21 = vld [vmem:[%s1818_s0 + $0x22] sm:$0x2]  ;;  %v1885_v29 = vld [vmem:[#allocation17_spill] sm:$0xff] }
  0x25   :  { %1881 = vst [vmem:[#allocation15_spill] sm:$0xff] %v1394_v19  ;;  %1883 = vst [vmem:[#allocation16_spill] sm:$0xff] %v1397_v43  ;;  %v1423_v45 = vmax.bf16 %v220_v31, %v1885_v29  ;;  %v1428_v57 = vld [vmem:[%s1818_s0 + $0x24] sm:$0x2]  ;;  %v1433_v59 = vld [vmem:[%s1818_s0 + $0x26] sm:$0x2] }
  0x26   :  { %1884 = vst [vmem:[#allocation22_spill] sm:$0xff] %v1420_v28  ;;  %v1438_v63 = vld [vmem:[%s1818_s0 + $0x28] sm:$0x2]  ;;  %v1443_v30 = vld [vmem:[%s1818_s0 + $0x2a] sm:$0x2]  ;;  %v960_v31 = vrot.slane %v1284_v13, 9 }
  0x27   :  { %1886 = vst [vmem:[#allocation17_spill] sm:$0xff] %v1423_v45  ;;  %v1450_v23 = vld [vmem:[%s1818_s0 + $0x2c] sm:$0x2]  ;;  %v1455_v18 = vld [vmem:[%s1818_s0 + $0x2e] sm:$0x2]  ;;  %v962_v14 = vrot.slane %v1306_v33, 9 }
  0x28   :  { %v1460_v41 = vld [vmem:[%s1818_s0 + $0x30] sm:$0x2]  ;;  %v1465_v13 = vld [vmem:[%s1818_s0 + $0x32] sm:$0x2]  ;;  %v963_v29 = vrot.slane %v1311_v34, 9  ;;  %v964_v45 = vrot.slane %v1316_v35, 9 }
  0x29   :  { %v965_v28 = vrot.slane %v1321_v40, 9  ;;  %v1474_v43 = vld [vmem:[%s1818_s0 + $0x34] sm:$0x2]  ;;  %v1479_v19 = vld [vmem:[%s1818_s0 + $0x36] sm:$0x2]  ;;  %v966_v35 = vrot.slane %v1338_v53, 9 }
  0x2a   :  { %v1484_v33 = vld [vmem:[%s1818_s0 + $0x38] sm:$0x2]  ;;  %v1489_v34 = vld [vmem:[%s1818_s0 + $0x3a] sm:$0x2]  ;;  %v967_v40 = vrot.slane %v1343_v54, 9  ;;  %v968_v38 = vrot.slane %v1348_v55, 9 }
  0x2b   :  { %v969_v27 = vrot.slane %v1353_v26, 9  ;;  %v1498_v6 = vld [vmem:[%s1818_s0 + $0x3c] sm:$0x2]  ;;  %v1503_v62 = vld [vmem:[%s1818_s0 + $0x3e] sm:$0x2]  ;;  %v970_v54 = vrot.slane %v1370_v15, 9 }
  0x2c   :  { %v1508_v53 = vld [vmem:[%s1818_s0 + $0x40] sm:$0x2]  ;;  %v971_v55 = vrot.slane %v1375_v17, 9  ;;  %v972_v26 = vrot.slane %v1380_v7, 9  ;;  %v329_v58 = vld [vmem:[%s1818_s0 + $0x42] sm:$0x2] }
  0x2d   :  { %v974_v52 = vrot.slane %v1402_v48, 9  ;;  %v975_v49 = vrot.slane %v1407_v50, 9  ;;  %v976_v47 = vrot.slane %v1412_v20, 9  ;;  %v977_v42 = vrot.slane %v1417_v21, 9  ;;  %v330_v15 = vld [vmem:[%s1818_s0 + $0x44] sm:$0x2] }
  0x2e   :  { %v978_v17 = vrot.slane %v1428_v57, 9  ;;  %v979_v7 = vrot.slane %v1433_v59, 9  ;;  %v980_v22 = vrot.slane %v1438_v63, 9  ;;  %v981_v32 = vrot.slane %v1443_v30, 9  ;;  %v331_v48 = vld [vmem:[%s1818_s0 + $0x46] sm:$0x2] }
  0x2f   :  { %v982_v50 = vrot.slane %v1450_v23, 9  ;;  %v983_v20 = vrot.slane %v1455_v18, 9  ;;  %v984_v21 = vrot.slane %v1460_v41, 9  ;;  %v985_v25 = vrot.slane %v1465_v13, 9 }
  0x30   :  { %v986_v57 = vrot.slane %v1474_v43, 9  ;;  %v987_v59 = vrot.slane %v1479_v19, 9  ;;  %v988_v63 = vrot.slane %v1484_v33, 9  ;;  %v989_v30 = vrot.slane %v1489_v34, 9  ;;  %v1897_v33 = vld [vmem:[#allocation10_spill] sm:$0xff] }
  0x31   :  { %v990_v24 = vrot.slane %v1498_v6, 9  ;;  %v991_v16 = vrot.slane %v1503_v62, 9  ;;  %v992_v23 = vrot.slane %v1508_v53, 9  ;;  %v993_v12 = vrot.slane %v329_v58, 9  ;;  %v1899_v53 = vld [vmem:[#allocation12_spill] sm:$0xff] }
  0x32   :  { %v994_v18 = vrot.slane %v330_v15, 9  ;;  %v995_v11 = vrot.slane %v331_v48, 9  ;;  %v1543_v41 = vmax.bf16 %v960_v31, %v1228_v36  ;;  %v1546_v43 = vmax.bf16 %v961_v56, %v1231_v37 }
  0x33   :  { %v1549_v19 = vmax.bf16 %v962_v14, %v1234_v39  ;;  %v1552_v13 = vmax.bf16 %v963_v29, %v1237_v44  ;;  %v1555_v6 = vmax.bf16 %v964_v45, %v1240_v46  ;;  %v1558_v62 = vmax.bf16 %v965_v28, %v1243_v51 }
  0x34   :  { %v1561_v58 = vmax.bf16 %v966_v35, %v1246_v61  ;;  %v1564_v36 = vmax.bf16 %v967_v40, %v1249_v0  ;;  %v1567_v37 = vmax.bf16 %v968_v38, %v1252_v1  ;;  %v1570_v39 = vmax.bf16 %v969_v27, %v1255_v2  ;;  %v1887_v2 = vld [vmem:[#allocation18_spill] sm:$0xff]  ;;  %v1898_v35 = vld [vmem:[#allocation11_spill] sm:$0xff] }
  0x35   :  { %v1573_v44 = vmax.bf16 %v970_v54, %v1258_v3  ;;  %v1576_v46 = vmax.bf16 %v971_v55, %v1261_v4  ;;  %v1579_v51 = vmax.bf16 %v972_v26, %v1264_v5  ;;  %v1582_v61 = vmax.bf16 %v973_v60, %v1267_v8  ;;  %v1888_v3 = vld [vmem:[#allocation19_spill] sm:$0xff]  ;;  %v1890_v5 = vld [vmem:[#allocation4_spill] sm:$0xff]  ;;  %v1891_v8 = vld [vmem:[#allocation5_spill] sm:$0xff] }
  0x36   :  { %v1585_v0 = vmax.bf16 %v974_v52, %v1270_v9  ;;  %v1588_v1 = vmax.bf16 %v975_v49, %v1273_v10  ;;  %v1591_v27 = vmax.bf16 %v976_v47, %v1887_v2  ;;  %v1594_v38 = vmax.bf16 %v977_v42, %v1888_v3  ;;  %v1889_v4 = vld [vmem:[#allocation3_spill] sm:$0xff]  ;;  %v1892_v9 = vld [vmem:[#allocation6_spill] sm:$0xff]  ;;  %v1894_v47 = vld [vmem:[#allocation8_spill] sm:$0xff] }
  0x37   :  { %v1597_v28 = vmax.bf16 %v978_v17, %v1889_v4  ;;  %v1600_v45 = vmax.bf16 %v979_v7, %v1890_v5  ;;  %v1603_v60 = vmax.bf16 %v980_v22, %v1891_v8  ;;  %v1606_v52 = vmax.bf16 %v981_v32, %v1892_v9  ;;  %v1893_v10 = vld [vmem:[#allocation7_spill] sm:$0xff]  ;;  %v1895_v42 = vld [vmem:[#allocation9_spill] sm:$0xff]  ;;  %v1900_v54 = vld [vmem:[#allocation20_spill] sm:$0xff] }
  0x38   :  { %v1609_v49 = vmax.bf16 %v982_v50, %v1893_v10  ;;  %v1612_v31 = vmax.bf16 %v983_v20, %v1894_v47  ;;  %v1615_v56 = vmax.bf16 %v984_v21, %v1895_v42  ;;  %v1896_v14 = vlaneseq  ;;  %v1901_v26 = vld [vmem:[#allocation13_spill] sm:$0xff]  ;;  %v1902_v17 = vld [vmem:[#allocation14_spill] sm:$0xff]  ;;  %v1906_v21 = vld [vmem:[#allocation15_spill] sm:$0xff] }
  0x39   :  { %v1619_v34 = vmax.bf16 %v985_v25, %v1897_v33  ;;  %v1622_v40 = vmax.bf16 %v986_v57, %v1898_v35  ;;  %v1625_v32 = vmax.bf16 %v987_v59, %v1899_v53  ;;  %v1628_v55 = vmax.bf16 %v988_v63, %v1900_v54  ;;  %v1903_v22 = vld [vmem:[#allocation21_spill] sm:$0xff]  ;;  %v1904_v25 = vld [vmem:[#allocation2_spill] sm:$0xff]  ;;  %v1907_v59 = vld [vmem:[#allocation16_spill] sm:$0xff] }
  0x3a   :  { %v552_v29 = vshrl.u32 %v1896_v14, 7  ;;  %v1631_v15 = vmax.bf16 %v989_v30, %v1901_v26  ;;  %v1634_v7 = vmax.bf16 %v990_v24, %v1902_v17  ;;  %v1637_v48 = vmax.bf16 %v991_v16, %v1903_v22  ;;  %v1908_v63 = vld [vmem:[#allocation22_spill] sm:$0xff]  ;;  %v1909_v30 = vld [vmem:[#allocation17_spill] sm:$0xff] }
  0x3b   :  { %v1905_v50 = vunpack.c.0.s8 %v1904_v25  ;;  %v1644_v57 = vmax.bf16 %v992_v23, %v1906_v21  ;;  %v1647_v2 = vmax.bf16 %v993_v12, %v1907_v59  ;;  %v1650_v3 = vmax.bf16 %v994_v18, %v1908_v63 }
  0x3c   :  { %v1653_v4 = vmax.bf16 %v995_v11, %v1909_v30 }
  0x3d   :  { %v1641_v20 = vsub.s32 %v1905_v50, %v552_v29 }
  0x3f   :  { %v554_v16 = vrot.slane %v1543_v41, %v1641_v20  ;;  %v561_v24 = vrot.slane %v1546_v43, %v1641_v20  ;;  %v568_v5 = vrot.slane %v1549_v19, %v1641_v20  ;;  %v575_v23 = vrot.slane %v1552_v13, %v1641_v20 }
  0x40   :  { %v582_v12 = vrot.slane %v1555_v6, %v1641_v20  ;;  %v589_v18 = vrot.slane %v1558_v62, %v1641_v20  ;;  %v596_v11 = vrot.slane %v1561_v58, %v1641_v20  ;;  %v603_v41 = vrot.slane %v1564_v36, %v1641_v20 }
  0x41   :  { %v610_v43 = vrot.slane %v1567_v37, %v1641_v20  ;;  %v617_v19 = vrot.slane %v1570_v39, %v1641_v20  ;;  %v624_v13 = vrot.slane %v1573_v44, %v1641_v20  ;;  %v631_v6 = vrot.slane %v1576_v46, %v1641_v20 }
  0x42   :  { %v638_v62 = vrot.slane %v1579_v51, %v1641_v20  ;;  %v645_v58 = vrot.slane %v1582_v61, %v1641_v20  ;;  %v652_v36 = vrot.slane %v1585_v0, %v1641_v20  ;;  %v659_v37 = vrot.slane %v1588_v1, %v1641_v20 }
  0x43   :  { %v666_v39 = vrot.slane %v1591_v27, %v1641_v20  ;;  %v673_v44 = vrot.slane %v1594_v38, %v1641_v20  ;;  %v680_v46 = vrot.slane %v1597_v28, %v1641_v20  ;;  %v687_v51 = vrot.slane %v1600_v45, %v1641_v20 }
  0x44   :  { %v694_v61 = vrot.slane %v1603_v60, %v1641_v20  ;;  %v701_v0 = vrot.slane %v1606_v52, %v1641_v20  ;;  %v708_v1 = vrot.slane %v1609_v49, %v1641_v20  ;;  %v715_v27 = vrot.slane %v1612_v31, %v1641_v20 }
  0x45   :  { %v722_v38 = vrot.slane %v1615_v56, %v1641_v20  ;;  %v729_v28 = vrot.slane %v1619_v34, %v1641_v20  ;;  %v736_v45 = vrot.slane %v1622_v40, %v1641_v20  ;;  %v743_v8 = vrot.slane %v1625_v32, %v1641_v20 }
  0x46   :  { %v750_v60 = vrot.slane %v1628_v55, %v1641_v20  ;;  %v757_v9 = vrot.slane %v1631_v15, %v1641_v20  ;;  %v764_v52 = vrot.slane %v1634_v7, %v1641_v20  ;;  %v771_v10 = vrot.slane %v1637_v48, %v1641_v20 }
  0x47   :  { %v778_v49 = vrot.slane %v1644_v57, %v1641_v20  ;;  %v785_v47 = vrot.slane %v1647_v2, %v1641_v20  ;;  %v792_v31 = vrot.slane %v1650_v3, %v1641_v20  ;;  %v799_v42 = vrot.slane %v1653_v4, %v1641_v20 }
  0x48   :  { %v800_v56 = vunpack.c.l.b16 %v554_v16  ;;  %v801_v14 = vunpack.c.l.b16 %v561_v24  ;;  %v802_v29 = vunpack.c.l.b16 %v568_v5  ;;  %v803_v33 = vunpack.c.l.b16 %v575_v23 }
  0x49   :  { %v804_v34 = vunpack.c.l.b16 %v582_v12  ;;  %v1727_v35 = vunpack.c.l.b16 %v589_v18  ;;  %v1729_v40 = vunpack.c.l.b16 %v596_v11  ;;  %v1731_v53 = vunpack.c.l.b16 %v603_v41 }
  0x4a   :  { %v808_v32 = vunpack.c.l.b16 %v610_v43  ;;  %v809_v54 = vunpack.c.l.b16 %v617_v19  ;;  %v810_v55 = vunpack.c.l.b16 %v624_v13  ;;  %v811_v26 = vunpack.c.l.b16 %v631_v6 }
  0x4b   :  { %v812_v15 = vunpack.c.l.b16 %v638_v62  ;;  %v813_v17 = vunpack.c.l.b16 %v645_v58  ;;  %v814_v7 = vunpack.c.l.b16 %v652_v36  ;;  %v1733_v22 = vunpack.c.l.b16 %v659_v37 }
  0x4c   :  { %v816_v48 = vunpack.c.l.b16 %v666_v39  ;;  %v817_v25 = vunpack.c.l.b16 %v673_v44  ;;  %v818_v50 = vunpack.c.l.b16 %v680_v46  ;;  %v819_v20 = vunpack.c.l.b16 %v687_v51 }
  0x4d   :  { %v820_v21 = vunpack.c.l.b16 %v694_v61  ;;  %v821_v57 = vunpack.c.l.b16 %v701_v0  ;;  %v822_v59 = vunpack.c.l.b16 %v708_v1  ;;  %v1735_v2 = vunpack.c.l.b16 %v715_v27 }
  0x4e   :  { %v824_v63 = vunpack.c.l.b16 %v722_v38  ;;  %v825_v3 = vunpack.c.l.b16 %v729_v28  ;;  %v1737_v30 = vunpack.c.l.b16 %v736_v45  ;;  %v1739_v4 = vunpack.c.l.b16 %v743_v8 }
  0x4f   :  { %v1741_v16 = vunpack.c.l.b16 %v750_v60  ;;  %v1743_v24 = vunpack.c.l.b16 %v757_v9  ;;  %v1745_v5 = vunpack.c.l.b16 %v764_v52  ;;  %v1747_v23 = vunpack.c.l.b16 %v771_v10 }
  0x50   :  { %v1749_v12 = vunpack.c.l.b16 %v778_v49  ;;  %v1751_v18 = vunpack.c.l.b16 %v785_v47  ;;  %v1753_v11 = vunpack.c.l.b16 %v792_v31  ;;  %v1755_v41 = vunpack.c.l.b16 %v799_v42 }
  0x51   :  { %v836_v43 = vrot.slane %v801_v14, 7  ;;  %v839_v19 = vrot.slane %v802_v29, 6  ;;  %v842_v13 = vrot.slane %v803_v33, 5  ;;  %v845_v6 = vrot.slane %v804_v34, 4 }
  0x52   :  { %v848_v62 = vrot.slane %v1727_v35, 3  ;;  %v851_v58 = vrot.slane %v1729_v40, 2  ;;  %v854_v36 = vrot.slane %v1731_v53, 1  ;;  %v857_v37 = vrot.slane %v809_v54, 7 }
  0x53   :  { %v838_v39 = vsel %vm837_vm0, %v836_v43, %v800_v56  ;;  %v859_v44 = vrot.slane %v810_v55, 6  ;;  %v861_v46 = vrot.slane %v811_v26, 5  ;;  %v863_v51 = vrot.slane %v812_v15, 4 }
  0x54   :  { %v841_v61 = vsel %vm840_vm1, %v839_v19, %v838_v39  ;;  %v858_v0 = vsel %vm837_vm0, %v857_v37, %v808_v32  ;;  %v865_v1 = vrot.slane %v813_v17, 3  ;;  %v867_v27 = vrot.slane %v814_v7, 2 }
  0x55   :  { %v844_v38 = vsel %vm843_vm2, %v842_v13, %v841_v61  ;;  %v860_v28 = vsel %vm840_vm1, %v859_v44, %v858_v0  ;;  %v869_v45 = vrot.slane %v1733_v22, 1  ;;  %v871_v8 = vrot.slane %v817_v25, 7 }
  0x56   :  { %v847_v60 = vsel %vm846_vm3, %v845_v6, %v844_v38  ;;  %v862_v9 = vsel %vm843_vm2, %v861_v46, %v860_v28  ;;  %v873_v52 = vrot.slane %v818_v50, 6  ;;  %v875_v10 = vrot.slane %v819_v20, 5 }
  0x57   :  { %v850_v49 = vsel %vm849_vm4, %v848_v62, %v847_v60  ;;  %v864_v47 = vsel %vm846_vm3, %v863_v51, %v862_v9  ;;  %v872_v31 = vsel %vm837_vm0, %v871_v8, %v816_v48  ;;  %v877_v42 = vrot.slane %v820_v21, 4 }
  0x58   :  { %v853_v56 = vsel %vm852_vm5, %v851_v58, %v850_v49  ;;  %v866_v14 = vsel %vm849_vm4, %v865_v1, %v864_v47  ;;  %v874_v29 = vsel %vm840_vm1, %v873_v52, %v872_v31  ;;  %v879_v33 = vrot.slane %v821_v57, 3 }
  0x59   :  { %v856_v34 = vsel %vm855_vm6, %v854_v36, %v853_v56  ;;  %v868_v35 = vsel %vm852_vm5, %v867_v27, %v866_v14  ;;  %v876_v40 = vsel %vm843_vm2, %v875_v10, %v874_v29  ;;  %v881_v53 = vrot.slane %v822_v59, 2 }
  0x5a   :  { %v870_v32 = vsel %vm855_vm6, %v869_v45, %v868_v35  ;;  %v878_v54 = vsel %vm846_vm3, %v877_v42, %v876_v40  ;;  %v883_v55 = vrot.slane %v1735_v2, 1  ;;  %v885_v26 = vrot.slane %v825_v3, 7 }
  0x5b   :  { %v880_v15 = vsel %vm849_vm4, %v879_v33, %v878_v54  ;;  %v887_v17 = vrot.slane %v1737_v30, 6  ;;  %v889_v7 = vrot.slane %v1739_v4, 5  ;;  %v891_v22 = vrot.slane %v1741_v16, 4 }
  0x5c   :  { %v882_v48 = vsel %vm852_vm5, %v881_v53, %v880_v15  ;;  %v886_v25 = vsel %vm837_vm0, %v885_v26, %v824_v63  ;;  %v893_v50 = vrot.slane %v1743_v24, 3  ;;  %v895_v20 = vrot.slane %v1745_v5, 2 }
  0x5d   :  { %v884_v21 = vsel %vm855_vm6, %v883_v55, %v882_v48  ;;  %v888_v57 = vsel %vm840_vm1, %v887_v17, %v886_v25  ;;  %v897_v59 = vrot.slane %v1747_v23, 1  ;;  %v899_v2 = vrot.slane %v1751_v18, 7 }
  0x5e   :  { %v890_v3 = vsel %vm843_vm2, %v889_v7, %v888_v57  ;;  %v901_v30 = vrot.slane %v1753_v11, 6  ;;  %v903_v4 = vrot.slane %v1755_v41, 5  ;;  %v905_v16 = vpack.c.b16 %v856_v34, %v856_v34 }
  0x5f   :  { %v892_v63 = vsel %vm846_vm3, %v891_v22, %v890_v3  ;;  %v900_v24 = vsel %vm837_vm0, %v899_v2, %v1749_v12  ;;  %v906_v5 = vpack.c.b16 %v870_v32, %v870_v32  ;;  %v907_v43 = vpack.c.b16 %v884_v21, %v884_v21 }
  0x60   :  { %v894_v19 = vsel %vm849_vm4, %v893_v50, %v892_v63  ;;  %v902_v23 = vsel %vm840_vm1, %v901_v30, %v900_v24  ;;  %915 = vst [vmem:[%s1819_s1] sm:$0xf] %v905_v16 }
  0x61   :  { %v896_v18 = vsel %vm852_vm5, %v895_v20, %v894_v19  ;;  %v904_v11 = vsel %vm843_vm2, %v903_v4, %v902_v23  ;;  %916 = vst [vmem:[%s1819_s1 + $0x4] sm:$0xf] %v906_v5  ;;  %917 = vst [vmem:[%s1819_s1 + $0x8] sm:$0xf] %v907_v43 }
  0x62   :  { %v898_v12 = vsel %vm855_vm6, %v897_v59, %v896_v18  ;;  %v909_v41 = vpack.c.b16 %v904_v11, %v904_v11 }
  0x63   :  { %v908_v13 = vpack.c.b16 %v898_v12, %v898_v12 }
  0x64   :  { %919 = vst [vmem:[%s1819_s1 + $0x10] sm:$0x3] %v909_v41 }
  0x65   :  { %918 = vst [vmem:[%s1819_s1 + $0xc] sm:$0xf] %v908_v13 }

// kernel: forward.17
= control target key start
LH: loop header
LB: loop body
LE: loop exit
PB: predicated region body
PF: predicated region fallthrough
CT: control target
= control target key end

     0   :  { %s1858_s12 = smov 0   ;;  %s2207_s0 = inlined_call_operand.vmem [shape: bf16[6,14,128], index: 0, kind: input, shape index: {}]   ;;  %s2208_s1 = inlined_call_operand.vmem [shape: bf16[9,128,64], index: 1, kind: input, shape index: {}]   ;;  %s2209_s2 = inlined_call_operand.vmem [shape: f32[1,64], index: 2, kind: input, shape index: {}]   ;;  %s2210_s3 = inlined_call_operand.vmem [shape: bf16[6,6,64], index: 3, kind: output, shape index: {}]  }
   0x1 LB: > { %s1259_s13 = sadd.s32 4294967295, %s1834_s12   ;;  %p1263_p0 = scmp.ge.s32.totalorder %s1834_s12, 1  ;;  %s1834_s12 = sphi %s1858_s12, %s13_s12  }
   0x2   : > { %p137_p1 = scmp.lt.s32.totalorder %s1834_s12, 7 }
   0x4   : > { %p138_p2 = pnand %p1263_p0, %p137_p1 }
   0x5   : > { %p160_p3 = scmp.lt.s32.totalorder (!%p138_p2), %s1259_s13, 5 }
   0x6   : > { %141 = sbr.rel (%p138_p2) target bundleno = 374 (0x176), region = 32 }
   0xb   : > { %v1749_v0 = vld [vmem:[%s2208_s1 + $0x78] sm:$0xff]   ;;  %v1836_v1 = vmov 0.0   ;;  %v1751_v3 = vld [vmem:[%s2208_s1 + $0x70] sm:$0xff]   ;;  %vm1837_vm0 = vmmov 0   ;;  %v1753_v5 = vld [vmem:[%s2208_s1 + $0x68] sm:$0xff]   ;;  %s2212_s13 = smov (!%p160_p3, %s1259_s13), 5 }
   0xc   : > { %1559 = vmatprep.subr.bf16.mxu0 %v1836_v1  ;;  %1579 = vmatprep.subr.bf16.mxu1 %v1836_v1  ;;  %v1750_v2 = vld [vmem:[%s2208_s1 + $0x38] sm:$0xff]   ;;  %v1752_v4 = vld [vmem:[%s2208_s1 + $0x30] sm:$0xff]   ;;  %v1754_v6 = vld [vmem:[%s2208_s1 + $0x28] sm:$0xff]   ;;  %s1477_s30 = sshll.u32 %s2212_s13, 3  ;;  %vm1204_vm1 = vcmask 518144  }
   0xd   : > { %1560 = vmatpush3.bf16.msra.mxu0 %v1749_v0  ;;  %1575 = vmatprep.mubr.msk.bf16.mxu0 %vm1837_vm0, %v1836_v1  ;;  %v1755_v7 = vld [vmem:[%s2208_s1 + $0x60] sm:$0xff]   ;;  %v1757_v9 = vld [vmem:[%s2208_s1 + $0x58] sm:$0xff]   ;;  %s1911_s8 = scalar_lea.vmem %s2207_s0, %s1477_s30  ;;  %v1759_v12 = vld [vmem:[%s2208_s1 + $0x50] sm:$0xff]  }
   0xe   : > { %1580 = vmatpush3.bf16.msra.mxu1 %v1750_v2  ;;  %1561 = vmatprep.subr.bf16.mxu0 %v1836_v1  ;;  %v1756_v8 = vld [vmem:[%s2208_s1 + $0x20] sm:$0xff]   ;;  %v1758_v10 = vld [vmem:[%s2208_s1 + $0x18] sm:$0xff]   ;;  %v1760_v13 = vld [vmem:[%s2208_s1 + $0x10] sm:$0xff]  }
   0xf   : > { %1581 = vmatprep.subr.bf16.mxu1 %v1836_v1  ;;  %1595 = vmatprep.mubr.msk.bf16.mxu1 %vm1837_vm0, %v1836_v1  ;;  %v1765_v11 = vld [vmem:[%s1911_s8] ss:$0 sps:$4 sm:$0xff]   ;;  %v1761_v15 = vld [vmem:[%s2208_s1 + $0x48] sm:$0xff]   ;;  %v1766_v23 = vld [vmem:[%s2208_s1 + $0xb8] sm:$0xff]  }
  0x10   : > { %v211_v14 = vshll.u32 %v1765_v11, 16  ;;  %v1762_v16 = vld [vmem:[%s2208_s1 + $0x8] sm:$0xff]   ;;  %v209_v17 = vshrl.u32 %v1765_v11, 16  ;;  %v1763_v19 = vld [vmem:[%s2208_s1 + $0x40] sm:$0xff]   ;;  %v1767_v24 = vld [vmem:[%s2208_s1 + $0xf8] sm:$0xff]  }
  0x11   : > { %1562 = vmatpush3.bf16.msra.mxu0 %v1751_v3  ;;  %v1764_v20 = vld [vmem:[%s2208_s1] sm:$0xff]   ;;  %v1768_v25 = vld [vmem:[%s2208_s1 + $0xb0] sm:$0xff]   ;;  %v1770_v27 = vld [vmem:[%s2208_s1 + $0xa8] sm:$0xff]  }
  0x12   : > { %1582 = vmatpush3.bf16.msra.mxu1 %v1752_v4  ;;  %1563 = vmatprep.subr.bf16.mxu0 %v1836_v1  ;;  %v213_v18 = vrot.slane %v211_v14, 1  ;;  %v170_v22 = vld [vmem:[%s1911_s8] sm:$0x7]  ;;  %v1769_v26 = vld [vmem:[%s2208_s1 + $0xf0] sm:$0xff]   ;;  %v1771_v28 = vld [vmem:[%s2208_s1 + $0xe8] sm:$0xff]  }
  0x13   : > { %1583 = vmatprep.subr.bf16.mxu1 %v1836_v1  ;;  %v1772_v29 = vld [vmem:[%s2208_s1 + $0xa0] sm:$0xff]   ;;  %v1774_v31 = vld [vmem:[%s2208_s1 + $0x98] sm:$0xff]   ;;  %v1776_v35 = vld [vmem:[%s2208_s1 + $0x90] sm:$0xff]  }
  0x14   : > { %v214_v21 = vor.u32 %v213_v18, %v209_v17  ;;  %v1773_v30 = vld [vmem:[%s2208_s1 + $0xe0] sm:$0xff]   ;;  %v1775_v32 = vld [vmem:[%s2208_s1 + $0xd8] sm:$0xff]   ;;  %v1777_v37 = vld [vmem:[%s2208_s1 + $0xd0] sm:$0xff]  }
  0x15   : > { %1564 = vmatpush3.bf16.msra.mxu0 %v1753_v5  ;;  %v504_v33 = vld [vmem:[%s1911_s8] sm:$0xe]  ;;  %v1989_v34 = vld [vmem:[%s1911_s8 + $0x4] sm:$0x1]  ;;  %v1778_v38 = vld [vmem:[%s2208_s1 + $0x88] sm:$0xff]  }
  0x16   : > { %1584 = vmatpush3.bf16.msra.mxu1 %v1754_v6  ;;  %1565 = vmatprep.subr.bf16.mxu0 %v1836_v1  ;;  %v1341_v36 = vcombine.low %v504_v33, %v1989_v34  ;;  %v1779_v39 = vld [vmem:[%s2208_s1 + $0xc8] sm:$0xff]   ;;  %v1780_v42 = vld [vmem:[%s2208_s1 + $0x80] sm:$0xff]   ;;  %v1783_v48 = vld [vmem:[%s2208_s1 + $0x138] sm:$0xff]  }
  0x17   : > { %1585 = vmatprep.subr.bf16.mxu1 %v1836_v1  ;;  %v1782_v43 = vld [vmem:[%s1911_s8] ss:$0 sps:$4 sm:$0xee]   ;;  %v1785_v50 = vld [vmem:[%s2208_s1 + $0x178] sm:$0xff]   ;;  %v1786_v51 = vld [vmem:[%s2208_s1 + $0x130] sm:$0xff]  }
  0x18   : > { %v529_v40 = vshrl.u32 %v1341_v36, 16  ;;  %v532_v41 = vshll.u32 %v1341_v36, 16  ;;  %v1781_v46 = vld [vmem:[%s2208_s1 + $0xc0] sm:$0xff]   ;;  %v413_v47 = vrot.slane %v1782_v43, 1  ;;  %v1787_v52 = vld [vmem:[%s2208_s1 + $0x170] sm:$0xff]   ;;  %v1788_v53 = vld [vmem:[%s2208_s1 + $0x128] sm:$0xff]  }
  0x19   : > { %1566 = vmatpush3.bf16.msra.mxu0 %v1755_v7  ;;  %v1789_v54 = vld [vmem:[%s2208_s1 + $0x168] sm:$0xff]   ;;  %v1790_v55 = vld [vmem:[%s2208_s1 + $0x120] sm:$0xff]   ;;  %v1792_v57 = vld [vmem:[%s2208_s1 + $0x118] sm:$0xff]  }
  0x1a   : > { %1586 = vmatpush3.bf16.msra.mxu1 %v1756_v8  ;;  %1567 = vmatprep.subr.bf16.mxu0 %v1836_v1  ;;  %v531_v44 = vrot.slane %v529_v40, 1  ;;  %v534_v45 = vrot.slane %v532_v41, 2  ;;  %v1791_v56 = vld [vmem:[%s2208_s1 + $0x160] sm:$0xff]   ;;  %v1793_v58 = vld [vmem:[%s2208_s1 + $0x158] sm:$0xff]   ;;  %v1794_v61 = vld [vmem:[%s2208_s1 + $0x110] sm:$0xff]  }
  0x1b   : > { %1587 = vmatprep.subr.bf16.mxu1 %v1836_v1  ;;  %v626_v59 = vld [vmem:[%s1911_s8] sm:$0xc]  ;;  %v2063_v60 = vld [vmem:[%s1911_s8 + $0x4] sm:$0x3]  ;;  %v1795_v63 = vld [vmem:[%s2208_s1 + $0x150] sm:$0xff]  }
  0x1c   : > { %v535_v49 = vor.u32 %v534_v45, %v531_v44  ;;  %v1391_v62 = vcombine.low %v626_v59, %v2063_v60  ;;  %v1796_v0 = vld [vmem:[%s2208_s1 + $0x108] sm:$0xff]   ;;  %v1366_v5 = vcombine.low %v626_v59, %v1989_v34  ;;  %v1798_v6 = vld [vmem:[%s2208_s1 + $0x100] sm:$0xff]   ;;  %v1802_v11 = vld [vmem:[%s2208_s1 + $0x1b8] sm:$0xff]  }
  0x1d   : > { %1568 = vmatpush3.bf16.msra.mxu0 %v1757_v9  ;;  %v1797_v4 = vld [vmem:[%s2208_s1 + $0x148] sm:$0xff]   ;;  %v1799_v9 = vld [vmem:[%s2208_s1 + $0x140] sm:$0xff]   ;;  %v1804_v14 = vld [vmem:[%s2208_s1 + $0x1b0] sm:$0xff]  }
  0x1e   : > { %1588 = vmatpush3.bf16.msra.mxu1 %v1758_v10  ;;  %1569 = vmatprep.subr.bf16.mxu0 %v1836_v1  ;;  %v760_v2 = vshrl.u32 %v1391_v62, 16  ;;  %v763_v3 = vshll.u32 %v1391_v62, 16  ;;  %v647_v10 = vrot.slane %v1366_v5, 2  ;;  %v1807_v17 = vld [vmem:[%s2208_s1 + $0x1e8] sm:$0xff]   ;;  %v1808_v18 = vld [vmem:[%s2208_s1 + $0x1a0] sm:$0xff]   ;;  %v1825_v43 = vld [vmem:[%s2208_s1 + $0x210] sm:$0xff]  }
  0x1f   : > { %1589 = vmatprep.subr.bf16.mxu1 %v1836_v1  ;;  %v1822_v40 = vld [vmem:[%s2208_s1 + $0x228] sm:$0xff]   ;;  %v1823_v41 = vld [vmem:[%s2208_s1 + $0x220] sm:$0xff]  }
  0x20   : > { %v762_v7 = vrot.slane %v760_v2, 2  ;;  %v765_v8 = vrot.slane %v763_v3, 3  ;;  %v1826_v44 = vld [vmem:[%s2208_s1 + $0x208] sm:$0xff]   ;;  %v1827_v45 = vld [vmem:[%s2208_s1 + $0x200] sm:$0xff]  }
  0x21   : > { %1570 = vmatpush3.bf16.msra.mxu0 %v1759_v12 }
  0x22   : > { %1590 = vmatpush3.bf16.msra.mxu1 %v1760_v13  ;;  %1571 = vmatprep.subr.bf16.mxu0 %v1836_v1  ;;  %v766_v12 = vor.u32 %v765_v8, %v762_v7  ;;  %v1803_v13 = vld [vmem:[%s2208_s1 + $0x1f8] sm:$0xff]  }
  0x23   : > { %1591 = vmatprep.subr.bf16.mxu1 %v1836_v1 }
  0x25   : > { %1572 = vmatpush3.bf16.msra.mxu0 %v1761_v15  ;;  %v1805_v15 = vld [vmem:[%s2208_s1 + $0x1f0] sm:$0xff]  }
  0x26   : > { %1592 = vmatpush3.bf16.msra.mxu1 %v1762_v16  ;;  %1573 = vmatprep.subr.bf16.mxu0 %v1836_v1  ;;  %v1806_v16 = vld [vmem:[%s2208_s1 + $0x1a8] sm:$0xff]  }
  0x27   : > { %1593 = vmatprep.subr.bf16.mxu1 %v1836_v1 }
  0x29   : > { %1574 = vmatpush3.bf16.msra.mxu0 %v1763_v19  ;;  %v1809_v19 = vld [vmem:[%s2208_s1 + $0x1e0] sm:$0xff]  }
  0x2a   : > { %1594 = vmatpush3.bf16.msra.mxu1 %v1764_v20  ;;  %1599 = vmatprep.subr.bf16.mxu0 %v1836_v1  ;;  %v1810_v20 = vld [vmem:[%s2208_s1 + $0x198] sm:$0xff]  }
  0x2b   : > { %1619 = vmatprep.subr.bf16.mxu1 %v1836_v1 }
  0x2c   : > { %1576 = vmatmul.mubr.bf16.vlgmr.msra.gmra.mxu0 %v214_v21  ;;  %v1811_v21 = vld [vmem:[%s2208_s1 + $0x1d8] sm:$0xff]  }
  0x2d   : > { %1596 = vmatmul.mubr.bf16.vlgmr.msra.gmra.mxu1 %v170_v22  ;;  %1600 = vmatpush3.bf16.msra.mxu0 %v1766_v23  ;;  %v857_v22 = vld [vmem:[%s1911_s8] sm:$0x8]  ;;  %v969_v23 = vld [vmem:[%s1911_s8 + $0x4] sm:$0x7]  ;;  %s1266_s8 = sshll.u32 %s2212_s13, 2 }
  0x2e   : > { %1620 = vmatpush3.bf16.msra.mxu1 %v1767_v24  ;;  %1601 = vmatprep.subr.bf16.mxu0 %v1836_v1  ;;  %v1812_v24 = vld [vmem:[%s2208_s1 + $0x190] sm:$0xff]   ;;  %s168_s20 = scalar_lea.vmem %s2210_s3, %s1266_s8 }
  0x2f   : > { %1621 = vmatprep.subr.bf16.mxu1 %v1836_v1  ;;  %1615 = vmatprep.mubr.msk.bf16.mxu0 %vm1837_vm0, %v1836_v1 }
  0x30   : > { %1635 = vmatprep.mubr.msk.bf16.mxu1 %vm1837_vm0, %v1836_v1 }
  0x31   : > { %1602 = vmatpush3.bf16.msra.mxu0 %v1768_v25  ;;  %v1441_v25 = vcombine.low %v857_v22, %v969_v23 }
  0x32   : > { %1622 = vmatpush3.bf16.msra.mxu1 %v1769_v26  ;;  %1603 = vmatprep.subr.bf16.mxu0 %v1836_v1  ;;  %v1813_v26 = vld [vmem:[%s2208_s1 + $0x1d0] sm:$0xff]  }
  0x33   : > { %1623 = vmatprep.subr.bf16.mxu1 %v1836_v1 }
  0x35   : > { %1604 = vmatpush3.bf16.msra.mxu0 %v1770_v27  ;;  %v1814_v27 = vld [vmem:[%s2208_s1 + $0x188] sm:$0xff]  }
  0x36   : > { %1624 = vmatpush3.bf16.msra.mxu1 %v1771_v28  ;;  %1605 = vmatprep.subr.bf16.mxu0 %v1836_v1  ;;  %v991_v28 = vshrl.u32 %v1441_v25, 16 }
  0x37   : > { %1625 = vmatprep.subr.bf16.mxu1 %v1836_v1 }
  0x38   : > { %v993_v33 = vrot.slane %v991_v28, 3 }
  0x39   : > { %1606 = vmatpush3.bf16.msra.mxu0 %v1772_v29  ;;  %v994_v29 = vshll.u32 %v1441_v25, 16 }
  0x3a   : > { %1626 = vmatpush3.bf16.msra.mxu1 %v1773_v30  ;;  %1607 = vmatprep.subr.bf16.mxu0 %v1836_v1  ;;  %v1815_v30 = vld [vmem:[%s2208_s1 + $0x1c8] sm:$0xff]  }
  0x3b   : > { %1627 = vmatprep.subr.bf16.mxu1 %v1836_v1  ;;  %v996_v34 = vrot.slane %v994_v29, 4 }
  0x3d   : > { %1608 = vmatpush3.bf16.msra.mxu0 %v1774_v31  ;;  %v1416_v31 = vcombine.low %v857_v22, %v2063_v60  ;;  %v1474_v22 = vld [vmem:[%s2209_s2] ss:$0 sm:$0xff] }
  0x3e   : > { %1628 = vmatpush3.bf16.msra.mxu1 %v1775_v32  ;;  %1609 = vmatprep.subr.bf16.mxu0 %v1836_v1  ;;  %v1816_v32 = vld [vmem:[%s2208_s1 + $0x180] sm:$0xff]  }
  0x3f   : > { %1629 = vmatprep.subr.bf16.mxu1 %v1836_v1  ;;  %v878_v36 = vrot.slane %v1416_v31, 3 }
  0x41   : > { %1610 = vmatpush3.bf16.msra.mxu0 %v1776_v35  ;;  %v1817_v35 = vld [vmem:[%s2208_s1 + $0x1c0] sm:$0xff]  }
  0x42   : > { %1630 = vmatpush3.bf16.msra.mxu1 %v1777_v37  ;;  %1611 = vmatprep.subr.bf16.mxu0 %v1836_v1  ;;  %v1820_v37 = vld [vmem:[%s2208_s1 + $0x238] sm:$0xff]  }
  0x43   : > { %1631 = vmatprep.subr.bf16.mxu1 %v1836_v1 }
  0x45   : > { %1612 = vmatpush3.bf16.msra.mxu0 %v1778_v38  ;;  %v997_v38 = vor.u32 %v996_v34, %v993_v33 }
  0x46   : > { %1632 = vmatpush3.bf16.msra.mxu1 %v1779_v39  ;;  %1613 = vmatprep.subr.bf16.mxu0 %v1836_v1  ;;  %v1821_v39 = vld [vmem:[%s2208_s1 + $0x230] sm:$0xff]  }
  0x47   : > { %1633 = vmatprep.subr.bf16.mxu1 %v1836_v1 }
  0x49   : > { %1614 = vmatpush3.bf16.msra.mxu0 %v1780_v42  ;;  %v1824_v42 = vld [vmem:[%s2208_s1 + $0x218] sm:$0xff]  }
  0x4a   : > { %1634 = vmatpush3.bf16.msra.mxu1 %v1781_v46  ;;  %1639 = vmatprep.subr.bf16.mxu0 %v1836_v1 }
  0x4b   : > { %1659 = vmatprep.subr.bf16.mxu1 %v1836_v1 }
  0x4c   : > { %1616 = vmatmul.mubr.bf16.vlgmr.msra.gmra.mxu0 %v413_v47 }
  0x4d   : > { %1640 = vmatpush3.bf16.msra.mxu0 %v1783_v48  ;;  %1636 = vmatmul.mubr.bf16.vlgmr.msra.gmra.mxu1 %v535_v49 }
  0x4e   : > { %1660 = vmatpush3.bf16.msra.mxu1 %v1785_v50  ;;  %1641 = vmatprep.subr.bf16.mxu0 %v1836_v1 }
  0x4f   : > { %1661 = vmatprep.subr.bf16.mxu1 %v1836_v1  ;;  %1655 = vmatprep.mubr.msk.bf16.mxu0 %vm1837_vm0, %v1836_v1 }
  0x50   : > { %1675 = vmatprep.mubr.msk.bf16.mxu1 %vm1837_vm0, %v1836_v1 }
  0x51   : > { %1642 = vmatpush3.bf16.msra.mxu0 %v1786_v51 }
  0x52   : > { %1662 = vmatpush3.bf16.msra.mxu1 %v1787_v52  ;;  %1643 = vmatprep.subr.bf16.mxu0 %v1836_v1 }
  0x53   : > { %1663 = vmatprep.subr.bf16.mxu1 %v1836_v1 }
  0x55   : > { %1644 = vmatpush3.bf16.msra.mxu0 %v1788_v53 }
  0x56   : > { %1664 = vmatpush3.bf16.msra.mxu1 %v1789_v54  ;;  %1645 = vmatprep.subr.bf16.mxu0 %v1836_v1 }
  0x57   : > { %1665 = vmatprep.subr.bf16.mxu1 %v1836_v1 }
  0x59   : > { %1646 = vmatpush3.bf16.msra.mxu0 %v1790_v55 }
  0x5a   : > { %1666 = vmatpush3.bf16.msra.mxu1 %v1791_v56  ;;  %1647 = vmatprep.subr.bf16.mxu0 %v1836_v1 }
  0x5b   : > { %1667 = vmatprep.subr.bf16.mxu1 %v1836_v1 }
  0x5d   : > { %1648 = vmatpush3.bf16.msra.mxu0 %v1792_v57 }
  0x5e   : > { %1668 = vmatpush3.bf16.msra.mxu1 %v1793_v58  ;;  %1649 = vmatprep.subr.bf16.mxu0 %v1836_v1 }
  0x5f   : > { %1669 = vmatprep.subr.bf16.mxu1 %v1836_v1 }
  0x61   : > { %1650 = vmatpush3.bf16.msra.mxu0 %v1794_v61 }
  0x62   : > { %1670 = vmatpush3.bf16.msra.mxu1 %v1795_v63  ;;  %1651 = vmatprep.subr.bf16.mxu0 %v1836_v1 }
  0x63   : > { %1671 = vmatprep.subr.bf16.mxu1 %v1836_v1 }
  0x65   : > { %1652 = vmatpush3.bf16.msra.mxu0 %v1796_v0 }
  0x66   : > { %1672 = vmatpush3.bf16.msra.mxu1 %v1797_v4  ;;  %1653 = vmatprep.subr.bf16.mxu0 %v1836_v1 }
  0x67   : > { %1673 = vmatprep.subr.bf16.mxu1 %v1836_v1 }
  0x69   : > { %1654 = vmatpush3.bf16.msra.mxu0 %v1798_v6 }
  0x6a   : > { %1674 = vmatpush3.bf16.msra.mxu1 %v1799_v9  ;;  %1679 = vmatprep.subr.bf16.mxu0 %v1836_v1 }
  0x6b   : > { %1699 = vmatprep.subr.bf16.mxu1 %v1836_v1 }
  0x6c   : > { %1656 = vmatmul.mubr.bf16.vlgmr.msra.gmra.mxu0 %v647_v10 }
  0x6d   : > { %1680 = vmatpush3.bf16.msra.mxu0 %v1802_v11  ;;  %1676 = vmatmul.mubr.bf16.vlgmr.msra.gmra.mxu1 %v766_v12 }
  0x6e   : > { %1700 = vmatpush3.bf16.msra.mxu1 %v1803_v13  ;;  %1681 = vmatprep.subr.bf16.mxu0 %v1836_v1 }
  0x6f   : > { %1701 = vmatprep.subr.bf16.mxu1 %v1836_v1  ;;  %1695 = vmatprep.mubr.msk.bf16.mxu0 %vm1837_vm0, %v1836_v1 }
  0x70   : > { %1715 = vmatprep.mubr.msk.bf16.mxu1 %vm1837_vm0, %v1836_v1 }
  0x71   : > { %1682 = vmatpush3.bf16.msra.mxu0 %v1804_v14 }
  0x72   : > { %1702 = vmatpush3.bf16.msra.mxu1 %v1805_v15  ;;  %1683 = vmatprep.subr.bf16.mxu0 %v1836_v1 }
  0x73   : > { %1703 = vmatprep.subr.bf16.mxu1 %v1836_v1 }
  0x75   : > { %1684 = vmatpush3.bf16.msra.mxu0 %v1806_v16 }
  0x76   : > { %1704 = vmatpush3.bf16.msra.mxu1 %v1807_v17  ;;  %1685 = vmatprep.subr.bf16.mxu0 %v1836_v1 }
  0x77   : > { %1705 = vmatprep.subr.bf16.mxu1 %v1836_v1 }
  0x79   : > { %1686 = vmatpush3.bf16.msra.mxu0 %v1808_v18 }
  0x7a   : > { %1706 = vmatpush3.bf16.msra.mxu1 %v1809_v19  ;;  %1687 = vmatprep.subr.bf16.mxu0 %v1836_v1 }
  0x7b   : > { %1707 = vmatprep.subr.bf16.mxu1 %v1836_v1 }
  0x7d   : > { %1688 = vmatpush3.bf16.msra.mxu0 %v1810_v20 }
  0x7e   : > { %1708 = vmatpush3.bf16.msra.mxu1 %v1811_v21  ;;  %1689 = vmatprep.subr.bf16.mxu0 %v1836_v1 }
  0x7f   : > { %1709 = vmatprep.subr.bf16.mxu1 %v1836_v1 }
  0x81   : > { %1690 = vmatpush3.bf16.msra.mxu0 %v1812_v24 }
  0x82   : > { %1710 = vmatpush3.bf16.msra.mxu1 %v1813_v26  ;;  %1691 = vmatprep.subr.bf16.mxu0 %v1836_v1 }
  0x83   : > { %1711 = vmatprep.subr.bf16.mxu1 %v1836_v1 }
  0x85   : > { %1692 = vmatpush3.bf16.msra.mxu0 %v1814_v27 }
  0x86   : > { %1712 = vmatpush3.bf16.msra.mxu1 %v1815_v30  ;;  %1693 = vmatprep.subr.bf16.mxu0 %v1836_v1 }
  0x87   : > { %1713 = vmatprep.subr.bf16.mxu1 %v1836_v1 }
  0x89   : > { %1694 = vmatpush3.bf16.msra.mxu0 %v1816_v32 }
  0x8a   : > { %1714 = vmatpush3.bf16.msra.mxu1 %v1817_v35  ;;  %1719 = vmatprep.subr.bf16.mxu0 %v1836_v1 }
  0x8c   : > { %1696 = vmatmul.mubr.bf16.vlgmr.msra.gmra.mxu0 %v878_v36 }
  0x8d   : > { %1720 = vmatpush3.bf16.msra.mxu0 %v1820_v37  ;;  %1716 = vmatmul.mubr.bf16.vlgmr.msra.gmra.mxu1 %v997_v38 }
  0x8e   : > { %1721 = vmatprep.subr.bf16.mxu0 %v1836_v1  ;;  %1735 = vmatprep.mubr.msk.bf16.mxu0 %vm1837_vm0, %v1836_v1 }
  0x91   : > { %1722 = vmatpush3.bf16.msra.mxu0 %v1821_v39 }
  0x92   : > { %1723 = vmatprep.subr.bf16.mxu0 %v1836_v1 }
  0x95   : > { %1724 = vmatpush3.bf16.msra.mxu0 %v1822_v40 }
  0x96   : > { %1725 = vmatprep.subr.bf16.mxu0 %v1836_v1 }
  0x99   : > { %1726 = vmatpush3.bf16.msra.mxu0 %v1823_v41 }
  0x9a   : > { %1727 = vmatprep.subr.bf16.mxu0 %v1836_v1 }
  0x9d   : > { %1728 = vmatpush3.bf16.msra.mxu0 %v1824_v42 }
  0x9e   : > { %1729 = vmatprep.subr.bf16.mxu0 %v1836_v1 }
  0xa1   : > { %1730 = vmatpush3.bf16.msra.mxu0 %v1825_v43 }
  0xa2   : > { %1731 = vmatprep.subr.bf16.mxu0 %v1836_v1 }
  0xa5   : > { %1732 = vmatpush3.bf16.msra.mxu0 %v1826_v44 }
  0xa6   : > { %1733 = vmatprep.subr.bf16.mxu0 %v1836_v1 }
  0xa9   : > { %1734 = vmatpush3.bf16.msra.mxu0 %v1827_v45 }
  0xac   : > { %1736 = vmatmul.mubr.bf16.vlgmr.msra.gmra.mxu0 %v969_v23 }
  0xec   : > { %v298_v46 = vpop.f32.mrf.mxu0 }
  0xed   : > { %v386_v47 = vpop.f32.mrf.mxu1 }
  0xee   : > { %v387_v48 = vadd.f32 %v386_v47, %v298_v46  ;;  %v1577_v49 = vpop.f32.mrf.mxu0 }
  0xef   : > { %v1597_v50 = vpop.f32.mrf.mxu1 }
  0xf0   : > { %v301_v51 = vpop.f32.mrf.mxu0 }
  0xf1   : > { %v389_v52 = vpop.f32.mrf.mxu1 }
  0xf2   : > { %v1578_v53 = vpop.f32.mrf.mxu0 }
  0xf3   : > { %v1598_v54 = vpop.f32.mrf.mxu1 }
 0x10c   : > { %v497_v55 = vpop.f32.mrf.mxu0 }
 0x10d   : > { %v503_v56 = vadd.f32 %v497_v55, %v387_v48  ;;  %v619_v57 = vpop.f32.mrf.mxu1 }
 0x10e   : > { %v1617_v58 = vpop.f32.mrf.mxu0 }
 0x10f   : > { %v625_v59 = vadd.f32 %v619_v57, %v503_v56  ;;  %v1637_v60 = vpop.f32.mrf.mxu1 }
 0x110   : > { %v500_v61 = vpop.f32.mrf.mxu0 }
 0x111   : > { %v622_v62 = vpop.f32.mrf.mxu1 }
 0x112   : > { %v1618_v1 = vpop.f32.mrf.mxu0 }
 0x113   : > { %v1638_v63 = vpop.f32.mrf.mxu1 }
 0x12c   : > { %v731_v0 = vpop.f32.mrf.mxu0 }
 0x12d   : > { %v850_v2 = vpop.f32.mrf.mxu1  ;;  %v737_v17 = vadd.f32 %v731_v0, %v625_v59 }
 0x12e   : > { %v1657_v3 = vpop.f32.mrf.mxu0 }
 0x12f   : > { %v1677_v4 = vpop.f32.mrf.mxu1  ;;  %v856_v18 = vadd.f32 %v850_v2, %v737_v17 }
 0x130   : > { %v734_v5 = vpop.f32.mrf.mxu0 }
 0x131   : > { %v853_v6 = vpop.f32.mrf.mxu1 }
 0x132   : > { %v1658_v7 = vpop.f32.mrf.mxu0 }
 0x133   : > { %v1678_v8 = vpop.f32.mrf.mxu1 }
 0x14c   : > { %v962_v9 = vpop.f32.mrf.mxu0 }
 0x14d   : > { %v1081_v10 = vpop.f32.mrf.mxu1  ;;  %v968_v19 = vadd.f32 %v962_v9, %v856_v18 }
 0x14e   : > { %v1697_v11 = vpop.f32.mrf.mxu0 }
 0x14f   : > { %v1717_v12 = vpop.f32.mrf.mxu1  ;;  %v1087_v20 = vadd.f32 %v1081_v10, %v968_v19 }
 0x150   : > { %v965_v13 = vpop.f32.mrf.mxu0 }
 0x151   : > { %v1084_v14 = vpop.f32.mrf.mxu1 }
 0x152   : > { %v1698_v15 = vpop.f32.mrf.mxu0 }
 0x153   : > { %v1718_v16 = vpop.f32.mrf.mxu1 }
 0x16c   : > { %v1187_v21 = vpop.f32.mrf.mxu0 }
 0x16d   : > { %v1193_v23 = vadd.f32 %v1187_v21, %v1087_v20 }
 0x16e   : > { %v1737_v24 = vpop.f32.mrf.mxu0 }
 0x16f   : > { %v1201_v25 = vadd.f32 %v1474_v22, %v1193_v23 }
 0x170   : > { %v1190_v26 = vpop.f32.mrf.mxu0 }
 0x171   : > { %v1202_v27 = vmax.f32 %v1201_v25, 0.0 }
 0x172   : > { %v1738_v28 = vpop.f32.mrf.mxu0 }
 0x173   : > { %v1203_v29 = vpack.c.bf16 %v1202_v27, %v1202_v27 }
 0x175   : > { %1205 = vst.msk [vmem:[%s168_s20] sm:$0x7] %vm1204_vm1, %v1203_v29 }
 0x176 PF: > { %s13_s12 = sadd.s32 1, %s1834_s12  }
 0x177   : > { %p10_p4 = scmp.ge.s32.totalorder %s13_s12, 8  }
 0x179   :  { %12 = sbr.rel (!%p10_p4) target bundleno = 1 (0x1), region = 70 }

// kernel: forward.19
= control target key start
LH: loop header
LB: loop body
LE: loop exit
PB: predicated region body
PF: predicated region fallthrough
CT: control target
= control target key end

     0   :  { %v348_v11 = vmov 1983009808   ;;  %v191_v31 = vlaneseq  ;;  %vm285_vm0 = vcmask 1041409   ;;  %vm288_vm1 = vcmask 1042434   ;;  %s446_s0 = inlined_call_operand.vmem [shape: bf16[12,3,64], index: 0, kind: input, shape index: {}]   ;;  %s447_s1 = inlined_call_operand.vmem [shape: bf16[12,64], index: 1, kind: output, shape index: {}]  }
   0x1   :  { %v8_v0 = vld [vmem:[%s446_s0] sm:$0x1]  ;;  %v9_v1 = vld [vmem:[%s446_s0 + $0x2] sm:$0x1]  ;;  %v10_v2 = vld [vmem:[%s446_s0 + $0x4] sm:$0x1]  ;;  %v392_v12 = vunpack.c.l.s4 %v348_v11 }
   0x2   :  { %v11_v3 = vld [vmem:[%s446_s0 + $0x6] sm:$0x1]  ;;  %v12_v4 = vld [vmem:[%s446_s0 + $0x8] sm:$0x1]  ;;  %v13_v5 = vld [vmem:[%s446_s0 + $0xa] sm:$0x1] }
   0x3   :  { %v14_v6 = vld [vmem:[%s446_s0 + $0xc] sm:$0x1]  ;;  %v15_v7 = vld [vmem:[%s446_s0 + $0xe] sm:$0x1]  ;;  %v16_v8 = vld [vmem:[%s446_s0 + $0x10] sm:$0x1]  ;;  %v190_v30 = vunpack.c.0.s8 %v392_v12 }
   0x4   :  { %v17_v9 = vld [vmem:[%s446_s0 + $0x12] sm:$0x1]  ;;  %v18_v10 = vld [vmem:[%s446_s0 + $0x14] sm:$0x1]  ;;  %v19_v13 = vld [vmem:[%s446_s0 + $0x16] sm:$0x1] }
   0x5   :  { %v21_v14 = vshrl.u32 %v8_v0, 16  ;;  %v26_v15 = vshrl.u32 %v9_v1, 16  ;;  %v31_v16 = vshrl.u32 %v10_v2, 16  ;;  %v36_v17 = vshrl.u32 %v11_v3, 16  ;;  %v104_v24 = vld [vmem:[%s446_s0] sm:$0x2] }
   0x6   :  { %v41_v18 = vshrl.u32 %v12_v4, 16  ;;  %v46_v19 = vshrl.u32 %v13_v5, 16  ;;  %v51_v20 = vshrl.u32 %v14_v6, 16  ;;  %v56_v21 = vshrl.u32 %v15_v7, 16  ;;  %v105_v25 = vld [vmem:[%s446_s0 + $0x2] sm:$0x2] }
   0x7   :  { %v61_v22 = vshrl.u32 %v16_v8, 16  ;;  %v66_v23 = vshrl.u32 %v17_v9, 16  ;;  %v71_v26 = vshrl.u32 %v18_v10, 16  ;;  %v76_v27 = vshrl.u32 %v19_v13, 16  ;;  %v106_v28 = vld [vmem:[%s446_s0 + $0x4] sm:$0x2] }
   0x8   :  { %v107_v29 = vld [vmem:[%s446_s0 + $0x6] sm:$0x2]  ;;  %v92_v32 = vmax.bf16 %v21_v14, %v8_v0  ;;  %v93_v33 = vmax.bf16 %v26_v15, %v9_v1  ;;  %v94_v34 = vmax.bf16 %v31_v16, %v10_v2  ;;  %v95_v35 = vmax.bf16 %v36_v17, %v11_v3  ;;  %v108_v36 = vld [vmem:[%s446_s0 + $0x8] sm:$0x2]  ;;  %v109_v37 = vld [vmem:[%s446_s0 + $0xa] sm:$0x2] }
   0x9   :  { %v110_v38 = vld [vmem:[%s446_s0 + $0xc] sm:$0x2]  ;;  %v96_v39 = vmax.bf16 %v41_v18, %v12_v4  ;;  %v97_v40 = vmax.bf16 %v46_v19, %v13_v5  ;;  %v98_v41 = vmax.bf16 %v51_v20, %v14_v6  ;;  %v99_v42 = vmax.bf16 %v56_v21, %v15_v7  ;;  %v111_v43 = vld [vmem:[%s446_s0 + $0xe] sm:$0x2]  ;;  %v112_v44 = vld [vmem:[%s446_s0 + $0x10] sm:$0x2] }
   0xa   :  { %v113_v45 = vld [vmem:[%s446_s0 + $0x12] sm:$0x2]  ;;  %v100_v46 = vmax.bf16 %v61_v22, %v16_v8  ;;  %v101_v47 = vmax.bf16 %v66_v23, %v17_v9  ;;  %v114_v48 = vld [vmem:[%s446_s0 + $0x14] sm:$0x2]  ;;  %v115_v49 = vld [vmem:[%s446_s0 + $0x16] sm:$0x2]  ;;  %v102_v52 = vmax.bf16 %v71_v26, %v18_v10  ;;  %v103_v60 = vmax.bf16 %v76_v27, %v19_v13 }
   0xb   :  { %v335_v50 = vrot.slane %v104_v24, 9  ;;  %v336_v51 = vrot.slane %v105_v25, 9  ;;  %v337_v53 = vrot.slane %v106_v28, 9  ;;  %v338_v54 = vrot.slane %v107_v29, 9 }
   0xc   :  { %v339_v55 = vrot.slane %v108_v36, 9  ;;  %v340_v56 = vrot.slane %v109_v37, 9  ;;  %v341_v57 = vrot.slane %v110_v38, 9  ;;  %v342_v58 = vrot.slane %v111_v43, 9 }
   0xd   :  { %v343_v59 = vrot.slane %v112_v44, 9  ;;  %v344_v61 = vrot.slane %v113_v45, 9  ;;  %v345_v62 = vrot.slane %v114_v48, 9  ;;  %v346_v63 = vrot.slane %v115_v49, 9 }
   0xe   :  { %v164_v0 = vmax.bf16 %v335_v50, %v92_v32  ;;  %v165_v1 = vmax.bf16 %v336_v51, %v93_v33  ;;  %v166_v2 = vmax.bf16 %v337_v53, %v94_v34  ;;  %v167_v3 = vmax.bf16 %v338_v54, %v95_v35 }
   0xf   :  { %v168_v4 = vmax.bf16 %v339_v55, %v96_v39  ;;  %v192_v5 = vshrl.u32 %v191_v31, 7  ;;  %v169_v6 = vmax.bf16 %v340_v56, %v97_v40  ;;  %v170_v7 = vmax.bf16 %v341_v57, %v98_v41 }
  0x10   :  { %v171_v8 = vmax.bf16 %v342_v58, %v99_v42  ;;  %v172_v9 = vmax.bf16 %v343_v59, %v100_v46  ;;  %v173_v10 = vmax.bf16 %v344_v61, %v101_v47  ;;  %v174_v11 = vmax.bf16 %v345_v62, %v102_v52 }
  0x11   :  { %v175_v12 = vmax.bf16 %v346_v63, %v103_v60  ;;  %v193_v14 = vsub.s32 %v190_v30, %v192_v5  ;;  %vm291_vm2 = vcmask 1043459   ;;  %vm294_vm3 = vcmask 1044484  }
  0x12   :  { %vm297_vm4 = vcmask 1045509   ;;  %vm300_vm5 = vcmask 1046534   ;;  %vm303_vm6 = vcmask 1047559   ;;  %vm317_vm7 = vcmask 517120  }
  0x13   :  { %v194_v15 = vrot.slane %v164_v0, %v193_v14  ;;  %v201_v13 = vrot.slane %v165_v1, %v193_v14  ;;  %v208_v16 = vrot.slane %v166_v2, %v193_v14  ;;  %v215_v17 = vrot.slane %v167_v3, %v193_v14 }
  0x14   :  { %v222_v18 = vrot.slane %v168_v4, %v193_v14  ;;  %v229_v19 = vrot.slane %v169_v6, %v193_v14  ;;  %v236_v20 = vrot.slane %v170_v7, %v193_v14  ;;  %v243_v21 = vrot.slane %v171_v8, %v193_v14 }
  0x15   :  { %v250_v22 = vrot.slane %v172_v9, %v193_v14  ;;  %v257_v23 = vrot.slane %v173_v10, %v193_v14  ;;  %v264_v24 = vrot.slane %v174_v11, %v193_v14  ;;  %v271_v25 = vrot.slane %v175_v12, %v193_v14 }
  0x16   :  { %v273_v26 = vunpack.c.l.b16 %v201_v13  ;;  %v274_v27 = vunpack.c.l.b16 %v208_v16  ;;  %v275_v28 = vunpack.c.l.b16 %v215_v17  ;;  %v272_v29 = vunpack.c.l.b16 %v194_v15 }
  0x17   :  { %v276_v31 = vunpack.c.l.b16 %v222_v18  ;;  %v277_v30 = vunpack.c.l.b16 %v229_v19  ;;  %v278_v32 = vunpack.c.l.b16 %v236_v20  ;;  %v280_v33 = vunpack.c.l.b16 %v250_v22 }
  0x18   :  { %v281_v34 = vunpack.c.l.b16 %v257_v23  ;;  %v282_v35 = vunpack.c.l.b16 %v264_v24  ;;  %v283_v36 = vunpack.c.l.b16 %v271_v25  ;;  %v279_v37 = vunpack.c.l.b16 %v243_v21 }
  0x19   :  { %v284_v38 = vrot.slane %v273_v26, 7  ;;  %v287_v39 = vrot.slane %v274_v27, 6  ;;  %v290_v40 = vrot.slane %v275_v28, 5  ;;  %v293_v41 = vrot.slane %v276_v31, 4 }
  0x1a   :  { %v305_v42 = vrot.slane %v281_v34, 7  ;;  %v296_v44 = vrot.slane %v277_v30, 3  ;;  %v307_v45 = vrot.slane %v282_v35, 6  ;;  %v309_v46 = vrot.slane %v283_v36, 5 }
  0x1b   :  { %v286_v43 = vsel %vm285_vm0, %v284_v38, %v272_v29  ;;  %v299_v48 = vrot.slane %v278_v32, 2  ;;  %v302_v51 = vrot.slane %v279_v37, 1  ;;  %vm315_vm8 = vcmask 519168  }
  0x1c   :  { %v289_v47 = vsel %vm288_vm1, %v287_v39, %v286_v43  ;;  %v306_v49 = vsel %vm285_vm0, %v305_v42, %v280_v33 }
  0x1d   :  { %v292_v50 = vsel %vm291_vm2, %v290_v40, %v289_v47  ;;  %v308_v52 = vsel %vm288_vm1, %v307_v45, %v306_v49 }
  0x1e   :  { %v295_v53 = vsel %vm294_vm3, %v293_v41, %v292_v50  ;;  %v310_v54 = vsel %vm291_vm2, %v309_v46, %v308_v52 }
  0x1f   :  { %v298_v55 = vsel %vm297_vm4, %v296_v44, %v295_v53  ;;  %v312_v56 = vpack.c.b16 %v310_v54, %v310_v54 }
  0x20   :  { %v301_v57 = vsel %vm300_vm5, %v299_v48, %v298_v55 }
  0x21   :  { %v304_v58 = vsel %vm303_vm6, %v302_v51, %v301_v57  ;;  %318 = vst.msk [vmem:[%s447_s1 + $0x4] sm:$0x3] %vm317_vm7, %v312_v56 }
  0x22   :  { %v311_v59 = vpack.c.b16 %v304_v58, %v304_v58 }
  0x24   :  { %316 = vst.msk [vmem:[%s447_s1] sm:$0xf] %vm315_vm8, %v311_v59 }

// kernel: forward.18
= control target key start
LH: loop header
LB: loop body
LE: loop exit
PB: predicated region body
PF: predicated region fallthrough
CT: control target
= control target key end

     0   :  { %s1356_s12 = smov 0   ;;  %s1566_s0 = inlined_call_operand.vmem [shape: bf16[6,14,64], index: 0, kind: input, shape index: {}]   ;;  %s1567_s1 = inlined_call_operand.vmem [shape: bf16[9,64,64], index: 1, kind: input, shape index: {}]   ;;  %s1568_s2 = inlined_call_operand.vmem [shape: f32[1,64], index: 2, kind: input, shape index: {}]   ;;  %s1569_s3 = inlined_call_operand.vmem [shape: bf16[6,6,64], index: 3, kind: output, shape index: {}]  }
   0x1 LB: > { %s992_s13 = sadd.s32 4294967295, %s1332_s12   ;;  %p996_p0 = scmp.ge.s32.totalorder %s1332_s12, 1  ;;  %s1332_s12 = sphi %s1356_s12, %s13_s12  }
   0x2   : > { %p137_p1 = scmp.lt.s32.totalorder %s1332_s12, 7 }
   0x4   : > { %p138_p2 = pnand %p996_p0, %p137_p1 }
   0x5   : > { %p160_p3 = scmp.lt.s32.totalorder (!%p138_p2), %s992_s13, 5 }
   0x6   : > { %141 = sbr.rel (%p138_p2) target bundleno = 294 (0x126), region = 32 }
   0xb   : > { %v1283_v0 = vld [vmem:[%s1567_s1 + $0x38] sm:$0xff]   ;;  %v1334_v1 = vmov 0.0   ;;  %v1285_v3 = vld [vmem:[%s1567_s1 + $0x30] sm:$0xff]   ;;  %vm1335_vm0 = vmmov 0   ;;  %s1571_s13 = smov (!%p160_p3, %s992_s13), 5  ;;  %v1287_v5 = vld [vmem:[%s1567_s1 + $0x28] sm:$0xff]  }
   0xc   : > { %1165 = vmatprep.subr.bf16.mxu0 %v1334_v1  ;;  %1177 = vmatprep.subr.bf16.mxu1 %v1334_v1  ;;  %v1284_v2 = vld [vmem:[%s1567_s1 + $0x18] sm:$0xff]   ;;  %v1286_v4 = vld [vmem:[%s1567_s1 + $0x10] sm:$0xff]   ;;  %s1119_s24 = sshll.u32 %s1571_s13, 3  ;;  %v1288_v6 = vld [vmem:[%s1567_s1 + $0x8] sm:$0xff]   ;;  %vm223_vm1 = vcmask 523264   ;;  %s999_s18 = sshll.u32 %s1571_s13, 2 }
   0xd   : > { %1166 = vmatpush3.bf16.msra.mxu0 %v1283_v0  ;;  %1173 = vmatprep.mubr.msk.bf16.mxu0 %vm1335_vm0, %v1334_v1  ;;  %s1397_s29 = scalar_lea.vmem %s1566_s0, %s1119_s24  ;;  %v1289_v8 = vld [vmem:[%s1567_s1 + $0x20] sm:$0xff]   ;;  %v1292_v15 = vld [vmem:[%s1567_s1 + $0x58] sm:$0xff]   ;;  %v1294_v17 = vld [vmem:[%s1567_s1 + $0x50] sm:$0xff]   ;;  %s168_s21 = scalar_lea.vmem %s1569_s3, %s999_s18  ;;  %vm937_vm2 = vcmask 518144  }
   0xe   : > { %1178 = vmatpush3.bf16.msra.mxu1 %v1284_v2  ;;  %1167 = vmatprep.subr.bf16.mxu0 %v1334_v1  ;;  %v1291_v7 = vld [vmem:[%s1397_s29] ss:$0 sps:$4 sm:$0xff]   ;;  %v1293_v16 = vld [vmem:[%s1567_s1 + $0x78] sm:$0xff]   ;;  %v1295_v18 = vld [vmem:[%s1567_s1 + $0x70] sm:$0xff]  }
   0xf   : > { %1179 = vmatprep.subr.bf16.mxu1 %v1334_v1  ;;  %1185 = vmatprep.mubr.msk.bf16.mxu1 %vm1335_vm0, %v1334_v1  ;;  %v193_v9 = vshrl.u32 %v1291_v7, 16  ;;  %v195_v10 = vshll.u32 %v1291_v7, 16  ;;  %v1290_v11 = vld [vmem:[%s1567_s1] sm:$0xff]   ;;  %v1296_v22 = vld [vmem:[%s1567_s1 + $0x48] sm:$0xff]   ;;  %v1301_v31 = vld [vmem:[%s1567_s1 + $0x98] sm:$0xff]  }
  0x10   : > { %v170_v13 = vld [vmem:[%s1397_s29] sm:$0x7]  ;;  %v417_v20 = vld [vmem:[%s1397_s29 + $0x4] sm:$0x1]  ;;  %v1297_v23 = vld [vmem:[%s1567_s1 + $0x68] sm:$0xff]  }
  0x11   : > { %1168 = vmatpush3.bf16.msra.mxu0 %v1285_v3  ;;  %v197_v12 = vrot.slane %v195_v10, 1  ;;  %v416_v19 = vld [vmem:[%s1397_s29] sm:$0xe]  ;;  %v1300_v26 = vld [vmem:[%s1397_s29] ss:$0 sps:$4 sm:$0xee]  }
  0x12   : > { %1180 = vmatpush3.bf16.msra.mxu1 %v1286_v4  ;;  %1169 = vmatprep.subr.bf16.mxu0 %v1334_v1  ;;  %v1041_v21 = vcombine.low %v416_v19, %v417_v20  ;;  %v1298_v27 = vld [vmem:[%s1567_s1 + $0x40] sm:$0xff]   ;;  %v347_v32 = vrot.slane %v1300_v26, 1  ;;  %v1303_v33 = vld [vmem:[%s1567_s1 + $0xb8] sm:$0xff]   ;;  %v1304_v37 = vld [vmem:[%s1567_s1 + $0x90] sm:$0xff]  }
  0x13   : > { %1181 = vmatprep.subr.bf16.mxu1 %v1334_v1  ;;  %v198_v14 = vor.u32 %v197_v12, %v193_v9  ;;  %v1299_v30 = vld [vmem:[%s1567_s1 + $0x60] sm:$0xff]   ;;  %v1305_v39 = vld [vmem:[%s1567_s1 + $0xb0] sm:$0xff]   ;;  %v1306_v40 = vld [vmem:[%s1567_s1 + $0x88] sm:$0xff]  }
  0x14   : > { %v433_v24 = vshrl.u32 %v1041_v21, 16  ;;  %v436_v25 = vshll.u32 %v1041_v21, 16  ;;  %v508_v35 = vld [vmem:[%s1397_s29] sm:$0xc]  ;;  %v1459_v36 = vld [vmem:[%s1397_s29 + $0x4] sm:$0x3] }
  0x15   : > { %1170 = vmatpush3.bf16.msra.mxu0 %v1287_v5  ;;  %v1069_v38 = vcombine.low %v508_v35, %v1459_v36  ;;  %v1307_v41 = vld [vmem:[%s1567_s1 + $0xa8] sm:$0xff]   ;;  %v1055_v44 = vcombine.low %v508_v35, %v417_v20  ;;  %v1308_v45 = vld [vmem:[%s1567_s1 + $0x80] sm:$0xff]   ;;  %v1312_v50 = vld [vmem:[%s1567_s1 + $0xd8] sm:$0xff]  }
  0x16   : > { %1182 = vmatpush3.bf16.msra.mxu1 %v1288_v6  ;;  %1171 = vmatprep.subr.bf16.mxu0 %v1334_v1  ;;  %v435_v28 = vrot.slane %v433_v24, 1  ;;  %v438_v29 = vrot.slane %v436_v25, 2  ;;  %v1309_v48 = vld [vmem:[%s1567_s1 + $0xa0] sm:$0xff]   ;;  %v1313_v52 = vld [vmem:[%s1567_s1 + $0xf8] sm:$0xff]   ;;  %v1314_v55 = vld [vmem:[%s1567_s1 + $0xd0] sm:$0xff]  }
  0x17   : > { %1183 = vmatprep.subr.bf16.mxu1 %v1334_v1  ;;  %v604_v42 = vshrl.u32 %v1069_v38, 16  ;;  %v607_v43 = vshll.u32 %v1069_v38, 16  ;;  %v521_v49 = vrot.slane %v1055_v44, 2  ;;  %v679_v53 = vld [vmem:[%s1397_s29] sm:$0x8]  ;;  %v1315_v57 = vld [vmem:[%s1567_s1 + $0xf0] sm:$0xff]  }
  0x18   : > { %v439_v34 = vor.u32 %v438_v29, %v435_v28  ;;  %v761_v54 = vld [vmem:[%s1397_s29 + $0x4] sm:$0x7]  ;;  %v1316_v58 = vld [vmem:[%s1567_s1 + $0xc8] sm:$0xff]   ;;  %v1083_v62 = vcombine.low %v679_v53, %v1459_v36  ;;  %v1322_v5 = vld [vmem:[%s1567_s1 + $0x118] sm:$0xff]  }
  0x19   : > { %1172 = vmatpush3.bf16.msra.mxu0 %v1289_v8  ;;  %v606_v46 = vrot.slane %v604_v42, 2  ;;  %v609_v47 = vrot.slane %v607_v43, 3  ;;  %v1097_v56 = vcombine.low %v679_v53, %v761_v54  ;;  %v1317_v61 = vld [vmem:[%s1567_s1 + $0xe8] sm:$0xff]   ;;  %v1318_v63 = vld [vmem:[%s1567_s1 + $0xc0] sm:$0xff]   ;;  %v1323_v7 = vld [vmem:[%s1567_s1 + $0x110] sm:$0xff]  }
  0x1a   : > { %1184 = vmatpush3.bf16.msra.mxu1 %v1290_v11  ;;  %1189 = vmatprep.subr.bf16.mxu0 %v1334_v1  ;;  %v1319_v3 = vld [vmem:[%s1567_s1 + $0xe0] sm:$0xff]   ;;  %v692_v4 = vrot.slane %v1083_v62, 3  ;;  %v1324_v8 = vld [vmem:[%s1567_s1 + $0x108] sm:$0xff]  }
  0x1b   : > { %1201 = vmatprep.subr.bf16.mxu1 %v1334_v1  ;;  %v610_v51 = vor.u32 %v609_v47, %v606_v46  ;;  %v775_v59 = vshrl.u32 %v1097_v56, 16  ;;  %v778_v60 = vshll.u32 %v1097_v56, 16  ;;  %v1325_v9 = vld [vmem:[%s1567_s1 + $0x100] sm:$0xff]  }
  0x1c   : > { %1174 = vmatmul.mubr.msk.bf16.vlgmr.msra.gmra.mxu0 %vm223_vm1, %v198_v14 }
  0x1d   : > { %1186 = vmatmul.mubr.msk.bf16.vlgmr.msra.gmra.mxu1 %vm223_vm1, %v170_v13  ;;  %1190 = vmatpush3.bf16.msra.mxu0 %v1292_v15  ;;  %v777_v0 = vrot.slane %v775_v59, 3  ;;  %v780_v2 = vrot.slane %v778_v60, 4 }
  0x1e   : > { %1202 = vmatpush3.bf16.msra.mxu1 %v1293_v16  ;;  %1191 = vmatprep.subr.bf16.mxu0 %v1334_v1 }
  0x1f   : > { %1203 = vmatprep.subr.bf16.mxu1 %v1334_v1  ;;  %1197 = vmatprep.mubr.msk.bf16.mxu0 %vm1335_vm0, %v1334_v1  ;;  %v781_v6 = vor.u32 %v780_v2, %v777_v0 }
  0x20   : > { %1209 = vmatprep.mubr.msk.bf16.mxu1 %vm1335_vm0, %v1334_v1 }
  0x21   : > { %1192 = vmatpush3.bf16.msra.mxu0 %v1294_v17 }
  0x22   : > { %1204 = vmatpush3.bf16.msra.mxu1 %v1295_v18  ;;  %1193 = vmatprep.subr.bf16.mxu0 %v1334_v1 }
  0x23   : > { %1205 = vmatprep.subr.bf16.mxu1 %v1334_v1 }
  0x25   : > { %1194 = vmatpush3.bf16.msra.mxu0 %v1296_v22 }
  0x26   : > { %1206 = vmatpush3.bf16.msra.mxu1 %v1297_v23  ;;  %1195 = vmatprep.subr.bf16.mxu0 %v1334_v1 }
  0x27   : > { %1207 = vmatprep.subr.bf16.mxu1 %v1334_v1 }
  0x29   : > { %1196 = vmatpush3.bf16.msra.mxu0 %v1298_v27 }
  0x2a   : > { %1208 = vmatpush3.bf16.msra.mxu1 %v1299_v30  ;;  %1213 = vmatprep.subr.bf16.mxu0 %v1334_v1 }
  0x2b   : > { %1225 = vmatprep.subr.bf16.mxu1 %v1334_v1 }
  0x2c   : > { %1198 = vmatmul.mubr.msk.bf16.vlgmr.msra.gmra.mxu0 %vm223_vm1, %v347_v32 }
  0x2d   : > { %1214 = vmatpush3.bf16.msra.mxu0 %v1301_v31  ;;  %1210 = vmatmul.mubr.msk.bf16.vlgmr.msra.gmra.mxu1 %vm223_vm1, %v439_v34 }
  0x2e   : > { %1226 = vmatpush3.bf16.msra.mxu1 %v1303_v33  ;;  %1215 = vmatprep.subr.bf16.mxu0 %v1334_v1 }
  0x2f   : > { %1227 = vmatprep.subr.bf16.mxu1 %v1334_v1  ;;  %1221 = vmatprep.mubr.msk.bf16.mxu0 %vm1335_vm0, %v1334_v1 }
  0x30   : > { %1233 = vmatprep.mubr.msk.bf16.mxu1 %vm1335_vm0, %v1334_v1 }
  0x31   : > { %1216 = vmatpush3.bf16.msra.mxu0 %v1304_v37 }
  0x32   : > { %1228 = vmatpush3.bf16.msra.mxu1 %v1305_v39  ;;  %1217 = vmatprep.subr.bf16.mxu0 %v1334_v1 }
  0x33   : > { %1229 = vmatprep.subr.bf16.mxu1 %v1334_v1 }
  0x35   : > { %1218 = vmatpush3.bf16.msra.mxu0 %v1306_v40 }
  0x36   : > { %1230 = vmatpush3.bf16.msra.mxu1 %v1307_v41  ;;  %1219 = vmatprep.subr.bf16.mxu0 %v1334_v1 }
  0x37   : > { %1231 = vmatprep.subr.bf16.mxu1 %v1334_v1 }
  0x39   : > { %1220 = vmatpush3.bf16.msra.mxu0 %v1308_v45 }
  0x3a   : > { %1232 = vmatpush3.bf16.msra.mxu1 %v1309_v48  ;;  %1237 = vmatprep.subr.bf16.mxu0 %v1334_v1 }
  0x3b   : > { %1249 = vmatprep.subr.bf16.mxu1 %v1334_v1 }
  0x3c   : > { %1222 = vmatmul.mubr.msk.bf16.vlgmr.msra.gmra.mxu0 %vm223_vm1, %v521_v49  ;;  %v1116_v49 = vld [vmem:[%s1568_s2] ss:$0 sm:$0xff] }
  0x3d   : > { %1238 = vmatpush3.bf16.msra.mxu0 %v1312_v50  ;;  %1234 = vmatmul.mubr.msk.bf16.vlgmr.msra.gmra.mxu1 %vm223_vm1, %v610_v51 }
  0x3e   : > { %1250 = vmatpush3.bf16.msra.mxu1 %v1313_v52  ;;  %1239 = vmatprep.subr.bf16.mxu0 %v1334_v1 }
  0x3f   : > { %1251 = vmatprep.subr.bf16.mxu1 %v1334_v1  ;;  %1245 = vmatprep.mubr.msk.bf16.mxu0 %vm1335_vm0, %v1334_v1 }
  0x40   : > { %1257 = vmatprep.mubr.msk.bf16.mxu1 %vm1335_vm0, %v1334_v1 }
  0x41   : > { %1240 = vmatpush3.bf16.msra.mxu0 %v1314_v55 }
  0x42   : > { %1252 = vmatpush3.bf16.msra.mxu1 %v1315_v57  ;;  %1241 = vmatprep.subr.bf16.mxu0 %v1334_v1 }
  0x43   : > { %1253 = vmatprep.subr.bf16.mxu1 %v1334_v1 }
  0x45   : > { %1242 = vmatpush3.bf16.msra.mxu0 %v1316_v58 }
  0x46   : > { %1254 = vmatpush3.bf16.msra.mxu1 %v1317_v61  ;;  %1243 = vmatprep.subr.bf16.mxu0 %v1334_v1 }
  0x47   : > { %1255 = vmatprep.subr.bf16.mxu1 %v1334_v1 }
  0x49   : > { %1244 = vmatpush3.bf16.msra.mxu0 %v1318_v63 }
  0x4a   : > { %1256 = vmatpush3.bf16.msra.mxu1 %v1319_v3  ;;  %1261 = vmatprep.subr.bf16.mxu0 %v1334_v1 }
  0x4c   : > { %1246 = vmatmul.mubr.msk.bf16.vlgmr.msra.gmra.mxu0 %vm223_vm1, %v692_v4 }
  0x4d   : > { %1262 = vmatpush3.bf16.msra.mxu0 %v1322_v5  ;;  %1258 = vmatmul.mubr.msk.bf16.vlgmr.msra.gmra.mxu1 %vm223_vm1, %v781_v6 }
  0x4e   : > { %1263 = vmatprep.subr.bf16.mxu0 %v1334_v1  ;;  %1269 = vmatprep.mubr.msk.bf16.mxu0 %vm1335_vm0, %v1334_v1 }
  0x51   : > { %1264 = vmatpush3.bf16.msra.mxu0 %v1323_v7 }
  0x52   : > { %1265 = vmatprep.subr.bf16.mxu0 %v1334_v1 }
  0x55   : > { %1266 = vmatpush3.bf16.msra.mxu0 %v1324_v8 }
  0x56   : > { %1267 = vmatprep.subr.bf16.mxu0 %v1334_v1 }
  0x59   : > { %1268 = vmatpush3.bf16.msra.mxu0 %v1325_v9 }
  0x5c   : > { %1270 = vmatmul.mubr.msk.bf16.vlgmr.msra.gmra.mxu0 %vm223_vm1, %v761_v54 }
  0xdc   : > { %v261_v10 = vpop.f32.mrf.mxu0 }
  0xdd   : > { %v328_v11 = vpop.f32.mrf.mxu1 }
  0xde   : > { %v1175_v12 = vpop.f32.mrf.mxu0  ;;  %v329_v33 = vadd.f32 %v328_v11, %v261_v10 }
  0xdf   : > { %v1187_v13 = vpop.f32.mrf.mxu1 }
  0xe0   : > { %v264_v14 = vpop.f32.mrf.mxu0 }
  0xe1   : > { %v331_v15 = vpop.f32.mrf.mxu1 }
  0xe2   : > { %v1176_v16 = vpop.f32.mrf.mxu0 }
  0xe3   : > { %v1188_v17 = vpop.f32.mrf.mxu1 }
  0xec   : > { %v409_v18 = vpop.f32.mrf.mxu0 }
  0xed   : > { %v501_v19 = vpop.f32.mrf.mxu1  ;;  %v415_v34 = vadd.f32 %v409_v18, %v329_v33 }
  0xee   : > { %v1199_v20 = vpop.f32.mrf.mxu0 }
  0xef   : > { %v1211_v21 = vpop.f32.mrf.mxu1  ;;  %v507_v38 = vadd.f32 %v501_v19, %v415_v34 }
  0xf0   : > { %v412_v22 = vpop.f32.mrf.mxu0 }
  0xf1   : > { %v504_v23 = vpop.f32.mrf.mxu1 }
  0xf2   : > { %v1200_v24 = vpop.f32.mrf.mxu0 }
  0xf3   : > { %v1212_v25 = vpop.f32.mrf.mxu1 }
  0xfc   : > { %v583_v1 = vpop.f32.mrf.mxu0 }
  0xfd   : > { %v672_v26 = vpop.f32.mrf.mxu1  ;;  %v589_v41 = vadd.f32 %v583_v1, %v507_v38 }
  0xfe   : > { %v1223_v27 = vpop.f32.mrf.mxu0 }
  0xff   : > { %v1235_v28 = vpop.f32.mrf.mxu1  ;;  %v678_v45 = vadd.f32 %v672_v26, %v589_v41 }
 0x100   : > { %v586_v29 = vpop.f32.mrf.mxu0 }
 0x101   : > { %v675_v30 = vpop.f32.mrf.mxu1 }
 0x102   : > { %v1224_v31 = vpop.f32.mrf.mxu0 }
 0x103   : > { %v1236_v32 = vpop.f32.mrf.mxu1 }
 0x10c   : > { %v754_v35 = vpop.f32.mrf.mxu0 }
 0x10d   : > { %v843_v36 = vpop.f32.mrf.mxu1  ;;  %v760_v46 = vadd.f32 %v754_v35, %v678_v45 }
 0x10e   : > { %v1247_v37 = vpop.f32.mrf.mxu0 }
 0x10f   : > { %v1259_v39 = vpop.f32.mrf.mxu1  ;;  %v849_v47 = vadd.f32 %v843_v36, %v760_v46 }
 0x110   : > { %v757_v40 = vpop.f32.mrf.mxu0 }
 0x111   : > { %v846_v42 = vpop.f32.mrf.mxu1 }
 0x112   : > { %v1248_v43 = vpop.f32.mrf.mxu0 }
 0x113   : > { %v1260_v44 = vpop.f32.mrf.mxu1 }
 0x11c   : > { %v920_v48 = vpop.f32.mrf.mxu0 }
 0x11d   : > { %v926_v50 = vadd.f32 %v920_v48, %v849_v47 }
 0x11e   : > { %v1271_v51 = vpop.f32.mrf.mxu0 }
 0x11f   : > { %v934_v52 = vadd.f32 %v1116_v49, %v926_v50 }
 0x120   : > { %v923_v53 = vpop.f32.mrf.mxu0 }
 0x121   : > { %v935_v54 = vmax.f32 %v934_v52, 0.0 }
 0x122   : > { %v1272_v55 = vpop.f32.mrf.mxu0 }
 0x123   : > { %v936_v56 = vpack.c.bf16 %v935_v54, %v935_v54 }
 0x125   : > { %938 = vst.msk [vmem:[%s168_s21] sm:$0x7] %vm937_vm2, %v936_v56 }
 0x126 PF: > { %s13_s12 = sadd.s32 1, %s1332_s12  }
 0x127   : > { %p10_p4 = scmp.ge.s32.totalorder %s13_s12, 8  }
 0x129   :  { %12 = sbr.rel (!%p10_p4) target bundleno = 1 (0x1), region = 70 }

// kernel: forward.21
= control target key start
LH: loop header
LB: loop body
LE: loop exit
PB: predicated region body
PF: predicated region fallthrough
CT: control target
= control target key end

     0   :  { %v68_v9 = vlaneseq  ;;  %v313_v13 = vmov 1966171168   ;;  %s392_s0 = inlined_call_operand.vmem [shape: bf16[2,256], index: 0, kind: input, shape index: {}]   ;;  %s393_s1 = inlined_call_operand.vmem [shape: bf16[256,128], index: 1, kind: input, shape index: {}]   ;;  %s394_s2 = inlined_call_operand.vmem [shape: f32[1,128], index: 2, kind: input, shape index: {}]   ;;  %s395_s3 = inlined_call_operand.hbm [shape: f32[2,128], index: 3, kind: output, shape index: {}]  }
   0x1   :  { %v275_v0 = vld [vmem:[%s393_s1 + $0x78] sm:$0xff]   ;;  %v277_v2 = vld [vmem:[%s393_s1 + $0x70] sm:$0xff]   ;;  %v279_v4 = vld [vmem:[%s393_s1 + $0x68] sm:$0xff]   ;;  %v66_v14 = vunpack.c.l.s4 %v313_v13 }
   0x2   :  { %v276_v1 = vld [vmem:[%s393_s1 + $0x38] sm:$0xff]   ;;  %251 = vmatprep.subr.bf16.mxu0 %v275_v0  ;;  %v278_v3 = vld [vmem:[%s393_s1 + $0x30] sm:$0xff]   ;;  %v280_v5 = vld [vmem:[%s393_s1 + $0x28] sm:$0xff]   ;;  %v69_v15 = vshrl.u32 %v68_v9, 7 }
   0x3   :  { %252 = vmatpush3.bf16.msra.mxu0 %v276_v1  ;;  %v281_v6 = vld [vmem:[%s393_s1 + $0x60] sm:$0xff]   ;;  %v283_v8 = vld [vmem:[%s393_s1 + $0x58] sm:$0xff]   ;;  %v285_v11 = vld [vmem:[%s393_s1 + $0x50] sm:$0xff]  }
   0x4   :  { %253 = vmatprep.subr.bf16.mxu0 %v277_v2  ;;  %v282_v7 = vld [vmem:[%s393_s1 + $0x20] sm:$0xff]   ;;  %v284_v10 = vld [vmem:[%s393_s1 + $0x18] sm:$0xff]  }
   0x5   :  { %v234_v12 = vld.sshfl [vmem:[%s392_s0] sm:$0x11 pattern:$0x75316420] }
   0x7   :  { %254 = vmatpush3.bf16.msra.mxu0 %v278_v3 }
   0x8   :  { %255 = vmatprep.subr.bf16.mxu0 %v279_v4 }
   0xb   :  { %256 = vmatpush3.bf16.msra.mxu0 %v280_v5 }
   0xc   :  { %257 = vmatprep.subr.bf16.mxu0 %v281_v6 }
   0xf   :  { %258 = vmatpush3.bf16.msra.mxu0 %v282_v7 }
  0x10   :  { %259 = vmatprep.subr.bf16.mxu0 %v283_v8 }
  0x11   :  { %8 = vsyncpa [#allocation3], 0  ;;  %v286_v16 = vld [vmem:[%s393_s1 + $0x10] sm:$0xff]   ;;  %v64_v17 = vcombine.high %v234_v12, %v234_v12  ;;  %v67_v18 = vunpack.c.0.s8 %v66_v14  ;;  %v287_v19 = vld [vmem:[%s393_s1 + $0x48] sm:$0xff]   ;;  %s314_s20 = smov [#allocation2]  }
  0x12   :  { %v288_v21 = vld [vmem:[%s393_s1 + $0x8] sm:$0xff]   ;;  %v289_v23 = vld [vmem:[%s393_s1 + $0x40] sm:$0xff]   ;;  %s225_s21 = sshll.u32 %s314_s20, 4  ;;  %s226_s21 = int_to_ptr.vmem [resolvable:$true] %s225_s21 }
  0x13   :  { %260 = vmatpush3.bf16.msra.mxu0 %v284_v10  ;;  %v70_v20 = vsub.s32 %v67_v18, %v69_v15  ;;  %v290_v24 = vld [vmem:[%s393_s1] sm:$0xff]   ;;  %s291_s1 = scalar_lea.vmem %s226_s21, 32  ;;  %p296_p1 = scmp.lt.s32.totalorder %s226_s21, %s226_s21 }
  0x14   :  { %261 = vmatprep.subr.bf16.mxu0 %v285_v11  ;;  %v233_v27 = vld [vmem:[%s394_s2] ss:$0 sm:$0xff]  ;;  %p292_p0 = scmp.ne.s32.totalorder %s226_s21, %s291_s1  ;;  %p297_p2 = scmp.lt.s32.totalorder %s291_s1, %s291_s1 }
  0x15   :  { %v78_v22 = vrot.slane %v64_v17, %v70_v20  ;;  %v71_v25 = vrot.slane %v234_v12, %v70_v20 }
  0x16   :  { %p298_p3 = por %p297_p2, %p296_p1 }
  0x17   :  { %262 = vmatpush3.bf16.msra.mxu0 %v286_v16  ;;  %209 = vmatprep.mubr.bf16.mxu0 %v78_v22 }
  0x18   :  { %263 = vmatprep.subr.bf16.mxu0 %v287_v19  ;;  %p299_p4 = pnand %p298_p3, %p292_p0 }
  0x1b   :  { %264 = vmatpush3.bf16.msra.mxu0 %v288_v21 }
  0x1c   :  { %265 = vmatprep.subr.bf16.mxu0 %v289_v23 }
  0x1f   :  { %266 = vmatpush3.bf16.msra.mxu0 %v290_v24 }
  0x22   :  { %210 = vmatmul.mubr.bf16.vlgmr.msra.gmra.mxu0 %v71_v25 }
  0xe2   :  { %v267_v26 = vpop.f32.mrf.mxu0 }
  0xe4   :  { %v268_v28 = vpop.f32.mrf.mxu0 }
  0xe5   :  { %v269_v29 = vadd.f32 %v268_v28, %v267_v26 }
  0xe6   :  { %v270_v30 = vpop.f32.mrf.mxu0 }
  0xe7   :  { %v212_v31 = vadd.f32 %v269_v29, %v233_v27 }
  0xe8   :  { %v271_v32 = vpop.f32.mrf.mxu0 }
  0xe9   :  { %v217_v33 = vmax.f32 %v212_v31, 0.0 }
  0xeb   :  { %218 = vst [vmem:[#allocation2] sm:$0x3] %v217_v33 }
  0xec   :  { %302 = shalt.err (!%p299_p4)
}
  0xed   :  { %228 = dma.vmem_to_hbm [thread:$0]  %s226_s21, 32, %s395_s3, [#allocation3]  }
  0xee   :  { %311 = dma.done.wait [#allocation3], 32  }
  0xef   :  { %312 = vsyncadd [#allocation3], 4294967264 }
  0xf0   :  { %232 = vsyncpa [#allocation3], 1 }

// kernel: forward.20
= control target key start
LH: loop header
LB: loop body
LE: loop exit
PB: predicated region body
PF: predicated region fallthrough
CT: control target
= control target key end

     0   :  { %v577_v1 = vmov 0   ;;  %v66_v25 = vlaneseq  ;;  %v578_v26 = vmov 1966171168   ;;  %s762_s1 = inlined_call_operand.vmem [shape: bf16[384,256], index: 1, kind: input, shape index: {}]   ;;  %s763_s0 = inlined_call_operand.vmem [shape: bf16[2,384], index: 0, kind: input, shape index: {}]   ;;  %s764_s2 = inlined_call_operand.vmem [shape: f32[1,256], index: 2, kind: input, shape index: {}]   ;;  %s765_s3 = inlined_call_operand.vmem [shape: bf16[2,256], index: 3, kind: output, shape index: {}]  }
   0x1   :  { %v505_v0 = vld [vmem:[%s762_s1 + $0x74] ss:$8 sps:$4 sm:$0xff]   ;;  %416 = vmatprep.mubr.bf16.mxu1 %v577_v1  ;;  %v507_v2 = vld [vmem:[%s762_s1 + $0x70] ss:$8 sps:$4 sm:$0xff]   ;;  %v508_v3 = vld [vmem:[%s762_s1 + $0x64] ss:$8 sps:$4 sm:$0xff]   ;;  %v86_v27 = vunpack.c.l.s4 %v578_v26 }
   0x2   :  { %343 = vmatprep.subr.bf16.mxu0 %v505_v0  ;;  %v510_v4 = vld [vmem:[%s762_s1 + $0x60] ss:$8 sps:$4 sm:$0xff]   ;;  %v511_v5 = vld [vmem:[%s762_s1 + $0x54] ss:$8 sps:$4 sm:$0xff]   ;;  %v513_v6 = vld [vmem:[%s762_s1 + $0x50] ss:$8 sps:$4 sm:$0xff]  }
   0x3   :  { %344 = vmatpush1.bf16.msra.mxu0 %v507_v2  ;;  %v514_v7 = vld [vmem:[%s762_s1 + $0x44] ss:$8 sps:$4 sm:$0xff]   ;;  %v516_v8 = vld [vmem:[%s762_s1 + $0x40] ss:$8 sps:$4 sm:$0xff]   ;;  %v528_v9 = vld [vmem:[%s762_s1 + $0x174] ss:$8 sps:$4 sm:$0xff]   ;;  %v87_v33 = vunpack.c.0.s8 %v86_v27 }
   0x4   :  { %345 = vmatprep.subr.bf16.mxu0 %v508_v3  ;;  %v531_v10 = vld [vmem:[%s762_s1 + $0x170] ss:$8 sps:$4 sm:$0xff]   ;;  %v517_v11 = vld [vmem:[%s762_s1 + $0x34] ss:$8 sps:$4 sm:$0xff]   ;;  %384 = vmatprep.subr.bf16.mxu1 %v528_v9  ;;  %v534_v12 = vld [vmem:[%s762_s1 + $0x164] ss:$8 sps:$4 sm:$0xff]  }
   0x5   :  { %385 = vmatpush1.bf16.msra.mxu1 %v531_v10  ;;  %v537_v13 = vld [vmem:[%s762_s1 + $0x160] ss:$8 sps:$4 sm:$0xff]   ;;  %v519_v14 = vld [vmem:[%s762_s1 + $0x30] ss:$8 sps:$4 sm:$0xff]   ;;  %v520_v15 = vld [vmem:[%s762_s1 + $0x24] ss:$8 sps:$4 sm:$0xff]  }
   0x6   :  { %386 = vmatprep.subr.bf16.mxu1 %v534_v12  ;;  %v540_v16 = vld [vmem:[%s762_s1 + $0x154] ss:$8 sps:$4 sm:$0xff]   ;;  %v543_v17 = vld [vmem:[%s762_s1 + $0x150] ss:$8 sps:$4 sm:$0xff]   ;;  %v522_v18 = vld [vmem:[%s762_s1 + $0x20] ss:$8 sps:$4 sm:$0xff]  }
   0x7   :  { %346 = vmatpush1.bf16.msra.mxu0 %v510_v4  ;;  %v546_v19 = vld [vmem:[%s762_s1 + $0x144] ss:$8 sps:$4 sm:$0xff]   ;;  %v523_v20 = vld [vmem:[%s762_s1 + $0x14] ss:$8 sps:$4 sm:$0xff]   ;;  %v525_v21 = vld [vmem:[%s762_s1 + $0x10] ss:$8 sps:$4 sm:$0xff]  }
   0x8   :  { %347 = vmatprep.subr.bf16.mxu0 %v511_v5  ;;  %v549_v22 = vld [vmem:[%s762_s1 + $0x140] ss:$8 sps:$4 sm:$0xff]   ;;  %v552_v23 = vld [vmem:[%s762_s1 + $0x134] ss:$8 sps:$4 sm:$0xff]   ;;  %v526_v24 = vld [vmem:[%s762_s1 + $0x4] ss:$8 sps:$4 sm:$0xff]  }
   0x9   :  { %387 = vmatpush1.bf16.msra.mxu1 %v537_v13  ;;  %v555_v28 = vld [vmem:[%s762_s1 + $0x130] ss:$8 sps:$4 sm:$0xff]   ;;  %v530_v29 = vld [vmem:[%s762_s1] ss:$8 sps:$4 sm:$0xff]   ;;  %v558_v30 = vld [vmem:[%s762_s1 + $0x124] ss:$8 sps:$4 sm:$0xff]  }
   0xa   :  { %388 = vmatprep.subr.bf16.mxu1 %v540_v16  ;;  %v532_v31 = vld [vmem:[%s762_s1 + $0xf4] ss:$8 sps:$4 sm:$0xff]   ;;  %v683_v32 = vshrl.u32 %v66_v25, 7  ;;  %v561_v34 = vld [vmem:[%s762_s1 + $0x120] ss:$8 sps:$4 sm:$0xff]  }
   0xb   :  { %348 = vmatpush1.bf16.msra.mxu0 %v513_v6  ;;  %v536_v35 = vld [vmem:[%s762_s1 + $0xf0] ss:$8 sps:$4 sm:$0xff]   ;;  %v564_v36 = vld [vmem:[%s762_s1 + $0x114] ss:$8 sps:$4 sm:$0xff]   ;;  %v538_v37 = vld [vmem:[%s762_s1 + $0xe4] ss:$8 sps:$4 sm:$0xff]  }
   0xc   :  { %349 = vmatprep.subr.bf16.mxu0 %v514_v7  ;;  %v452_v38 = vld.sshfl [vmem:[%s763_s0] sm:$0x13 pattern:$0x75316420]  ;;  %v701_v39 = vsub.s32 %v87_v33, %v683_v32  ;;  %v567_v41 = vld [vmem:[%s762_s1 + $0x110] ss:$8 sps:$4 sm:$0xff]  }
   0xd   :  { %389 = vmatpush1.bf16.msra.mxu1 %v543_v17  ;;  %v84_v40 = vcombine.high %v452_v38, %v452_v38  ;;  %v542_v42 = vld [vmem:[%s762_s1 + $0xe0] ss:$8 sps:$4 sm:$0xff]   ;;  %v570_v43 = vld [vmem:[%s762_s1 + $0x104] ss:$8 sps:$4 sm:$0xff]   ;;  %v544_v45 = vld [vmem:[%s762_s1 + $0xd4] ss:$8 sps:$4 sm:$0xff]  }
   0xe   :  { %390 = vmatprep.subr.bf16.mxu1 %v546_v19  ;;  %v91_v46 = vrot.slane %v452_v38, %v701_v39  ;;  %v573_v47 = vld [vmem:[%s762_s1 + $0x100] ss:$8 sps:$4 sm:$0xff]   ;;  %v548_v48 = vld [vmem:[%s762_s1 + $0xd0] ss:$8 sps:$4 sm:$0xff]   ;;  %v550_v49 = vld [vmem:[%s762_s1 + $0xc4] ss:$8 sps:$4 sm:$0xff]  }
   0xf   :  { %350 = vmatpush1.bf16.msra.mxu0 %v516_v8  ;;  %v98_v44 = vrot.slane %v84_v40, %v701_v39  ;;  %v554_v51 = vld [vmem:[%s762_s1 + $0xc0] ss:$8 sps:$4 sm:$0xff]   ;;  %v556_v52 = vld [vmem:[%s762_s1 + $0xb4] ss:$8 sps:$4 sm:$0xff]   ;;  %v560_v53 = vld [vmem:[%s762_s1 + $0xb0] ss:$8 sps:$4 sm:$0xff]  }
  0x10   :  { %351 = vmatprep.subr.bf16.mxu0 %v517_v11  ;;  %v99_v50 = vcombine.high %v91_v46, %v91_v46  ;;  %v562_v54 = vld [vmem:[%s762_s1 + $0xa4] ss:$8 sps:$4 sm:$0xff]   ;;  %v566_v55 = vld [vmem:[%s762_s1 + $0xa0] ss:$8 sps:$4 sm:$0xff]   ;;  %v568_v56 = vld [vmem:[%s762_s1 + $0x94] ss:$8 sps:$4 sm:$0xff]  }
  0x11   :  { %391 = vmatpush1.bf16.msra.mxu1 %v549_v22  ;;  %375 = vmatprep.mubr.bf16.mxu0 %v98_v44  ;;  %v572_v57 = vld [vmem:[%s762_s1 + $0x90] ss:$8 sps:$4 sm:$0xff]   ;;  %v574_v58 = vld [vmem:[%s762_s1 + $0x84] ss:$8 sps:$4 sm:$0xff]   ;;  %v576_v59 = vld [vmem:[%s762_s1 + $0x80] ss:$8 sps:$4 sm:$0xff]  }
  0x12   :  { %392 = vmatprep.subr.bf16.mxu1 %v552_v23  ;;  %v68_v0 = vsub.s32 0, %v683_v32  ;;  %v64_v1 = vld [vmem:[%s764_s2] sm:$0x3]  ;;  %v72_v2 = vsub.s32 1, %v683_v32 }
  0x13   :  { %352 = vmatpush1.bf16.msra.mxu0 %v519_v14 }
  0x14   :  { %353 = vmatprep.subr.bf16.mxu0 %v520_v15  ;;  %v69_v3 = vrot.slane %v64_v1, %v68_v0  ;;  %v73_v4 = vrot.slane %v64_v1, %v72_v2 }
  0x15   :  { %393 = vmatpush1.bf16.msra.mxu1 %v555_v28 }
  0x16   :  { %394 = vmatprep.subr.bf16.mxu1 %v558_v30 }
  0x17   :  { %354 = vmatpush1.bf16.msra.mxu0 %v522_v18 }
  0x18   :  { %355 = vmatprep.subr.bf16.mxu0 %v523_v20 }
  0x19   :  { %395 = vmatpush1.bf16.msra.mxu1 %v561_v34 }
  0x1a   :  { %396 = vmatprep.subr.bf16.mxu1 %v564_v36 }
  0x1b   :  { %356 = vmatpush1.bf16.msra.mxu0 %v525_v21 }
  0x1c   :  { %357 = vmatprep.subr.bf16.mxu0 %v526_v24 }
  0x1d   :  { %397 = vmatpush1.bf16.msra.mxu1 %v567_v41 }
  0x1e   :  { %398 = vmatprep.subr.bf16.mxu1 %v570_v43 }
  0x1f   :  { %358 = vmatpush1.bf16.msra.mxu0 %v530_v29 }
  0x20   :  { %359 = vmatprep.subr.bf16.mxu0 %v532_v31 }
  0x21   :  { %399 = vmatpush1.bf16.msra.mxu1 %v573_v47 }
  0x23   :  { %360 = vmatpush2.bf16.msra.mxu0 %v536_v35 }
  0x24   :  { %361 = vmatprep.subr.bf16.mxu0 %v538_v37  ;;  %417 = vmatmul.mubr.bf16.vlgmr.msra.gmra.mxu1 %v99_v50 }
  0x27   :  { %362 = vmatpush2.bf16.msra.mxu0 %v542_v42 }
  0x28   :  { %363 = vmatprep.subr.bf16.mxu0 %v544_v45 }
  0x2b   :  { %364 = vmatpush2.bf16.msra.mxu0 %v548_v48 }
  0x2c   :  { %365 = vmatprep.subr.bf16.mxu0 %v550_v49 }
  0x2f   :  { %366 = vmatpush2.bf16.msra.mxu0 %v554_v51 }
  0x30   :  { %367 = vmatprep.subr.bf16.mxu0 %v556_v52 }
  0x33   :  { %368 = vmatpush2.bf16.msra.mxu0 %v560_v53 }
  0x34   :  { %369 = vmatprep.subr.bf16.mxu0 %v562_v54 }
  0x37   :  { %370 = vmatpush2.bf16.msra.mxu0 %v566_v55 }
  0x38   :  { %371 = vmatprep.subr.bf16.mxu0 %v568_v56 }
  0x3b   :  { %372 = vmatpush2.bf16.msra.mxu0 %v572_v57 }
  0x3c   :  { %373 = vmatprep.subr.bf16.mxu0 %v574_v58 }
  0x3f   :  { %374 = vmatpush2.bf16.msra.mxu0 %v576_v59 }
  0x42   :  { %376 = vmatmul.mubr.bf16.vlgmr.msra.gmra.mxu0 %v91_v46 }
  0xe4   :  { %v418_v60 = vpop.f32.mrf.mxu1 }
  0xe6   :  { %v420_v61 = vpop.f32.mrf.mxu1 }
  0xe8   :  { %v422_v62 = vpop.f32.mrf.mxu1 }
  0xea   :  { %v423_v63 = vpop.f32.mrf.mxu1 }
 0x102   :  { %v377_v5 = vpop.f32.mrf.mxu0 }
 0x103   :  { %v378_v6 = vadd.f32 %v377_v5, %v69_v3 }
 0x104   :  { %v379_v7 = vpop.f32.mrf.mxu0 }
 0x105   :  { %v419_v8 = vadd.f32 %v418_v60, %v378_v6  ;;  %v380_v9 = vadd.f32 %v379_v7, %v73_v4 }
 0x106   :  { %v381_v10 = vpop.f32.mrf.mxu0 }
 0x107   :  { %v421_v11 = vadd.f32 %v420_v61, %v380_v9  ;;  %v425_v13 = vmax.f32 %v419_v8, 0.0 }
 0x108   :  { %v382_v12 = vpop.f32.mrf.mxu0 }
 0x109   :  { %v426_v14 = vmax.f32 %v421_v11, 0.0 }
 0x10b   :  { %v501_v15 = vpack.c.bf16 %v426_v14, %v425_v13 }
 0x10d   :  { %v438_v16 = vrot.slane %v501_v15, %v701_v39 }
 0x10f   :  { %502 = vst.sshfl [vmem:[%s765_s3] sm:$0x5 pattern:$0x73625140] %v438_v16 }

</bundles_post_ra>
